<compile_context>
chip_gen: v7x
topology: tpu7x:2x2x1
jax: 0.10.0
libtpu: 0.0.40
codegen_flags: <defaults>
</compile_context>

<pallas_src>
import numpy as np
import jax
import jax.numpy as jnp
from jax import lax
from jax.experimental import pallas as pl
from jax.experimental.pallas import tpu as pltpu


def _round_up(x: int, m: int) -> int:
    return ((x + m - 1) // m) * m


def _adaptive_windows(in_size: int, out_size: int):
    """PyTorch adaptive-pool windows: start=floor(o*in/out), end=ceil((o+1)*in/out)."""
    starts = [(o * in_size) // out_size for o in range(out_size)]
    ends = [-((-(o + 1) * in_size) // out_size) for o in range(out_size)]
    return starts, ends


def _indicator_and_lengths(in_size: int, out_size: int):
    """0/1 membership matrix (out, in) and per-window lengths (out,)."""
    starts, ends = _adaptive_windows(in_size, out_size)
    S = np.zeros((out_size, in_size), dtype=np.float32)
    lens = np.zeros((out_size,), dtype=np.float32)
    for o, (s, e) in enumerate(zip(starts, ends)):
        S[o, s:e] = 1.0
        lens[o] = float(e - s)
    return S, lens


def _pool_matrix(in_size: int, out_size: int) -> np.ndarray:
    """Fractional averaging matrix P[o, i] = 1/len(window_o) for i in window_o."""
    S, lens = _indicator_and_lengths(in_size, out_size)
    return S / lens[:, None]


def _reference_adaptive_avg_pool2d(x: jax.Array, output_size=(7, 13)) -> jax.Array:
    """Pure-JAX reference (and small-problem fallback) using PyTorch window math."""
    C, H, W = x.shape
    H_out, W_out = output_size
    Ph = jnp.asarray(_pool_matrix(H, H_out))
    Pw = jnp.asarray(_pool_matrix(W, W_out))
    y = jnp.einsum("oh,chw->cow", Ph, x, precision=lax.Precision.HIGHEST)
    return jnp.einsum("pw,cow->cop", Pw, y, precision=lax.Precision.HIGHEST)


def _aap2d_kernel(x_ref, swt_ref, sht_ref, inv_ref, o_ref):
    # x_ref  : (C_TILE * H, W)        f32   rows are (c, h) pairs of one channel tile
    # swt_ref: (W, W_out)             bf16  0/1 column-window indicators (resident)
    # sht_ref: (H, H_out)             f32   0/1 row-window indicators     (resident)
    # inv_ref: (1, H_out, W_out)      f32   1 / (len_h * len_w) per output pixel
    # o_ref  : (C_TILE, H_out, W_out) f32
    ct = o_ref.shape[0]
    h, ho = sht_ref.shape
    wo = swt_ref.shape[1]

    x = x_ref[...]
    # Exact hi/lo bf16 split of x: with exactly-representable 0/1 bf16 weights,
    # two single-pass bf16 MXU matmuls reproduce the f32 window sums to ~2^-17
    # relative error (vs ~6 passes for an fp32 HIGHEST contraction).
    x_hi = x.astype(jnp.bfloat16)
    x_lo = (x - x_hi.astype(jnp.float32)).astype(jnp.bfloat16)
    sw = swt_ref[...]
    # Stage 1: column (W) window sums -> (C_TILE*H, W_out)
    ysum = (jnp.dot(x_hi, sw, preferred_element_type=jnp.float32)
            + jnp.dot(x_lo, sw, preferred_element_type=jnp.float32))

    # Rearrange only the *small* stage-1 output so H becomes the contracting dim.
    yt = jnp.swapaxes(ysum.reshape(ct, h, wo), 1, 2).reshape(ct * wo, h)

    # Stage 2: row (H) window sums -> (C_TILE*W_out, H_out).  Tiny matmul; exact
    # f32 contraction against the 0/1 indicator.
    zsum = jnp.dot(yt, sht_ref[...], preferred_element_type=jnp.float32,
                   precision=lax.Precision.HIGHEST)

    z = jnp.swapaxes(zsum.reshape(ct, wo, ho), 1, 2)         # (C_TILE, H_out, W_out)
    o_ref[...] = (z * inv_ref[...]).astype(o_ref.dtype)      # window sums -> means


_TARGET_X_TILE_BYTES = 2 << 20   # per-step streamed x tile (Pallas double-buffers it)
_MAX_X_TILE_BYTES = 3 << 20      # above this even an 8-channel tile busts the VMEM budget


def adaptive_avg_pool2d(x: jax.Array, output_size=(7, 13), *, c_block=None) -> jax.Array:
    """AdaptiveAvgPool2d for a single 3-D (C, H, W) float32 input."""
    C, H, W = x.shape
    H_out, W_out = output_size

    # Identity short-circuit: every adaptive window has exactly one element.
    if (H, W) == (H_out, W_out):
        return x

    bytes_per_channel = 4 * H * _round_up(W, 128)   # lane-padded VMEM footprint
    if C < 8 or 8 * bytes_per_channel > _MAX_X_TILE_BYTES:
        # Tiny-C traces are pure fixed overhead for a custom call; very large
        # spatial inputs would additionally need H tiling.  Use fused XLA path.
        # TODO(synk): tile H as well for very large spatial inputs instead of falling back.
        return _reference_adaptive_avg_pool2d(x, output_size)

    # Channel tile: multiple of 8, sized so the streamed x tile is ~2 MiB.
    if c_block is None:
        c_tile = max(8, min(256, ((_TARGET_X_TILE_BYTES // bytes_per_channel) // 8) * 8))
    else:
        c_tile = int(c_block)
    c_tile = min(c_tile, C)
    if c_tile < C:
        c_tile = min(C, max(8, (c_tile // 8) * 8))
    grid = (pl.cdiv(C, c_tile),)

    # Factorized pooling weights: 0/1 indicators + combined 1/area epilogue scale.
    Sh, len_h = _indicator_and_lengths(H, H_out)
    Sw, len_w = _indicator_and_lengths(W, W_out)
    swt = jnp.asarray(Sw.T, dtype=jnp.bfloat16)                         # (W, W_out)
    sht = jnp.asarray(Sh.T, dtype=jnp.float32)                          # (H, H_out)
    inv = jnp.asarray(((1.0 / len_h)[:, None] * (1.0 / len_w)[None, :])[None],
                      dtype=jnp.float32)                                # (1, H_out, W_out)

    x2 = x.reshape(C * H, W)   # free row-major view; rows are (c, h) pairs

    out = pl.pallas_call(
        _aap2d_kernel,
        out_shape=jax.ShapeDtypeStruct((C, H_out, W_out), x.dtype),
        grid=grid,
        in_specs=[
            pl.BlockSpec((c_tile * H, W), lambda i: (i, 0)),            # streamed x tile
            pl.BlockSpec((W, W_out), lambda i: (0, 0)),                 # resident weights
            pl.BlockSpec((H, H_out), lambda i: (0, 0)),
            pl.BlockSpec((1, H_out, W_out), lambda i: (0, 0, 0)),
        ],
        out_specs=pl.BlockSpec((c_tile, H_out, W_out), lambda i: (i, 0, 0)),
        compiler_params=pltpu.CompilerParams(
            dimension_semantics=("parallel",)),                         # v7x dual-TC split
        cost_estimate=pl.CostEstimate(
            flops=2 * C * H * W * W_out + 2 * C * W_out * H * H_out,
            transcendentals=0,
            bytes_accessed=4 * C * H * W + 4 * C * H_out * W_out
                           + 2 * W * W_out + 4 * H * H_out + 4 * H_out * W_out,
        ),
    )(x2, swt, sht, inv)
    return out


if __name__ == "__main__":
    key = jax.random.PRNGKey(0)
    k1, k2, k3, k4 = jax.random.split(key, 4)

    # 1) Main Pallas path (single channel block): (32, 16, 20) -> (32, 7, 13).
    x = jax.random.normal(k1, (32, 16, 20), dtype=jnp.float32)
    out = jax.block_until_ready(adaptive_avg_pool2d(x, (7, 13)))
    assert out.shape == (32, 7, 13) and out.dtype == jnp.float32
    np.testing.assert_allclose(np.asarray(out),
                               np.asarray(_reference_adaptive_avg_pool2d(x, (7, 13))),
                               rtol=1e-4, atol=2e-5)

    # 2) Multi-step C grid with a ragged last channel tile (exercises streaming).
    x2 = jax.random.normal(k2, (20, 24, 36), dtype=jnp.float32)
    out2 = jax.block_until_ready(adaptive_avg_pool2d(x2, (7, 13), c_block=8))
    assert out2.shape == (20, 7, 13)
    np.testing.assert_allclose(np.asarray(out2),
                               np.asarray(_reference_adaptive_avg_pool2d(x2, (7, 13))),
                               rtol=1e-4, atol=2e-5)

    # 3) Tiny-C fallback path (dispatched to fused XLA einsums).
    x3 = jax.random.normal(k3, (4, 16, 20), dtype=jnp.float32)
    out3 = jax.block_until_ready(adaptive_avg_pool2d(x3, (7, 13)))
    assert out3.shape == (4, 7, 13)
    np.testing.assert_allclose(np.asarray(out3),
                               np.asarray(_reference_adaptive_avg_pool2d(x3, (7, 13))),
                               rtol=1e-5, atol=1e-6)

    # 4) Identity short-circuit: spatial dims already (7, 13).
    x4 = jax.random.normal(k4, (8, 7, 13), dtype=jnp.float32)
    out4 = jax.block_until_ready(adaptive_avg_pool2d(x4, (7, 13)))
    np.testing.assert_allclose(np.asarray(out4), np.asarray(x4), rtol=0, atol=0)

    print("KERNEL_OK")
</pallas_src>

<mosaic_0001>
module attributes {stable_mosaic.version = 11 : i64} {
  func.func @_aap2d_kernel(%arg0: i32, %arg1: memref<512x20xf32, #tpu.memory_space<vmem>>, %arg2: memref<20x13xbf16, #tpu.memory_space<vmem>>, %arg3: memref<16x7xf32, #tpu.memory_space<vmem>>, %arg4: memref<1x7x13xf32, #tpu.memory_space<vmem>>, %arg5: memref<32x7x13xf32, #tpu.memory_space<vmem>>) attributes {dimension_semantics = [#tpu.dimension_semantics<parallel>], iteration_bounds = array<i64: 1>, scalar_prefetch = 0 : i64, scratch_operands = 0 : i64, tpu.core_type = #tpu.core_type<tc>, window_params = [{transform_indices = @transform_0, window_bounds = array<i64: 512, 20>}, {pipeline_mode = #tpu.pipeline_mode<synchronous>, transform_indices = @transform_1, window_bounds = array<i64: 20, 13>}, {pipeline_mode = #tpu.pipeline_mode<synchronous>, transform_indices = @transform_2, window_bounds = array<i64: 16, 7>}, {pipeline_mode = #tpu.pipeline_mode<synchronous>, transform_indices = @transform_3, window_bounds = array<i64: 1, 7, 13>}, {transform_indices = @transform_4, window_bounds = array<i64: 32, 7, 13>}]} {
    %c0 = arith.constant 0 : index
    %c0_0 = arith.constant 0 : index
    %0 = vector.load %arg1[%c0, %c0_0] : memref<512x20xf32, #tpu.memory_space<vmem>>, vector<512x20xf32>
    %1 = arith.truncf %0 : vector<512x20xf32> to vector<512x20xbf16>
    %2 = arith.extf %1 : vector<512x20xbf16> to vector<512x20xf32>
    %3 = arith.subf %0, %2 : vector<512x20xf32>
    %4 = arith.truncf %3 : vector<512x20xf32> to vector<512x20xbf16>
    %c0_1 = arith.constant 0 : index
    %c0_2 = arith.constant 0 : index
    %5 = vector.load %arg2[%c0_1, %c0_2] : memref<20x13xbf16, #tpu.memory_space<vmem>>, vector<20x13xbf16>
    %cst = arith.constant dense<0.000000e+00> : vector<512x13xf32>
    %6 = tpu.matmul %1, %5, %cst {dimension_numbers = #tpu.dot_dimension_numbers<[1], [0], [0], [1], [0, 0, 1, 1], [], []>} : vector<512x20xbf16>, vector<20x13xbf16>, vector<512x13xf32> -> vector<512x13xf32>
    %cst_3 = arith.constant dense<0.000000e+00> : vector<512x13xf32>
    %7 = tpu.matmul %4, %5, %cst_3 {dimension_numbers = #tpu.dot_dimension_numbers<[1], [0], [0], [1], [0, 0, 1, 1], [], []>} : vector<512x20xbf16>, vector<20x13xbf16>, vector<512x13xf32> -> vector<512x13xf32>
    %8 = arith.addf %6, %7 : vector<512x13xf32>
    %9 = vector.shape_cast %8 : vector<512x13xf32> to vector<32x16x13xf32>
    %10 = tpu.transpose %9, [0, 2, 1] : vector<32x16x13xf32> -> vector<32x13x16xf32>
    %11 = vector.shape_cast %10 : vector<32x13x16xf32> to vector<416x16xf32>
    %c0_4 = arith.constant 0 : index
    %c0_5 = arith.constant 0 : index
    %12 = vector.load %arg3[%c0_4, %c0_5] : memref<16x7xf32, #tpu.memory_space<vmem>>, vector<16x7xf32>
    %cst_6 = arith.constant dense<0.000000e+00> : vector<416x7xf32>
    %13 = tpu.matmul %11, %12, %cst_6 {dimension_numbers = #tpu.dot_dimension_numbers<[1], [0], [0], [1], [0, 0, 1, 1], [], []>, precision = #tpu.contract_precision<fp32>} : vector<416x16xf32>, vector<16x7xf32>, vector<416x7xf32> -> vector<416x7xf32>
    %14 = vector.shape_cast %13 : vector<416x7xf32> to vector<32x13x7xf32>
    %15 = tpu.transpose %14, [0, 2, 1] : vector<32x13x7xf32> -> vector<32x7x13xf32>
    %c0_7 = arith.constant 0 : index
    %c0_8 = arith.constant 0 : index
    %c0_9 = arith.constant 0 : index
    %16 = vector.load %arg4[%c0_7, %c0_8, %c0_9] : memref<1x7x13xf32, #tpu.memory_space<vmem>>, vector<1x7x13xf32>
    %17 = vector.broadcast %16 : vector<1x7x13xf32> to vector<32x7x13xf32>
    %18 = arith.mulf %15, %17 : vector<32x7x13xf32>
    %c0_10 = arith.constant 0 : index
    %c0_11 = arith.constant 0 : index
    %c0_12 = arith.constant 0 : index
    %19 = vector.load %arg5[%c0_10, %c0_11, %c0_12] : memref<32x7x13xf32, #tpu.memory_space<vmem>>, vector<32x7x13xf32>
    tpu.vector_store %arg5[%c0_10, %c0_11, %c0_12], %18 {strides = array<i32>} : memref<32x7x13xf32, #tpu.memory_space<vmem>>, vector<32x7x13xf32>,
    return
  }
  func.func @transform_0(%arg0: i32) -> (i32, i32) {
    %c0_i32 = arith.constant 0 : i32
    %c0_i32_0 = arith.constant 0 : i32
    return %arg0, %c0_i32 : i32, i32
  }
  func.func @transform_1(%arg0: i32) -> (i32, i32) {
    %c0_i32 = arith.constant 0 : i32
    %c0_i32_0 = arith.constant 0 : i32
    %c0_i32_1 = arith.constant 0 : i32
    return %c0_i32, %c0_i32_0 : i32, i32
  }
  func.func @transform_2(%arg0: i32) -> (i32, i32) {
    %c0_i32 = arith.constant 0 : i32
    %c0_i32_0 = arith.constant 0 : i32
    %c0_i32_1 = arith.constant 0 : i32
    return %c0_i32, %c0_i32_0 : i32, i32
  }
  func.func @transform_3(%arg0: i32) -> (i32, i32, i32) {
    %c0_i32 = arith.constant 0 : i32
    %c0_i32_0 = arith.constant 0 : i32
    %c0_i32_1 = arith.constant 0 : i32
    %c0_i32_2 = arith.constant 0 : i32
    return %c0_i32, %c0_i32_0, %c0_i32_1 : i32, i32, i32
  }
  func.func @transform_4(%arg0: i32) -> (i32, i32, i32) {
    %c0_i32 = arith.constant 0 : i32
    %c0_i32_0 = arith.constant 0 : i32
    %c0_i32_1 = arith.constant 0 : i32
    return %arg0, %c0_i32, %c0_i32_0 : i32, i32, i32
  }
}

</mosaic_0001>

<bundles_post_ra>
// kernel: tpu_custom_call.1
= control target key start
LH: loop header
LB: loop body
LE: loop exit
PB: predicated region body
PF: predicated region fallthrough
CT: control target
= control target key end

     0   :  { %vm383_vm0 = vcmask 1041408   ;;  %vm286_vm1 = vcmask 162816   ;;  %vm7515_vm2 = vcmask 130048   ;;  %vm16809_vm3 = vcmask 104448   ;;  %s23714_s1 = inlined_call_operand.vmem [shape: bf16[20,13], index: 1, kind: input, shape index: {}]   ;;  %s23715_s0 = inlined_call_operand.vmem [shape: f32[512,20], index: 0, kind: input, shape index: {}]   ;;  %s23716_s2 = inlined_call_operand.vmem [shape: f32[16,7], index: 2, kind: input, shape index: {}]   ;;  %s23717_s3 = inlined_call_operand.vmem [shape: f32[1,7,13], index: 3, kind: input, shape index: {}]   ;;  %s23718_s4 = inlined_call_operand.vmem [shape: f32[32,7,13], index: 4, kind: output, shape index: {}]  }
   0x1   :  { %v18382_v0 = vld [vmem:[%s23714_s1] sm:$0xff]   ;;  %v18383_v1 = vld [vmem:[%s23714_s1 + $0x8] ss:$0 sps:$4 sm:$0x33]   ;;  %v20_v4 = vld [vmem:[%s23715_s0 + $0x10] sm:$0xff] }
   0x2   :  { %v18_v2 = vld [vmem:[%s23715_s0] sm:$0xff]  ;;  %17400 = vmatprep.subr.bf16.mxu0 %v18382_v0  ;;  %v19_v3 = vld [vmem:[%s23715_s0 + $0x8] sm:$0xff]  ;;  %v21_v5 = vld [vmem:[%s23715_s0 + $0x18] sm:$0xff]  ;;  %v385_v11 = vsel %vm383_vm0, %v18383_v1, 0 }
   0x3   :  { %17401 = vmatpush3.bf16.msra.mxu0 %v18382_v0  ;;  %v18428_v6 = vpack.c.bf16 %v19_v3, %v18_v2  ;;  %v18430_v7 = vpack.c.bf16 %v21_v5, %v20_v4  ;;  %v22_v8 = vld [vmem:[%s23715_s0 + $0x20] sm:$0xff]  ;;  %v23_v9 = vld [vmem:[%s23715_s0 + $0x28] sm:$0xff]  ;;  %v24_v10 = vld [vmem:[%s23715_s0 + $0x30] sm:$0xff] }
   0x4   :  { %18378 = vmatprep.subr.msk.bf16.mxu0 %vm383_vm0, %v18383_v1  ;;  %v18443_v12 = vpack.c.bf16 %v23_v9, %v22_v8  ;;  %v25_v13 = vld [vmem:[%s23715_s0 + $0x38] sm:$0xff]  ;;  %v26_v14 = vld [vmem:[%s23715_s0 + $0x40] sm:$0xff]  ;;  %v27_v15 = vld [vmem:[%s23715_s0 + $0x48] sm:$0xff] }
   0x5   :  { %v114_v16 = vunpack.c.l.bf16 %v18428_v6  ;;  %v115_v17 = vunpack.c.h.bf16 %v18428_v6  ;;  %v116_v18 = vunpack.c.l.bf16 %v18430_v7  ;;  %v117_v19 = vunpack.c.h.bf16 %v18430_v7  ;;  %v28_v36 = vld [vmem:[%s23715_s0 + $0x50] sm:$0xff]  ;;  %v29_v37 = vld [vmem:[%s23715_s0 + $0x58] sm:$0xff]  ;;  %v30_v39 = vld [vmem:[%s23715_s0 + $0x60] sm:$0xff] }
   0x6   :  { %v118_v20 = vunpack.c.l.bf16 %v18443_v12  ;;  %v119_v21 = vunpack.c.h.bf16 %v18443_v12  ;;  %v18460_v22 = vpack.c.bf16 %v25_v13, %v24_v10  ;;  %v18462_v23 = vpack.c.bf16 %v27_v15, %v26_v14  ;;  %v31_v40 = vld [vmem:[%s23715_s0 + $0x68] sm:$0xff]  ;;  %v32_v53 = vld [vmem:[%s23715_s0 + $0x70] sm:$0xff]  ;;  %v33_v54 = vld [vmem:[%s23715_s0 + $0x78] sm:$0xff] }
   0x7   :  { %17403 = vmatpush3.bf16.msra.mxu0 %v385_v11  ;;  %v178_v24 = vsub.f32 %v18_v2, %v114_v16  ;;  %v179_v25 = vsub.f32 %v19_v3, %v115_v17  ;;  %v180_v26 = vsub.f32 %v20_v4, %v116_v18  ;;  %v181_v27 = vsub.f32 %v21_v5, %v117_v19  ;;  %v34_v55 = vld [vmem:[%s23715_s0 + $0x80] sm:$0xff]  ;;  %v35_v56 = vld [vmem:[%s23715_s0 + $0x88] sm:$0xff]  ;;  %v36_v5 = vld [vmem:[%s23715_s0 + $0x90] sm:$0xff] }
   0x8   :  { %17468 = vmatprep.subr.bf16.mxu0 %v18382_v0  ;;  %v182_v28 = vsub.f32 %v22_v8, %v118_v20  ;;  %v183_v29 = vsub.f32 %v23_v9, %v119_v21  ;;  %v120_v30 = vunpack.c.l.bf16 %v18460_v22  ;;  %v121_v31 = vunpack.c.h.bf16 %v18460_v22  ;;  %v37_v8 = vld [vmem:[%s23715_s0 + $0x98] sm:$0xff]  ;;  %v38_v9 = vld [vmem:[%s23715_s0 + $0xa0] sm:$0xff] }
   0x9   :  { %v242_v32 = vpack.c.bf16 %v179_v25, %v178_v24  ;;  %v243_v33 = vpack.c.bf16 %v181_v27, %v180_v26  ;;  %v122_v34 = vunpack.c.l.bf16 %v18462_v23  ;;  %v123_v35 = vunpack.c.h.bf16 %v18462_v23  ;;  %v40_v26 = vld [vmem:[%s23715_s0 + $0xb0] sm:$0xff]  ;;  %v41_v27 = vld [vmem:[%s23715_s0 + $0xb8] sm:$0xff] }
   0xa   :  { %v244_v38 = vpack.c.bf16 %v183_v29, %v182_v28  ;;  %v184_v41 = vsub.f32 %v24_v10, %v120_v30  ;;  %v185_v42 = vsub.f32 %v25_v13, %v121_v31  ;;  %v18482_v43 = vpack.c.bf16 %v29_v37, %v28_v36  ;;  %v39_v10 = vld [vmem:[%s23715_s0 + $0xa8] sm:$0xff]  ;;  %v42_v28 = vld [vmem:[%s23715_s0 + $0xc0] sm:$0xff] }
   0xb   :  { %17404 = vmatprep.mubr.msk.bf16.mxu0 %vm286_vm1, %v242_v32  ;;  %v186_v44 = vsub.f32 %v26_v14, %v122_v34  ;;  %v187_v45 = vsub.f32 %v27_v15, %v123_v35  ;;  %v18485_v46 = vpack.c.bf16 %v31_v40, %v30_v39  ;;  %v18505_v59 = vpack.c.bf16 %v33_v54, %v32_v53  ;;  %v43_v29 = vld [vmem:[%s23715_s0 + $0xc8] sm:$0xff] }
   0xc   :  { %17405 = vmatmul.mubr.msk.bf16.vlgmr.msra.gmra.mrb[0].mxu0 %vm286_vm1, %v243_v33  ;;  %v245_v47 = vpack.c.bf16 %v185_v42, %v184_v41  ;;  %v124_v48 = vunpack.c.l.bf16 %v18482_v43  ;;  %v125_v49 = vunpack.c.h.bf16 %v18482_v43  ;;  %v18508_v62 = vpack.c.bf16 %v35_v56, %v34_v55  ;;  %v44_v42 = vld [vmem:[%s23715_s0 + $0xd0] sm:$0xff] }
   0xd   :  { %17469 = vmatpush3.bf16.msra.mxu0 %v18382_v0  ;;  %17408 = vmatprep.mubr.msk.bf16.mxu0 %vm286_vm1, %v244_v38  ;;  %v246_v50 = vpack.c.bf16 %v187_v45, %v186_v44  ;;  %v126_v51 = vunpack.c.l.bf16 %v18485_v46  ;;  %v127_v52 = vunpack.c.h.bf16 %v18485_v46  ;;  %v128_v0 = vunpack.c.l.bf16 %v18505_v59  ;;  %v45_v44 = vld [vmem:[%s23715_s0 + $0xd8] sm:$0xff]  ;;  %v46_v45 = vld [vmem:[%s23715_s0 + $0xe0] sm:$0xff] }
   0xe   :  { %18379 = vmatprep.subr.msk.bf16.mxu0 %vm383_vm0, %v18383_v1  ;;  %v188_v57 = vsub.f32 %v28_v36, %v124_v48  ;;  %v189_v58 = vsub.f32 %v29_v37, %v125_v49  ;;  %v129_v1 = vunpack.c.h.bf16 %v18505_v59  ;;  %v130_v3 = vunpack.c.l.bf16 %v18508_v62 }
   0xf   :  { %v190_v60 = vsub.f32 %v30_v39, %v126_v51  ;;  %v191_v61 = vsub.f32 %v31_v40, %v127_v52  ;;  %v131_v4 = vunpack.c.h.bf16 %v18508_v62  ;;  %v18527_v14 = vpack.c.bf16 %v37_v8, %v36_v5 }
  0x10   :  { %v247_v63 = vpack.c.bf16 %v189_v58, %v188_v57  ;;  %v193_v13 = vsub.f32 %v33_v54, %v129_v1  ;;  %v194_v15 = vsub.f32 %v34_v55, %v130_v3  ;;  %v18530_v17 = vpack.c.bf16 %v39_v10, %v38_v9  ;;  %v51_v1 = vld [vmem:[%s23715_s0 + $0x108] sm:$0xff] }
  0x11   :  { %17471 = vmatpush3.bf16.msra.mxu0 %v385_v11  ;;  %v248_v2 = vpack.c.bf16 %v191_v61, %v190_v60  ;;  %v192_v11 = vsub.f32 %v32_v53, %v128_v0  ;;  %v195_v16 = vsub.f32 %v35_v56, %v131_v4  ;;  %v132_v19 = vunpack.c.l.bf16 %v18527_v14  ;;  %v48_v61 = vld [vmem:[%s23715_s0 + $0xf0] sm:$0xff]  ;;  %v50_v0 = vld [vmem:[%s23715_s0 + $0x100] sm:$0xff] }
  0x12   :  { %v133_v20 = vunpack.c.h.bf16 %v18527_v14  ;;  %v134_v24 = vunpack.c.l.bf16 %v18530_v17  ;;  %v135_v25 = vunpack.c.h.bf16 %v18530_v17  ;;  %v18549_v32 = vpack.c.bf16 %v41_v27, %v40_v26 }
  0x13   :  { %v249_v18 = vpack.c.bf16 %v193_v13, %v192_v11  ;;  %v250_v21 = vpack.c.bf16 %v195_v16, %v194_v15  ;;  %v196_v30 = vsub.f32 %v36_v5, %v132_v19  ;;  %v18552_v35 = vpack.c.bf16 %v43_v29, %v42_v28  ;;  %v52_v19 = vld [vmem:[%s23715_s0 + $0x110] sm:$0xff] }
  0x14   :  { %17409 = vmatmul.mubr.msk.bf16.gmra.mrb[4].mxu0 %vm286_vm1, %v245_v47  ;;  %v197_v31 = vsub.f32 %v37_v8, %v133_v20  ;;  %v198_v33 = vsub.f32 %v38_v9, %v134_v24  ;;  %v199_v34 = vsub.f32 %v39_v10, %v135_v25  ;;  %v136_v37 = vunpack.c.l.bf16 %v18549_v32  ;;  %v47_v47 = vld [vmem:[%s23715_s0 + $0xe8] sm:$0xff]  ;;  %v53_v20 = vld [vmem:[%s23715_s0 + $0x118] sm:$0xff] }
  0x15   :  { %17412 = vmatprep.mubr.msk.bf16.mxu0 %vm286_vm1, %v246_v50  ;;  %v137_v38 = vunpack.c.h.bf16 %v18549_v32  ;;  %v138_v40 = vunpack.c.l.bf16 %v18552_v35  ;;  %v139_v41 = vunpack.c.h.bf16 %v18552_v35  ;;  %v18571_v50 = vpack.c.bf16 %v45_v44, %v44_v42  ;;  %v55_v24 = vld [vmem:[%s23715_s0 + $0x128] sm:$0xff] }
  0x16   :  { %v251_v36 = vpack.c.bf16 %v197_v31, %v196_v30  ;;  %v252_v39 = vpack.c.bf16 %v199_v34, %v198_v33  ;;  %v200_v48 = vsub.f32 %v40_v26, %v136_v37  ;;  %v18574_v53 = vpack.c.bf16 %v47_v47, %v46_v45 }
  0x17   :  { %v201_v49 = vsub.f32 %v41_v27, %v137_v38  ;;  %v202_v51 = vsub.f32 %v42_v28, %v138_v40  ;;  %v203_v52 = vsub.f32 %v43_v29, %v139_v41  ;;  %v140_v55 = vunpack.c.l.bf16 %v18571_v50  ;;  %v57_v40 = vld [vmem:[%s23715_s0 + $0x138] sm:$0xff]  ;;  %v58_v41 = vld [vmem:[%s23715_s0 + $0x140] sm:$0xff] }
  0x18   :  { %v141_v56 = vunpack.c.h.bf16 %v18571_v50  ;;  %v142_v58 = vunpack.c.l.bf16 %v18574_v53  ;;  %v143_v60 = vunpack.c.h.bf16 %v18574_v53  ;;  %v18596_v9 = vpack.c.bf16 %v51_v1, %v50_v0 }
  0x19   :  { %v253_v54 = vpack.c.bf16 %v201_v49, %v200_v48  ;;  %v254_v57 = vpack.c.bf16 %v203_v52, %v202_v51  ;;  %v18615_v27 = vpack.c.bf16 %v53_v20, %v52_v19 }
  0x1a   :  { %v205_v3 = vsub.f32 %v45_v44, %v141_v56  ;;  %v206_v5 = vsub.f32 %v46_v45, %v142_v58  ;;  %v207_v8 = vsub.f32 %v47_v47, %v143_v60  ;;  %v146_v16 = vunpack.c.l.bf16 %v18596_v9  ;;  %v60_v60 = vld [vmem:[%s23715_s0 + $0x150] sm:$0xff] }
  0x1b   :  { %v148_v33 = vunpack.c.l.bf16 %v18615_v27  ;;  %v149_v34 = vunpack.c.h.bf16 %v18615_v27 }
  0x1c   :  { %17413 = vmatmul.mubr.msk.bf16.gmra.mrb[8].mxu0 %vm286_vm1, %v247_v63  ;;  %v49_v63 = vld [vmem:[%s23715_s0 + $0xf8] sm:$0xff]  ;;  %v256_v15 = vpack.c.bf16 %v207_v8, %v206_v5  ;;  %v210_v28 = vsub.f32 %v50_v0, %v146_v16  ;;  %v63_v0 = vld [vmem:[%s23715_s0 + $0x168] sm:$0xff] }
  0x1d   :  { %17416 = vmatprep.mubr.msk.bf16.mxu0 %vm286_vm1, %v248_v2  ;;  %v204_v2 = vsub.f32 %v44_v42, %v140_v55  ;;  %v18593_v4 = vpack.c.bf16 %v49_v63, %v48_v61  ;;  %v59_v42 = vld [vmem:[%s23715_s0 + $0x148] sm:$0xff]  ;;  %v212_v44 = vsub.f32 %v52_v19, %v148_v33  ;;  %v213_v45 = vsub.f32 %v53_v20, %v149_v34  ;;  %v64_v20 = vld [vmem:[%s23715_s0 + $0x170] sm:$0xff] }
  0x1e   :  { %v18640_v51 = vpack.c.bf16 %v59_v42, %v58_v41 }
  0x1f   :  { %v255_v10 = vpack.c.bf16 %v205_v3, %v204_v2  ;;  %v144_v11 = vunpack.c.l.bf16 %v18593_v4  ;;  %v145_v13 = vunpack.c.h.bf16 %v18593_v4  ;;  %v259_v52 = vpack.c.bf16 %v213_v45, %v212_v44  ;;  %v69_v44 = vld [vmem:[%s23715_s0 + $0x198] sm:$0xff]  ;;  %v70_v45 = vld [vmem:[%s23715_s0 + $0x1a0] sm:$0xff] }
  0x20   :  { %v155_v58 = vunpack.c.h.bf16 %v18640_v51 }
  0x21   :  { %v208_v25 = vsub.f32 %v48_v61, %v144_v11  ;;  %v209_v26 = vsub.f32 %v49_v63, %v145_v13  ;;  %v61_v61 = vld [vmem:[%s23715_s0 + $0x158] sm:$0xff]  ;;  %v62_v63 = vld [vmem:[%s23715_s0 + $0x160] sm:$0xff] }
  0x22   :  { %v18659_v3 = vpack.c.bf16 %v61_v61, %v60_v60  ;;  %v219_v8 = vsub.f32 %v59_v42, %v155_v58  ;;  %v68_v42 = vld [vmem:[%s23715_s0 + $0x190] sm:$0xff] }
  0x23   :  { %v257_v31 = vpack.c.bf16 %v209_v26, %v208_v25  ;;  %v67_v25 = vld [vmem:[%s23715_s0 + $0x188] sm:$0xff] }
  0x24   :  { %17417 = vmatmul.mubr.msk.bf16.gmra.mrb[12].mxu0 %vm286_vm1, %v249_v18  ;;  %v147_v18 = vunpack.c.h.bf16 %v18596_v9  ;;  %v156_v13 = vunpack.c.l.bf16 %v18659_v3 }
  0x25   :  { %17420 = vmatprep.mubr.msk.bf16.mxu0 %vm286_vm1, %v250_v21  ;;  %v54_v21 = vld [vmem:[%s23715_s0 + $0x120] sm:$0xff] }
  0x26   :  { %v211_v29 = vsub.f32 %v51_v1, %v147_v18  ;;  %v18618_v30 = vpack.c.bf16 %v55_v24, %v54_v21  ;;  %v220_v26 = vsub.f32 %v60_v60, %v156_v13 }
  0x28   :  { %v150_v37 = vunpack.c.l.bf16 %v18618_v30  ;;  %v151_v38 = vunpack.c.h.bf16 %v18618_v30 }
  0x2a   :  { %v214_v48 = vsub.f32 %v54_v21, %v150_v37  ;;  %v215_v49 = vsub.f32 %v55_v24, %v151_v38  ;;  %v65_v21 = vld [vmem:[%s23715_s0 + $0x178] sm:$0xff]  ;;  %v66_v24 = vld [vmem:[%s23715_s0 + $0x180] sm:$0xff] }
  0x2b   :  { %v18684_v34 = vpack.c.bf16 %v67_v25, %v66_v24 }
  0x2c   :  { %17421 = vmatmul.mubr.msk.bf16.gmra.mrb[16].mxu0 %vm286_vm1, %v251_v36  ;;  %v258_v36 = vpack.c.bf16 %v211_v29, %v210_v28  ;;  %v260_v56 = vpack.c.bf16 %v215_v49, %v214_v48  ;;  %v18681_v29 = vpack.c.bf16 %v65_v21, %v64_v20  ;;  %v71_v48 = vld [vmem:[%s23715_s0 + $0x1a8] sm:$0xff] }
  0x2d   :  { %17424 = vmatprep.mubr.msk.bf16.mxu0 %vm286_vm1, %v252_v39  ;;  %v56_v39 = vld [vmem:[%s23715_s0 + $0x130] sm:$0xff] }
  0x2e   :  { %v18637_v47 = vpack.c.bf16 %v57_v40, %v56_v39  ;;  %v160_v37 = vunpack.c.l.bf16 %v18681_v29  ;;  %v161_v38 = vunpack.c.h.bf16 %v18681_v29 }
  0x30   :  { %v153_v55 = vunpack.c.h.bf16 %v18637_v47  ;;  %v224_v49 = vsub.f32 %v64_v20, %v160_v37  ;;  %v78_v37 = vld [vmem:[%s23715_s0 + $0x1e0] sm:$0xff] }
  0x32   :  { %v217_v2 = vsub.f32 %v57_v40, %v153_v55  ;;  %v162_v40 = vunpack.c.l.bf16 %v18684_v34 }
  0x34   :  { %17425 = vmatmul.mubr.msk.bf16.gmra.mrb[20].mxu0 %vm286_vm1, %v253_v54  ;;  %v152_v54 = vunpack.c.l.bf16 %v18637_v47  ;;  %v226_v55 = vsub.f32 %v66_v24, %v162_v40 }
  0x35   :  { %17428 = vmatprep.mubr.msk.bf16.mxu0 %vm286_vm1, %v254_v57  ;;  %v154_v57 = vunpack.c.l.bf16 %v18640_v51 }
  0x36   :  { %v216_v1 = vsub.f32 %v56_v39, %v152_v54  ;;  %v18703_v54 = vpack.c.bf16 %v69_v44, %v68_v42 }
  0x37   :  { %v218_v5 = vsub.f32 %v58_v41, %v154_v57  ;;  %v163_v41 = vunpack.c.h.bf16 %v18684_v34  ;;  %v18706_v57 = vpack.c.bf16 %v71_v48, %v70_v45 }
  0x38   :  { %v261_v11 = vpack.c.bf16 %v217_v2, %v216_v1  ;;  %v164_v60 = vunpack.c.l.bf16 %v18703_v54  ;;  %v72_v2 = vld [vmem:[%s23715_s0 + $0x1b0] sm:$0xff] }
  0x39   :  { %v262_v16 = vpack.c.bf16 %v219_v8, %v218_v5  ;;  %v167_v1 = vunpack.c.h.bf16 %v18706_v57  ;;  %v73_v5 = vld [vmem:[%s23715_s0 + $0x1b8] sm:$0xff]  ;;  %v74_v8 = vld [vmem:[%s23715_s0 + $0x1c0] sm:$0xff] }
  0x3a   :  { %v228_v13 = vsub.f32 %v68_v42, %v164_v60  ;;  %v80_v60 = vld [vmem:[%s23715_s0 + $0x1f0] sm:$0xff] }
  0x3c   :  { %17429 = vmatmul.mubr.msk.bf16.gmra.mrb[24].mxu0 %vm286_vm1, %v255_v10  ;;  %v18662_v10 = vpack.c.bf16 %v63_v0, %v62_v63 }
  0x3d   :  { %17432 = vmatprep.mubr.msk.bf16.mxu0 %vm286_vm1, %v256_v15  ;;  %v157_v15 = vunpack.c.h.bf16 %v18659_v3 }
  0x3e   :  { %v158_v18 = vunpack.c.l.bf16 %v18662_v10  ;;  %v159_v19 = vunpack.c.h.bf16 %v18662_v10 }
  0x3f   :  { %v221_v28 = vsub.f32 %v61_v61, %v157_v15  ;;  %v165_v61 = vunpack.c.h.bf16 %v18703_v54 }
  0x40   :  { %v223_v33 = vsub.f32 %v63_v0, %v159_v19  ;;  %v166_v0 = vunpack.c.l.bf16 %v18706_v57  ;;  %v231_v19 = vsub.f32 %v71_v48, %v167_v1 }
  0x41   :  { %v229_v15 = vsub.f32 %v69_v44, %v165_v61  ;;  %v81_v61 = vld [vmem:[%s23715_s0 + $0x1f8] sm:$0xff] }
  0x42   :  { %v113_v1 = vpack.c.bf16 %v81_v61, %v80_v60 }
  0x44   :  { %17433 = vmatmul.mubr.msk.bf16.gmra.mrb[28].mxu0 %vm286_vm1, %v257_v31  ;;  %v222_v31 = vsub.f32 %v62_v63, %v158_v18  ;;  %v230_v18 = vsub.f32 %v70_v45, %v166_v0 }
  0x45   :  { %17436 = vmatprep.mubr.msk.bf16.mxu0 %vm286_vm1, %v258_v36  ;;  %v263_v36 = vpack.c.bf16 %v221_v28, %v220_v26 }
  0x46   :  { %v264_v39 = vpack.c.bf16 %v223_v33, %v222_v31  ;;  %v268_v26 = vpack.c.bf16 %v231_v19, %v230_v18  ;;  %v76_v33 = vld [vmem:[%s23715_s0 + $0x1d0] sm:$0xff] }
  0x4c   :  { %17437 = vmatmul.mubr.msk.bf16.gmra.mrb[32].mxu0 %vm286_vm1, %v259_v52  ;;  %v225_v52 = vsub.f32 %v65_v21, %v161_v38  ;;  %v267_v21 = vpack.c.bf16 %v229_v15, %v228_v13  ;;  %v79_v38 = vld [vmem:[%s23715_s0 + $0x1e8] sm:$0xff]  ;;  %v177_v13 = vunpack.c.h.bf16 %v113_v1 }
  0x4d   :  { %17440 = vmatprep.mubr.msk.bf16.mxu0 %vm286_vm1, %v260_v56  ;;  %v227_v56 = vsub.f32 %v67_v25, %v163_v41  ;;  %v112_v45 = vpack.c.bf16 %v79_v38, %v78_v37 }
  0x4e   :  { %v265_v58 = vpack.c.bf16 %v225_v52, %v224_v49  ;;  %v241_v19 = vsub.f32 %v81_v61, %v177_v13 }
  0x4f   :  { %v266_v63 = vpack.c.bf16 %v227_v56, %v226_v55  ;;  %v174_v56 = vunpack.c.l.bf16 %v112_v45 }
  0x54   :  { %17441 = vmatmul.mubr.msk.bf16.gmra.mrb[36].mxu0 %vm286_vm1, %v261_v11  ;;  %v75_v11 = vld [vmem:[%s23715_s0 + $0x1c8] sm:$0xff] }
  0x55   :  { %17444 = vmatprep.mubr.msk.bf16.mxu0 %vm286_vm1, %v262_v16  ;;  %v18725_v16 = vpack.c.bf16 %v73_v5, %v72_v2  ;;  %v18728_v20 = vpack.c.bf16 %v75_v11, %v74_v8 }
  0x57   :  { %v168_v24 = vunpack.c.l.bf16 %v18725_v16  ;;  %v169_v25 = vunpack.c.h.bf16 %v18725_v16  ;;  %v170_v28 = vunpack.c.l.bf16 %v18728_v20  ;;  %v171_v31 = vunpack.c.h.bf16 %v18728_v20 }
  0x59   :  { %v233_v40 = vsub.f32 %v73_v5, %v169_v25  ;;  %v234_v42 = vsub.f32 %v74_v8, %v170_v28  ;;  %v235_v44 = vsub.f32 %v75_v11, %v171_v31  ;;  %v176_v11 = vunpack.c.l.bf16 %v113_v1 }
  0x5b   :  { %v270_v55 = vpack.c.bf16 %v235_v44, %v234_v42  ;;  %v240_v18 = vsub.f32 %v80_v60, %v176_v11 }
  0x5c   :  { %17445 = vmatmul.mubr.msk.bf16.gmra.mrb[40].mxu0 %vm286_vm1, %v263_v36  ;;  %v77_v36 = vld [vmem:[%s23715_s0 + $0x1d8] sm:$0xff] }
  0x5d   :  { %17448 = vmatprep.mubr.msk.bf16.mxu0 %vm286_vm1, %v264_v39  ;;  %v232_v39 = vsub.f32 %v72_v2, %v168_v24  ;;  %v111_v41 = vpack.c.bf16 %v77_v36, %v76_v33  ;;  %v238_v2 = vsub.f32 %v78_v37, %v174_v56  ;;  %v4965_v56 = vld [vmem:[%s23716_s2] sm:$0xff] }
  0x5e   :  { %v7621_v60 = vand.u32 4294901760, %v4965_v56 }
  0x5f   :  { %v269_v48 = vpack.c.bf16 %v233_v40, %v232_v39  ;;  %v172_v49 = vunpack.c.l.bf16 %v111_v41  ;;  %v173_v52 = vunpack.c.h.bf16 %v111_v41 }
  0x61   :  { %v237_v0 = vsub.f32 %v77_v36, %v173_v52 }
  0x64   :  { %17449 = vmatmul.mubr.msk.bf16.gmra.mrb[44].mxu0 %vm286_vm1, %v265_v58  ;;  %v175_v58 = vunpack.c.h.bf16 %v112_v45 }
  0x65   :  { %17452 = vmatprep.mubr.msk.bf16.mxu0 %vm286_vm1, %v266_v63  ;;  %v236_v63 = vsub.f32 %v76_v33, %v172_v49 }
  0x66   :  { %v239_v5 = vsub.f32 %v79_v38, %v175_v58  ;;  %v18902_v58 = vld [vmem:[%s23716_s2 + $0x8] sm:$0xff] }
  0x67   :  { %v271_v8 = vpack.c.bf16 %v237_v0, %v236_v63  ;;  %v7624_v61 = vand.u32 4294901760, %v18902_v58 }
  0x68   :  { %v272_v15 = vpack.c.bf16 %v239_v5, %v238_v2 }
  0x69   :  { %v18907_v63 = vpack.c.bf16 %v7624_v61, %v7621_v60 }
  0x6b   :  { %23988 = vst [vmem:[#allocation2_spill] sm:$0xff] %v18907_v63  ;;  %18029 = vmatprep.subr.bf16.mxu0 %v18907_v63 }
  0x6c   :  { %17453 = vmatmul.mubr.msk.bf16.gmra.mrb[48].mxu0 %vm286_vm1, %v267_v21  ;;  %v273_v21 = vpack.c.bf16 %v241_v19, %v240_v18 }
  0x6d   :  { %17456 = vmatprep.mubr.msk.bf16.mxu0 %vm286_vm1, %v268_v26 }
  0x74   :  { %17457 = vmatmul.mubr.msk.bf16.gmra.mrb[52].mxu0 %vm286_vm1, %v269_v48 }
  0x75   :  { %17460 = vmatprep.mubr.msk.bf16.mxu0 %vm286_vm1, %v270_v55 }
  0x7c   :  { %17461 = vmatmul.mubr.msk.bf16.gmra.mrb[56].mxu0 %vm286_vm1, %v271_v8 }
  0x7d   :  { %17464 = vmatprep.mubr.msk.bf16.mxu0 %vm286_vm1, %v272_v15 }
  0x84   :  { %17465 = vmatmul.mubr.msk.bf16.gmra.mrb[60].mxu0 %vm286_vm1, %v273_v21 }
  0x85   :  { %17472 = vmatprep.mubr.msk.bf16.mxu0 %vm286_vm1, %v18428_v6 }
  0x8c   :  { %17473 = vmatmul.mubr.msk.bf16.vlgmr.msra.gmra.mrb[0].mxu0 %vm286_vm1, %v18430_v7 }
  0x8d   :  { %17476 = vmatprep.mubr.msk.bf16.mxu0 %vm286_vm1, %v18443_v12  ;;  %18031 = vmatpush3.bf16.msra.mxu0 %v18907_v63 }
  0x94   :  { %17477 = vmatmul.mubr.msk.bf16.gmra.mrb[4].mxu0 %vm286_vm1, %v18460_v22 }
  0x95   :  { %17480 = vmatprep.mubr.msk.bf16.mxu0 %vm286_vm1, %v18462_v23 }
  0x9c   :  { %17481 = vmatmul.mubr.msk.bf16.gmra.mrb[8].mxu0 %vm286_vm1, %v18482_v43 }
  0x9d   :  { %17484 = vmatprep.mubr.msk.bf16.mxu0 %vm286_vm1, %v18485_v46 }
  0xa4   :  { %17485 = vmatmul.mubr.msk.bf16.gmra.mrb[12].mxu0 %vm286_vm1, %v18505_v59 }
  0xa5   :  { %17488 = vmatprep.mubr.msk.bf16.mxu0 %vm286_vm1, %v18508_v62 }
  0xac   :  { %17489 = vmatmul.mubr.msk.bf16.gmra.mrb[16].mxu0 %vm286_vm1, %v18527_v14 }
  0xad   :  { %17492 = vmatprep.mubr.msk.bf16.mxu0 %vm286_vm1, %v18530_v17 }
  0xb4   :  { %17493 = vmatmul.mubr.msk.bf16.gmra.mrb[20].mxu0 %vm286_vm1, %v18549_v32 }
  0xb5   :  { %17496 = vmatprep.mubr.msk.bf16.mxu0 %vm286_vm1, %v18552_v35 }
  0xbc   :  { %17497 = vmatmul.mubr.msk.bf16.gmra.mrb[24].mxu0 %vm286_vm1, %v18571_v50 }
  0xbd   :  { %17500 = vmatprep.mubr.msk.bf16.mxu0 %vm286_vm1, %v18574_v53 }
  0xc4   :  { %17501 = vmatmul.mubr.msk.bf16.gmra.mrb[28].mxu0 %vm286_vm1, %v18593_v4 }
  0xc5   :  { %17504 = vmatprep.mubr.msk.bf16.mxu0 %vm286_vm1, %v18596_v9 }
  0xcc   :  { %17505 = vmatmul.mubr.msk.bf16.gmra.mrb[32].mxu0 %vm286_vm1, %v18615_v27 }
  0xcd   :  { %17508 = vmatprep.mubr.msk.bf16.mxu0 %vm286_vm1, %v18618_v30 }
  0xd4   :  { %17509 = vmatmul.mubr.msk.bf16.gmra.mrb[36].mxu0 %vm286_vm1, %v18637_v47 }
  0xd5   :  { %17512 = vmatprep.mubr.msk.bf16.mxu0 %vm286_vm1, %v18640_v51 }
  0xdc   :  { %17513 = vmatmul.mubr.msk.bf16.gmra.mrb[40].mxu0 %vm286_vm1, %v18659_v3 }
  0xdd   :  { %17516 = vmatprep.mubr.msk.bf16.mxu0 %vm286_vm1, %v18662_v10 }
  0xe4   :  { %17517 = vmatmul.mubr.msk.bf16.gmra.mrb[44].mxu0 %vm286_vm1, %v18681_v29 }
  0xe5   :  { %17520 = vmatprep.mubr.msk.bf16.mxu0 %vm286_vm1, %v18684_v34 }
  0xec   :  { %17521 = vmatmul.mubr.msk.bf16.gmra.mrb[48].mxu0 %vm286_vm1, %v18703_v54 }
  0xed   :  { %17524 = vmatprep.mubr.msk.bf16.mxu0 %vm286_vm1, %v18706_v57 }
  0xf4   :  { %17525 = vmatmul.mubr.msk.bf16.gmra.mrb[52].mxu0 %vm286_vm1, %v18725_v16 }
  0xf5   :  { %17528 = vmatprep.mubr.msk.bf16.mxu0 %vm286_vm1, %v18728_v20 }
  0xfc   :  { %17529 = vmatmul.mubr.msk.bf16.gmra.mrb[56].mxu0 %vm286_vm1, %v111_v41 }
  0xfd   :  { %17532 = vmatprep.mubr.msk.bf16.mxu0 %vm286_vm1, %v112_v45 }
 0x104   :  { %17533 = vmatmul.mubr.msk.bf16.gmra.mrb[60].mxu0 %vm286_vm1, %v113_v1 }
 0x15f   :  { %v17474_v6 = vpop.f32.mrb[0].mxu0 }
 0x160   :  { %1093 = vxpose.xlu0.b32.start [1/2] (short) (narrow) %v17474_v6, 16  ;;  %v806_v7 = vpop.f32.mrb[1].mxu0 }
 0x161   :  { %1061 = vxpose.xlu1.b32.start [1/2] (short) (narrow) %v806_v7, 16  ;;  %v17475_v12 = vpop.f32.mrb[2].mxu0  ;;  %v18384_v7 = vmov 1966171168  }
 0x162   :  { %v809_v22 = vpop.f32.mrb[3].mxu0 }
 0x164   :  { %1094 = vxpose.xlu0.b32.end [2/2] (short) (narrow) %v17475_v12, 16  ;;  %v2151_v12 = vunpack.c.l.s4 %v18384_v7 }
 0x165   :  { %1062 = vxpose.xlu1.b32.end [2/2] (short) (narrow) %v809_v22, 16  ;;  %v2153_v22 = vlaneseq }
 0x167   :  { %v17478_v23 = vpop.f32.mrb[4].mxu0 }
 0x168   :  { %1157 = vxpose.xlu0.b32.start [1/2] (short) (narrow) %v17478_v23, 16  ;;  %v822_v43 = vpop.f32.mrb[5].mxu0 }
 0x169   :  { %1125 = vxpose.xlu1.b32.start [1/2] (short) (narrow) %v822_v43, 16  ;;  %v17479_v46 = vpop.f32.mrb[6].mxu0 }
 0x16a   :  { %v825_v59 = vpop.f32.mrb[7].mxu0 }
 0x16c   :  { %1158 = vxpose.xlu0.b32.end [2/2] (short) (narrow) %v17479_v46, 16 }
 0x16d   :  { %1126 = vxpose.xlu1.b32.end [2/2] (short) (narrow) %v825_v59, 16  ;;  %v2152_v59 = vunpack.c.0.s8 %v2151_v12 }
 0x16f   :  { %v18820_v62 = vpop.f32.mrb[8].mxu0 }
 0x170   :  { %v18822_v14 = vpop.f32.mrb[9].mxu0 }
 0x171   :  { %v18824_v17 = vpop.f32.mrb[10].mxu0 }
 0x172   :  { %v18826_v32 = vpop.f32.mrb[11].mxu0 }
 0x177   :  { %v18828_v35 = vpop.f32.mrb[12].mxu0 }
 0x178   :  { %v18830_v50 = vpop.f32.mrb[13].mxu0 }
 0x179   :  { %v18832_v53 = vpop.f32.mrb[14].mxu0 }
 0x17a   :  { %v18834_v4 = vpop.f32.mrb[15].mxu0 }
 0x17f   :  { %v18836_v9 = vpop.f32.mrb[16].mxu0 }
 0x180   :  { %v18838_v27 = vpop.f32.mrb[17].mxu0 }
 0x181   :  { %v18840_v30 = vpop.f32.mrb[18].mxu0 }
 0x182   :  { %v18842_v47 = vpop.f32.mrb[19].mxu0 }
 0x187   :  { %v18844_v51 = vpop.f32.mrb[20].mxu0 }
 0x188   :  { %v18846_v3 = vpop.f32.mrb[21].mxu0 }
 0x189   :  { %v18848_v10 = vpop.f32.mrb[22].mxu0 }
 0x18a   :  { %v18850_v29 = vpop.f32.mrb[23].mxu0 }
 0x18f   :  { %v18852_v34 = vpop.f32.mrb[24].mxu0 }
 0x190   :  { %v18854_v54 = vpop.f32.mrb[25].mxu0 }
 0x191   :  { %v18856_v57 = vpop.f32.mrb[26].mxu0 }
 0x192   :  { %v18858_v16 = vpop.f32.mrb[27].mxu0 }
 0x197   :  { %v18860_v20 = vpop.f32.mrb[28].mxu0 }
 0x198   :  { %v18862_v24 = vpop.f32.mrb[29].mxu0 }
 0x199   :  { %v18864_v25 = vpop.f32.mrb[30].mxu0 }
 0x19a   :  { %v18866_v26 = vpop.f32.mrb[31].mxu0 }
 0x19f   :  { %v18868_v28 = vpop.f32.mrb[32].mxu0 }
 0x1a0   :  { %v18870_v31 = vpop.f32.mrb[33].mxu0 }
 0x1a1   :  { %v18872_v33 = vpop.f32.mrb[34].mxu0 }
 0x1a2   :  { %v18874_v36 = vpop.f32.mrb[35].mxu0 }
 0x1a7   :  { %v18876_v37 = vpop.f32.mrb[36].mxu0 }
 0x1a8   :  { %v18878_v38 = vpop.f32.mrb[37].mxu0 }
 0x1a9   :  { %v18880_v39 = vpop.f32.mrb[38].mxu0 }
 0x1aa   :  { %v18882_v40 = vpop.f32.mrb[39].mxu0 }
 0x1af   :  { %v18884_v41 = vpop.f32.mrb[40].mxu0 }
 0x1b0   :  { %v18886_v42 = vpop.f32.mrb[41].mxu0 }
 0x1b1   :  { %v18888_v44 = vpop.f32.mrb[42].mxu0 }
 0x1b2   :  { %v18890_v45 = vpop.f32.mrb[43].mxu0 }
 0x1b7   :  { %v17518_v48 = vpop.f32.mrb[44].mxu0 }
 0x1b8   :  { %1797 = vxpose.xlu0.b32.start [1/2] (short) (narrow) %v17518_v48, 16  ;;  %v18892_v49 = vpop.f32.mrb[45].mxu0  ;;  %v2154_v48 = vshrl.u32 %v2153_v22, 7 }
 0x1b9   :  { %v17519_v52 = vpop.f32.mrb[46].mxu0 }
 0x1ba   :  { %v18894_v55 = vpop.f32.mrb[47].mxu0 }
 0x1bc   :  { %1798 = vxpose.xlu0.b32.end [2/2] (short) (narrow) %v17519_v52, 16 }
 0x1bf   :  { %v17522_v0 = vpop.f32.mrb[48].mxu0 }
 0x1c0   :  { %1861 = vxpose.xlu0.b32.start [1/2] (short) (narrow) %v17522_v0, 16  ;;  %v998_v1 = vpop.f32.mrb[49].mxu0  ;;  %v18911_v0 = vsub.s32 %v2152_v59, %v2154_v48 }
 0x1c1   :  { %1829 = vxpose.xlu1.b32.start [1/2] (short) (narrow) %v998_v1, 16  ;;  %v17523_v2 = vpop.f32.mrb[50].mxu0 }
 0x1c2   :  { %v1001_v5 = vpop.f32.mrb[51].mxu0  ;;  %23989 = vst [vmem:[#allocation3_spill] sm:$0xff] %v18911_v0 }
 0x1c4   :  { %1862 = vxpose.xlu0.b32.end [2/2] (short) (narrow) %v17523_v2, 16 }
 0x1c5   :  { %1830 = vxpose.xlu1.b32.end [2/2] (short) (narrow) %v1001_v5, 16 }
 0x1c7   :  { %v17526_v8 = vpop.f32.mrb[52].mxu0 }
 0x1c8   :  { %1925 = vxpose.xlu0.b32.start [1/2] (short) (narrow) %v17526_v8, 16  ;;  %v1014_v11 = vpop.f32.mrb[53].mxu0 }
 0x1c9   :  { %1893 = vxpose.xlu1.b32.start [1/2] (short) (narrow) %v1014_v11, 16  ;;  %v17527_v13 = vpop.f32.mrb[54].mxu0 }
 0x1ca   :  { %v1017_v15 = vpop.f32.mrb[55].mxu0 }
 0x1cc   :  { %1926 = vxpose.xlu0.b32.end [2/2] (short) (narrow) %v17527_v13, 16 }
 0x1cd   :  { %1894 = vxpose.xlu1.b32.end [2/2] (short) (narrow) %v1017_v15, 16 }
 0x1cf   :  { %v17530_v18 = vpop.f32.mrb[56].mxu0 }
 0x1d0   :  { %1989 = vxpose.xlu0.b32.start [1/2] (short) (narrow) %v17530_v18, 16  ;;  %v1030_v19 = vpop.f32.mrb[57].mxu0 }
 0x1d1   :  { %1957 = vxpose.xlu1.b32.start [1/2] (short) (narrow) %v1030_v19, 16  ;;  %v17531_v21 = vpop.f32.mrb[58].mxu0 }
 0x1d2   :  { %v1033_v6 = vpop.f32.mrb[59].mxu0 }
 0x1d4   :  { %1990 = vxpose.xlu0.b32.end [2/2] (short) (narrow) %v17531_v21, 16 }
 0x1d5   :  { %1958 = vxpose.xlu1.b32.end [2/2] (short) (narrow) %v1033_v6, 16 }
 0x1d7   :  { %v17534_v23 = vpop.f32.mrb[60].mxu0 }
 0x1d8   :  { %2053 = vxpose.xlu0.b32.start [1/2] (short) (narrow) %v17534_v23, 16  ;;  %v1046_v43 = vpop.f32.mrb[61].mxu0 }
 0x1d9   :  { %2021 = vxpose.xlu1.b32.start [1/2] (short) (narrow) %v1046_v43, 16  ;;  %v17535_v46 = vpop.f32.mrb[62].mxu0 }
 0x1da   :  { %v1049_v52 = vpop.f32.mrb[63].mxu0 }
 0x1dc   :  { %2054 = vxpose.xlu0.b32.end [2/2] (short) (narrow) %v17535_v46, 16 }
 0x1dd   :  { %2022 = vxpose.xlu1.b32.end [2/2] (short) (narrow) %v1049_v52, 16 }
 0x1e0   :  { %1221 = vxpose.xlu0.b32.start [1/2] (short) (narrow) %v18820_v62, 16  ;;  %v1109_v1 = vpop.trf.xlu0 }
 0x1e1   :  { %1189 = vxpose.xlu1.b32.start [1/2] (short) (narrow) %v18822_v14, 16  ;;  %v1077_v2 = vpop.trf.xlu1  ;;  %v2237_v5 = vcombine.high %v1109_v1, %v1109_v1  ;;  %v2244_v8 = vrot.slane %v1109_v1, %v18911_v0  ;;  %v18922_v14 = vsub.f32 %v4965_v56, %v7621_v60 }
 0x1e2   :  { %v2149_v11 = vcombine.high %v1077_v2, %v1077_v2  ;;  %v2156_v13 = vrot.slane %v1077_v2, %v18911_v0 }
 0x1e3   :  { %v2251_v15 = vrot.slane %v2237_v5, %v18911_v0  ;;  %v2252_v18 = vcombine.high %v2244_v8, %v2244_v8  ;;  %v2260_v19 = vrot.slane %v2244_v8, %v18911_v0  ;;  %23990 = vst [vmem:[#allocation4_spill] sm:$0xff] %v18922_v14 }
 0x1e4   :  { %1222 = vxpose.xlu0.b32.end [2/2] (short) (narrow) %v18824_v17, 16  ;;  %v2163_v21 = vrot.slane %v2149_v11, %v18911_v0  ;;  %v2164_v62 = vcombine.high %v2156_v13, %v2156_v13  ;;  %v2172_v6 = vrot.slane %v2156_v13, %v18911_v0 }
 0x1e5   :  { %1190 = vxpose.xlu1.b32.end [2/2] (short) (narrow) %v18826_v32, 16  ;;  %v2253_v7 = vcombine.high %v2251_v15, %v2251_v15  ;;  %v2267_v12 = vrot.slane %v2251_v15, %v18911_v0  ;;  %v2274_v22 = vrot.slane %v2252_v18, %v18911_v0  ;;  %v2282_v23 = vcombine.high %v2260_v19, %v2260_v19  ;;  %v1078_v43 = vpop.trf.xlu1 }
 0x1e6   :  { %v2165_v46 = vcombine.high %v2163_v21, %v2163_v21  ;;  %v2179_v59 = vrot.slane %v2163_v21, %v18911_v0  ;;  %v2186_v17 = vrot.slane %v2164_v62, %v18911_v0  ;;  %v2198_v48 = vcombine.high %v1078_v43, %v1078_v43 }
 0x1e7   :  { %v2281_v52 = vrot.slane %v2253_v7, %v18911_v0  ;;  %v2283_v1 = vcombine.high %v2267_v12, %v2267_v12  ;;  %v2284_v56 = vcombine.high %v2274_v22, %v2274_v22  ;;  %v2205_v5 = vrot.slane %v1078_v43, %v18911_v0 }
 0x1e8   :  { %1285 = vxpose.xlu0.b32.start [1/2] (short) (narrow) %v18828_v35, 16  ;;  %v2193_v32 = vrot.slane %v2165_v46, %v18911_v0  ;;  %v4967_v60 = vcombine.low %v2172_v6, %v2186_v17  ;;  %v16912_v2 = vcombine.high %v2172_v6, %v2186_v17  ;;  %v5019_v8 = vcombine.low %v2274_v22, %v2282_v23  ;;  %v1110_v35 = vpop.trf.xlu0 }
 0x1e9   :  { %1253 = vxpose.xlu1.b32.start [1/2] (short) (narrow) %v18830_v50, 16  ;;  %v5065_v11 = vcombine.low %v2284_v56, %v2267_v12  ;;  %v5066_v13 = vcombine.low %v2281_v52, %v2283_v1  ;;  %v2212_v15 = vrot.slane %v2198_v48, %v18911_v0  ;;  %v2213_v17 = vcombine.high %v2205_v5, %v2205_v5 }
 0x1ea   :  { %v4969_v18 = vcombine.low %v2179_v59, %v2193_v32  ;;  %v16913_v21 = vcombine.high %v2179_v59, %v2193_v32  ;;  %v4977_v62 = vrot.slane %v4967_v60, %v18911_v0  ;;  %v4984_v7 = vrot.slane %v16912_v2, %v18911_v0 }
 0x1eb   :  { %v5075_v46 = vrot.slane %v5065_v11, %v18911_v0  ;;  %v5082_v6 = vrot.slane %v5066_v13, %v18911_v0  ;;  %v2220_v43 = vrot.slane %v2205_v5, %v18911_v0  ;;  %v2227_v23 = vrot.slane %v2212_v15, %v18911_v0  ;;  %v1141_v5 = vpop.trf.xlu1 }
 0x1ec   :  { %1286 = vxpose.xlu0.b32.end [2/2] (short) (narrow) %v18832_v53, 16  ;;  %v18942_v50 = vrot.slane %v4969_v18, %v18911_v0  ;;  %v18945_v12 = vrot.slane %v16913_v21, %v18911_v0  ;;  %v4999_v22 = vcombine.low %v4977_v62, %v4984_v7  ;;  %v5047_v59 = vrot.slane %v5019_v8, %v18911_v0 }
 0x1ed   :  { %1254 = vxpose.xlu1.b32.end [2/2] (short) (narrow) %v18834_v4, 16  ;;  %v18950_v48 = vcombine.low %v5075_v46, %v5082_v6  ;;  %v2234_v1 = vrot.slane %v2213_v17, %v18911_v0  ;;  %v2286_v56 = vcombine.high %v1110_v35, %v1110_v35  ;;  %v5018_v32 = vcombine.low %v2227_v23, %v2260_v19 }
 0x1ee   :  { %v5000_v53 = vcombine.low %v18942_v50, %v18945_v12  ;;  %v2285_v60 = vcombine.high %v2281_v52, %v2281_v52  ;;  %v2293_v2 = vrot.slane %v1110_v35, %v18911_v0  ;;  %v18957_v11 = vrot.slane %v4999_v22, %v18911_v0  ;;  %v1173_v52 = vpop.trf.xlu0 }
 0x1ef   :  { %v5016_v4 = vcombine.low %v2220_v43, %v2234_v1  ;;  %v16914_v13 = vcombine.high %v2220_v43, %v2234_v1  ;;  %v2300_v8 = vrot.slane %v2286_v56, %v18911_v0  ;;  %v5105_v15 = vrot.slane %v18950_v48, %v18911_v0 }
 0x1f0   :  { %1349 = vxpose.xlu0.b32.start [1/2] (short) (narrow) %v18836_v9, 16  ;;  %v5040_v18 = vrot.slane %v5018_v32, %v18911_v0  ;;  %v2301_v21 = vcombine.high %v2293_v2, %v2293_v2  ;;  %v2308_v19 = vrot.slane %v2293_v2, %v18911_v0  ;;  %v2325_v46 = vcombine.high %v1141_v5, %v1141_v5 }
 0x1f1   :  { %1317 = vxpose.xlu1.b32.start [1/2] (short) (narrow) %v18838_v27, 16  ;;  %v5026_v62 = vrot.slane %v5016_v4, %v18911_v0  ;;  %v5033_v7 = vrot.slane %v16914_v13, %v18911_v0  ;;  %v2315_v35 = vrot.slane %v2300_v8, %v18911_v0  ;;  %v2332_v12 = vrot.slane %v1141_v5, %v18911_v0 }
 0x1f2   :  { %v5049_v6 = vcombine.low %v5040_v18, %v5047_v59  ;;  %v2322_v9 = vrot.slane %v2301_v21, %v18911_v0  ;;  %v2323_v17 = vcombine.high %v2308_v19, %v2308_v19  ;;  %v5067_v43 = vcombine.low %v2285_v60, %v2308_v19 }
 0x1f3   :  { %v5048_v50 = vcombine.low %v5026_v62, %v5033_v7  ;;  %v2339_v22 = vrot.slane %v2325_v46, %v18911_v0  ;;  %v2413_v23 = vcombine.high %v1173_v52, %v1173_v52  ;;  %v2340_v2 = vcombine.high %v2332_v12, %v2332_v12 }
 0x1f4   :  { %1350 = vxpose.xlu0.b32.end [2/2] (short) (narrow) %v18840_v30, 16  ;;  %v5063_v27 = vrot.slane %v5049_v6, %v18911_v0  ;;  %v2324_v1 = vcombine.high %v2322_v9, %v2322_v9  ;;  %v5068_v56 = vcombine.low %v2322_v9, %v2323_v17  ;;  %v5089_v32 = vrot.slane %v5067_v43, %v18911_v0 }
 0x1f5   :  { %1318 = vxpose.xlu1.b32.end [2/2] (short) (narrow) %v18842_v47, 16  ;;  %v5056_v59 = vrot.slane %v5048_v50, %v18911_v0  ;;  %v2341_v60 = vcombine.high %v2339_v22, %v2339_v22  ;;  %v2348_v4 = vrot.slane %v2332_v12, %v18911_v0  ;;  %v2355_v8 = vrot.slane %v2339_v22, %v18911_v0 }
 0x1f6   :  { %v5096_v5 = vrot.slane %v5068_v56, %v18911_v0  ;;  %v5114_v13 = vcombine.low %v2324_v1, %v2315_v35  ;;  %v2420_v30 = vrot.slane %v1173_v52, %v18911_v0  ;;  %v2362_v21 = vrot.slane %v2340_v2, %v18911_v0  ;;  %v1142_v1 = vpop.trf.xlu1 }
 0x1f7   :  { %v5064_v18 = vcombine.low %v5056_v59, %v5063_v27  ;;  %v2369_v19 = vrot.slane %v2341_v60, %v18911_v0  ;;  %v2427_v47 = vrot.slane %v2413_v23, %v18911_v0  ;;  %v18992_v43 = vrot.slane %v5000_v53, %v18911_v0 }
 0x1f8   :  { %1413 = vxpose.xlu0.b32.start [1/2] (short) (narrow) %v18844_v51, 16  ;;  %v18985_v62 = vcombine.low %v5089_v32, %v5096_v5  ;;  %v5124_v7 = vrot.slane %v5114_v13, %v18911_v0  ;;  %v2428_v46 = vcombine.high %v2420_v30, %v2420_v30  ;;  %v2436_v35 = vrot.slane %v2420_v30, %v18911_v0 }
 0x1f9   :  { %1381 = vxpose.xlu1.b32.start [1/2] (short) (narrow) %v18846_v3, 16  ;;  %v7518_v52 = vsel %vm7515_vm2, %v5064_v18, 0  ;;  %v5115_v6 = vcombine.low %v2348_v4, %v2362_v21  ;;  %v16915_v9 = vcombine.high %v2348_v4, %v2362_v21  ;;  %v5117_v17 = vcombine.low %v2355_v8, %v2369_v19  ;;  %v1174_v18 = vpop.trf.xlu0 }
 0x1fa   :  { %v18994_v50 = vand.u32 4294901760, %v7518_v52  ;;  %v16916_v51 = vcombine.high %v2355_v8, %v2369_v19  ;;  %v2429_v12 = vcombine.high %v2427_v47, %v2427_v47  ;;  %v2443_v3 = vrot.slane %v2427_v47, %v18911_v0 }
 0x1fb   :  { %v5131_v22 = vrot.slane %v5115_v6, %v18911_v0  ;;  %v5138_v23 = vrot.slane %v16915_v9, %v18911_v0  ;;  %v5145_v27 = vrot.slane %v5117_v17, %v18911_v0  ;;  %v5112_v53 = vrot.slane %v18985_v62, %v18911_v0 }
 0x1fc   :  { %23991 = vst [vmem:[#allocation5_spill] sm:$0xff] %v18994_v50  ;;  %1414 = vxpose.xlu0.b32.end [2/2] (short) (narrow) %v18848_v10, 16  ;;  %v19002_v56 = vsub.f32 %v7518_v52, %v18994_v50  ;;  %v2450_v32 = vrot.slane %v2428_v46, %v18911_v0  ;;  %v2457_v59 = vrot.slane %v2429_v12, %v18911_v0 }
 0x1fd   :  { %1382 = vxpose.xlu1.b32.end [2/2] (short) (narrow) %v18850_v29, 16  ;;  %v19009_v2 = vcombine.low %v5124_v7, %v5131_v22  ;;  %v5147_v60 = vcombine.low %v5138_v23, %v5145_v27  ;;  %v2458_v4 = vcombine.high %v2436_v35, %v2436_v35  ;;  %v2459_v5 = vcombine.high %v2443_v3, %v2443_v3 }
 0x1fe   :  { %23992 = vst [vmem:[#allocation6_spill] sm:$0xff] %v19002_v56  ;;  %v5173_v13 = vrot.slane %v16916_v51, %v18911_v0  ;;  %v2460_v10 = vcombine.high %v2450_v32, %v2450_v32  ;;  %v2374_v8 = vcombine.high %v1142_v1, %v1142_v1  ;;  %v2381_v30 = vrot.slane %v1142_v1, %v18911_v0 }
 0x1ff   :  { %v5154_v21 = vrot.slane %v19009_v2, %v18911_v0  ;;  %v5212_v19 = vcombine.low %v2450_v32, %v2458_v4  ;;  %v5214_v47 = vcombine.low %v2457_v59, %v2459_v5  ;;  %v2461_v62 = vcombine.high %v2457_v59, %v2457_v59 }
 0x200   :  { %1477 = vxpose.xlu0.b32.start [1/2] (short) (narrow) %v18852_v34, 16  ;;  %v5213_v29 = vcombine.low %v2460_v10, %v2443_v3  ;;  %v2388_v7 = vrot.slane %v2374_v8, %v18911_v0  ;;  %v2389_v46 = vcombine.high %v2381_v30, %v2381_v30  ;;  %v2396_v52 = vrot.slane %v2381_v30, %v18911_v0 }
 0x201   :  { %1445 = vxpose.xlu1.b32.start [1/2] (short) (narrow) %v18854_v54, 16  ;;  %v5161_v6 = vrot.slane %v5147_v60, %v18911_v0  ;;  %v5222_v9 = vrot.slane %v5212_v19, %v18911_v0  ;;  %v2462_v17 = vcombine.high %v1174_v18, %v1174_v18  ;;  %v2469_v51 = vrot.slane %v1174_v18, %v18911_v0 }
 0x202   :  { %v5229_v12 = vrot.slane %v5213_v29, %v18911_v0  ;;  %v2403_v22 = vrot.slane %v2388_v7, %v18911_v0  ;;  %v2410_v34 = vrot.slane %v2389_v46, %v18911_v0  ;;  %v5236_v23 = vrot.slane %v5214_v47, %v18911_v0 }
 0x203   :  { %v2476_v27 = vrot.slane %v2462_v17, %v18911_v0  ;;  %v2477_v3 = vcombine.high %v2469_v51, %v2469_v51  ;;  %v2484_v54 = vrot.slane %v2469_v51, %v18911_v0  ;;  %v5015_v1 = vcombine.low %v18957_v11, %v18992_v43 }
 0x204   :  { %1478 = vxpose.xlu0.b32.end [2/2] (short) (narrow) %v18856_v57, 16  ;;  %v5244_v32 = vcombine.low %v5222_v9, %v5229_v12  ;;  %v5164_v59 = vcombine.low %v2396_v52, %v2410_v34  ;;  %v16917_v2 = vcombine.high %v2396_v52, %v2410_v34  ;;  %v5166_v60 = vcombine.low %v2403_v22, %v2436_v35 }
 0x205   :  { %1446 = vxpose.xlu1.b32.end [2/2] (short) (narrow) %v18858_v16, 16  ;;  %v2491_v4 = vrot.slane %v2476_v27, %v18911_v0  ;;  %v2498_v5 = vrot.slane %v2477_v3, %v18911_v0  ;;  %v2499_v10 = vcombine.high %v2484_v54, %v2484_v54  ;;  %v5215_v8 = vcombine.low %v2461_v62, %v2484_v54 }
 0x206   :  { %v5180_v30 = vrot.slane %v5164_v59, %v18911_v0  ;;  %v5187_v18 = vrot.slane %v16917_v2, %v18911_v0  ;;  %v5194_v11 = vrot.slane %v5166_v60, %v18911_v0  ;;  %v23723_v57 = vand.u32 4294901760, %v19002_v56 }
 0x207   :  { %v2500_v43 = vcombine.high %v2498_v5, %v2498_v5  ;;  %v5243_v19 = vrot.slane %v5215_v8, %v18911_v0  ;;  %v5261_v35 = vcombine.low %v2498_v5, %v2499_v10  ;;  %v7516_v16 = vsel %vm7515_vm2, %v5015_v1, 0 }
 0x208   :  { %1541 = vxpose.xlu0.b32.start [1/2] (short) (narrow) %v18860_v20, 16  ;;  %v5252_v47 = vrot.slane %v5244_v32, %v18911_v0  ;;  %v5195_v29 = vcombine.low %v5173_v13, %v5180_v30  ;;  %v5196_v62 = vcombine.low %v5187_v18, %v5194_v11  ;;  %v19042_v7 = vand.u32 4294901760, %v7516_v16 }
 0x209   :  { %1509 = vxpose.xlu1.b32.start [1/2] (short) (narrow) %v18862_v24, 16  ;;  %v5245_v46 = vcombine.low %v5236_v23, %v5243_v19  ;;  %v5262_v52 = vcombine.low %v2500_v43, %v2491_v4  ;;  %v5271_v9 = vrot.slane %v5261_v35, %v18911_v0  ;;  %v5113_v17 = vcombine.low %v5105_v15, %v5112_v53 }
 0x20a   :  { %23993 = vst [vmem:[#allocation7_spill] sm:$0xff] %v19042_v7  ;;  %v5203_v51 = vrot.slane %v5195_v29, %v18911_v0  ;;  %v5210_v20 = vrot.slane %v5196_v62, %v18911_v0  ;;  %v19052_v12 = vsub.f32 %v7516_v16, %v19042_v7  ;;  %v7700_v13 = vsub.f32 %v19002_v56, %v23723_v57 }
 0x20b   :  { %v5259_v24 = vrot.slane %v5245_v46, %v18911_v0  ;;  %v5278_v22 = vrot.slane %v5262_v52, %v18911_v0  ;;  %v7520_v34 = vsel %vm7515_vm2, %v5113_v17, 0  ;;  %v5162_v23 = vcombine.low %v5154_v21, %v5161_v6 }
 0x20c   :  { %23994 = vst [vmem:[#allocation8_spill] sm:$0xff] %v19052_v12  ;;  %1542 = vxpose.xlu0.b32.end [2/2] (short) (narrow) %v18864_v25, 16  ;;  %v23724_v48 = vand.u32 4294901760, %v19052_v12  ;;  %v19062_v15 = vand.u32 4294901760, %v7520_v34  ;;  %v5211_v53 = vcombine.low %v5203_v51, %v5210_v20  ;;  %v23726_v27 = vand.u32 4294901760, %v18922_v14 }
 0x20d   :  { %1510 = vxpose.xlu1.b32.end [2/2] (short) (narrow) %v18866_v26, 16  ;;  %v19066_v3 = vcombine.low %v5271_v9, %v5278_v22  ;;  %v7522_v54 = vsel %vm7515_vm2, %v5162_v23, 0  ;;  %v5260_v1 = vcombine.low %v5252_v47, %v5259_v24  ;;  %v19072_v21 = vsub.f32 %v18902_v58, %v7624_v61 }
 0x20e   :  { %23995 = vst [vmem:[#allocation9_spill] sm:$0xff] %v19062_v15  ;;  %v7690_v25 = vsub.f32 %v19052_v12, %v23724_v48  ;;  %v19078_v6 = vsub.f32 %v7520_v34, %v19062_v15  ;;  %v19080_v32 = vand.u32 4294901760, %v7522_v54  ;;  %v7524_v26 = vsel %vm7515_vm2, %v5211_v53, 0 }
 0x20f   :  { %23996 = vst [vmem:[#allocation10_spill] sm:$0xff] %v19072_v21  ;;  %v7701_v59 = vand.u32 4294901760, %v7700_v13  ;;  %v19083_v2 = vand.u32 4294901760, %v7524_v26  ;;  %v7526_v60 = vsel %vm7515_vm2, %v5260_v1, 0  ;;  %v8211_v58 = vsub.f32 %v18922_v14, %v23726_v27 }
 0x210   :  { %23997 = vst [vmem:[#allocation11_spill] sm:$0xff] %v19078_v6  ;;  %23998 = vst [vmem:[#allocation12_spill] sm:$0xff] %v19080_v32  ;;  %1605 = vxpose.xlu0.b32.start [1/2] (short) (narrow) %v18868_v28, 16  ;;  %v7691_v61 = vand.u32 4294901760, %v7690_v25  ;;  %v23722_v4 = vand.u32 4294901760, %v19078_v6  ;;  %v19092_v5 = vsub.f32 %v7522_v54, %v19080_v32  ;;  %v19094_v10 = vand.u32 4294901760, %v7526_v60 }
 0x211   :  { %23999 = vst [vmem:[#allocation13_spill] sm:$0xff] %v19083_v2  ;;  %1573 = vxpose.xlu1.b32.start [1/2] (short) (narrow) %v18870_v31, 16  ;;  %v19098_v8 = vsub.f32 %v7524_v26, %v19083_v2  ;;  %v23725_v30 = vand.u32 4294901760, %v19072_v21  ;;  %v8212_v19 = vand.u32 4294901760, %v8211_v58 }
 0x212   :  { %24000 = vst [vmem:[#allocation14_spill] sm:$0xff] %v19092_v5  ;;  %24001 = vst [vmem:[#allocation15_spill] sm:$0xff] %v19094_v10  ;;  %17540 = vmatprep.mubr.f32.mxu0 %v7691_v61  ;;  %v7710_v28 = vsub.f32 %v19078_v6, %v23722_v4  ;;  %v23721_v18 = vand.u32 4294901760, %v19092_v5  ;;  %v19106_v11 = vsub.f32 %v7526_v60, %v19094_v10 }
 0x213   :  { %24002 = vst [vmem:[#allocation16_spill] sm:$0xff] %v19098_v8  ;;  %17541 = vmatmul.mubr.f32.vlgmr.msra.gmra.mrb[64].mxu0 %v7701_v59  ;;  %v23720_v43 = vand.u32 4294901760, %v19098_v8  ;;  %v8218_v31 = vsub.f32 %v19072_v21, %v23725_v30 }
 0x214   :  { %24003 = vst [vmem:[#allocation17_spill] sm:$0xff] %v19106_v11  ;;  %1606 = vxpose.xlu0.b32.end [2/2] (short) (narrow) %v18872_v33, 16  ;;  %v7711_v35 = vand.u32 4294901760, %v7710_v28  ;;  %v7720_v16 = vsub.f32 %v19092_v5, %v23721_v18  ;;  %v23719_v47 = vand.u32 4294901760, %v19106_v11 }
 0x215   :  { %1574 = vxpose.xlu1.b32.end [2/2] (short) (narrow) %v18874_v36, 16  ;;  %v7730_v29 = vsub.f32 %v19098_v8, %v23720_v43  ;;  %v8219_v62 = vand.u32 4294901760, %v8218_v31  ;;  %v19128_v36 = vpack.c.bf16 %v19072_v21, %v18922_v14 }
 0x216   :  { %17543 = vmatprep.mubr.f32.mxu0 %v7711_v35  ;;  %v7721_v46 = vand.u32 4294901760, %v7720_v16  ;;  %v7740_v33 = vsub.f32 %v19106_v11, %v23719_v47 }
 0x217   :  { %v7731_v52 = vand.u32 4294901760, %v7730_v29  ;;  %v18032_v9 = vpack.c.bf16 %v8219_v62, %v8212_v19 }
 0x218   :  { %1669 = vxpose.xlu0.b32.start [1/2] (short) (narrow) %v18876_v37, 16  ;;  %17544 = vmatmul.mubr.f32.gmra.mrb[66].mxu0 %v7721_v46  ;;  %v7741_v17 = vand.u32 4294901760, %v7740_v33 }
 0x219   :  { %1637 = vxpose.xlu1.b32.start [1/2] (short) (narrow) %v18878_v38, 16  ;;  %17546 = vmatprep.mubr.f32.mxu0 %v7731_v52 }
 0x21a   :  { %18052 = vmatprep.subr.bf16.mxu1 %v18032_v9  ;;  %18033 = vmatprep.subr.bf16.mxu0 %v18032_v9 }
 0x21b   :  { %18053 = vmatpush3.bf16.msra.mxu1 %v18032_v9  ;;  %18035 = vmatpush3.bf16.msra.mxu0 %v18032_v9 }
 0x21c   :  { %1670 = vxpose.xlu0.b32.end [2/2] (short) (narrow) %v18880_v39, 16  ;;  %17547 = vmatmul.mubr.f32.gmra.mrb[68].mxu0 %v7741_v17 }
 0x21d   :  { %1638 = vxpose.xlu1.b32.end [2/2] (short) (narrow) %v18882_v40, 16  ;;  %18037 = vmatprep.subr.bf16.mxu1 %v19128_v36 }
 0x220   :  { %1733 = vxpose.xlu0.b32.start [1/2] (short) (narrow) %v18884_v41, 16 }
 0x221   :  { %1701 = vxpose.xlu1.b32.start [1/2] (short) (narrow) %v18886_v42, 16 }
 0x224   :  { %1734 = vxpose.xlu0.b32.end [2/2] (short) (narrow) %v18888_v44, 16 }
 0x225   :  { %1702 = vxpose.xlu1.b32.end [2/2] (short) (narrow) %v18890_v45, 16 }
 0x229   :  { %1765 = vxpose.xlu1.b32.start [1/2] (short) (narrow) %v18892_v49, 16 }
 0x22d   :  { %1766 = vxpose.xlu1.b32.end [2/2] (short) (narrow) %v18894_v55, 16 }
 0x238   :  { %v1813_v37 = vpop.trf.xlu0 }
 0x239   :  { %v4173_v38 = vcombine.high %v1813_v37, %v1813_v37  ;;  %v4180_v39 = vrot.slane %v1813_v37, %v18911_v0 }
 0x23b   :  { %v4187_v40 = vrot.slane %v4173_v38, %v18911_v0  ;;  %v4188_v51 = vcombine.high %v4180_v39, %v4180_v39  ;;  %v19142_v20 = vrot.slane %v4180_v39, %v18911_v0 }
 0x23c   :  { %v1814_v41 = vpop.trf.xlu0 }
 0x23d   :  { %v4189_v42 = vcombine.high %v4187_v40, %v4187_v40  ;;  %v4203_v44 = vrot.slane %v4187_v40, %v18911_v0  ;;  %v4210_v45 = vrot.slane %v4188_v51, %v18911_v0  ;;  %v4218_v49 = vcombine.high %v19142_v20, %v19142_v20 }
 0x23e   :  { %v4222_v55 = vcombine.high %v1814_v41, %v1814_v41  ;;  %v4229_v13 = vrot.slane %v1814_v41, %v18911_v0 }
 0x23f   :  { %v4217_v24 = vrot.slane %v4189_v42, %v18911_v0  ;;  %v4219_v22 = vcombine.high %v4203_v44, %v4203_v44  ;;  %v4220_v34 = vcombine.high %v4210_v45, %v4210_v45  ;;  %v19150_v23 = vcombine.low %v4210_v45, %v4218_v49 }
 0x240   :  { %v4236_v54 = vrot.slane %v4222_v55, %v18911_v0  ;;  %v4237_v1 = vcombine.high %v4229_v13, %v4229_v13  ;;  %v4244_v25 = vrot.slane %v4229_v13, %v18911_v0  ;;  %v1877_v26 = vpop.trf.xlu0 }
 0x241   :  { %v19156_v59 = vcombine.low %v4220_v34, %v4203_v44  ;;  %v6829_v58 = vcombine.low %v4217_v24, %v4219_v22  ;;  %v4221_v61 = vcombine.high %v4217_v24, %v4217_v24  ;;  %v1845_v28 = vpop.trf.xlu1  ;;  %v4349_v16 = vcombine.high %v1877_v26, %v1877_v26 }
 0x242   :  { %v4251_v19 = vrot.slane %v4236_v54, %v18911_v0  ;;  %v4258_v31 = vrot.slane %v4237_v1, %v18911_v0  ;;  %v4259_v35 = vcombine.high %v4244_v25, %v4244_v25  ;;  %v4356_v33 = vrot.slane %v1877_v26, %v18911_v0 }
 0x243   :  { %v6839_v62 = vrot.slane %v6829_v58, %v18911_v0  ;;  %v6830_v46 = vcombine.low %v4221_v61, %v4244_v25  ;;  %v4363_v17 = vrot.slane %v4349_v16, %v18911_v0  ;;  %v4261_v37 = vcombine.high %v1845_v28, %v1845_v28 }
 0x244   :  { %v4260_v52 = vcombine.high %v4258_v31, %v4258_v31  ;;  %v6831_v9 = vcombine.low %v4258_v31, %v4259_v35  ;;  %v4364_v39 = vcombine.high %v4356_v33, %v4356_v33  ;;  %v19169_v40 = vrot.slane %v4356_v33, %v18911_v0 }
 0x245   :  { %v6846_v38 = vrot.slane %v6830_v46, %v18911_v0  ;;  %v4268_v51 = vrot.slane %v1845_v28, %v18911_v0  ;;  %v4365_v44 = vcombine.high %v4363_v17, %v4363_v17  ;;  %v4379_v45 = vrot.slane %v4363_v17, %v18911_v0  ;;  %v1878_v28 = vpop.trf.xlu0 }
 0x246   :  { %v6832_v41 = vcombine.low %v4260_v52, %v4251_v19  ;;  %v6853_v42 = vrot.slane %v6831_v9, %v18911_v0  ;;  %v4386_v55 = vrot.slane %v4364_v39, %v18911_v0  ;;  %v4394_v13 = vcombine.high %v19169_v40, %v19169_v40  ;;  %v1846_v39 = vpop.trf.xlu1 }
 0x247   :  { %v19174_v49 = vcombine.low %v6839_v62, %v6846_v38  ;;  %v4275_v24 = vrot.slane %v4261_v37, %v18911_v0  ;;  %v4393_v34 = vrot.slane %v4365_v44, %v18911_v0  ;;  %v4395_v54 = vcombine.high %v4379_v45, %v4379_v45 }
 0x248   :  { %v6860_v22 = vrot.slane %v6832_v41, %v18911_v0  ;;  %v4276_v1 = vcombine.high %v4268_v51, %v4268_v51  ;;  %v4396_v26 = vcombine.high %v4386_v55, %v4386_v55  ;;  %v19184_v58 = vcombine.low %v4386_v55, %v4394_v13 }
 0x249   :  { %v6869_v25 = vrot.slane %v19174_v49, %v18911_v0  ;;  %v4277_v61 = vcombine.high %v4275_v24, %v4275_v24  ;;  %v6977_v31 = vcombine.low %v4393_v34, %v4395_v54  ;;  %v4284_v35 = vrot.slane %v4268_v51, %v18911_v0 }
 0x24a   :  { %v19186_v19 = vcombine.low %v6853_v42, %v6860_v22  ;;  %v4291_v16 = vrot.slane %v4275_v24, %v18911_v0  ;;  %v6958_v62 = vrot.slane %v19184_v58, %v18911_v0  ;;  %v6976_v46 = vcombine.low %v4396_v26, %v4379_v45  ;;  %v1941_v26 = vpop.trf.xlu0 }
 0x24b   :  { %v4298_v33 = vrot.slane %v4276_v1, %v18911_v0  ;;  %v4305_v52 = vrot.slane %v4277_v61, %v18911_v0  ;;  %v6993_v9 = vrot.slane %v6977_v31, %v18911_v0  ;;  %v4397_v17 = vcombine.high %v4393_v34, %v4393_v34 }
 0x24c   :  { %v4398_v37 = vcombine.high %v1878_v28, %v1878_v28  ;;  %v4405_v38 = vrot.slane %v1878_v28, %v18911_v0  ;;  %v6986_v41 = vrot.slane %v6976_v46, %v18911_v0 }
 0x24d   :  { %v6878_v51 = vcombine.low %v4284_v35, %v4298_v33  ;;  %v16948_v42 = vcombine.high %v4284_v35, %v4298_v33  ;;  %v6880_v44 = vcombine.low %v4291_v16, %v4305_v52  ;;  %v16949_v55 = vcombine.high %v4291_v16, %v4305_v52 }
 0x24e   :  { %v4412_v13 = vrot.slane %v4398_v37, %v18911_v0  ;;  %v4413_v45 = vcombine.high %v4405_v38, %v4405_v38  ;;  %v4420_v24 = vrot.slane %v4405_v38, %v18911_v0  ;;  %v19199_v22 = vcombine.low %v6986_v41, %v6993_v9  ;;  %v1942_v58 = vpop.trf.xlu0 }
 0x24f   :  { %v6888_v54 = vrot.slane %v6878_v51, %v18911_v0  ;;  %v6895_v34 = vrot.slane %v16948_v42, %v18911_v0  ;;  %v19204_v1 = vrot.slane %v6880_v44, %v18911_v0  ;;  %v19207_v61 = vrot.slane %v16949_v55, %v18911_v0  ;;  %v1909_v51 = vpop.trf.xlu1 }
 0x250   :  { %v4427_v28 = vrot.slane %v4412_v13, %v18911_v0  ;;  %v4434_v31 = vrot.slane %v4413_v45, %v18911_v0  ;;  %v4435_v35 = vcombine.high %v4420_v24, %v4420_v24  ;;  %v6978_v46 = vcombine.low %v4397_v17, %v4420_v24 }
 0x251   :  { %v6910_v16 = vcombine.low %v6888_v54, %v6895_v34  ;;  %v4310_v33 = vcombine.high %v1846_v39, %v1846_v39  ;;  %v4317_v52 = vrot.slane %v1846_v39, %v18911_v0  ;;  %v6911_v9 = vcombine.low %v19204_v1, %v19207_v61 }
 0x252   :  { %v4436_v37 = vcombine.high %v4434_v31, %v4434_v31  ;;  %v6979_v38 = vcombine.low %v4434_v31, %v4435_v35  ;;  %v4525_v41 = vcombine.high %v1941_v26, %v1941_v26  ;;  %v7000_v44 = vrot.slane %v6978_v46, %v18911_v0  ;;  %v2005_v27 = vpop.trf.xlu0 }
 0x253   :  { %v19215_v42 = vrot.slane %v6910_v16, %v18911_v0  ;;  %v4324_v55 = vrot.slane %v4310_v33, %v18911_v0  ;;  %v4325_v13 = vcombine.high %v4317_v52, %v4317_v52  ;;  %v4332_v39 = vrot.slane %v4317_v52, %v18911_v0 }
 0x254   :  { %v7007_v17 = vrot.slane %v6979_v38, %v18911_v0  ;;  %v19220_v45 = vcombine.low %v4436_v37, %v4427_v28  ;;  %v4532_v24 = vrot.slane %v1941_v26, %v18911_v0  ;;  %v4539_v31 = vrot.slane %v4525_v41, %v18911_v0 }
 0x255   :  { %v4339_v54 = vrot.slane %v4324_v55, %v18911_v0  ;;  %v4346_v34 = vrot.slane %v4325_v13, %v18911_v0  ;;  %v4437_v35 = vcombine.high %v1909_v51, %v1909_v51  ;;  %v4444_v47 = vrot.slane %v1909_v51, %v18911_v0 }
 0x256   :  { %v19227_v16 = vcombine.low %v7000_v44, %v7007_v17  ;;  %v7035_v46 = vrot.slane %v19220_v45, %v18911_v0  ;;  %v4540_v33 = vcombine.high %v4532_v24, %v4532_v24  ;;  %v19232_v28 = vrot.slane %v4532_v24, %v18911_v0 }
 0x257   :  { %v6927_v37 = vcombine.low %v4332_v39, %v4346_v34  ;;  %v16950_v52 = vcombine.high %v4332_v39, %v4346_v34  ;;  %v6929_v26 = vcombine.low %v4339_v54, %v19169_v40  ;;  %v4541_v38 = vcombine.high %v4539_v31, %v4539_v31 }
 0x258   :  { %v7023_v55 = vrot.slane %v19227_v16, %v18911_v0  ;;  %v4555_v41 = vrot.slane %v4539_v31, %v18911_v0  ;;  %v4562_v44 = vrot.slane %v4540_v33, %v18911_v0  ;;  %v4570_v13 = vcombine.high %v19232_v28, %v19232_v28 }
 0x259   :  { %v6937_v17 = vrot.slane %v6927_v37, %v18911_v0  ;;  %v6944_v45 = vrot.slane %v16950_v52, %v18911_v0  ;;  %v6951_v24 = vrot.slane %v6929_v26, %v18911_v0  ;;  %v4569_v39 = vrot.slane %v4541_v38, %v18911_v0  ;;  %v1910_v38 = vpop.trf.xlu1 }
 0x25a   :  { %v4571_v40 = vcombine.high %v4555_v41, %v4555_v41  ;;  %v4572_v54 = vcombine.high %v4562_v44, %v4562_v44  ;;  %v7123_v34 = vcombine.low %v4562_v44, %v4570_v13  ;;  %v4451_v33 = vrot.slane %v4437_v35, %v18911_v0 }
 0x25b   :  { %v6959_v43 = vcombine.low %v6937_v17, %v6944_v45  ;;  %v19249_v31 = vcombine.low %v6951_v24, %v6958_v62  ;;  %v4573_v37 = vcombine.high %v4569_v39, %v4569_v39  ;;  %v4452_v4 = vcombine.high %v4444_v47, %v4444_v47 }
 0x25c   :  { %v7124_v18 = vcombine.low %v4572_v54, %v4555_v41  ;;  %v7125_v52 = vcombine.low %v4569_v39, %v4571_v40  ;;  %v7133_v26 = vrot.slane %v7123_v34, %v18911_v0  ;;  %v4453_v44 = vcombine.high %v4451_v33, %v4451_v33 }
 0x25d   :  { %v19254_v57 = vrot.slane %v6959_v43, %v18911_v0  ;;  %v4460_v51 = vrot.slane %v4444_v47, %v18911_v0  ;;  %v4467_v13 = vrot.slane %v4451_v33, %v18911_v0  ;;  %v4474_v35 = vrot.slane %v4452_v4, %v18911_v0 }
 0x25e   :  { %v7140_v62 = vrot.slane %v7124_v18, %v18911_v0  ;;  %v7147_v41 = vrot.slane %v7125_v52, %v18911_v0  ;;  %v4574_v17 = vcombine.high %v1942_v58, %v1942_v58  ;;  %v4481_v45 = vrot.slane %v4453_v44, %v18911_v0 }
 0x25f   :  { %v4581_v24 = vrot.slane %v1942_v58, %v18911_v0  ;;  %v4486_v39 = vcombine.high %v1910_v38, %v1910_v38  ;;  %v4493_v43 = vrot.slane %v1910_v38, %v18911_v0  ;;  %v7026_v47 = vcombine.low %v4460_v51, %v4474_v35 }
 0x260   :  { %v19264_v40 = vcombine.low %v7133_v26, %v7140_v62  ;;  %v16951_v54 = vcombine.high %v4460_v51, %v4474_v35  ;;  %v4588_v34 = vrot.slane %v4574_v17, %v18911_v0  ;;  %v7028_v33 = vcombine.low %v4467_v13, %v4481_v45 }
 0x261   :  { %v16952_v18 = vcombine.high %v4467_v13, %v4481_v45  ;;  %v4589_v48 = vcombine.high %v4581_v24, %v4581_v24  ;;  %v4596_v4 = vrot.slane %v4581_v24, %v18911_v0  ;;  %v7042_v52 = vrot.slane %v7026_v47, %v18911_v0 }
 0x262   :  { %v7049_v44 = vrot.slane %v16951_v54, %v18911_v0  ;;  %v4603_v58 = vrot.slane %v4588_v34, %v18911_v0  ;;  %v4500_v30 = vrot.slane %v4486_v39, %v18911_v0  ;;  %v7056_v26 = vrot.slane %v7028_v33, %v18911_v0 }
 0x263   :  { %v7084_v38 = vrot.slane %v16952_v18, %v18911_v0  ;;  %v4610_v51 = vrot.slane %v4589_v48, %v18911_v0  ;;  %v4611_v62 = vcombine.high %v4596_v4, %v4596_v4  ;;  %v19275_v35 = vcombine.low %v7035_v46, %v7042_v52  ;;  %v1973_v46 = vpop.trf.xlu1 }
 0x264   :  { %v7126_v13 = vcombine.low %v4573_v37, %v4596_v4  ;;  %v4501_v17 = vcombine.high %v4493_v43, %v4493_v43  ;;  %v4508_v45 = vrot.slane %v4493_v43, %v18911_v0  ;;  %v7058_v24 = vcombine.low %v7049_v44, %v7056_v26 }
 0x265   :  { %v4612_v47 = vcombine.high %v4610_v51, %v4610_v51  ;;  %v7172_v54 = vcombine.low %v4610_v51, %v4611_v62  ;;  %v4515_v34 = vrot.slane %v4500_v30, %v18911_v0  ;;  %v4701_v18 = vcombine.high %v2005_v27, %v2005_v27 }
 0x266   :  { %v7154_v33 = vrot.slane %v7126_v13, %v18911_v0  ;;  %v4522_v48 = vrot.slane %v4501_v17, %v18911_v0  ;;  %v19284_v37 = vrot.slane %v7058_v24, %v18911_v0  ;;  %v4708_v51 = vrot.slane %v2005_v27, %v18911_v0 }
 0x267   :  { %v7173_v4 = vcombine.low %v4612_v47, %v4603_v58  ;;  %v7182_v43 = vrot.slane %v7172_v54, %v18911_v0  ;;  %v7077_v52 = vcombine.low %v4515_v34, %v19232_v28  ;;  %v4715_v17 = vrot.slane %v4701_v18, %v18911_v0 }
 0x268   :  { %v19288_v44 = vcombine.low %v7147_v41, %v7154_v33  ;;  %v7075_v30 = vcombine.low %v4508_v45, %v4522_v48  ;;  %v16953_v26 = vcombine.high %v4508_v45, %v4522_v48  ;;  %v4613_v60 = vcombine.high %v1973_v46, %v1973_v46 }
 0x269   :  { %v7189_v62 = vrot.slane %v7173_v4, %v18911_v0  ;;  %v7105_v13 = vrot.slane %v7077_v52, %v18911_v0  ;;  %v4716_v41 = vcombine.high %v4708_v51, %v4708_v51  ;;  %v4717_v45 = vcombine.high %v4715_v17, %v4715_v17 }
 0x26a   :  { %v7091_v24 = vrot.slane %v7075_v30, %v18911_v0  ;;  %v7098_v28 = vrot.slane %v16953_v26, %v18911_v0  ;;  %v19301_v27 = vrot.slane %v4708_v51, %v18911_v0  ;;  %v4731_v54 = vrot.slane %v4715_v17, %v18911_v0 }
 0x26b   :  { %v19298_v47 = vcombine.low %v7182_v43, %v7189_v62  ;;  %v4738_v48 = vrot.slane %v4716_v41, %v18911_v0  ;;  %v4620_v18 = vrot.slane %v1973_v46, %v18911_v0  ;;  %v4745_v4 = vrot.slane %v4717_v45, %v18911_v0 }
 0x26c   :  { %v7106_v34 = vcombine.low %v7084_v38, %v7091_v24  ;;  %v19304_v33 = vcombine.low %v7098_v28, %v7105_v13  ;;  %v4746_v52 = vcombine.high %v19301_v27, %v19301_v27  ;;  %v4747_v43 = vcombine.high %v4731_v54, %v4731_v54  ;;  %v1974_v38 = vpop.trf.xlu1 }
 0x26d   :  { %v4627_v30 = vrot.slane %v4613_v60, %v18911_v0  ;;  %v4748_v51 = vcombine.high %v4738_v48, %v4738_v48  ;;  %v4628_v62 = vcombine.high %v4620_v18, %v4620_v18  ;;  %v4636_v24 = vrot.slane %v4620_v18, %v18911_v0 }
 0x26e   :  { %v19313_v26 = vrot.slane %v7106_v34, %v18911_v0  ;;  %v19317_v13 = vcombine.low %v4738_v48, %v4746_v52  ;;  %v7273_v17 = vcombine.low %v4745_v4, %v4747_v43  ;;  %v6876_v60 = vrot.slane %v19186_v19, %v18911_v0 }
 0x26f   :  { %v4629_v46 = vcombine.high %v4627_v30, %v4627_v30  ;;  %v7272_v28 = vcombine.low %v4748_v51, %v4731_v54  ;;  %v4643_v41 = vrot.slane %v4627_v30, %v18911_v0  ;;  %v4650_v45 = vrot.slane %v4628_v62, %v18911_v0  ;;  %v2006_v30 = vpop.trf.xlu0 }
 0x270   :  { %v7287_v34 = vrot.slane %v19317_v13, %v18911_v0  ;;  %v7301_v29 = vrot.slane %v7273_v17, %v18911_v0  ;;  %v4749_v52 = vcombine.high %v4745_v4, %v4745_v4  ;;  %v6877_v54 = vcombine.low %v6869_v25, %v6876_v60 }
 0x271   :  { %v4657_v48 = vrot.slane %v4629_v46, %v18911_v0  ;;  %v7294_v43 = vrot.slane %v7272_v28, %v18911_v0  ;;  %v7174_v53 = vcombine.low %v4636_v24, %v4650_v45  ;;  %v16954_v18 = vcombine.high %v4636_v24, %v4650_v45 }
 0x272   :  { %v4750_v19 = vcombine.high %v2006_v30, %v2006_v30  ;;  %v4757_v58 = vrot.slane %v2006_v30, %v18911_v0  ;;  %v19338_v46 = vsel %vm7515_vm2, %v6877_v54, 0  ;;  %v4662_v45 = vcombine.high %v1974_v38, %v1974_v38 }
 0x273   :  { %v7221_v51 = vcombine.low %v4643_v41, %v4657_v48  ;;  %v16955_v62 = vcombine.high %v4643_v41, %v4657_v48  ;;  %v19333_v39 = vcombine.low %v7294_v43, %v7301_v29  ;;  %v7196_v17 = vrot.slane %v7174_v53, %v18911_v0  ;;  %24004 = vst [vmem:[#allocation18_spill] sm:$0xff] %v19338_v46 }
 0x274   :  { %v7203_v4 = vrot.slane %v16954_v18, %v18911_v0  ;;  %v19347_v25 = vand.u32 4294901760, %v19338_v46  ;;  %v4764_v28 = vrot.slane %v4750_v19, %v18911_v0  ;;  %v4765_v41 = vcombine.high %v4757_v58, %v4757_v58 }
 0x275   :  { %v19341_v24 = vrot.slane %v7221_v51, %v18911_v0  ;;  %v19344_v49 = vrot.slane %v16955_v62, %v18911_v0  ;;  %v4772_v53 = vrot.slane %v4757_v58, %v18911_v0  ;;  %v4669_v43 = vrot.slane %v1974_v38, %v18911_v0  ;;  %v2069_v38 = vpop.trf.xlu0 }
 0x276   :  { %24005 = vst [vmem:[#allocation19_spill] sm:$0xff] %v19347_v25  ;;  %v7205_v29 = vcombine.low %v7196_v17, %v7203_v4  ;;  %17679 = vmatprep.mubr.f32.mxu1 %v19347_v25  ;;  %v4779_v48 = vrot.slane %v4764_v28, %v18911_v0  ;;  %v6925_v18 = vrot.slane %v6911_v9, %v18911_v0 }
 0x277   :  { %v4786_v58 = vrot.slane %v4765_v41, %v18911_v0  ;;  %v4787_v30 = vcombine.high %v4772_v53, %v4772_v53  ;;  %v7319_v51 = vcombine.low %v4749_v52, %v4772_v53  ;;  %v4676_v62 = vrot.slane %v4662_v45, %v18911_v0 }
 0x278   :  { %v19361_v54 = vrot.slane %v7205_v29, %v18911_v0  ;;  %v4677_v19 = vcombine.high %v4669_v43, %v4669_v43  ;;  %v4684_v17 = vrot.slane %v4669_v43, %v18911_v0  ;;  %v6926_v4 = vcombine.low %v19215_v42, %v6925_v18 }
 0x279   :  { %v4788_v28 = vcombine.high %v4786_v58, %v4786_v58  ;;  %v7320_v60 = vcombine.low %v4786_v58, %v4787_v30  ;;  %v7329_v1 = vrot.slane %v7319_v51, %v18911_v0  ;;  %v4877_v61 = vcombine.high %v2069_v38, %v2069_v38 }
 0x27a   :  { %v4691_v9 = vrot.slane %v4676_v62, %v18911_v0  ;;  %v4698_v29 = vrot.slane %v4677_v19, %v18911_v0  ;;  %v19371_v41 = vsel %vm7515_vm2, %v6926_v4, 0  ;;  %v4884_v52 = vrot.slane %v2069_v38, %v18911_v0 }
 0x27b   :  { %24006 = vst [vmem:[#allocation20_spill] sm:$0xff] %v19371_v41  ;;  %v19374_v53 = vcombine.low %v4788_v28, %v4779_v48  ;;  %v7336_v45 = vrot.slane %v7320_v60, %v18911_v0  ;;  %v19378_v42 = vand.u32 4294901760, %v19371_v41  ;;  %v4891_v43 = vrot.slane %v4877_v61, %v18911_v0  ;;  %v2037_v28 = vpop.trf.xlu1 }
 0x27c   :  { %v7223_v18 = vcombine.low %v4684_v17, %v4698_v29  ;;  %v16956_v58 = vcombine.high %v4684_v17, %v4698_v29  ;;  %v7270_v30 = vcombine.low %v4691_v9, %v19301_v27  ;;  %v4892_v51 = vcombine.high %v4884_v52, %v4884_v52 }
 0x27d   :  { %24007 = vst [vmem:[#allocation21_spill] sm:$0xff] %v19378_v42  ;;  %v19384_v19 = vcombine.low %v7329_v1, %v7336_v45  ;;  %17680 = vmatmul.mubr.f32.vlgmr.msra.gmra.mrb[0].mxu1 %v19378_v42  ;;  %v4893_v48 = vcombine.high %v4891_v43, %v4891_v43  ;;  %v19388_v60 = vrot.slane %v4884_v52, %v18911_v0 }
 0x27e   :  { %v7245_v4 = vrot.slane %v7223_v18, %v18911_v0  ;;  %v7252_v38 = vrot.slane %v16956_v58, %v18911_v0  ;;  %v7280_v17 = vrot.slane %v7270_v30, %v18911_v0  ;;  %v4907_v27 = vrot.slane %v4891_v43, %v18911_v0  ;;  %18039 = vmatpush3.bf16.msra.mxu1 %v19128_v36 }
 0x27f   :  { %v4914_v61 = vrot.slane %v4892_v51, %v18911_v0  ;;  %v4921_v9 = vrot.slane %v4893_v48, %v18911_v0  ;;  %v4922_v29 = vcombine.high %v19388_v60, %v19388_v60  ;;  %18041 = vmatprep.subr.bf16.mxu1 %v18907_v63  ;;  %v6974_v36 = vrot.slane %v19249_v31, %v18911_v0 }
 0x280   :  { %v7254_v52 = vcombine.low %v7245_v4, %v7252_v38  ;;  %v19405_v45 = vcombine.low %v7280_v17, %v7287_v34  ;;  %v4923_v43 = vcombine.high %v4907_v27, %v4907_v27  ;;  %v4789_v30 = vcombine.high %v2037_v28, %v2037_v28 }
 0x281   :  { %v4924_v18 = vcombine.high %v4914_v61, %v4914_v61  ;;  %v7419_v58 = vcombine.low %v4914_v61, %v4922_v29  ;;  %v4796_v51 = vrot.slane %v2037_v28, %v18911_v0  ;;  %v6975_v4 = vcombine.low %v19254_v57, %v6974_v36  ;;  %v2070_v57 = vpop.trf.xlu0 }
 0x282   :  { %v19411_v48 = vrot.slane %v7254_v52, %v18911_v0  ;;  %v7466_v1 = vcombine.low %v4921_v9, %v4923_v43  ;;  %v7016_v13 = vrot.slane %v19199_v22, %v18911_v0  ;;  %v4803_v17 = vrot.slane %v4789_v30, %v18911_v0 }
 0x283   :  { %v7420_v34 = vcombine.low %v4924_v18, %v4907_v27  ;;  %v7441_v38 = vrot.slane %v7419_v58, %v18911_v0  ;;  %v4804_v31 = vcombine.high %v4796_v51, %v4796_v51  ;;  %v19419_v61 = vsel %vm7515_vm2, %v6975_v4, 0  ;;  %v2038_v18 = vpop.trf.xlu1 }
 0x284   :  { %24008 = vst [vmem:[#allocation22_spill] sm:$0xff] %v19419_v61  ;;  %v4812_v28 = vrot.slane %v4796_v51, %v18911_v0  ;;  %v7024_v29 = vcombine.low %v7016_v13, %v7023_v55  ;;  %v4925_v52 = vcombine.high %v4921_v9, %v4921_v9  ;;  %v19427_v22 = vand.u32 4294901760, %v19419_v61 }
 0x285   :  { %v7448_v43 = vrot.slane %v7420_v34, %v18911_v0  ;;  %v4805_v27 = vcombine.high %v4803_v17, %v4803_v17  ;;  %v4819_v36 = vrot.slane %v4803_v17, %v18911_v0  ;;  %v4826_v58 = vrot.slane %v4804_v31, %v18911_v0 }
 0x286   :  { %24009 = vst [vmem:[#allocation23_spill] sm:$0xff] %v19427_v22  ;;  %v19432_v30 = vsel %vm7515_vm2, %v7024_v29, 0  ;;  %v7476_v51 = vrot.slane %v7466_v1, %v18911_v0  ;;  %v4926_v16 = vcombine.high %v2070_v57, %v2070_v57  ;;  %17682 = vmatprep.mubr.f32.mxu1 %v19427_v22  ;;  %v4933_v13 = vrot.slane %v2070_v57, %v18911_v0 }
 0x287   :  { %24010 = vst [vmem:[#allocation24_spill] sm:$0xff] %v19432_v30  ;;  %v19435_v55 = vcombine.low %v7441_v38, %v7448_v43  ;;  %v4833_v9 = vrot.slane %v4805_v27, %v18911_v0  ;;  %v19440_v4 = vand.u32 4294901760, %v19432_v30  ;;  %v7322_v34 = vcombine.low %v4812_v28, %v4826_v58 }
 0x288   :  { %v16957_v17 = vcombine.high %v4812_v28, %v4826_v58  ;;  %v4940_v31 = vrot.slane %v4926_v16, %v18911_v0  ;;  %v4838_v29 = vcombine.high %v2038_v18, %v2038_v18  ;;  %v4941_v1 = vcombine.high %v4933_v13, %v4933_v13 }
 0x289   :  { %24011 = vst [vmem:[#allocation25_spill] sm:$0xff] %v19440_v4  ;;  %v7369_v62 = vcombine.low %v4819_v36, %v4833_v9  ;;  %v16958_v10 = vcombine.high %v4819_v36, %v4833_v9  ;;  %17683 = vmatmul.mubr.f32.gmra.mrb[2].mxu1 %v19440_v4  ;;  %v4948_v38 = vrot.slane %v4933_v13, %v18911_v0 }
 0x28a   :  { %v7350_v43 = vrot.slane %v7322_v34, %v18911_v0  ;;  %v7378_v27 = vrot.slane %v16957_v17, %v18911_v0  ;;  %v4955_v2 = vrot.slane %v4940_v31, %v18911_v0  ;;  %v4845_v57 = vrot.slane %v2038_v18, %v18911_v0 }
 0x28b   :  { %v7385_v28 = vrot.slane %v7369_v62, %v18911_v0  ;;  %v7392_v58 = vrot.slane %v16958_v10, %v18911_v0  ;;  %v4962_v16 = vrot.slane %v4941_v1, %v18911_v0  ;;  %v4963_v36 = vcombine.high %v4948_v38, %v4948_v38 }
 0x28c   :  { %v24012_v9 = vrot.slane %v19374_v53, %v18911_v0  ;;  %v7467_v13 = vcombine.low %v4925_v52, %v4948_v38  ;;  %v4852_v34 = vrot.slane %v4838_v29, %v18911_v0  ;;  %v4853_v17 = vcombine.high %v4845_v57, %v4845_v57 }
 0x28d   :  { %v7400_v15 = vcombine.low %v7378_v27, %v7385_v28  ;;  %v4964_v31 = vcombine.high %v4962_v16, %v4962_v16  ;;  %v7468_v50 = vcombine.low %v4962_v16, %v4963_v36  ;;  %v4860_v18 = vrot.slane %v4845_v57, %v18911_v0 }
 0x28e   :  { %v19456_v32 = vcombine.low %v24012_v9, %v7350_v43  ;;  %v7483_v62 = vrot.slane %v7467_v13, %v18911_v0  ;;  %v4867_v1 = vrot.slane %v4852_v34, %v18911_v0  ;;  %v4874_v53 = vrot.slane %v4853_v17, %v18911_v0  ;;  %v1237_v9 = vpop.trf.xlu0  ;;  %v1205_v17 = vpop.trf.xlu1 }
 0x28f   :  { %v19466_v43 = vrot.slane %v7400_v15, %v18911_v0  ;;  %v7469_v52 = vcombine.low %v4964_v31, %v4955_v2  ;;  %v7490_v29 = vrot.slane %v7468_v50, %v18911_v0  ;;  %v24013_v38 = vrot.slane %v19275_v35, %v18911_v0 }
 0x290   :  { %v19473_v57 = vcombine.low %v7476_v51, %v7483_v62  ;;  %v7371_v28 = vcombine.low %v4860_v18, %v4874_v53  ;;  %v16959_v16 = vcombine.high %v4860_v18, %v4874_v53  ;;  %v7418_v36 = vcombine.low %v4867_v1, %v19388_v60 }
 0x291   :  { %v7073_v27 = vcombine.low %v24013_v38, %v19284_v37  ;;  %v7497_v13 = vrot.slane %v7469_v52, %v18911_v0  ;;  %v2589_v2 = vcombine.high %v1237_v9, %v1237_v9  ;;  %v2596_v50 = vrot.slane %v1237_v9, %v18911_v0 }
 0x292   :  { %v7399_v35 = vrot.slane %v7371_v28, %v18911_v0  ;;  %v7427_v37 = vrot.slane %v16959_v16, %v18911_v0  ;;  %v7434_v51 = vrot.slane %v7418_v36, %v18911_v0  ;;  %v24016_v38 = vrot.slane %v19304_v33, %v18911_v0 }
 0x293   :  { %v19478_v15 = vsel %vm7515_vm2, %v7073_v27, 0  ;;  %v19486_v60 = vcombine.low %v7490_v29, %v7497_v13  ;;  %v2603_v18 = vrot.slane %v2589_v2, %v18911_v0  ;;  %v2604_v62 = vcombine.high %v2596_v50, %v2596_v50 }
 0x294   :  { %24014 = vst [vmem:[#allocation26_spill] sm:$0xff] %v19478_v15  ;;  %v19489_v31 = vand.u32 4294901760, %v19478_v15  ;;  %v7401_v1 = vcombine.low %v7392_v58, %v7399_v35  ;;  %v19492_v53 = vcombine.low %v7427_v37, %v7434_v51  ;;  %v19495_v52 = vrot.slane %v2596_v50, %v18911_v0 }
 0x295   :  { %v7122_v27 = vcombine.low %v19313_v26, %v24016_v38  ;;  %v2605_v29 = vcombine.high %v2603_v18, %v2603_v18  ;;  %v2619_v28 = vrot.slane %v2603_v18, %v18911_v0  ;;  %v2626_v16 = vrot.slane %v2604_v62, %v18911_v0 }
 0x296   :  { %24015 = vst [vmem:[#allocation27_spill] sm:$0xff] %v19489_v31  ;;  %17685 = vmatprep.mubr.f32.mxu1 %v19489_v31  ;;  %v2501_v36 = vcombine.high %v1205_v17, %v1205_v17  ;;  %v19505_v58 = vrot.slane %v7401_v1, %v18911_v0  ;;  %v2634_v13 = vcombine.high %v19495_v52, %v19495_v52  ;;  %v1238_v1 = vpop.trf.xlu0 }
 0x297   :  { %v19512_v33 = vsel %vm7515_vm2, %v7122_v27, 0  ;;  %v2633_v26 = vrot.slane %v2605_v29, %v18911_v0  ;;  %v2635_v2 = vcombine.high %v2619_v28, %v2619_v28  ;;  %v2636_v50 = vcombine.high %v2626_v16, %v2626_v16 }
 0x298   :  { %24017 = vst [vmem:[#allocation28_spill] sm:$0xff] %v19512_v33  ;;  %v19516_v35 = vand.u32 4294901760, %v19512_v33  ;;  %v19518_v37 = vcombine.low %v2626_v16, %v2634_v13  ;;  %v2508_v51 = vrot.slane %v1205_v17, %v18911_v0  ;;  %v2515_v18 = vrot.slane %v2501_v36, %v18911_v0  ;;  %v1206_v17 = vpop.trf.xlu1 }
 0x299   :  { %v7163_v62 = vrot.slane %v19264_v40, %v18911_v0  ;;  %v5361_v38 = vcombine.low %v2636_v50, %v2619_v28  ;;  %v5362_v27 = vcombine.low %v2633_v26, %v2635_v2  ;;  %v2637_v29 = vcombine.high %v2633_v26, %v2633_v26 }
 0x29a   :  { %24018 = vst [vmem:[#allocation29_spill] sm:$0xff] %v19516_v35  ;;  %17686 = vmatmul.mubr.f32.gmra.mrb[4].mxu1 %v19516_v35  ;;  %v2638_v34 = vcombine.high %v1238_v1, %v1238_v1  ;;  %v2516_v10 = vcombine.high %v2508_v51, %v2508_v51  ;;  %v2517_v16 = vcombine.high %v2515_v18, %v2515_v18 }
 0x29b   :  { %v2524_v13 = vrot.slane %v2508_v51, %v18911_v0  ;;  %v5383_v36 = vrot.slane %v5361_v38, %v18911_v0  ;;  %v5390_v7 = vrot.slane %v5362_v27, %v18911_v0  ;;  %v2531_v40 = vrot.slane %v2515_v18, %v18911_v0 }
 0x29c   :  { %v24019_v28 = vrot.slane %v19288_v44, %v18911_v0  ;;  %v2538_v26 = vrot.slane %v2516_v10, %v18911_v0  ;;  %v2545_v50 = vrot.slane %v2517_v16, %v18911_v0  ;;  %v2645_v9 = vrot.slane %v1238_v1, %v18911_v0 }
 0x29d   :  { %v2652_v21 = vrot.slane %v2638_v34, %v18911_v0  ;;  %v19538_v51 = vcombine.low %v5383_v36, %v5390_v7  ;;  %v7212_v18 = vrot.slane %v19298_v47, %v18911_v0  ;;  %v2550_v27 = vcombine.high %v1206_v17, %v1206_v17 }
 0x29e   :  { %v7171_v2 = vcombine.low %v7163_v62, %v24019_v28  ;;  %v5263_v14 = vcombine.low %v2524_v13, %v2538_v26  ;;  %v16918_v44 = vcombine.high %v2524_v13, %v2538_v26  ;;  %v5310_v62 = vcombine.low %v2531_v40, %v2545_v50 }
 0x29f   :  { %v16919_v28 = vcombine.high %v2531_v40, %v2545_v50  ;;  %v2653_v34 = vcombine.high %v2645_v9, %v2645_v9  ;;  %v2660_v7 = vrot.slane %v2645_v9, %v18911_v0  ;;  %v2667_v13 = vrot.slane %v2652_v21, %v18911_v0 }
 0x2a0   :  { %v19541_v38 = vsel %vm7515_vm2, %v7171_v2, 0  ;;  %v5285_v16 = vrot.slane %v5263_v14, %v18911_v0  ;;  %v5292_v36 = vrot.slane %v16918_v44, %v18911_v0  ;;  %v5320_v47 = vrot.slane %v5310_v62, %v18911_v0 }
 0x2a1   :  { %24020 = vst [vmem:[#allocation30_spill] sm:$0xff] %v19541_v38  ;;  %v19548_v1 = vand.u32 4294901760, %v19541_v38  ;;  %v5327_v2 = vrot.slane %v16919_v28, %v18911_v0  ;;  %v2674_v40 = vrot.slane %v2653_v34, %v18911_v0  ;;  %v2675_v26 = vcombine.high %v2660_v7, %v2660_v7 }
 0x2a2   :  { %v5408_v50 = vcombine.low %v2637_v29, %v2660_v7  ;;  %v5294_v10 = vcombine.low %v5285_v16, %v5292_v36  ;;  %v7220_v9 = vcombine.low %v7212_v18, %v19361_v54  ;;  %v2557_v14 = vrot.slane %v1206_v17, %v18911_v0  ;;  %v1269_v7 = vpop.trf.xlu1  ;;  %v1301_v16 = vpop.trf.xlu0 }
 0x2a3   :  { %24021 = vst [vmem:[#allocation31_spill] sm:$0xff] %v19548_v1  ;;  %17688 = vmatprep.mubr.f32.mxu1 %v19548_v1  ;;  %v5342_v38 = vcombine.low %v5320_v47, %v5327_v2  ;;  %v2676_v33 = vcombine.high %v2674_v40, %v2674_v40  ;;  %v5409_v44 = vcombine.low %v2674_v40, %v2675_v26 }
 0x2a4   :  { %v5418_v62 = vrot.slane %v5408_v50, %v18911_v0  ;;  %v2564_v28 = vrot.slane %v2550_v27, %v18911_v0  ;;  %v19563_v1 = vrot.slane %v5294_v10, %v18911_v0  ;;  %v19569_v29 = vsel %vm7515_vm2, %v7220_v9, 0 }
 0x2a5   :  { %v19566_v21 = vrot.slane %v5342_v38, %v18911_v0  ;;  %24022 = vst [vmem:[#allocation32_spill] sm:$0xff] %v19569_v29  ;;  %v2565_v34 = vcombine.high %v2557_v14, %v2557_v14  ;;  %v19571_v54 = vcombine.low %v2676_v33, %v2667_v13  ;;  %v5425_v17 = vrot.slane %v5409_v44, %v18911_v0 }
 0x2a6   :  { %v19575_v18 = vand.u32 4294901760, %v19569_v29  ;;  %v2572_v27 = vrot.slane %v2557_v14, %v18911_v0  ;;  %v2579_v10 = vrot.slane %v2564_v28, %v18911_v0  ;;  %v2765_v36 = vcombine.high %v1301_v16, %v1301_v16 }
 0x2a7   :  { %v2586_v38 = vrot.slane %v2565_v34, %v18911_v0  ;;  %v2772_v47 = vrot.slane %v1301_v16, %v18911_v0  ;;  %v19583_v33 = vcombine.low %v5418_v62, %v5425_v17  ;;  %v24024_v13 = vcombine.low %v19341_v24, %v19344_v49 }
 0x2a8   :  { %24023 = vst [vmem:[#allocation33_spill] sm:$0xff] %v19575_v18  ;;  %17689 = vmatmul.mubr.f32.gmra.mrb[6].mxu1 %v19575_v18  ;;  %v2677_v26 = vcombine.high %v1269_v7, %v1269_v7  ;;  %v5359_v14 = vcombine.low %v2579_v10, %v19495_v52  ;;  %v2779_v44 = vrot.slane %v2765_v36, %v18911_v0 }
 0x2a9   :  { %v7261_v40 = vrot.slane %v24024_v13, %v18911_v0  ;;  %v5312_v50 = vcombine.low %v2572_v27, %v2586_v38  ;;  %v16920_v9 = vcombine.high %v2572_v27, %v2586_v38  ;;  %v2780_v34 = vcombine.high %v2772_v47, %v2772_v47 }
 0x2aa   :  { %v19595_v62 = vrot.slane %v2772_v47, %v18911_v0  ;;  %v5369_v49 = vrot.slane %v5359_v14, %v18911_v0  ;;  %v2781_v27 = vcombine.high %v2779_v44, %v2779_v44  ;;  %v2795_v52 = vrot.slane %v2779_v44, %v18911_v0 }
 0x2ab   :  { %v7269_v17 = vcombine.low %v7261_v40, %v19411_v48  ;;  %v5334_v16 = vrot.slane %v5312_v50, %v18911_v0  ;;  %v5341_v24 = vrot.slane %v16920_v9, %v18911_v0  ;;  %v2802_v10 = vrot.slane %v2780_v34, %v18911_v0 }
 0x2ac   :  { %v2810_v38 = vcombine.high %v19595_v62, %v19595_v62  ;;  %v24026_v48 = vrot.slane %v19518_v37, %v18911_v0  ;;  %v2809_v40 = vrot.slane %v2781_v27, %v18911_v0  ;;  %v2811_v9 = vcombine.high %v2795_v52, %v2795_v52 }
 0x2ad   :  { %v19606_v36 = vsel %vm7515_vm2, %v7269_v17, 0  ;;  %v5343_v47 = vcombine.low %v5334_v16, %v5341_v24  ;;  %v2812_v14 = vcombine.high %v2802_v10, %v2802_v10  ;;  %v2684_v34 = vrot.slane %v1269_v7, %v18911_v0 }
 0x2ae   :  { %24025 = vst [vmem:[#allocation34_spill] sm:$0xff] %v19606_v36  ;;  %v19611_v13 = vcombine.low %v5369_v49, %v24026_v48  ;;  %v19615_v50 = vand.u32 4294901760, %v19606_v36  ;;  %v5508_v44 = vcombine.low %v2802_v10, %v2810_v38  ;;  %v2691_v37 = vrot.slane %v2677_v26, %v18911_v0  ;;  %v1302_v38 = vpop.trf.xlu0 }
 0x2af   :  { %v19619_v28 = vrot.slane %v5343_v47, %v18911_v0  ;;  %v7310_v16 = vrot.slane %v19405_v45, %v18911_v0  ;;  %v5509_v24 = vcombine.low %v2812_v14, %v2795_v52  ;;  %v5555_v27 = vcombine.low %v2809_v40, %v2811_v9 }
 0x2b0   :  { %24027 = vst [vmem:[#allocation35_spill] sm:$0xff] %v19615_v50  ;;  %17691 = vmatprep.mubr.f32.mxu1 %v19615_v50  ;;  %v5530_v49 = vrot.slane %v5508_v44, %v18911_v0  ;;  %v2692_v10 = vcombine.high %v2684_v34, %v2684_v34  ;;  %v2693_v7 = vcombine.high %v2691_v37, %v2691_v37 }
 0x2b1   :  { %v2700_v47 = vrot.slane %v2684_v34, %v18911_v0  ;;  %v2707_v48 = vrot.slane %v2691_v37, %v18911_v0  ;;  %v7317_v17 = vrot.slane %v19333_v39, %v18911_v0  ;;  %v5537_v2 = vrot.slane %v5509_v24, %v18911_v0 }
 0x2b2   :  { %v2714_v26 = vrot.slane %v2692_v10, %v18911_v0  ;;  %v2813_v36 = vcombine.high %v2809_v40, %v2809_v40  ;;  %v5565_v45 = vrot.slane %v5555_v27, %v18911_v0  ;;  %v2721_v52 = vrot.slane %v2693_v7, %v18911_v0 }
 0x2b3   :  { %v7318_v9 = vcombine.low %v7310_v16, %v7317_v17  ;;  %v2814_v14 = vcombine.high %v1302_v38, %v1302_v38  ;;  %v2821_v44 = vrot.slane %v1302_v38, %v18911_v0  ;;  %v19637_v50 = vcombine.low %v5530_v49, %v5537_v2  ;;  %v1270_v16 = vpop.trf.xlu1 }
 0x2b4   :  { %v5411_v34 = vcombine.low %v2700_v47, %v2714_v26  ;;  %v16921_v37 = vcombine.high %v2700_v47, %v2714_v26  ;;  %v24028_v39 = vrot.slane %v19456_v32, %v18911_v0  ;;  %v24029_v24 = vrot.slane %v19384_v19, %v18911_v0 }
 0x2b5   :  { %v5458_v40 = vcombine.low %v2707_v48, %v2721_v52  ;;  %v16922_v29 = vcombine.high %v2707_v48, %v2721_v52  ;;  %v19646_v27 = vsel %vm7515_vm2, %v7318_v9, 0  ;;  %v2828_v17 = vrot.slane %v2814_v14, %v18911_v0 }
 0x2b6   :  { %v7367_v10 = vcombine.low %v24029_v24, %v24028_v39  ;;  %24030 = vst [vmem:[#allocation36_spill] sm:$0xff] %v19646_v27  ;;  %v5439_v49 = vrot.slane %v5411_v34, %v18911_v0  ;;  %v5467_v38 = vrot.slane %v16921_v37, %v18911_v0  ;;  %v19654_v32 = vand.u32 4294901760, %v19646_v27 }
 0x2b7   :  { %v5474_v19 = vrot.slane %v5458_v40, %v18911_v0  ;;  %v19658_v7 = vrot.slane %v16922_v29, %v18911_v0  ;;  %v2829_v47 = vcombine.high %v2821_v44, %v2821_v44  ;;  %v2836_v48 = vrot.slane %v2821_v44, %v18911_v0  ;;  %v1365_v40 = vpop.trf.xlu0 }
 0x2b8   :  { %24031 = vst [vmem:[#allocation37_spill] sm:$0xff] %v19654_v32  ;;  %v24032_v26 = vrot.slane %v19571_v54, %v18911_v0  ;;  %17692 = vmatmul.mubr.f32.gmra.mrb[8].mxu1 %v19654_v32  ;;  %v2843_v9 = vrot.slane %v2828_v17, %v18911_v0  ;;  %v19669_v14 = vsel %vm7515_vm2, %v7367_v10, 0  ;;  %v2726_v34 = vcombine.high %v1270_v16, %v1270_v16 }
 0x2b9   :  { %24033 = vst [vmem:[#allocation38_spill] sm:$0xff] %v19669_v14  ;;  %v5489_v37 = vcombine.low %v5467_v38, %v5474_v19  ;;  %v2850_v29 = vrot.slane %v2829_v47, %v18911_v0  ;;  %v2851_v39 = vcombine.high %v2836_v48, %v2836_v48  ;;  %v5556_v24 = vcombine.low %v2813_v36, %v2836_v48 }
 0x2ba   :  { %v19664_v52 = vcombine.low %v24032_v26, %v5439_v49  ;;  %v19675_v54 = vand.u32 4294901760, %v19669_v14  ;;  %v2733_v49 = vrot.slane %v1270_v16, %v18911_v0  ;;  %v2740_v17 = vrot.slane %v2726_v34, %v18911_v0 }
 0x2bb   :  { %v19680_v10 = vrot.slane %v5489_v37, %v18911_v0  ;;  %v2852_v26 = vcombine.high %v2850_v29, %v2850_v29  ;;  %v5557_v38 = vcombine.low %v2850_v29, %v2851_v39  ;;  %v5572_v19 = vrot.slane %v5556_v24, %v18911_v0 }
 0x2bc   :  { %24034 = vst [vmem:[#allocation39_spill] sm:$0xff] %v19675_v54  ;;  %17694 = vmatprep.mubr.f32.mxu1 %v19675_v54  ;;  %v2741_v36 = vcombine.high %v2733_v49, %v2733_v49  ;;  %v2748_v47 = vrot.slane %v2733_v49, %v18911_v0  ;;  %v2755_v48 = vrot.slane %v2740_v17, %v18911_v0 }
 0x2bd   :  { %v2941_v2 = vcombine.high %v1365_v40, %v1365_v40  ;;  %v5558_v44 = vcombine.low %v2852_v26, %v2843_v9  ;;  %v5579_v16 = vrot.slane %v5557_v38, %v18911_v0  ;;  %v19687_v14 = vcombine.low %v5565_v45, %v5572_v19 }
 0x2be   :  { %v2948_v34 = vrot.slane %v1365_v40, %v18911_v0  ;;  %v2762_v37 = vrot.slane %v2741_v36, %v18911_v0  ;;  %v5507_v29 = vcombine.low %v2755_v48, %v19595_v62  ;;  %v7416_v24 = vcombine.low %v19466_v43, %v19505_v58 }
 0x2bf   :  { %v2955_v39 = vrot.slane %v2941_v2, %v18911_v0  ;;  %v5586_v49 = vrot.slane %v5558_v44, %v18911_v0  ;;  %v1333_v44 = vpop.trf.xlu1 }
 0x2c0   :  { %v2956_v17 = vcombine.high %v2948_v34, %v2948_v34  ;;  %v19699_v45 = vrot.slane %v2948_v34, %v18911_v0  ;;  %v5460_v26 = vcombine.low %v2748_v47, %v2762_v37  ;;  %v16923_v40 = vcombine.high %v2748_v47, %v2762_v37 }
 0x2c1   :  { %v5523_v38 = vrot.slane %v5507_v29, %v18911_v0  ;;  %v2957_v19 = vcombine.high %v2955_v39, %v2955_v39  ;;  %v19702_v62 = vcombine.low %v5579_v16, %v5586_v49  ;;  %v2971_v2 = vrot.slane %v2955_v39, %v18911_v0 }
 0x2c2   :  { %v2978_v43 = vrot.slane %v2956_v17, %v18911_v0  ;;  %v2986_v58 = vcombine.high %v19699_v45, %v19699_v45  ;;  %v5488_v36 = vrot.slane %v5460_v26, %v18911_v0  ;;  %v5516_v48 = vrot.slane %v16923_v40, %v18911_v0 }
 0x2c3   :  { %v2985_v34 = vrot.slane %v2957_v19, %v18911_v0  ;;  %v19712_v47 = vsel %vm7515_vm2, %v7416_v24, 0  ;;  %v2987_v37 = vcombine.high %v2971_v2, %v2971_v2  ;;  %v2853_v40 = vcombine.high %v1333_v44, %v1333_v44 }
 0x2c4   :  { %24035 = vst [vmem:[#allocation40_spill] sm:$0xff] %v19712_v47  ;;  %v2988_v29 = vcombine.high %v2978_v43, %v2978_v43  ;;  %v19716_v39 = vcombine.low %v2978_v43, %v2986_v58  ;;  %v5490_v49 = vcombine.low %v19658_v7, %v5488_v36  ;;  %v19719_v17 = vcombine.low %v5516_v48, %v5523_v38  ;;  %v1366_v58 = vpop.trf.xlu0 }
 0x2c5   :  { %v19722_v26 = vand.u32 4294901760, %v19712_v47  ;;  %v5703_v9 = vcombine.low %v2985_v34, %v2987_v37  ;;  %v2860_v54 = vrot.slane %v1333_v44, %v18911_v0  ;;  %v2867_v7 = vrot.slane %v2853_v40, %v18911_v0  ;;  %v1334_v37 = vpop.trf.xlu1 }
 0x2c6   :  { %v5702_v24 = vcombine.low %v2988_v29, %v2971_v2  ;;  %v19728_v16 = vrot.slane %v5490_v49, %v18911_v0  ;;  %v7464_v38 = vrot.slane %v19435_v55, %v18911_v0  ;;  %v24037_v43 = vrot.slane %v19492_v53, %v18911_v0 }
 0x2c7   :  { %24036 = vst [vmem:[#allocation41_spill] sm:$0xff] %v19722_v26  ;;  %17695 = vmatmul.mubr.f32.gmra.mrb[10].mxu1 %v19722_v26  ;;  %v5719_v2 = vrot.slane %v5703_v9, %v18911_v0  ;;  %v2868_v48 = vcombine.high %v2860_v54, %v2860_v54  ;;  %v2876_v44 = vrot.slane %v2860_v54, %v18911_v0 }
 0x2c8   :  { %v5712_v36 = vrot.slane %v5702_v24, %v18911_v0  ;;  %v2869_v29 = vcombine.high %v2867_v7, %v2867_v7  ;;  %v2883_v49 = vrot.slane %v2867_v7, %v18911_v0  ;;  %v7465_v19 = vcombine.low %v24037_v43, %v7464_v38 }
 0x2c9   :  { %v2989_v40 = vcombine.high %v2985_v34, %v2985_v34  ;;  %v2890_v55 = vrot.slane %v2868_v48, %v18911_v0  ;;  %v2990_v26 = vcombine.high %v1366_v58, %v1366_v58  ;;  %v2997_v24 = vrot.slane %v1366_v58, %v18911_v0 }
 0x2ca   :  { %v19743_v47 = vcombine.low %v5712_v36, %v5719_v2  ;;  %v2897_v9 = vrot.slane %v2869_v29, %v18911_v0  ;;  %v19749_v54 = vsel %vm7515_vm2, %v7465_v19, 0  ;;  %v7513_v7 = vrot.slane %v19486_v60, %v18911_v0 }
 0x2cb   :  { %24038 = vst [vmem:[#allocation42_spill] sm:$0xff] %v19749_v54  ;;  %v2902_v27 = vcombine.high %v1334_v37, %v1334_v37  ;;  %v5604_v34 = vcombine.low %v2876_v44, %v2890_v55  ;;  %v16924_v43 = vcombine.high %v2876_v44, %v2890_v55  ;;  %v19756_v38 = vand.u32 4294901760, %v19749_v54 }
 0x2cc   :  { %v5606_v36 = vcombine.low %v2883_v49, %v2897_v9  ;;  %v16925_v2 = vcombine.high %v2883_v49, %v2897_v9  ;;  %v3004_v58 = vrot.slane %v2990_v26, %v18911_v0  ;;  %v3005_v48 = vcombine.high %v2997_v24, %v2997_v24 }
 0x2cd   :  { %24039 = vst [vmem:[#allocation43_spill] sm:$0xff] %v19756_v38  ;;  %v5614_v19 = vrot.slane %v5604_v34, %v18911_v0  ;;  %v5621_v29 = vrot.slane %v16924_v43, %v18911_v0  ;;  %17697 = vmatprep.mubr.f32.mxu1 %v19756_v38  ;;  %v3012_v60 = vrot.slane %v2997_v24, %v18911_v0 }
 0x2ce   :  { %v24040_v53 = vrot.slane %v19473_v57, %v18911_v0  ;;  %v5628_v55 = vrot.slane %v5606_v36, %v18911_v0  ;;  %v5635_v54 = vrot.slane %v16925_v2, %v18911_v0  ;;  %v3019_v49 = vrot.slane %v3004_v58, %v18911_v0 }
 0x2cf   :  { %v3026_v26 = vrot.slane %v3005_v48, %v18911_v0  ;;  %v5636_v9 = vcombine.low %v5614_v19, %v5621_v29  ;;  %v3027_v34 = vcombine.high %v3012_v60, %v3012_v60  ;;  %v5704_v32 = vcombine.low %v2989_v40, %v3012_v60  ;;  %v1397_v40 = vpop.trf.xlu1 }
 0x2d0   :  { %v7514_v44 = vcombine.low %v24040_v53, %v7513_v7  ;;  %v5637_v38 = vcombine.low %v5628_v55, %v5635_v54  ;;  %v2909_v57 = vrot.slane %v1334_v37, %v18911_v0  ;;  %v1429_v7 = vpop.trf.xlu0  ;;  %v2916_v58 = vrot.slane %v2902_v27, %v18911_v0 }
 0x2d1   :  { %v3028_v24 = vcombine.high %v3026_v26, %v3026_v26  ;;  %v19778_v53 = vrot.slane %v5636_v9, %v18911_v0  ;;  %v5705_v36 = vcombine.low %v3026_v26, %v3027_v34  ;;  %v5726_v2 = vrot.slane %v5704_v32, %v18911_v0 }
 0x2d2   :  { %v19771_v43 = vsel %vm7515_vm2, %v7514_v44, 0  ;;  %v19783_v48 = vrot.slane %v5637_v38, %v18911_v0  ;;  %v2917_v19 = vcombine.high %v2909_v57, %v2909_v57  ;;  %v2924_v37 = vrot.slane %v2909_v57, %v18911_v0 }
 0x2d3   :  { %24041 = vst [vmem:[#allocation44_spill] sm:$0xff] %v19771_v43  ;;  %v19774_v18 = vand.u32 4294901760, %v19771_v43  ;;  %v19785_v54 = vcombine.low %v3028_v24, %v3019_v49  ;;  %v5733_v29 = vrot.slane %v5705_v36, %v18911_v0  ;;  %v2931_v60 = vrot.slane %v2916_v58, %v18911_v0 }
 0x2d4   :  { %v3117_v32 = vcombine.high %v1429_v7, %v1429_v7  ;;  %v3124_v27 = vrot.slane %v1429_v7, %v18911_v0  ;;  %v2938_v44 = vrot.slane %v2917_v19, %v18911_v0  ;;  %v3029_v55 = vcombine.high %v1397_v40, %v1397_v40 }
 0x2d5   :  { %24042 = vst [vmem:[#allocation45_spill] sm:$0xff] %v19774_v18  ;;  %17698 = vmatmul.mubr.f32.gmra.mrb[12].mxu1 %v19774_v18  ;;  %v3036_v49 = vrot.slane %v1397_v40, %v18911_v0  ;;  %v19797_v26 = vcombine.low %v5726_v2, %v5733_v29  ;;  %v5655_v9 = vcombine.low %v2931_v60, %v19699_v45 }
 0x2d6   :  { %17704 = vmatprep.mubr.f32.mxu1 %v19052_v12  ;;  %v3131_v34 = vrot.slane %v3117_v32, %v18911_v0  ;;  %v3132_v24 = vcombine.high %v3124_v27, %v3124_v27  ;;  %v5653_v57 = vcombine.low %v2924_v37, %v2938_v44  ;;  %v16926_v36 = vcombine.high %v2924_v37, %v2938_v44 }
 0x2d7   :  { %v19802_v58 = vrot.slane %v3124_v27, %v18911_v0  ;;  %v3043_v7 = vrot.slane %v3029_v55, %v18911_v0  ;;  %v5677_v2 = vrot.slane %v5655_v9, %v18911_v0  ;;  %v24043_v27 = vrot.slane %v19716_v39, %v18911_v0 }
 0x2d8   :  { %v3133_v40 = vcombine.high %v3131_v34, %v3131_v34  ;;  %v3147_v45 = vrot.slane %v3131_v34, %v18911_v0  ;;  %v5663_v29 = vrot.slane %v5653_v57, %v18911_v0  ;;  %v5670_v37 = vrot.slane %v16926_v36, %v18911_v0 }
 0x2d9   :  { %17705 = vmatmul.mubr.f32.vlgmr.msra.gmra.mrb[14].mxu1 %v19002_v56  ;;  %v3154_v60 = vrot.slane %v3132_v24, %v18911_v0  ;;  %v3162_v32 = vcombine.high %v19802_v58, %v19802_v58  ;;  %v19820_v44 = vcombine.low %v5677_v2, %v24043_v27  ;;  %v3044_v34 = vcombine.high %v3036_v49, %v3036_v49 }
 0x2da   :  { %17707 = vmatprep.mubr.f32.mxu1 %v19078_v6  ;;  %18043 = vmatpush3.bf16.msra.mxu1 %v18907_v63  ;;  %v3161_v55 = vrot.slane %v3133_v40, %v18911_v0  ;;  %v3163_v9 = vcombine.high %v3147_v45, %v3147_v45  ;;  %v5685_v19 = vcombine.low %v5663_v29, %v5670_v37 }
 0x2db   :  { %v3164_v57 = vcombine.high %v3154_v60, %v3154_v60  ;;  %v5849_v38 = vcombine.low %v3154_v60, %v3162_v32  ;;  %v3045_v36 = vcombine.high %v3043_v7, %v3043_v7  ;;  %v3052_v63 = vrot.slane %v3036_v49, %v18911_v0  ;;  %v1430_v60 = vpop.trf.xlu0 }
 0x2dc   :  { %v5851_v6 = vcombine.low %v3161_v55, %v3163_v9  ;;  %v3059_v39 = vrot.slane %v3043_v7, %v18911_v0  ;;  %v19830_v2 = vrot.slane %v5685_v19, %v18911_v0  ;;  %v3066_v37 = vrot.slane %v3044_v34, %v18911_v0 }
 0x2dd   :  { %17708 = vmatmul.mubr.f32.gmra.mrb[16].mxu1 %v19092_v5  ;;  %v5850_v40 = vcombine.low %v3164_v57, %v3147_v45  ;;  %v5859_v29 = vrot.slane %v5849_v38, %v18911_v0  ;;  %v3073_v32 = vrot.slane %v3045_v36, %v18911_v0  ;;  %v3165_v27 = vcombine.high %v3161_v55, %v3161_v55 }
 0x2de   :  { %17710 = vmatprep.mubr.f32.mxu1 %v19098_v8  ;;  %v5873_v9 = vrot.slane %v5851_v6, %v18911_v0  ;;  %v3166_v24 = vcombine.high %v1430_v60, %v1430_v60  ;;  %v5752_v7 = vcombine.low %v3052_v63, %v3066_v37  ;;  %v16927_v5 = vcombine.high %v3052_v63, %v3066_v37 }
 0x2df   :  { %v5866_v49 = vrot.slane %v5850_v40, %v18911_v0  ;;  %v3173_v8 = vrot.slane %v1430_v60, %v18911_v0  ;;  %v5754_v19 = vcombine.low %v3059_v39, %v3073_v32  ;;  %v16928_v45 = vcombine.high %v3059_v39, %v3073_v32 }
 0x2e0   :  { %v3180_v38 = vrot.slane %v3166_v24, %v18911_v0  ;;  %v24044_v34 = vrot.slane %v19066_v3, %v18911_v0  ;;  %v5768_v6 = vrot.slane %v5752_v7, %v18911_v0  ;;  %v19848_v36 = vrot.slane %v16927_v5, %v18911_v0  ;;  %v1398_v3 = vpop.trf.xlu1 }
 0x2e1   :  { %17711 = vmatmul.mubr.f32.gmra.mrb[18].mxu1 %v19106_v11  ;;  %v19844_v57 = vcombine.low %v5859_v29, %v5866_v49  ;;  %v3181_v63 = vcombine.high %v3173_v8, %v3173_v8  ;;  %v19851_v40 = vrot.slane %v5754_v19, %v18911_v0  ;;  %v19854_v39 = vrot.slane %v16928_v45, %v18911_v0  ;;  %v1493_v45 = vpop.trf.xlu0 }
 0x2e2   :  { %v5309_v55 = vcombine.low %v24044_v34, %v19563_v1  ;;  %v3188_v24 = vrot.slane %v3173_v8, %v18911_v0  ;;  %v3195_v37 = vrot.slane %v3180_v38, %v18911_v0  ;;  %v24045_v29 = vrot.slane %v19785_v54, %v18911_v0 }
 0x2e3   :  { %v3202_v60 = vrot.slane %v3181_v63, %v18911_v0  ;;  %v3078_v34 = vcombine.high %v1398_v3, %v1398_v3  ;;  %v3085_v1 = vrot.slane %v1398_v3, %v18911_v0  ;;  %v3293_v11 = vcombine.high %v1493_v45, %v1493_v45 }
 0x2e4   :  { %v19863_v5 = vcombine.low %v24045_v29, %v5768_v6  ;;  %v7528_v32 = vsel %vm7515_vm2, %v5309_v55, 0  ;;  %v3203_v7 = vcombine.high %v3188_v24, %v3188_v24  ;;  %v5852_v8 = vcombine.low %v3165_v27, %v3188_v24 }
 0x2e5   :  { %v19869_v19 = vand.u32 4294901760, %v7528_v32  ;;  %v3204_v38 = vcombine.high %v3202_v60, %v3202_v60  ;;  %v3300_v55 = vrot.slane %v1493_v45, %v18911_v0  ;;  %v3092_v49 = vrot.slane %v3078_v34, %v18911_v0 }
 0x2e6   :  { %v5880_v54 = vrot.slane %v5852_v8, %v18911_v0  ;;  %v5898_v6 = vcombine.low %v3202_v60, %v3203_v7  ;;  %v3093_v27 = vcombine.high %v3085_v1, %v3085_v1  ;;  %v3100_v24 = vrot.slane %v3085_v1, %v18911_v0 }
 0x2e7   :  { %24046 = vst [vmem:[#allocation46_spill] sm:$0xff] %v19869_v19  ;;  %v19874_v63 = vsub.f32 %v7528_v32, %v19869_v19  ;;  %v5899_v29 = vcombine.low %v3204_v38, %v3195_v37  ;;  %v3307_v8 = vrot.slane %v3293_v11, %v18911_v0  ;;  %v3107_v32 = vrot.slane %v3092_v49, %v18911_v0  ;;  %v1461_v19 = vpop.trf.xlu1 }
 0x2e8   :  { %v19879_v56 = vcombine.low %v5873_v9, %v5880_v54  ;;  %v5908_v12 = vrot.slane %v5898_v6, %v18911_v0  ;;  %v3114_v37 = vrot.slane %v3093_v27, %v18911_v0  ;;  %v3308_v7 = vcombine.high %v3300_v55, %v3300_v55 }
 0x2e9   :  { %24047 = vst [vmem:[#allocation47_spill] sm:$0xff] %v19874_v63  ;;  %v23773_v3 = vand.u32 4294901760, %v19874_v63  ;;  %17713 = vmatprep.mubr.f32.mxu1 %v19874_v63  ;;  %v5915_v60 = vrot.slane %v5899_v29, %v18911_v0  ;;  %v3309_v45 = vcombine.high %v3307_v8, %v3307_v8  ;;  %v19894_v38 = vrot.slane %v3300_v55, %v18911_v0 }
 0x2ea   :  { %v5801_v34 = vcombine.low %v3100_v24, %v3114_v37  ;;  %v16929_v54 = vcombine.high %v3100_v24, %v3114_v37  ;;  %v5803_v49 = vcombine.low %v3107_v32, %v19802_v58  ;;  %v3323_v29 = vrot.slane %v3307_v8, %v18911_v0 }
 0x2eb   :  { %v7750_v9 = vsub.f32 %v19874_v63, %v23773_v3  ;;  %v19896_v11 = vcombine.low %v5908_v12, %v5915_v60  ;;  %v3330_v27 = vrot.slane %v3308_v7, %v18911_v0  ;;  %v19902_v1 = vrot.slane %v3309_v45, %v18911_v0 }
 0x2ec   :  { %v5817_v55 = vrot.slane %v5801_v34, %v18911_v0  ;;  %v5824_v12 = vrot.slane %v16929_v54, %v18911_v0  ;;  %v5831_v24 = vrot.slane %v5803_v49, %v18911_v0  ;;  %v3338_v58 = vcombine.high %v19894_v38, %v19894_v38 }
 0x2ed   :  { %v7751_v6 = vand.u32 4294901760, %v7750_v9  ;;  %v3339_v8 = vcombine.high %v3323_v29, %v3323_v29  ;;  %v3340_v60 = vcombine.high %v3330_v27, %v3330_v27  ;;  %v5358_v32 = vcombine.low %v19566_v21, %v19619_v28 }
 0x2ee   :  { %v5832_v37 = vcombine.low %v19854_v39, %v5817_v55  ;;  %v19914_v7 = vcombine.low %v5824_v12, %v5831_v24  ;;  %v3205_v9 = vcombine.high %v1461_v19, %v1461_v19  ;;  %v3212_v45 = vrot.slane %v1461_v19, %v18911_v0 }
 0x2ef   :  { %17549 = vmatprep.mubr.f32.mxu0 %v7751_v6  ;;  %v19917_v34 = vcombine.low %v3330_v27, %v3338_v58  ;;  %v19919_v54 = vcombine.low %v3340_v60, %v3323_v29  ;;  %v19922_v49 = vcombine.low %v19902_v1, %v3339_v8  ;;  %v7530_v6 = vsel %vm7515_vm2, %v5358_v32, 0  ;;  %v1494_v60 = vpop.trf.xlu0 }
 0x2f0   :  { %v19926_v3 = vrot.slane %v5832_v37, %v18911_v0  ;;  %v19930_v28 = vand.u32 4294901760, %v7530_v6  ;;  %v3219_v39 = vrot.slane %v3205_v9, %v18911_v0  ;;  %v3220_v55 = vcombine.high %v3212_v45, %v3212_v45 }
 0x2f1   :  { %v3228_v58 = vrot.slane %v3212_v45, %v18911_v0  ;;  %v24050_v37 = vrot.slane %v19538_v51, %v18911_v0  ;;  %v24051_v9 = vrot.slane %v19611_v13, %v18911_v0  ;;  %v3341_v27 = vcombine.high %v19902_v1, %v19902_v1 }
 0x2f2   :  { %24048 = vst [vmem:[#allocation48_spill] sm:$0xff] %v19930_v28  ;;  %v19940_v12 = vsub.f32 %v7530_v6, %v19930_v28  ;;  %v3221_v24 = vcombine.high %v3219_v39, %v3219_v39  ;;  %v3235_v8 = vrot.slane %v3219_v39, %v18911_v0  ;;  %v3242_v32 = vrot.slane %v3220_v55, %v18911_v0 }
 0x2f3   :  { %v5407_v29 = vcombine.low %v24051_v9, %v24050_v37  ;;  %v3342_v6 = vcombine.high %v1494_v60, %v1494_v60  ;;  %v3349_v39 = vrot.slane %v1494_v60, %v18911_v0  ;;  %v24052_v55 = vrot.slane %v19664_v52, %v18911_v0 }
 0x2f4   :  { %24049 = vst [vmem:[#allocation49_spill] sm:$0xff] %v19940_v12  ;;  %v23777_v19 = vand.u32 4294901760, %v19940_v12  ;;  %v3249_v45 = vrot.slane %v3221_v24, %v18911_v0  ;;  %v24053_v51 = vrot.slane %v19583_v33, %v18911_v0  ;;  %17714 = vmatmul.mubr.f32.gmra.mrb[20].mxu1 %v19940_v12  ;;  %v5900_v13 = vcombine.low %v3228_v58, %v3242_v32 }
 0x2f5   :  { %v16930_v37 = vcombine.high %v3228_v58, %v3242_v32  ;;  %v7532_v1 = vsel %vm7515_vm2, %v5407_v29, 0  ;;  %v3356_v9 = vrot.slane %v3342_v6, %v18911_v0  ;;  %v1462_v58 = vpop.trf.xlu1 }
 0x2f6   :  { %v5456_v21 = vcombine.low %v24053_v51, %v24052_v55  ;;  %v7760_v24 = vsub.f32 %v19940_v12, %v23777_v19  ;;  %v5947_v60 = vcombine.low %v3235_v8, %v3249_v45  ;;  %v16931_v28 = vcombine.high %v3235_v8, %v3249_v45 }
 0x2f7   :  { %v19968_v63 = vand.u32 4294901760, %v7532_v1  ;;  %v5922_v52 = vrot.slane %v5900_v13, %v18911_v0  ;;  %v5929_v33 = vrot.slane %v16930_v37, %v18911_v0  ;;  %v3357_v55 = vcombine.high %v3349_v39, %v3349_v39 }
 0x2f8   :  { %v3364_v51 = vrot.slane %v3349_v39, %v18911_v0  ;;  %v7761_v32 = vand.u32 4294901760, %v7760_v24  ;;  %v19974_v29 = vrot.slane %v5947_v60, %v18911_v0  ;;  %v19977_v6 = vrot.slane %v16931_v28, %v18911_v0 }
 0x2f9   :  { %24054 = vst [vmem:[#allocation50_spill] sm:$0xff] %v19968_v63  ;;  %v19980_v19 = vsub.f32 %v7532_v1, %v19968_v63  ;;  %v5931_v8 = vcombine.low %v5922_v52, %v5929_v33  ;;  %v3371_v45 = vrot.slane %v3356_v9, %v18911_v0  ;;  %v3378_v13 = vrot.slane %v3357_v55, %v18911_v0  ;;  %v1557_v55 = vpop.trf.xlu0 }
 0x2fa   :  { %v3379_v37 = vcombine.high %v3364_v51, %v3364_v51  ;;  %17550 = vmatmul.mubr.f32.gmra.mrb[70].mxu0 %v7761_v32  ;;  %v6045_v12 = vcombine.low %v3341_v27, %v3364_v51  ;;  %v7534_v24 = vsel %vm7515_vm2, %v5456_v21, 0  ;;  %v3254_v60 = vcombine.high %v1462_v58, %v1462_v58 }
 0x2fb   :  { %24055 = vst [vmem:[#allocation51_spill] sm:$0xff] %v19980_v19  ;;  %v23784_v39 = vand.u32 4294901760, %v19980_v19  ;;  %17716 = vmatprep.mubr.f32.mxu1 %v19980_v19  ;;  %v19988_v28 = vrot.slane %v5931_v8, %v18911_v0  ;;  %v3380_v1 = vcombine.high %v3378_v13, %v3378_v13  ;;  %v19990_v52 = vand.u32 4294901760, %v7534_v24 }
 0x2fc   :  { %v6046_v63 = vcombine.low %v3378_v13, %v3379_v37  ;;  %v6055_v33 = vrot.slane %v6045_v12, %v18911_v0  ;;  %v3261_v27 = vrot.slane %v1462_v58, %v18911_v0  ;;  %v3268_v21 = vrot.slane %v3254_v60, %v18911_v0  ;;  %v1525_v12 = vpop.trf.xlu1 }
 0x2fd   :  { %24056 = vst [vmem:[#allocation52_spill] sm:$0xff] %v19990_v52  ;;  %v7770_v9 = vsub.f32 %v19980_v19, %v23784_v39  ;;  %v19998_v51 = vcombine.low %v3380_v1, %v3371_v45  ;;  %v20002_v8 = vsub.f32 %v7534_v24, %v19990_v52  ;;  %v3469_v13 = vcombine.high %v1557_v55, %v1557_v55 }
 0x2fe   :  { %v6062_v32 = vrot.slane %v6046_v63, %v18911_v0  ;;  %v3269_v43 = vcombine.high %v3261_v27, %v3261_v27  ;;  %v3276_v18 = vrot.slane %v3261_v27, %v18911_v0  ;;  %v3283_v39 = vrot.slane %v3268_v21, %v18911_v0 }
 0x2ff   :  { %24057 = vst [vmem:[#allocation53_spill] sm:$0xff] %v20002_v8  ;;  %v7771_v37 = vand.u32 4294901760, %v7770_v9  ;;  %v23785_v45 = vand.u32 4294901760, %v20002_v8  ;;  %v3476_v63 = vrot.slane %v1557_v55, %v18911_v0  ;;  %17717 = vmatmul.mubr.f32.gmra.mrb[22].mxu1 %v20002_v8  ;;  %v3483_v9 = vrot.slane %v3469_v13, %v18911_v0 }
 0x300   :  { %v20008_v60 = vcombine.low %v6055_v33, %v6062_v32  ;;  %v3290_v24 = vrot.slane %v3269_v43, %v18911_v0  ;;  %v20015_v1 = vcombine.low %v3283_v39, %v19894_v38  ;;  %v5505_v27 = vcombine.low %v19680_v10, %v19728_v16  ;;  %v1526_v30 = vpop.trf.xlu1 }
 0x301   :  { %17552 = vmatprep.mubr.f32.mxu0 %v7771_v37  ;;  %v7780_v33 = vsub.f32 %v20002_v8, %v23785_v45  ;;  %v3484_v21 = vcombine.high %v3476_v63, %v3476_v63  ;;  %v20024_v55 = vrot.slane %v3476_v63, %v18911_v0  ;;  %v3381_v32 = vcombine.high %v1525_v12, %v1525_v12 }
 0x302   :  { %v5949_v37 = vcombine.low %v3276_v18, %v3290_v24  ;;  %v16932_v58 = vcombine.high %v3276_v18, %v3290_v24  ;;  %v3485_v38 = vcombine.high %v3483_v9, %v3483_v9  ;;  %v3499_v13 = vrot.slane %v3483_v9, %v18911_v0 }
 0x303   :  { %v7781_v39 = vand.u32 4294901760, %v7780_v33  ;;  %v3506_v10 = vrot.slane %v3484_v21, %v18911_v0  ;;  %v3514_v16 = vcombine.high %v20024_v55, %v20024_v55  ;;  %v7536_v24 = vsel %vm7515_vm2, %v5505_v27, 0 }
 0x304   :  { %v20033_v45 = vrot.slane %v5949_v37, %v18911_v0  ;;  %v20036_v63 = vrot.slane %v16932_v58, %v18911_v0  ;;  %v20039_v18 = vrot.slane %v3485_v38, %v18911_v0  ;;  %v3515_v33 = vcombine.high %v3499_v13, %v3499_v13 }
 0x305   :  { %17553 = vmatmul.mubr.f32.gmra.mrb[72].mxu0 %v7781_v39  ;;  %v3516_v43 = vcombine.high %v3506_v10, %v3506_v10  ;;  %v20042_v9 = vcombine.low %v3506_v10, %v3514_v16  ;;  %v20044_v21 = vand.u32 4294901760, %v7536_v24  ;;  %v3388_v37 = vrot.slane %v1525_v12, %v18911_v0 }
 0x306   :  { %v3395_v58 = vrot.slane %v3381_v32, %v18911_v0  ;;  %v24059_v38 = vrot.slane %v19637_v50, %v18911_v0  ;;  %v24060_v27 = vrot.slane %v19719_v17, %v18911_v0  ;;  %v20061_v16 = vcombine.low %v20039_v18, %v3515_v33  ;;  %v1558_v17 = vpop.trf.xlu0 }
 0x307   :  { %24058 = vst [vmem:[#allocation54_spill] sm:$0xff] %v20044_v21  ;;  %v20056_v8 = vcombine.low %v3516_v43, %v3499_v13  ;;  %v20064_v52 = vsub.f32 %v7536_v24, %v20044_v21  ;;  %v3396_v12 = vcombine.high %v3388_v37, %v3388_v37  ;;  %v3404_v19 = vrot.slane %v3388_v37, %v18911_v0 }
 0x308   :  { %v5554_v39 = vcombine.low %v24060_v27, %v24059_v38  ;;  %v3397_v32 = vcombine.high %v3395_v58, %v3395_v58  ;;  %v3411_v50 = vrot.slane %v3395_v58, %v18911_v0  ;;  %v24062_v33 = vrot.slane %v19702_v62, %v18911_v0 }
 0x309   :  { %24061 = vst [vmem:[#allocation55_spill] sm:$0xff] %v20064_v52  ;;  %v23798_v43 = vand.u32 4294901760, %v20064_v52  ;;  %17719 = vmatprep.mubr.f32.mxu1 %v20064_v52  ;;  %v24063_v24 = vrot.slane %v19687_v14, %v18911_v0  ;;  %v3418_v37 = vrot.slane %v3396_v12, %v18911_v0  ;;  %v3517_v10 = vcombine.high %v20039_v18, %v20039_v18 }
 0x30a   :  { %v7538_v13 = vsel %vm7515_vm2, %v5554_v39, 0  ;;  %v3425_v58 = vrot.slane %v3397_v32, %v18911_v0  ;;  %v6202_v14 = vrot.slane %v20061_v16, %v18911_v0  ;;  %v3525_v31 = vrot.slane %v1558_v17, %v18911_v0 }
 0x30b   :  { %v5603_v38 = vcombine.low %v24063_v24, %v24062_v33  ;;  %v20081_v27 = vand.u32 4294901760, %v7538_v13  ;;  %v7790_v39 = vsub.f32 %v20064_v52, %v23798_v43  ;;  %v3518_v33 = vcombine.high %v1558_v17, %v1558_v17 }
 0x30c   :  { %v6048_v24 = vcombine.low %v3404_v19, %v3418_v37  ;;  %v16933_v12 = vcombine.high %v3404_v19, %v3418_v37  ;;  %v6095_v21 = vcombine.low %v3411_v50, %v3425_v58  ;;  %v16934_v32 = vcombine.high %v3411_v50, %v3425_v58 }
 0x30d   :  { %24064 = vst [vmem:[#allocation56_spill] sm:$0xff] %v20081_v27  ;;  %v7540_v62 = vsel %vm7515_vm2, %v5603_v38, 0  ;;  %v7791_v35 = vand.u32 4294901760, %v7790_v39  ;;  %v20092_v15 = vsub.f32 %v7538_v13, %v20081_v27  ;;  %v3532_v17 = vrot.slane %v3518_v33, %v18911_v0 }
 0x30e   :  { %v20094_v18 = vand.u32 4294901760, %v7540_v62  ;;  %v6076_v43 = vrot.slane %v6048_v24, %v18911_v0  ;;  %v20099_v38 = vrot.slane %v16933_v12, %v18911_v0  ;;  %v20102_v16 = vrot.slane %v6095_v21, %v18911_v0 }
 0x30f   :  { %24065 = vst [vmem:[#allocation57_spill] sm:$0xff] %v20092_v15  ;;  %v20105_v19 = vrot.slane %v16934_v32, %v18911_v0  ;;  %17555 = vmatprep.mubr.f32.mxu0 %v7791_v35  ;;  %v23801_v50 = vand.u32 4294901760, %v20092_v15  ;;  %v3533_v37 = vcombine.high %v3525_v31, %v3525_v31  ;;  %17720 = vmatmul.mubr.f32.gmra.mrb[24].mxu1 %v20092_v15 }
 0x310   :  { %24066 = vst [vmem:[#allocation58_spill] sm:$0xff] %v20094_v18  ;;  %v20109_v13 = vsub.f32 %v7540_v62, %v20094_v18  ;;  %v24068_v58 = vrot.slane %v19998_v51, %v18911_v0  ;;  %v3540_v35 = vrot.slane %v3525_v31, %v18911_v0  ;;  %v3430_v24 = vcombine.high %v1526_v30, %v1526_v30 }
 0x311   :  { %v7800_v62 = vsub.f32 %v20092_v15, %v23801_v50  ;;  %v3547_v12 = vrot.slane %v3532_v17, %v18911_v0  ;;  %v3554_v32 = vrot.slane %v3533_v37, %v18911_v0  ;;  %v5652_v27 = vcombine.low %v19778_v53, %v19783_v48 }
 0x312   :  { %24067 = vst [vmem:[#allocation59_spill] sm:$0xff] %v20109_v13  ;;  %v20116_v39 = vcombine.low %v24068_v58, %v6076_v43  ;;  %v23805_v33 = vand.u32 4294901760, %v20109_v13  ;;  %17722 = vmatprep.mubr.f32.mxu1 %v20109_v13  ;;  %v3555_v51 = vcombine.high %v3540_v35, %v3540_v35  ;;  %v6193_v43 = vcombine.low %v3517_v10, %v3540_v35  ;;  %v1621_v35 = vpop.trf.xlu0 }
 0x313   :  { %v3437_v58 = vrot.slane %v1526_v30, %v18911_v0  ;;  %v3444_v21 = vrot.slane %v3430_v24, %v18911_v0  ;;  %v7801_v31 = vand.u32 4294901760, %v7800_v62  ;;  %v3556_v50 = vcombine.high %v3554_v32, %v3554_v32 }
 0x314   :  { %v7810_v18 = vsub.f32 %v20109_v13, %v23805_v33  ;;  %v20135_v17 = vcombine.low %v3554_v32, %v3555_v51  ;;  %v6209_v37 = vrot.slane %v6193_v43, %v18911_v0  ;;  %v7542_v33 = vsel %vm7515_vm2, %v5652_v27, 0 }
 0x315   :  { %v3445_v15 = vcombine.high %v3437_v58, %v3437_v58  ;;  %v3452_v10 = vrot.slane %v3437_v58, %v18911_v0  ;;  %17556 = vmatmul.mubr.f32.gmra.mrb[74].mxu0 %v7801_v31  ;;  %v20139_v24 = vcombine.low %v3556_v50, %v3547_v12  ;;  %v3459_v62 = vrot.slane %v3444_v21, %v18911_v0 }
 0x316   :  { %v7811_v30 = vand.u32 4294901760, %v7810_v18  ;;  %v20145_v53 = vcombine.low %v6202_v14, %v6209_v37  ;;  %v20148_v32 = vand.u32 4294901760, %v7542_v33  ;;  %v3645_v50 = vcombine.high %v1621_v35, %v1621_v35 }
 0x317   :  { %v3466_v48 = vrot.slane %v3445_v15, %v18911_v0  ;;  %v6144_v18 = vcombine.low %v3459_v62, %v20024_v55  ;;  %v3652_v21 = vrot.slane %v1621_v35, %v18911_v0  ;;  %v24071_v14 = vrot.slane %v19820_v44, %v18911_v0  ;;  %v1589_v44 = vpop.trf.xlu1 }
 0x318   :  { %24069 = vst [vmem:[#allocation60_spill] sm:$0xff] %v20148_v32  ;;  %17558 = vmatprep.mubr.f32.mxu0 %v7811_v30  ;;  %v20155_v43 = vsub.f32 %v7542_v33, %v20148_v32  ;;  %v3659_v31 = vrot.slane %v3645_v50, %v18911_v0  ;;  %v3557_v32 = vcombine.high %v1589_v44, %v1589_v44 }
 0x319   :  { %v6097_v12 = vcombine.low %v3452_v10, %v3466_v48  ;;  %v16935_v27 = vcombine.high %v3452_v10, %v3466_v48  ;;  %v5701_v15 = vcombine.low %v19830_v2, %v24071_v14  ;;  %v6160_v58 = vrot.slane %v6144_v18, %v18911_v0 }
 0x31a   :  { %24070 = vst [vmem:[#allocation61_spill] sm:$0xff] %v20155_v43  ;;  %v3660_v37 = vcombine.high %v3652_v21, %v3652_v21  ;;  %v20164_v55 = vrot.slane %v3652_v21, %v18911_v0  ;;  %v23809_v33 = vand.u32 4294901760, %v20155_v43  ;;  %17723 = vmatmul.mubr.f32.gmra.mrb[26].mxu1 %v20155_v43  ;;  %v3661_v2 = vcombine.high %v3659_v31, %v3659_v31 }
 0x31b   :  { %v20167_v35 = vrot.slane %v6097_v12, %v18911_v0  ;;  %v6153_v10 = vrot.slane %v16935_v27, %v18911_v0  ;;  %v7544_v30 = vsel %vm7515_vm2, %v5701_v15, 0  ;;  %v3675_v62 = vrot.slane %v3659_v31, %v18911_v0 }
 0x31c   :  { %v3682_v48 = vrot.slane %v3660_v37, %v18911_v0  ;;  %v3690_v18 = vcombine.high %v20164_v55, %v20164_v55  ;;  %v7820_v12 = vsub.f32 %v20155_v43, %v23809_v33  ;;  %v20184_v27 = vand.u32 4294901760, %v7544_v30 }
 0x31d   :  { %v20179_v21 = vcombine.low %v6153_v10, %v6160_v58  ;;  %v3689_v14 = vrot.slane %v3661_v2, %v18911_v0  ;;  %v3691_v15 = vcombine.high %v3675_v62, %v3675_v62  ;;  %v3564_v58 = vrot.slane %v1589_v44, %v18911_v0 }
 0x31e   :  { %24072 = vst [vmem:[#allocation62_spill] sm:$0xff] %v20184_v27  ;;  %v3692_v31 = vcombine.high %v3682_v48, %v3682_v48  ;;  %v20187_v13 = vcombine.low %v3682_v48, %v3690_v18  ;;  %v7821_v37 = vand.u32 4294901760, %v7820_v12  ;;  %v20190_v51 = vsub.f32 %v7544_v30, %v20184_v27 }
 0x31f   :  { %v20197_v33 = vcombine.low %v3689_v14, %v3691_v15  ;;  %v24074_v2 = vrot.slane %v19797_v26, %v18911_v0  ;;  %v24075_v48 = vrot.slane %v19743_v47, %v18911_v0  ;;  %v3571_v12 = vrot.slane %v3557_v32, %v18911_v0  ;;  %v1590_v15 = vpop.trf.xlu1 }
 0x320   :  { %24073 = vst [vmem:[#allocation63_spill] sm:$0xff] %v20190_v51  ;;  %v20195_v50 = vcombine.low %v3692_v31, %v3675_v62  ;;  %17559 = vmatmul.mubr.f32.gmra.mrb[76].mxu0 %v7821_v37  ;;  %v23817_v30 = vand.u32 4294901760, %v20190_v51  ;;  %v3572_v44 = vcombine.high %v3564_v58, %v3564_v58  ;;  %v3580_v27 = vrot.slane %v3564_v58, %v18911_v0  ;;  %v1622_v62 = vpop.trf.xlu0 }
 0x321   :  { %v5750_v18 = vcombine.low %v24075_v48, %v24074_v2  ;;  %17725 = vmatprep.mubr.f32.mxu1 %v20190_v51  ;;  %v3693_v37 = vcombine.high %v3689_v14, %v3689_v14  ;;  %v3573_v2 = vcombine.high %v3571_v12, %v3571_v12  ;;  %v3587_v58 = vrot.slane %v3571_v12, %v18911_v0 }
 0x322   :  { %v7830_v32 = vsub.f32 %v20190_v51, %v23817_v30  ;;  %v3594_v48 = vrot.slane %v3572_v44, %v18911_v0  ;;  %v3694_v43 = vcombine.high %v1622_v62, %v1622_v62  ;;  %v3701_v31 = vrot.slane %v1622_v62, %v18911_v0 }
 0x323   :  { %v7546_v47 = vsel %vm7515_vm2, %v5750_v18, 0  ;;  %v3606_v52 = vcombine.high %v1590_v15, %v1590_v15  ;;  %v3601_v26 = vrot.slane %v3573_v2, %v18911_v0 }
 0x324   :  { %v20219_v10 = vand.u32 4294901760, %v7546_v47  ;;  %v7831_v4 = vand.u32 4294901760, %v7830_v32  ;;  %v6241_v18 = vcombine.low %v3580_v27, %v3594_v48  ;;  %v16936_v14 = vcombine.high %v3580_v27, %v3594_v48 }
 0x325   :  { %v3708_v30 = vrot.slane %v3694_v43, %v18911_v0  ;;  %v3709_v51 = vcombine.high %v3701_v31, %v3701_v31  ;;  %v3716_v12 = vrot.slane %v3701_v31, %v18911_v0  ;;  %v6243_v44 = vcombine.low %v3587_v58, %v3601_v26 }
 0x326   :  { %24076 = vst [vmem:[#allocation64_spill] sm:$0xff] %v20219_v10  ;;  %v20224_v61 = vsub.f32 %v7546_v47, %v20219_v10  ;;  %17561 = vmatprep.mubr.f32.mxu0 %v7831_v4  ;;  %v16937_v22 = vcombine.high %v3587_v58, %v3601_v26  ;;  %v20229_v41 = vrot.slane %v6241_v18, %v18911_v0  ;;  %v1685_v18 = vpop.trf.xlu0 }
 0x327   :  { %v20232_v62 = vrot.slane %v16936_v14, %v18911_v0  ;;  %v3723_v27 = vrot.slane %v3708_v30, %v18911_v0  ;;  %v3730_v47 = vrot.slane %v3709_v51, %v18911_v0  ;;  %v3731_v2 = vcombine.high %v3716_v12, %v3716_v12 }
 0x328   :  { %24077 = vst [vmem:[#allocation65_spill] sm:$0xff] %v20224_v61  ;;  %v23822_v32 = vand.u32 4294901760, %v20224_v61  ;;  %17726 = vmatmul.mubr.f32.gmra.mrb[28].mxu1 %v20224_v61  ;;  %v20239_v43 = vrot.slane %v6243_v44, %v18911_v0  ;;  %v20242_v4 = vrot.slane %v16937_v22, %v18911_v0  ;;  %v6341_v26 = vcombine.low %v3693_v37, %v3716_v12 }
 0x329   :  { %v3732_v30 = vcombine.high %v3730_v47, %v3730_v47  ;;  %v6342_v48 = vcombine.low %v3730_v47, %v3731_v2  ;;  %v3613_v51 = vrot.slane %v1590_v15, %v18911_v0  ;;  %v3620_v44 = vrot.slane %v3606_v52, %v18911_v0 }
 0x32a   :  { %v7840_v58 = vsub.f32 %v20224_v61, %v23822_v32  ;;  %v6363_v14 = vrot.slane %v6341_v26, %v18911_v0  ;;  %v5791_v22 = vrot.slane %v19863_v5, %v18911_v0  ;;  %v24078_v37 = vcombine.low %v19848_v36, %v19851_v40 }
 0x32b   :  { %v6370_v32 = vrot.slane %v6342_v48, %v18911_v0  ;;  %v20259_v10 = vcombine.low %v3732_v30, %v3723_v27  ;;  %v3621_v47 = vcombine.high %v3613_v51, %v3613_v51  ;;  %v3628_v15 = vrot.slane %v3613_v51, %v18911_v0 }
 0x32c   :  { %v5798_v12 = vrot.slane %v24078_v37, %v18911_v0  ;;  %v7841_v31 = vand.u32 4294901760, %v7840_v58  ;;  %v3635_v2 = vrot.slane %v3620_v44, %v18911_v0  ;;  %v3821_v52 = vcombine.high %v1685_v18, %v1685_v18 }
 0x32d   :  { %v20263_v61 = vcombine.low %v6363_v14, %v6370_v32  ;;  %v3642_v36 = vrot.slane %v3621_v47, %v18911_v0  ;;  %v3828_v40 = vrot.slane %v1685_v18, %v18911_v0  ;;  %v24079_v48 = vrot.slane %v19914_v7, %v18911_v0 }
 0x32e   :  { %v5799_v26 = vcombine.low %v5791_v22, %v5798_v12  ;;  %17562 = vmatmul.mubr.f32.gmra.mrb[78].mxu0 %v7841_v31  ;;  %v20270_v27 = vcombine.low %v3635_v2, %v20164_v55  ;;  %v3835_v30 = vrot.slane %v3821_v52, %v18911_v0  ;;  %v1653_v12 = vpop.trf.xlu1  ;;  %v24084_v5 = vrot.slane %v19879_v56, %v18911_v0 }
 0x32f   :  { %v5848_v32 = vcombine.low %v19926_v3, %v24079_v48  ;;  %v6290_v31 = vcombine.low %v3628_v15, %v3642_v36  ;;  %v16938_v51 = vcombine.high %v3628_v15, %v3642_v36  ;;  %v3836_v44 = vcombine.high %v3828_v40, %v3828_v40 }
 0x330   :  { %v7548_v58 = vsel %vm7515_vm2, %v5799_v26, 0  ;;  %v3837_v22 = vcombine.high %v3835_v30, %v3835_v30  ;;  %v20283_v55 = vrot.slane %v3828_v40, %v18911_v0  ;;  %v3851_v37 = vrot.slane %v3835_v30, %v18911_v0 }
 0x331   :  { %v20278_v14 = vand.u32 4294901760, %v7548_v58  ;;  %v20287_v47 = vrot.slane %v6290_v31, %v18911_v0  ;;  %v20290_v3 = vrot.slane %v16938_v51, %v18911_v0  ;;  %v3858_v15 = vrot.slane %v3836_v44, %v18911_v0 }
 0x332   :  { %v20297_v2 = vrot.slane %v3837_v22, %v18911_v0  ;;  %v3866_v26 = vcombine.high %v20283_v55, %v20283_v55  ;;  %v3867_v52 = vcombine.high %v3851_v37, %v3851_v37  ;;  %v7550_v36 = vsel %vm7515_vm2, %v5848_v32, 0 }
 0x333   :  { %24080 = vst [vmem:[#allocation66_spill] sm:$0xff] %v20278_v14  ;;  %v20293_v7 = vsub.f32 %v7548_v58, %v20278_v14  ;;  %v3868_v58 = vcombine.high %v3858_v15, %v3858_v15  ;;  %v20306_v48 = vand.u32 4294901760, %v7550_v36  ;;  %v3733_v44 = vcombine.high %v1653_v12, %v1653_v12 }
 0x334   :  { %v20308_v31 = vcombine.low %v3858_v15, %v3866_v26  ;;  %v20311_v51 = vcombine.low %v20297_v2, %v3867_v52  ;;  %v3740_v22 = vrot.slane %v1653_v12, %v18911_v0  ;;  %v24085_v15 = vrot.slane %v19844_v57, %v18911_v0 }
 0x335   :  { %24081 = vst [vmem:[#allocation67_spill] sm:$0xff] %v20293_v7  ;;  %17728 = vmatprep.mubr.f32.mxu1 %v20293_v7  ;;  %v23828_v30 = vand.u32 4294901760, %v20293_v7  ;;  %24082 = vst [vmem:[#allocation68_spill] sm:$0xff] %v20306_v48  ;;  %v20317_v40 = vcombine.low %v3868_v58, %v3851_v37  ;;  %v20320_v18 = vsub.f32 %v7550_v36, %v20306_v48  ;;  %v1654_v37 = vpop.trf.xlu1 }
 0x336   :  { %v5897_v26 = vcombine.low %v24085_v15, %v24084_v5  ;;  %v3747_v12 = vrot.slane %v3733_v44, %v18911_v0  ;;  %v3748_v14 = vcombine.high %v3740_v22, %v3740_v22  ;;  %v3782_v36 = vcombine.high %v1654_v37, %v1654_v37 }
 0x337   :  { %v7850_v32 = vsub.f32 %v20293_v7, %v23828_v30  ;;  %24083 = vst [vmem:[#allocation69_spill] sm:$0xff] %v20320_v18  ;;  %v3756_v30 = vrot.slane %v3740_v22, %v18911_v0  ;;  %v23835_v48 = vand.u32 4294901760, %v20320_v18  ;;  %17729 = vmatmul.mubr.f32.gmra.mrb[30].mxu1 %v20320_v18 }
 0x338   :  { %v7552_v56 = vsel %vm7515_vm2, %v5897_v26, 0  ;;  %v3749_v57 = vcombine.high %v3747_v12, %v3747_v12  ;;  %v3763_v5 = vrot.slane %v3747_v12, %v18911_v0  ;;  %v3770_v15 = vrot.slane %v3748_v14, %v18911_v0 }
 0x339   :  { %v7851_v58 = vand.u32 4294901760, %v7850_v32  ;;  %v20339_v44 = vand.u32 4294901760, %v7552_v56  ;;  %v7860_v22 = vsub.f32 %v20320_v18, %v23835_v48  ;;  %v24086_v32 = vrot.slane %v19896_v11, %v18911_v0 }
 0x33a   :  { %v3789_v26 = vrot.slane %v1654_v37, %v18911_v0  ;;  %v3777_v7 = vrot.slane %v3749_v57, %v18911_v0  ;;  %v6389_v12 = vcombine.low %v3756_v30, %v3770_v15  ;;  %v16939_v42 = vcombine.high %v3756_v30, %v3770_v15 }
 0x33b   :  { %17564 = vmatprep.mubr.f32.mxu0 %v7851_v58  ;;  %v5946_v52 = vcombine.low %v24086_v32, %v19988_v28  ;;  %v20351_v14 = vsub.f32 %v7552_v56, %v20339_v44  ;;  %v7861_v58 = vand.u32 4294901760, %v7860_v22  ;;  %v3796_v48 = vrot.slane %v3782_v36, %v18911_v0 }
 0x33c   :  { %v3797_v18 = vcombine.high %v3789_v26, %v3789_v26  ;;  %v6391_v25 = vcombine.low %v3763_v5, %v3777_v7  ;;  %v6405_v11 = vrot.slane %v6389_v12, %v18911_v0  ;;  %v20357_v28 = vrot.slane %v16939_v42, %v18911_v0 }
 0x33d   :  { %v7554_v46 = vsel %vm7515_vm2, %v5946_v52, 0  ;;  %v16940_v37 = vcombine.high %v3763_v5, %v3777_v7  ;;  %17731 = vmatprep.mubr.f32.mxu1 %v20351_v14  ;;  %17565 = vmatmul.mubr.f32.gmra.mrb[80].mxu0 %v7861_v58  ;;  %v23840_v30 = vand.u32 4294901760, %v20351_v14  ;;  %v3804_v57 = vrot.slane %v3789_v26, %v18911_v0 }
 0x33e   :  { %v20361_v56 = vand.u32 4294901760, %v7554_v46  ;;  %v3811_v52 = vrot.slane %v3796_v48, %v18911_v0  ;;  %v20366_v36 = vrot.slane %v6391_v25, %v18911_v0  ;;  %v24088_v15 = vrot.slane %v20259_v10, %v18911_v0  ;;  %v1686_v10 = vpop.trf.xlu0 }
 0x33f   :  { %v20374_v7 = vrot.slane %v16940_v37, %v18911_v0  ;;  %v3818_v5 = vrot.slane %v3797_v18, %v18911_v0  ;;  %v7870_v22 = vsub.f32 %v20351_v14, %v23840_v30  ;;  %v3869_v48 = vcombine.high %v20297_v2, %v20297_v2 }
 0x340   :  { %24087 = vst [vmem:[#allocation70_spill] sm:$0xff] %v20361_v56  ;;  %v20371_v42 = vcombine.low %v24088_v15, %v6405_v11  ;;  %v20381_v32 = vsub.f32 %v7554_v46, %v20361_v56  ;;  %v6440_v25 = vcombine.low %v3811_v52, %v20283_v55  ;;  %v6510_v18 = vrot.slane %v20311_v51, %v18911_v0 }
 0x341   :  { %v6438_v12 = vcombine.low %v3804_v57, %v3818_v5  ;;  %v16941_v58 = vcombine.high %v3804_v57, %v3818_v5  ;;  %v7871_v11 = vand.u32 4294901760, %v7870_v22  ;;  %v3870_v55 = vcombine.high %v1686_v10, %v1686_v10 }
 0x342   :  { %v23839_v37 = vand.u32 4294901760, %v20381_v32  ;;  %17732 = vmatmul.mubr.f32.gmra.mrb[32].mxu1 %v20381_v32  ;;  %v6468_v46 = vrot.slane %v6440_v25, %v18911_v0  ;;  %v3877_v15 = vrot.slane %v1686_v10, %v18911_v0  ;;  %v5979_v57 = vcombine.low %v19974_v29, %v19977_v6 }
 0x343   :  { %v20394_v52 = vrot.slane %v6438_v12, %v18911_v0  ;;  %v6461_v2 = vrot.slane %v16941_v58, %v18911_v0  ;;  %17567 = vmatprep.mubr.f32.mxu0 %v7871_v11  ;;  %v3884_v5 = vrot.slane %v3870_v55, %v18911_v0  ;;  %v24089_v22 = vcombine.low %v20033_v45, %v20036_v63 }
 0x344   :  { %v7880_v51 = vsub.f32 %v20381_v32, %v23839_v37  ;;  %v24090_v12 = vrot.slane %v19917_v34, %v18911_v0  ;;  %v24091_v10 = vrot.slane %v20015_v1, %v18911_v0  ;;  %v3885_v11 = vcombine.high %v3877_v15, %v3877_v15  ;;  %v1717_v37 = vpop.trf.xlu1 }
 0x345   :  { %v5994_v25 = vrot.slane %v24089_v22, %v18911_v0  ;;  %v20416_v6 = vcombine.low %v6461_v2, %v6468_v46  ;;  %v3892_v55 = vrot.slane %v3877_v15, %v18911_v0  ;;  %v3899_v45 = vrot.slane %v3884_v5, %v18911_v0 }
 0x346   :  { %v6028_v58 = vcombine.low %v24091_v10, %v24090_v12  ;;  %v7881_v30 = vand.u32 4294901760, %v7880_v51  ;;  %v5987_v63 = vrot.slane %v5979_v57, %v18911_v0  ;;  %v24092_v34 = vrot.slane %v19922_v49, %v18911_v0 }
 0x347   :  { %v24093_v1 = vrot.slane %v19919_v54, %v18911_v0  ;;  %v3906_v12 = vrot.slane %v3885_v11, %v18911_v0  ;;  %v3907_v46 = vcombine.high %v3892_v55, %v3892_v55  ;;  %v6489_v2 = vcombine.low %v3869_v48, %v3892_v55 }
 0x348   :  { %v6036_v10 = vrot.slane %v6028_v58, %v18911_v0  ;;  %17568 = vmatmul.mubr.f32.gmra.mrb[82].mxu0 %v7881_v30  ;;  %v5995_v15 = vcombine.low %v5987_v63, %v5994_v25  ;;  %v3909_v5 = vcombine.high %v1717_v37, %v1717_v37  ;;  %v3916_v57 = vrot.slane %v1717_v37, %v18911_v0 }
 0x349   :  { %v6029_v22 = vcombine.low %v24093_v1, %v24092_v34  ;;  %v3908_v29 = vcombine.high %v3906_v12, %v3906_v12  ;;  %v6517_v49 = vrot.slane %v6489_v2, %v18911_v0  ;;  %v20432_v26 = vcombine.low %v3906_v12, %v3907_v46  ;;  %v1749_v34 = vpop.trf.xlu0  ;;  %v1718_v46 = vpop.trf.xlu1 }
 0x34a   :  { %v6085_v54 = vrot.slane %v20008_v60, %v18911_v0  ;;  %v7556_v11 = vsel %vm7515_vm2, %v5995_v15, 0  ;;  %v3923_v58 = vrot.slane %v3909_v5, %v18911_v0  ;;  %v3924_v30 = vcombine.high %v3916_v57, %v3916_v57 }
 0x34b   :  { %v6043_v51 = vrot.slane %v6029_v22, %v18911_v0  ;;  %v20438_v25 = vcombine.low %v6510_v18, %v6517_v49  ;;  %v20440_v55 = vcombine.low %v3908_v29, %v3899_v45  ;;  %v20444_v63 = vand.u32 4294901760, %v7556_v11 }
 0x34c   :  { %v3925_v22 = vcombine.high %v3923_v58, %v3923_v58  ;;  %v3932_v60 = vrot.slane %v3916_v57, %v18911_v0  ;;  %v3939_v12 = vrot.slane %v3923_v58, %v18911_v0  ;;  %v3946_v45 = vrot.slane %v3924_v30, %v18911_v0 }
 0x34d   :  { %v6044_v48 = vcombine.low %v6036_v10, %v6043_v51  ;;  %24094 = vst [vmem:[#allocation71_spill] sm:$0xff] %v20444_v63  ;;  %v20452_v18 = vsub.f32 %v7556_v11, %v20444_v63  ;;  %v6092_v10 = vrot.slane %v20116_v39, %v18911_v0  ;;  %v3997_v15 = vcombine.high %v1749_v34, %v1749_v34 }
 0x34e   :  { %v3953_v2 = vrot.slane %v3925_v22, %v18911_v0  ;;  %v4004_v51 = vrot.slane %v1749_v34, %v18911_v0  ;;  %v6537_v49 = vcombine.low %v3932_v60, %v3946_v45  ;;  %v16942_v11 = vcombine.high %v3932_v60, %v3946_v45 }
 0x34f   :  { %v7558_v1 = vsel %vm7515_vm2, %v6044_v48, 0  ;;  %17734 = vmatprep.mubr.f32.mxu1 %v20452_v18  ;;  %v23841_v5 = vand.u32 4294901760, %v20452_v18  ;;  %v6093_v30 = vcombine.low %v6085_v54, %v6092_v10  ;;  %v4011_v22 = vrot.slane %v3997_v15, %v18911_v0 }
 0x350   :  { %v20454_v29 = vand.u32 4294901760, %v7558_v1  ;;  %v6584_v48 = vcombine.low %v3939_v12, %v3953_v2  ;;  %v16943_v58 = vcombine.high %v3939_v12, %v3953_v2  ;;  %v20472_v34 = vrot.slane %v6537_v49, %v18911_v0 }
 0x351   :  { %v7890_v39 = vsub.f32 %v20452_v18, %v23841_v5  ;;  %v20475_v37 = vrot.slane %v16942_v11, %v18911_v0  ;;  %v7560_v12 = vsel %vm7515_vm2, %v6093_v30, 0  ;;  %v4012_v45 = vcombine.high %v4004_v51, %v4004_v51 }
 0x352   :  { %24095 = vst [vmem:[#allocation72_spill] sm:$0xff] %v20454_v29  ;;  %v20464_v57 = vsub.f32 %v7558_v1, %v20454_v29  ;;  %v20479_v60 = vrot.slane %v6584_v48, %v18911_v0  ;;  %v20482_v54 = vrot.slane %v16943_v58, %v18911_v0  ;;  %v20490_v49 = vand.u32 4294901760, %v7560_v12 }
 0x353   :  { %v7891_v2 = vand.u32 4294901760, %v7890_v39  ;;  %v4013_v11 = vcombine.high %v4011_v22, %v4011_v22  ;;  %v4020_v48 = vrot.slane %v4004_v51, %v18911_v0  ;;  %v4027_v5 = vrot.slane %v4011_v22, %v18911_v0 }
 0x354   :  { %17735 = vmatmul.mubr.f32.gmra.mrb[34].mxu1 %v20464_v57  ;;  %v23842_v1 = vand.u32 4294901760, %v20464_v57  ;;  %24096 = vst [vmem:[#allocation73_spill] sm:$0xff] %v20490_v49  ;;  %v4034_v58 = vrot.slane %v4012_v45, %v18911_v0  ;;  %v20496_v39 = vsub.f32 %v7560_v12, %v20490_v49  ;;  %v24097_v10 = vcombine.low %v20099_v38, %v20102_v16 }
 0x355   :  { %17570 = vmatprep.mubr.f32.mxu0 %v7891_v2  ;;  %v24098_v29 = vcombine.low %v20105_v19, %v20167_v35  ;;  %v4041_v22 = vrot.slane %v4013_v11, %v18911_v0  ;;  %v4042_v63 = vcombine.high %v4020_v48, %v4020_v48  ;;  %v4043_v45 = vcombine.high %v4027_v5, %v4027_v5 }
 0x356   :  { %v7900_v15 = vsub.f32 %v20464_v57, %v23842_v1  ;;  %v6134_v1 = vrot.slane %v24097_v10, %v18911_v0  ;;  %v4044_v56 = vcombine.high %v4034_v58, %v4034_v58  ;;  %17737 = vmatprep.mubr.f32.mxu1 %v20496_v39  ;;  %v23849_v12 = vand.u32 4294901760, %v20496_v39 }
 0x357   :  { %v6141_v51 = vrot.slane %v24098_v29, %v18911_v0  ;;  %v3965_v38 = vrot.slane %v1718_v46, %v18911_v0  ;;  %v20510_v16 = vcombine.low %v4034_v58, %v4042_v63  ;;  %v20514_v19 = vcombine.low %v4041_v22, %v4043_v45 }
 0x358   :  { %v7901_v30 = vand.u32 4294901760, %v7900_v15  ;;  %v3958_v15 = vcombine.high %v1718_v46, %v1718_v46  ;;  %v20512_v10 = vcombine.low %v4044_v56, %v4027_v5  ;;  %v24099_v35 = vrot.slane %v20056_v8, %v18911_v0 }
 0x359   :  { %v6142_v2 = vcombine.low %v6134_v1, %v6141_v51  ;;  %v24100_v29 = vrot.slane %v20042_v9, %v18911_v0  ;;  %v7910_v1 = vsub.f32 %v20496_v39, %v23849_v12  ;;  %v3973_v46 = vcombine.high %v3965_v38, %v3965_v38 }
 0x35a   :  { %17571 = vmatmul.mubr.f32.gmra.mrb[84].mxu0 %v7901_v30  ;;  %v3972_v63 = vrot.slane %v3958_v15, %v18911_v0  ;;  %v3980_v51 = vrot.slane %v3965_v38, %v18911_v0  ;;  %v1750_v15 = vpop.trf.xlu0  ;;  %v4045_v5 = vcombine.high %v4041_v22, %v4041_v22 }
 0x35b   :  { %v6176_v11 = vcombine.low %v24100_v29, %v24099_v35  ;;  %v7562_v30 = vsel %vm7515_vm2, %v6142_v2, 0  ;;  %v7911_v58 = vand.u32 4294901760, %v7910_v1  ;;  %v3994_v2 = vrot.slane %v3973_v46, %v18911_v0 }
 0x35c   :  { %v20533_v9 = vand.u32 4294901760, %v7562_v30  ;;  %v3987_v45 = vrot.slane %v3972_v63, %v18911_v0  ;;  %v6183_v29 = vrot.slane %v20179_v21, %v18911_v0  ;;  %v4046_v38 = vcombine.high %v1750_v15, %v1750_v15 }
 0x35d   :  { %v6190_v12 = vrot.slane %v6176_v11, %v18911_v0  ;;  %17573 = vmatprep.mubr.f32.mxu0 %v7911_v58  ;;  %v6586_v8 = vcombine.low %v3980_v51, %v3994_v2  ;;  %v16944_v56 = vcombine.high %v3980_v51, %v3994_v2  ;;  %v4053_v46 = vrot.slane %v1750_v15, %v18911_v0 }
 0x35e   :  { %24101 = vst [vmem:[#allocation74_spill] sm:$0xff] %v20533_v9  ;;  %v20539_v35 = vsub.f32 %v7562_v30, %v20533_v9  ;;  %v20544_v1 = vcombine.low %v3987_v45, %v4020_v48  ;;  %v24103_v9 = vrot.slane %v20139_v24, %v18911_v0  ;;  %v24104_v21 = vrot.slane %v20135_v17, %v18911_v0 }
 0x35f   :  { %v6191_v63 = vcombine.low %v6183_v29, %v6190_v12  ;;  %v20556_v11 = vrot.slane %v6586_v8, %v18911_v0  ;;  %v20559_v48 = vrot.slane %v16944_v56, %v18911_v0  ;;  %v4060_v58 = vrot.slane %v4046_v38, %v18911_v0 }
 0x360   :  { %24102 = vst [vmem:[#allocation75_spill] sm:$0xff] %v20539_v35  ;;  %17738 = vmatmul.mubr.f32.gmra.mrb[36].mxu1 %v20539_v35  ;;  %v23852_v30 = vand.u32 4294901760, %v20539_v35  ;;  %v6225_v22 = vcombine.low %v24104_v21, %v24103_v9  ;;  %v4061_v45 = vcombine.high %v4053_v46, %v4053_v46  ;;  %v4068_v24 = vrot.slane %v4053_v46, %v18911_v0  ;;  %v1781_v9 = vpop.trf.xlu1 }
 0x361   :  { %v7564_v51 = vsel %vm7515_vm2, %v6191_v63, 0  ;;  %v4075_v2 = vrot.slane %v4060_v58, %v18911_v0  ;;  %v6232_v15 = vrot.slane %v20145_v53, %v18911_v0  ;;  %v4085_v12 = vcombine.high %v1781_v9, %v1781_v9 }
 0x362   :  { %v7920_v17 = vsub.f32 %v20539_v35, %v23852_v30  ;;  %v20571_v56 = vand.u32 4294901760, %v7564_v51  ;;  %v4082_v29 = vrot.slane %v4061_v45, %v18911_v0  ;;  %v4083_v38 = vcombine.high %v4068_v24, %v4068_v24 }
 0x363   :  { %v6682_v63 = vcombine.low %v4045_v5, %v4068_v24  ;;  %v6239_v30 = vrot.slane %v6225_v22, %v18911_v0  ;;  %v4092_v8 = vrot.slane %v1781_v9, %v18911_v0  ;;  %v6274_v53 = vcombine.low %v20239_v43, %v20242_v4 }
 0x364   :  { %v7921_v46 = vand.u32 4294901760, %v7920_v17  ;;  %v20578_v21 = vsub.f32 %v7564_v51, %v20571_v56  ;;  %v4084_v49 = vcombine.high %v4082_v29, %v4082_v29  ;;  %v6683_v35 = vcombine.low %v4082_v29, %v4083_v38 }
 0x365   :  { %v6692_v58 = vrot.slane %v6682_v63, %v18911_v0  ;;  %v6240_v5 = vcombine.low %v6232_v15, %v6239_v30  ;;  %v4099_v45 = vrot.slane %v4085_v12, %v18911_v0  ;;  %v4100_v51 = vcombine.high %v4092_v8, %v4092_v8 }
 0x366   :  { %17574 = vmatmul.mubr.f32.gmra.mrb[86].mxu0 %v7921_v46  ;;  %17740 = vmatprep.mubr.f32.mxu1 %v20578_v21  ;;  %v4108_v24 = vrot.slane %v4092_v8, %v18911_v0  ;;  %v6684_v22 = vcombine.low %v4084_v49, %v4075_v2  ;;  %v6699_v17 = vrot.slane %v6683_v35, %v18911_v0  ;;  %v23872_v9 = vand.u32 4294901760, %v20578_v21  ;;  %v1782_v46 = vpop.trf.xlu1 }
 0x367   :  { %v24105_v29 = vcombine.low %v20229_v41, %v20232_v62  ;;  %v7566_v43 = vsel %vm7515_vm2, %v6240_v5, 0  ;;  %v4101_v4 = vcombine.high %v4099_v45, %v4099_v45  ;;  %v4115_v30 = vrot.slane %v4099_v45, %v18911_v0 }
 0x368   :  { %v4122_v12 = vrot.slane %v4100_v51, %v18911_v0  ;;  %v6706_v15 = vrot.slane %v6684_v22, %v18911_v0  ;;  %v20598_v8 = vcombine.low %v6692_v58, %v6699_v17  ;;  %v20600_v49 = vand.u32 4294901760, %v7566_v43 }
 0x369   :  { %v6281_v38 = vrot.slane %v24105_v29, %v18911_v0  ;;  %v7930_v35 = vsub.f32 %v20578_v21, %v23872_v9  ;;  %v4129_v41 = vrot.slane %v4101_v4, %v18911_v0  ;;  %v6288_v63 = vrot.slane %v6274_v53, %v18911_v0  ;;  %v24143_v9 = vld [vmem:[#allocation4_spill] sm:$0xff] }
 0x36a   :  { %v6685_v62 = vcombine.low %v4108_v24, %v4122_v12  ;;  %v16945_v2 = vcombine.high %v4108_v24, %v4122_v12  ;;  %v20608_v5 = vsub.f32 %v7566_v43, %v20600_v49  ;;  %v24106_v58 = vrot.slane %v20187_v13, %v18911_v0 }
 0x36b   :  { %v7931_v45 = vand.u32 4294901760, %v7930_v35  ;;  %v24107_v51 = vrot.slane %v20270_v27, %v18911_v0  ;;  %v24108_v17 = vcombine.low %v20287_v47, %v20290_v3  ;;  %v6732_v53 = vcombine.low %v4115_v30, %v4129_v41 }
 0x36c   :  { %v6713_v24 = vrot.slane %v6685_v62, %v18911_v0  ;;  %v16946_v4 = vcombine.high %v4115_v30, %v4129_v41  ;;  %v20622_v43 = vrot.slane %v16945_v2, %v18911_v0  ;;  %17741 = vmatmul.mubr.f32.gmra.mrb[38].mxu1 %v20608_v5  ;;  %v6289_v13 = vcombine.low %v6281_v38, %v6288_v63 }
 0x36d   :  { %v6323_v22 = vcombine.low %v24107_v51, %v24106_v58  ;;  %v6330_v29 = vrot.slane %v24108_v17, %v18911_v0  ;;  %17576 = vmatprep.mubr.f32.mxu0 %v7931_v45  ;;  %v23871_v12 = vand.u32 4294901760, %v20608_v5  ;;  %v4134_v35 = vcombine.high %v1782_v46, %v1782_v46 }
 0x36e   :  { %v20627_v58 = vcombine.low %v6706_v15, %v6713_v24  ;;  %v20630_v47 = vrot.slane %v6732_v53, %v18911_v0  ;;  %v20633_v3 = vrot.slane %v16946_v4, %v18911_v0  ;;  %v4141_v30 = vrot.slane %v1782_v46, %v18911_v0 }
 0x36f   :  { %v6337_v27 = vrot.slane %v6323_v22, %v18911_v0  ;;  %v7568_v41 = vsel %vm7515_vm2, %v6289_v13, 0  ;;  %v7940_v38 = vsub.f32 %v20608_v5, %v23871_v12  ;;  %v4148_v2 = vrot.slane %v4134_v35, %v18911_v0 }
 0x370   :  { %v6763_v15 = vcombine.low %v20622_v43, %v20630_v47  ;;  %v20643_v63 = vand.u32 4294901760, %v7568_v41  ;;  %v4149_v45 = vcombine.high %v4141_v30, %v4141_v30  ;;  %v4156_v51 = vrot.slane %v4141_v30, %v18911_v0 }
 0x371   :  { %v6338_v62 = vcombine.low %v6330_v29, %v6337_v27  ;;  %v7941_v22 = vand.u32 4294901760, %v7940_v38  ;;  %v4163_v17 = vrot.slane %v4148_v2, %v18911_v0  ;;  %v24109_v24 = vrot.slane %v20197_v33, %v18911_v0 }
 0x372   :  { %v24110_v29 = vrot.slane %v20195_v50, %v18911_v0  ;;  %v20655_v4 = vsub.f32 %v7568_v41, %v20643_v63  ;;  %v4170_v27 = vrot.slane %v4149_v45, %v18911_v0  ;;  %v6386_v35 = vrot.slane %v20263_v61, %v18911_v0 }
 0x373   :  { %v7570_v46 = vsel %vm7515_vm2, %v6338_v62, 0  ;;  %17577 = vmatmul.mubr.f32.gmra.mrb[88].mxu0 %v7941_v22  ;;  %v6781_v30 = vcombine.low %v4163_v17, %v19142_v20  ;;  %v6428_v33 = vrot.slane %v20371_v42, %v18911_v0  ;;  %v24111_v50 = vcombine.low %v20357_v28, %v20366_v36 }
 0x374   :  { %v6371_v53 = vcombine.low %v24110_v29, %v24109_v24  ;;  %v20657_v13 = vand.u32 4294901760, %v7570_v46  ;;  %17743 = vmatprep.mubr.f32.mxu1 %v20655_v4  ;;  %v6734_v2 = vcombine.low %v4156_v51, %v4170_v27  ;;  %v16947_v61 = vcombine.high %v4156_v51, %v4170_v27 }
 0x375   :  { %v6435_v41 = vrot.slane %v24111_v50, %v18911_v0  ;;  %v23870_v45 = vand.u32 4294901760, %v20655_v4  ;;  %v6797_v20 = vrot.slane %v6781_v30, %v18911_v0  ;;  %v24112_v42 = vcombine.low %v20374_v7, %v20394_v52 }
 0x376   :  { %v6379_v38 = vrot.slane %v6371_v53, %v18911_v0  ;;  %v20672_v62 = vsub.f32 %v7570_v46, %v20657_v13  ;;  %v20682_v28 = vrot.slane %v6734_v2, %v18911_v0  ;;  %v6790_v36 = vrot.slane %v16947_v61, %v18911_v0 }
 0x377   :  { %v6436_v17 = vcombine.low %v6428_v33, %v6435_v41  ;;  %v6477_v24 = vrot.slane %v24112_v42, %v18911_v0  ;;  %v7950_v51 = vsub.f32 %v20655_v4, %v23870_v45  ;;  %v6484_v7 = vrot.slane %v20416_v6, %v18911_v0  ;;  %v24140_v45 = vld [vmem:[#allocation32_spill] sm:$0xff] }
 0x378   :  { %v6387_v22 = vcombine.low %v6379_v38, %v6386_v35  ;;  %17744 = vmatmul.mubr.f32.gmra.mrb[40].mxu1 %v20672_v62  ;;  %v23869_v46 = vand.u32 4294901760, %v20672_v62  ;;  %v24113_v52 = vrot.slane %v20317_v40, %v18911_v0  ;;  %v24114_v27 = vrot.slane %v20308_v31, %v18911_v0 }
 0x379   :  { %v7574_v53 = vsel %vm7515_vm2, %v6436_v17, 0  ;;  %v6764_v30 = vcombine.low %v20633_v3, %v20682_v28  ;;  %v20701_v38 = vcombine.low %v6790_v36, %v6797_v20  ;;  %v7951_v50 = vand.u32 4294901760, %v7950_v51 }
 0x37a   :  { %v7572_v29 = vsel %vm7515_vm2, %v6387_v22, 0  ;;  %v6518_v35 = vcombine.low %v24114_v27, %v24113_v52  ;;  %v7960_v41 = vsub.f32 %v20672_v62, %v23869_v46  ;;  %v20708_v6 = vand.u32 4294901760, %v7574_v53  ;;  %v24139_v46 = vld [vmem:[#allocation33_spill] sm:$0xff] }
 0x37b   :  { %v20703_v33 = vand.u32 4294901760, %v7572_v29  ;;  %v6485_v2 = vcombine.low %v6477_v24, %v6484_v7  ;;  %17579 = vmatprep.mubr.f32.mxu0 %v7951_v50  ;;  %v6533_v3 = vrot.slane %v20438_v25, %v18911_v0  ;;  %v24115_v61 = vrot.slane %v20440_v55, %v18911_v0 }
 0x37c   :  { %v6526_v40 = vrot.slane %v6518_v35, %v18911_v0  ;;  %v24116_v20 = vrot.slane %v20432_v26, %v18911_v0  ;;  %v24117_v17 = vcombine.low %v20472_v34, %v20475_v37  ;;  %v7961_v24 = vand.u32 4294901760, %v7960_v41 }
 0x37d   :  { %v20712_v31 = vsub.f32 %v7572_v29, %v20703_v33  ;;  %v20727_v28 = vsub.f32 %v7574_v53, %v20708_v6  ;;  %v7576_v36 = vsel %vm7515_vm2, %v6485_v2, 0  ;;  %v6616_v25 = vcombine.low %v20479_v60, %v20482_v54 }
 0x37e   :  { %v6567_v22 = vcombine.low %v24116_v20, %v24115_v61  ;;  %v6582_v42 = vrot.slane %v24117_v17, %v18911_v0  ;;  %v20734_v26 = vand.u32 4294901760, %v7576_v36  ;;  %v6534_v51 = vcombine.low %v6526_v40, %v6533_v3  ;;  %17580 = vmatmul.mubr.f32.gmra.mrb[90].mxu0 %v7961_v24 }
 0x37f   :  { %17746 = vmatprep.mubr.f32.mxu1 %v20712_v31  ;;  %v23866_v55 = vand.u32 4294901760, %v20712_v31  ;;  %v23865_v37 = vand.u32 4294901760, %v20727_v28  ;;  %v6624_v34 = vrot.slane %v6616_v25, %v18911_v0  ;;  %v24118_v60 = vcombine.low %v20556_v11, %v20559_v48 }
 0x380   :  { %v6575_v29 = vrot.slane %v6567_v22, %v18911_v0  ;;  %17747 = vmatmul.mubr.f32.gmra.mrb[42].mxu1 %v20727_v28  ;;  %v24119_v53 = vrot.slane %v20510_v16, %v18911_v0  ;;  %v24120_v7 = vrot.slane %v20544_v1, %v18911_v0  ;;  %v20754_v35 = vsub.f32 %v7576_v36, %v20734_v26 }
 0x381   :  { %v6631_v54 = vrot.slane %v24118_v60, %v18911_v0  ;;  %v7970_v27 = vsub.f32 %v20712_v31, %v23866_v55  ;;  %v7578_v50 = vsel %vm7515_vm2, %v6534_v51, 0  ;;  %v7980_v16 = vsub.f32 %v20727_v28, %v23865_v37  ;;  %v24138_v37 = vld [vmem:[#allocation30_spill] sm:$0xff] }
 0x382   :  { %v6665_v52 = vcombine.low %v24120_v7, %v24119_v53  ;;  %v6583_v41 = vcombine.low %v6575_v29, %v6582_v42  ;;  %v20757_v2 = vand.u32 4294901760, %v7578_v50  ;;  %v24121_v1 = vrot.slane %v20514_v19, %v18911_v0  ;;  %17749 = vmatprep.mubr.f32.mxu1 %v20754_v35 }
 0x383   :  { %v6632_v11 = vcombine.low %v6624_v34, %v6631_v54  ;;  %v24122_v48 = vrot.slane %v20512_v10, %v18911_v0  ;;  %v7971_v3 = vand.u32 4294901760, %v7970_v27  ;;  %v23864_v20 = vand.u32 4294901760, %v20754_v35 }
 0x384   :  { %v7580_v61 = vsel %vm7515_vm2, %v6583_v41, 0  ;;  %v6673_v22 = vrot.slane %v6665_v52, %v18911_v0  ;;  %v20773_v17 = vsub.f32 %v7578_v50, %v20757_v2  ;;  %v7981_v42 = vand.u32 4294901760, %v7980_v16 }
 0x385   :  { %v6666_v40 = vcombine.low %v24122_v48, %v24121_v1  ;;  %v20775_v24 = vand.u32 4294901760, %v7580_v61  ;;  %v7582_v19 = vsel %vm7515_vm2, %v6632_v11, 0  ;;  %17582 = vmatprep.mubr.f32.mxu0 %v7971_v3  ;;  %v7990_v10 = vsub.f32 %v20754_v35, %v23864_v20  ;;  %v24137_v20 = vld [vmem:[#allocation31_spill] sm:$0xff] }
 0x386   :  { %v20781_v36 = vand.u32 4294901760, %v7582_v19  ;;  %v6722_v51 = vrot.slane %v20598_v8, %v18911_v0  ;;  %17750 = vmatmul.mubr.f32.gmra.mrb[44].mxu1 %v20773_v17  ;;  %17583 = vmatmul.mubr.f32.gmra.mrb[92].mxu0 %v7981_v42  ;;  %v23862_v34 = vand.u32 4294901760, %v20773_v17  ;;  %v6729_v60 = vrot.slane %v20627_v58, %v18911_v0 }
 0x387   :  { %v6680_v25 = vrot.slane %v6666_v40, %v18911_v0  ;;  %v20788_v29 = vsub.f32 %v7580_v61, %v20775_v24  ;;  %v6771_v54 = vrot.slane %v6763_v15, %v18911_v0  ;;  %v7991_v53 = vand.u32 4294901760, %v7990_v10 }
 0x388   :  { %v20798_v7 = vsub.f32 %v7582_v19, %v20781_v36  ;;  %v6778_v52 = vrot.slane %v6764_v30, %v18911_v0  ;;  %v8000_v27 = vsub.f32 %v20773_v17, %v23862_v34  ;;  %v6730_v50 = vcombine.low %v6722_v51, %v6729_v60  ;;  %v24125_v60 = vld [vmem:[#allocation19_spill] sm:$0xff]  ;;  %v24136_v34 = vld [vmem:[#allocation28_spill] sm:$0xff] }
 0x389   :  { %v6681_v8 = vcombine.low %v6673_v22, %v6680_v25  ;;  %17752 = vmatprep.mubr.f32.mxu1 %v20788_v29  ;;  %v23861_v58 = vand.u32 4294901760, %v20788_v29  ;;  %v24123_v43 = vrot.slane %v19156_v59, %v18911_v0  ;;  %v24124_v47 = vrot.slane %v19150_v23, %v18911_v0  ;;  %17585 = vmatprep.mubr.f32.mxu0 %v7991_v53 }
 0x38a   :  { %v23858_v30 = vand.u32 4294901760, %v20798_v7  ;;  %v6779_v16 = vcombine.low %v6771_v54, %v6778_v52  ;;  %v6820_v11 = vrot.slane %v20701_v38, %v18911_v0  ;;  %v8001_v1 = vand.u32 4294901760, %v8000_v27  ;;  %17753 = vmatmul.mubr.f32.gmra.mrb[46].mxu1 %v20798_v7  ;;  %v24126_v54 = vld [vmem:[#allocation18_spill] sm:$0xff] }
 0x38b   :  { %v6813_v15 = vcombine.low %v24124_v47, %v24123_v43  ;;  %v7584_v41 = vsel %vm7515_vm2, %v6681_v8, 0  ;;  %v8010_v59 = vsub.f32 %v20788_v29, %v23861_v58  ;;  %v7586_v23 = vsel %vm7515_vm2, %v6730_v50, 0  ;;  %v24127_v43 = vld [vmem:[#allocation21_spill] sm:$0xff]  ;;  %v24128_v47 = vld [vmem:[#allocation20_spill] sm:$0xff] }
 0x38c   :  { %v20817_v48 = vand.u32 4294901760, %v7584_v41  ;;  %v20823_v40 = vand.u32 4294901760, %v7586_v23  ;;  %v8020_v3 = vsub.f32 %v20798_v7, %v23858_v30  ;;  %v7588_v61 = vsel %vm7515_vm2, %v6779_v16, 0  ;;  %17586 = vmatmul.mubr.f32.gmra.mrb[94].mxu0 %v8001_v1  ;;  %v24129_v1 = vld [vmem:[#allocation23_spill] sm:$0xff]  ;;  %v24135_v58 = vld [vmem:[#allocation29_spill] sm:$0xff] }
 0x38d   :  { %v6827_v38 = vrot.slane %v6813_v15, %v18911_v0  ;;  %v8011_v42 = vand.u32 4294901760, %v8010_v59  ;;  %v20833_v19 = vand.u32 4294901760, %v7588_v61  ;;  %v20840_v53 = vsub.f32 %v24126_v54, %v24125_v60  ;;  %v24130_v59 = vld [vmem:[#allocation22_spill] sm:$0xff] }
 0x38e   :  { %v20831_v22 = vsub.f32 %v7584_v41, %v20817_v48  ;;  %v20836_v10 = vsub.f32 %v7586_v23, %v20823_v40  ;;  %v8021_v25 = vand.u32 4294901760, %v8020_v3  ;;  %v20852_v15 = vsub.f32 %v24128_v47, %v24127_v43  ;;  %v24145_v0 = vld [vmem:[#allocation10_spill] sm:$0xff] }
 0x38f   :  { %v6828_v51 = vcombine.low %v6820_v11, %v6827_v38  ;;  %17588 = vmatprep.mubr.f32.mxu0 %v8011_v42  ;;  %v20845_v52 = vsub.f32 %v7588_v61, %v20833_v19  ;;  %v20863_v23 = vsub.f32 %v24130_v59, %v24129_v1  ;;  %v23860_v61 = vand.u32 4294901760, %v20840_v53 }
 0x390   :  { %17755 = vmatprep.mubr.f32.mxu1 %v20831_v22  ;;  %v23857_v8 = vand.u32 4294901760, %v20831_v22  ;;  %v23856_v50 = vand.u32 4294901760, %v20836_v10  ;;  %17589 = vmatmul.mubr.f32.gmra.mrb[96].mxu0 %v8021_v25  ;;  %v23867_v54 = vand.u32 4294901760, %v20852_v15  ;;  %v20909_v55 = vsub.f32 %v24138_v37, %v24137_v20 }
 0x391   :  { %17756 = vmatmul.mubr.f32.gmra.mrb[48].mxu1 %v20836_v10  ;;  %v7590_v27 = vsel %vm7515_vm2, %v6828_v51, 0  ;;  %v23859_v11 = vand.u32 4294901760, %v20845_v52  ;;  %v20918_v12 = vsub.f32 %v24140_v45, %v24139_v46  ;;  %v24146_v20 = vand.u32 4294901760, %v24145_v0 }
 0x392   :  { %v8030_v41 = vsub.f32 %v20831_v22, %v23857_v8  ;;  %17758 = vmatprep.mubr.f32.mxu1 %v20845_v52  ;;  %v20858_v16 = vand.u32 4294901760, %v7590_v27  ;;  %v8040_v3 = vsub.f32 %v20836_v10, %v23856_v50  ;;  %v24131_v50 = vld [vmem:[#allocation25_spill] sm:$0xff]  ;;  %v24132_v8 = vld [vmem:[#allocation24_spill] sm:$0xff] }
 0x393   :  { %v8050_v25 = vsub.f32 %v20845_v52, %v23859_v11  ;;  %v20880_v30 = vsub.f32 %v24132_v8, %v24131_v50  ;;  %v8080_v8 = vsub.f32 %v20852_v15, %v23867_v54 }
 0x394   :  { %v8031_v38 = vand.u32 4294901760, %v8030_v41  ;;  %v20870_v42 = vsub.f32 %v7590_v27, %v20858_v16  ;;  %v8041_v51 = vand.u32 4294901760, %v8040_v3  ;;  %v23868_v27 = vand.u32 4294901760, %v20863_v23  ;;  %v24133_v3 = vld [vmem:[#allocation27_spill] sm:$0xff] }
 0x395   :  { %v8051_v47 = vand.u32 4294901760, %v8050_v25  ;;  %v8070_v41 = vsub.f32 %v20840_v53, %v23860_v61 }
 0x396   :  { %17591 = vmatprep.mubr.f32.mxu0 %v8031_v38  ;;  %17759 = vmatmul.mubr.f32.gmra.mrb[50].mxu1 %v20870_v42  ;;  %v23863_v59 = vand.u32 4294901760, %v20870_v42  ;;  %v24134_v38 = vld [vmem:[#allocation26_spill] sm:$0xff]  ;;  %v8090_v61 = vsub.f32 %v20863_v23, %v23868_v27 }
 0x397   :  { %17592 = vmatmul.mubr.f32.gmra.mrb[98].mxu0 %v8041_v51  ;;  %17761 = vmatprep.mubr.f32.mxu1 %v20840_v53  ;;  %v20889_v11 = vsub.f32 %v24134_v38, %v24133_v3  ;;  %v20903_v38 = vsub.f32 %v24136_v34, %v24135_v58  ;;  %v24148_v58 = vld [vmem:[#allocation37_spill] sm:$0xff] }
 0x398   :  { %17594 = vmatprep.mubr.f32.mxu0 %v8051_v47  ;;  %v8060_v25 = vsub.f32 %v20870_v42, %v23863_v59  ;;  %v23873_v47 = vand.u32 4294901760, %v20880_v30  ;;  %v8071_v59 = vand.u32 4294901760, %v8070_v41  ;;  %v8091_v27 = vand.u32 4294901760, %v8090_v61 }
 0x399   :  { %v23876_v54 = vand.u32 4294901760, %v20889_v11  ;;  %v24147_v46 = vand.u32 4294901760, %v20903_v38  ;;  %v23877_v61 = vand.u32 4294901760, %v20918_v12 }
 0x39a   :  { %17762 = vmatmul.mubr.f32.gmra.mrb[0].mxu1 %v20852_v15  ;;  %v8061_v51 = vand.u32 4294901760, %v8060_v25  ;;  %v8081_v25 = vand.u32 4294901760, %v8080_v8  ;;  %v8100_v34 = vsub.f32 %v20880_v30, %v23873_v47  ;;  %v24142_v8 = vld [vmem:[#allocation34_spill] sm:$0xff]  ;;  %v24144_v47 = vand.u32 4294901760, %v24143_v9 }
 0x39b   :  { %17764 = vmatprep.mubr.f32.mxu1 %v20863_v23  ;;  %v8110_v37 = vsub.f32 %v20889_v11, %v23876_v54  ;;  %v8120_v54 = vsub.f32 %v20903_v38, %v24147_v46  ;;  %v24150_v9 = vand.u32 4294901760, %v20909_v55 }
 0x39c   :  { %17595 = vmatmul.mubr.f32.gmra.mrb[100].mxu0 %v8061_v51  ;;  %v18044_v45 = vpack.c.bf16 %v24146_v20, %v24144_v47  ;;  %v8101_v41 = vand.u32 4294901760, %v8100_v34  ;;  %v24152_v47 = vld [vmem:[#allocation38_spill] sm:$0xff] }
 0x39d   :  { %17597 = vmatprep.mubr.f32.mxu0 %v8071_v59  ;;  %v24141_v59 = vld [vmem:[#allocation35_spill] sm:$0xff]  ;;  %v8111_v0 = vand.u32 4294901760, %v8110_v37  ;;  %v8130_v20 = vsub.f32 %v20909_v55, %v24150_v9  ;;  %v8121_v46 = vand.u32 4294901760, %v8120_v54  ;;  %v24153_v37 = vld [vmem:[#allocation41_spill] sm:$0xff] }
 0x39e   :  { %17765 = vmatmul.mubr.f32.gmra.mrb[2].mxu1 %v20880_v30  ;;  %v20927_v51 = vsub.f32 %v24142_v8, %v24141_v59  ;;  %18045 = vmatprep.subr.bf16.mxu1 %v18044_v45  ;;  %v24149_v8 = vld [vmem:[#allocation36_spill] sm:$0xff] }
 0x39f   :  { %17767 = vmatprep.mubr.f32.mxu1 %v20889_v11  ;;  %v20940_v59 = vsub.f32 %v24149_v8, %v24148_v58  ;;  %v8140_v8 = vsub.f32 %v20918_v12, %v23877_v61  ;;  %v24154_v58 = vld [vmem:[#allocation40_spill] sm:$0xff] }
 0x3a0   :  { %17598 = vmatmul.mubr.f32.gmra.mrb[102].mxu0 %v8081_v25  ;;  %v23878_v34 = vand.u32 4294901760, %v20927_v51  ;;  %v20958_v3 = vsub.f32 %v24154_v58, %v24153_v37  ;;  %v24158_v37 = vld [vmem:[#allocation44_spill] sm:$0xff] }
 0x3a1   :  { %17600 = vmatprep.mubr.f32.mxu0 %v8091_v27  ;;  %v24151_v27 = vld [vmem:[#allocation39_spill] sm:$0xff]  ;;  %v23879_v9 = vand.u32 4294901760, %v20940_v59  ;;  %v8141_v58 = vand.u32 4294901760, %v8140_v8 }
 0x3a2   :  { %17768 = vmatmul.mubr.f32.gmra.mrb[4].mxu1 %v20903_v38  ;;  %v20949_v25 = vsub.f32 %v24152_v47, %v24151_v27  ;;  %v8131_v47 = vand.u32 4294901760, %v8130_v20  ;;  %v24156_v27 = vld [vmem:[#allocation42_spill] sm:$0xff]  ;;  %v24157_v20 = vld [vmem:[#allocation45_spill] sm:$0xff] }
 0x3a3   :  { %17770 = vmatprep.mubr.f32.mxu1 %v20909_v55  ;;  %v8160_v61 = vsub.f32 %v20940_v59, %v23879_v9  ;;  %v20976_v1 = vsub.f32 %v24158_v37, %v24157_v20 }
 0x3a4   :  { %17601 = vmatmul.mubr.f32.gmra.mrb[104].mxu0 %v8101_v41  ;;  %v8150_v41 = vsub.f32 %v20927_v51, %v23878_v34  ;;  %v23880_v50 = vand.u32 4294901760, %v20949_v25  ;;  %v23881_v34 = vand.u32 4294901760, %v20958_v3 }
 0x3a5   :  { %17603 = vmatprep.mubr.f32.mxu0 %v8111_v0  ;;  %v24155_v0 = vld [vmem:[#allocation43_spill] sm:$0xff]  ;;  %v8161_v8 = vand.u32 4294901760, %v8160_v61  ;;  %v23883_v9 = vand.u32 4294901760, %v20976_v1 }
 0x3a6   :  { %17771 = vmatmul.mubr.f32.gmra.mrb[6].mxu1 %v20918_v12  ;;  %v20967_v54 = vsub.f32 %v24156_v27, %v24155_v0  ;;  %v8151_v27 = vand.u32 4294901760, %v8150_v41  ;;  %v8180_v37 = vsub.f32 %v20958_v3, %v23881_v34 }
 0x3a7   :  { %17773 = vmatprep.mubr.f32.mxu1 %v20927_v51  ;;  %v8200_v61 = vsub.f32 %v20976_v1, %v23883_v9  ;;  %v24167_v9 = vld [vmem:[#allocation14_spill] sm:$0xff] }
 0x3a8   :  { %17604 = vmatmul.mubr.f32.gmra.mrb[106].mxu0 %v8121_v46  ;;  %v8170_v46 = vsub.f32 %v20949_v25, %v23880_v50  ;;  %v24168_v60 = vand.u32 4294901760, %v24167_v9 }
 0x3a9   :  { %17606 = vmatprep.mubr.f32.mxu0 %v8131_v47  ;;  %v23882_v47 = vand.u32 4294901760, %v20967_v54  ;;  %v8201_v43 = vand.u32 4294901760, %v8200_v61 }
 0x3aa   :  { %17774 = vmatmul.mubr.f32.gmra.mrb[8].mxu1 %v20940_v59  ;;  %v8171_v41 = vand.u32 4294901760, %v8170_v46  ;;  %v24161_v46 = vld [vmem:[#allocation6_spill] sm:$0xff] }
 0x3ab   :  { %17776 = vmatprep.mubr.f32.mxu1 %v20949_v25  ;;  %v8190_v50 = vsub.f32 %v20967_v54, %v23882_v47  ;;  %v24162_v0 = vand.u32 4294901760, %v24161_v46  ;;  %v24163_v47 = vld [vmem:[#allocation11_spill] sm:$0xff]  ;;  %v24179_v46 = vld [vmem:[#allocation49_spill] sm:$0xff] }
 0x3ac   :  { %17607 = vmatmul.mubr.f32.gmra.mrb[108].mxu0 %v8141_v58  ;;  %v8181_v58 = vand.u32 4294901760, %v8180_v37  ;;  %v24165_v37 = vld [vmem:[#allocation2_spill] sm:$0xff]  ;;  %v24180_v9 = vand.u32 4294901760, %v24179_v46 }
 0x3ad   :  { %17609 = vmatprep.mubr.f32.mxu0 %v8151_v27  ;;  %v24159_v27 = vld [vmem:[#allocation8_spill] sm:$0xff]  ;;  %v8191_v20 = vand.u32 4294901760, %v8190_v50 }
 0x3ae   :  { %17777 = vmatmul.mubr.f32.gmra.mrb[10].mxu1 %v20958_v3  ;;  %v24160_v34 = vand.u32 4294901760, %v24159_v27  ;;  %v24178_v27 = vld [vmem:[#allocation13_spill] sm:$0xff] }
 0x3af   :  { %17779 = vmatprep.mubr.f32.mxu1 %v20967_v54 }
 0x3b0   :  { %17610 = vmatmul.mubr.f32.gmra.mrb[110].mxu0 %v8161_v8  ;;  %v24164_v8 = vand.u32 4294901760, %v24163_v47  ;;  %v24175_v47 = vld [vmem:[#allocation47_spill] sm:$0xff] }
 0x3b1   :  { %17612 = vmatprep.mubr.f32.mxu0 %v8171_v41  ;;  %v24166_v41 = vld [vmem:[#allocation7_spill] sm:$0xff] }
 0x3b2   :  { %17780 = vmatmul.mubr.f32.gmra.mrb[12].mxu1 %v20976_v1 }
 0x3b3   :  { %17786 = vmatprep.mubr.f32.mxu1 %v24160_v34  ;;  %v24169_v34 = vld [vmem:[#allocation16_spill] sm:$0xff] }
 0x3b4   :  { %17613 = vmatmul.mubr.f32.gmra.mrb[112].mxu0 %v8181_v58  ;;  %v24170_v50 = vand.u32 4294901760, %v24169_v34  ;;  %v24172_v58 = vld [vmem:[#allocation9_spill] sm:$0xff]  ;;  %v24183_v34 = vld [vmem:[#allocation15_spill] sm:$0xff] }
 0x3b5   :  { %17615 = vmatprep.mubr.f32.mxu0 %v8191_v20  ;;  %v24171_v20 = vld [vmem:[#allocation5_spill] sm:$0xff] }
 0x3b6   :  { %17787 = vmatmul.mubr.f32.vlgmr.msra.gmra.mrb[14].mxu1 %v24162_v0  ;;  %v24173_v0 = vld [vmem:[#allocation17_spill] sm:$0xff] }
 0x3b7   :  { %17789 = vmatprep.mubr.f32.mxu1 %v24164_v8  ;;  %18047 = vmatpush3.bf16.msra.mxu1 %v18044_v45  ;;  %v24174_v61 = vand.u32 4294901760, %v24173_v0  ;;  %v24176_v45 = vand.u32 4294901760, %v24175_v47 }
 0x3b8   :  { %17616 = vmatmul.mubr.f32.gmra.mrb[114].mxu0 %v8201_v43  ;;  %18049 = vmatprep.subr.bf16.mxu1 %v24165_v37  ;;  %v24177_v43 = vld [vmem:[#allocation12_spill] sm:$0xff]  ;;  %v24185_v37 = vld [vmem:[#allocation53_spill] sm:$0xff] }
 0x3b9   :  { %17622 = vmatprep.mubr.f32.mxu0 %v24166_v41  ;;  %v24186_v0 = vand.u32 4294901760, %v24185_v37 }
 0x3ba   :  { %17790 = vmatmul.mubr.f32.gmra.mrb[16].mxu1 %v24168_v60  ;;  %v24181_v60 = vld [vmem:[#allocation51_spill] sm:$0xff] }
 0x3bb   :  { %17792 = vmatprep.mubr.f32.mxu1 %v24170_v50  ;;  %v24182_v8 = vand.u32 4294901760, %v24181_v60  ;;  %v24184_v50 = vld [vmem:[#allocation46_spill] sm:$0xff] }
 0x3bc   :  { %17623 = vmatmul.mubr.f32.vlgmr.msra.gmra.mrb[64].mxu0 %v24171_v20 }
 0x3bd   :  { %17625 = vmatprep.mubr.f32.mxu0 %v24172_v58 }
 0x3be   :  { %17793 = vmatmul.mubr.f32.gmra.mrb[18].mxu1 %v24174_v61  ;;  %v24187_v61 = vld [vmem:[#allocation55_spill] sm:$0xff] }
 0x3bf   :  { %17795 = vmatprep.mubr.f32.mxu1 %v24176_v45  ;;  %v24188_v47 = vand.u32 4294901760, %v24187_v61  ;;  %v24189_v45 = vld [vmem:[#allocation48_spill] sm:$0xff] }
 0x3c0   :  { %17626 = vmatmul.mubr.f32.gmra.mrb[66].mxu0 %v24177_v43  ;;  %v24190_v43 = vld [vmem:[#allocation50_spill] sm:$0xff] }
 0x3c1   :  { %17628 = vmatprep.mubr.f32.mxu0 %v24178_v27  ;;  %v24191_v27 = vld [vmem:[#allocation57_spill] sm:$0xff] }
 0x3c2   :  { %17796 = vmatmul.mubr.f32.gmra.mrb[20].mxu1 %v24180_v9  ;;  %v24192_v46 = vand.u32 4294901760, %v24191_v27  ;;  %v24193_v9 = vld [vmem:[#allocation59_spill] sm:$0xff] }
 0x3c3   :  { %17798 = vmatprep.mubr.f32.mxu1 %v24182_v8  ;;  %v24194_v60 = vand.u32 4294901760, %v24193_v9  ;;  %v24195_v8 = vld [vmem:[#allocation52_spill] sm:$0xff] }
 0x3c4   :  { %17629 = vmatmul.mubr.f32.gmra.mrb[68].mxu0 %v24183_v34  ;;  %v24196_v34 = vld [vmem:[#allocation54_spill] sm:$0xff] }
 0x3c5   :  { %17631 = vmatprep.mubr.f32.mxu0 %v24184_v50  ;;  %v24197_v50 = vld [vmem:[#allocation61_spill] sm:$0xff] }
 0x3c6   :  { %17799 = vmatmul.mubr.f32.gmra.mrb[22].mxu1 %v24186_v0  ;;  %v24198_v37 = vand.u32 4294901760, %v24197_v50  ;;  %v24199_v0 = vld [vmem:[#allocation63_spill] sm:$0xff] }
 0x3c7   :  { %17801 = vmatprep.mubr.f32.mxu1 %v24188_v47  ;;  %v24200_v61 = vand.u32 4294901760, %v24199_v0  ;;  %v24201_v47 = vld [vmem:[#allocation56_spill] sm:$0xff] }
 0x3c8   :  { %17632 = vmatmul.mubr.f32.gmra.mrb[70].mxu0 %v24189_v45  ;;  %v24202_v45 = vld [vmem:[#allocation58_spill] sm:$0xff]  ;;  %v24212_v0 = vld [vmem:[#allocation64_spill] sm:$0xff] }
 0x3c9   :  { %17634 = vmatprep.mubr.f32.mxu0 %v24190_v43  ;;  %v24203_v43 = vld [vmem:[#allocation65_spill] sm:$0xff] }
 0x3ca   :  { %17802 = vmatmul.mubr.f32.gmra.mrb[24].mxu1 %v24192_v46  ;;  %v24204_v27 = vand.u32 4294901760, %v24203_v43  ;;  %v24205_v46 = vld [vmem:[#allocation67_spill] sm:$0xff]  ;;  %v24214_v43 = vand.u32 4294901760, %v20381_v32 }
 0x3cb   :  { %17804 = vmatprep.mubr.f32.mxu1 %v24194_v60  ;;  %v24206_v9 = vand.u32 4294901760, %v24205_v46  ;;  %v24207_v60 = vld [vmem:[#allocation60_spill] sm:$0xff] }
 0x3cc   :  { %17635 = vmatmul.mubr.f32.gmra.mrb[72].mxu0 %v24195_v8  ;;  %v24208_v8 = vld [vmem:[#allocation62_spill] sm:$0xff]  ;;  %v24216_v46 = vld [vmem:[#allocation68_spill] sm:$0xff] }
 0x3cd   :  { %17637 = vmatprep.mubr.f32.mxu0 %v24196_v34  ;;  %v24209_v34 = vld [vmem:[#allocation69_spill] sm:$0xff] }
 0x3ce   :  { %17805 = vmatmul.mubr.f32.gmra.mrb[26].mxu1 %v24198_v37  ;;  %v24210_v50 = vand.u32 4294901760, %v24209_v34  ;;  %v24211_v37 = vand.u32 4294901760, %v20351_v14  ;;  %v24217_v34 = vand.u32 4294901760, %v20464_v57  ;;  %v24218_v14 = vand.u32 4294901760, %v20496_v39 }
 0x3cf   :  { %17807 = vmatprep.mubr.f32.mxu1 %v24200_v61  ;;  %v24213_v61 = vld [vmem:[#allocation66_spill] sm:$0xff]  ;;  %v24226_v57 = vand.u32 4294901760, %v20608_v5  ;;  %v24227_v39 = vand.u32 4294901760, %v20655_v4  ;;  %v24231_v5 = vand.u32 4294901760, %v20727_v28  ;;  %v24232_v4 = vand.u32 4294901760, %v20754_v35 }
 0x3d0   :  { %17638 = vmatmul.mubr.f32.gmra.mrb[74].mxu0 %v24201_v47  ;;  %v24235_v28 = vand.u32 4294901760, %v20798_v7  ;;  %v24236_v35 = vand.u32 4294901760, %v20831_v22  ;;  %v24239_v7 = vand.u32 4294901760, %v20870_v42  ;;  %v24240_v22 = vand.u32 4294901760, %v20840_v53 }
 0x3d1   :  { %17640 = vmatprep.mubr.f32.mxu0 %v24202_v45  ;;  %v24244_v42 = vand.u32 4294901760, %v20889_v11  ;;  %v24245_v53 = vand.u32 4294901760, %v20903_v38  ;;  %v24251_v11 = vand.u32 4294901760, %v20958_v3  ;;  %v24252_v38 = vand.u32 4294901760, %v20967_v54  ;;  %v24257_v3 = vld [vmem:[#allocation15_spill] sm:$0xff]  ;;  %v24259_v54 = vld [vmem:[#allocation48_spill] sm:$0xff] }
 0x3d2   :  { %17808 = vmatmul.mubr.f32.gmra.mrb[28].mxu1 %v24204_v27  ;;  %v24215_v27 = vand.u32 4294901760, %v20452_v18  ;;  %v24223_v18 = vand.u32 4294901760, %v20578_v21  ;;  %v24230_v21 = vand.u32 4294901760, %v20712_v31  ;;  %v24234_v31 = vand.u32 4294901760, %v20788_v29 }
 0x3d3   :  { %17810 = vmatprep.mubr.f32.mxu1 %v24206_v9  ;;  %v24219_v9 = vld [vmem:[#allocation70_spill] sm:$0xff]  ;;  %v24238_v29 = vand.u32 4294901760, %v20845_v52  ;;  %v24242_v52 = vand.u32 4294901760, %v20863_v23  ;;  %v24248_v23 = vand.u32 4294901760, %v20927_v51  ;;  %v24256_v51 = vld [vmem:[#allocation13_spill] sm:$0xff] }
 0x3d4   :  { %17641 = vmatmul.mubr.f32.gmra.mrb[76].mxu0 %v24207_v60 }
 0x3d5   :  { %17643 = vmatprep.mubr.f32.mxu0 %v24208_v8 }
 0x3d6   :  { %17811 = vmatmul.mubr.f32.gmra.mrb[30].mxu1 %v24210_v50  ;;  %v24220_v50 = vld [vmem:[#allocation71_spill] sm:$0xff] }
 0x3d7   :  { %17813 = vmatprep.mubr.f32.mxu1 %v24211_v37  ;;  %v24221_v37 = vld [vmem:[#allocation75_spill] sm:$0xff] }
 0x3d8   :  { %17644 = vmatmul.mubr.f32.gmra.mrb[78].mxu0 %v24212_v0  ;;  %v24222_v32 = vand.u32 4294901760, %v24221_v37  ;;  %v24243_v37 = vand.u32 4294901760, %v20880_v30  ;;  %v24250_v30 = vand.u32 4294901760, %v20949_v25  ;;  %v24258_v25 = vld [vmem:[#allocation46_spill] sm:$0xff] }
 0x3d9   :  { %17646 = vmatprep.mubr.f32.mxu0 %v24213_v61 }
 0x3da   :  { %17814 = vmatmul.mubr.f32.gmra.mrb[32].mxu1 %v24214_v43  ;;  %v24224_v43 = vld [vmem:[#allocation72_spill] sm:$0xff] }
 0x3db   :  { %17816 = vmatprep.mubr.f32.mxu1 %v24215_v27  ;;  %v24225_v27 = vld [vmem:[#allocation73_spill] sm:$0xff] }
 0x3dc   :  { %17647 = vmatmul.mubr.f32.gmra.mrb[80].mxu0 %v24216_v46 }
 0x3dd   :  { %17649 = vmatprep.mubr.f32.mxu0 %v20339_v44 }
 0x3de   :  { %17817 = vmatmul.mubr.f32.gmra.mrb[34].mxu1 %v24217_v34  ;;  %v24228_v34 = vld [vmem:[#allocation74_spill] sm:$0xff] }
 0x3df   :  { %17819 = vmatprep.mubr.f32.mxu1 %v24218_v14  ;;  %v24229_v14 = vand.u32 4294901760, %v20672_v62  ;;  %v24233_v62 = vand.u32 4294901760, %v20773_v17  ;;  %v24237_v17 = vand.u32 4294901760, %v20836_v10  ;;  %v24241_v10 = vand.u32 4294901760, %v20852_v15 }
 0x3e0   :  { %17650 = vmatmul.mubr.f32.gmra.mrb[82].mxu0 %v24219_v9  ;;  %v24247_v15 = vand.u32 4294901760, %v20918_v12  ;;  %v24254_v12 = vld [vmem:[#allocation2_spill] sm:$0xff] }
 0x3e1   :  { %17652 = vmatprep.mubr.f32.mxu0 %v24220_v50 }
 0x3e2   :  { %17820 = vmatmul.mubr.f32.gmra.mrb[36].mxu1 %v24222_v32  ;;  %v24246_v32 = vand.u32 4294901760, %v20909_v55  ;;  %v24253_v55 = vand.u32 4294901760, %v20976_v1  ;;  %v24260_v1 = vld [vmem:[#allocation50_spill] sm:$0xff] }
 0x3e3   :  { %17822 = vmatprep.mubr.f32.mxu1 %v24223_v18  ;;  %v24249_v18 = vand.u32 4294901760, %v20940_v59  ;;  %v24255_v59 = vld [vmem:[#allocation12_spill] sm:$0xff] }
 0x3e4   :  { %17653 = vmatmul.mubr.f32.gmra.mrb[84].mxu0 %v24224_v43 }
 0x3e5   :  { %17655 = vmatprep.mubr.f32.mxu0 %v24225_v27 }
 0x3e6   :  { %17823 = vmatmul.mubr.f32.gmra.mrb[38].mxu1 %v24226_v57  ;;  %v24261_v57 = vld [vmem:[#allocation52_spill] sm:$0xff] }
 0x3e7   :  { %17825 = vmatprep.mubr.f32.mxu1 %v24227_v39  ;;  %v24262_v39 = vld [vmem:[#allocation54_spill] sm:$0xff] }
 0x3e8   :  { %17656 = vmatmul.mubr.f32.gmra.mrb[86].mxu0 %v24228_v34 }
 0x3e9   :  { %17658 = vmatprep.mubr.f32.mxu0 %v20571_v56 }
 0x3ea   :  { %17826 = vmatmul.mubr.f32.gmra.mrb[40].mxu1 %v24229_v14  ;;  %v24263_v14 = vld [vmem:[#allocation19_spill] sm:$0xff] }
 0x3eb   :  { %17828 = vmatprep.mubr.f32.mxu1 %v24230_v21  ;;  %v24264_v21 = vld [vmem:[#allocation21_spill] sm:$0xff] }
 0x3ec   :  { %17659 = vmatmul.mubr.f32.gmra.mrb[88].mxu0 %v20600_v49 }
 0x3ed   :  { %17661 = vmatprep.mubr.f32.mxu0 %v20643_v63 }
 0x3ee   :  { %17829 = vmatmul.mubr.f32.gmra.mrb[42].mxu1 %v24231_v5  ;;  %v24265_v5 = vld [vmem:[#allocation23_spill] sm:$0xff] }
 0x3ef   :  { %17831 = vmatprep.mubr.f32.mxu1 %v24232_v4  ;;  %v24266_v4 = vld [vmem:[#allocation25_spill] sm:$0xff] }
 0x3f0   :  { %17662 = vmatmul.mubr.f32.gmra.mrb[90].mxu0 %v20657_v13 }
 0x3f1   :  { %17664 = vmatprep.mubr.f32.mxu0 %v20703_v33 }
 0x3f2   :  { %17832 = vmatmul.mubr.f32.gmra.mrb[44].mxu1 %v24233_v62  ;;  %v24267_v62 = vld [vmem:[#allocation27_spill] sm:$0xff] }
 0x3f3   :  { %17834 = vmatprep.mubr.f32.mxu1 %v24234_v31  ;;  %v24268_v31 = vld [vmem:[#allocation29_spill] sm:$0xff] }
 0x3f4   :  { %17665 = vmatmul.mubr.f32.gmra.mrb[92].mxu0 %v20708_v6 }
 0x3f5   :  { %17667 = vmatprep.mubr.f32.mxu0 %v20734_v26 }
 0x3f6   :  { %17835 = vmatmul.mubr.f32.gmra.mrb[46].mxu1 %v24235_v28 }
 0x3f7   :  { %17837 = vmatprep.mubr.f32.mxu1 %v24236_v35  ;;  %v24270_v35 = vld [vmem:[#allocation31_spill] sm:$0xff] }
 0x3f8   :  { %17668 = vmatmul.mubr.f32.gmra.mrb[94].mxu0 %v20757_v2 }
 0x3f9   :  { %17670 = vmatprep.mubr.f32.mxu0 %v20775_v24 }
 0x3fa   :  { %17838 = vmatmul.mubr.f32.gmra.mrb[48].mxu1 %v24237_v17 }
 0x3fb   :  { %17840 = vmatprep.mubr.f32.mxu1 %v24238_v29  ;;  %v24272_v29 = vld [vmem:[#allocation33_spill] sm:$0xff] }
 0x3fc   :  { %17671 = vmatmul.mubr.f32.gmra.mrb[96].mxu0 %v20781_v36 }
 0x3fd   :  { %17673 = vmatprep.mubr.f32.mxu0 %v20817_v48 }
 0x3fe   :  { %17841 = vmatmul.mubr.f32.gmra.mrb[50].mxu1 %v24239_v7 }
 0x3ff   :  { %17843 = vmatprep.mubr.f32.mxu1 %v24240_v22  ;;  %v24274_v22 = vld [vmem:[#allocation35_spill] sm:$0xff] }
 0x400   :  { %17674 = vmatmul.mubr.f32.gmra.mrb[98].mxu0 %v20823_v40 }
 0x401   :  { %17676 = vmatprep.mubr.f32.mxu0 %v20833_v19 }
 0x402   :  { %17844 = vmatmul.mubr.f32.gmra.mrb[0].mxu1 %v24241_v10 }
 0x403   :  { %17846 = vmatprep.mubr.f32.mxu1 %v24242_v52  ;;  %v24276_v52 = vld [vmem:[#allocation37_spill] sm:$0xff] }
 0x404   :  { %17677 = vmatmul.mubr.f32.gmra.mrb[100].mxu0 %v20858_v16 }
 0x406   :  { %17847 = vmatmul.mubr.f32.gmra.mrb[2].mxu1 %v24243_v37 }
 0x407   :  { %17849 = vmatprep.mubr.f32.mxu1 %v24244_v42  ;;  %v24278_v42 = vld [vmem:[#allocation39_spill] sm:$0xff] }
 0x40a   :  { %17850 = vmatmul.mubr.f32.gmra.mrb[4].mxu1 %v24245_v53 }
 0x40b   :  { %17852 = vmatprep.mubr.f32.mxu1 %v24246_v32  ;;  %v24280_v32 = vld [vmem:[#allocation41_spill] sm:$0xff] }
 0x40e   :  { %17853 = vmatmul.mubr.f32.gmra.mrb[6].mxu1 %v24247_v15 }
 0x40f   :  { %17855 = vmatprep.mubr.f32.mxu1 %v24248_v23  ;;  %v24282_v23 = vld [vmem:[#allocation43_spill] sm:$0xff] }
 0x412   :  { %17856 = vmatmul.mubr.f32.gmra.mrb[8].mxu1 %v24249_v18 }
 0x413   :  { %17858 = vmatprep.mubr.f32.mxu1 %v24250_v30  ;;  %v24284_v30 = vld [vmem:[#allocation45_spill] sm:$0xff] }
 0x416   :  { %17859 = vmatmul.mubr.f32.gmra.mrb[10].mxu1 %v24251_v11 }
 0x417   :  { %17861 = vmatprep.mubr.f32.mxu1 %v24252_v38 }
 0x41a   :  { %17862 = vmatmul.mubr.f32.gmra.mrb[12].mxu1 %v24253_v55 }
 0x41b   :  { %17868 = vmatprep.mubr.f32.mxu1 %v24166_v41 }
 0x41e   :  { %17869 = vmatmul.mubr.f32.vlgmr.msra.gmra.mrb[14].mxu1 %v24171_v20 }
 0x41f   :  { %17871 = vmatprep.mubr.f32.mxu1 %v24172_v58  ;;  %18051 = vmatpush3.bf16.msra.mxu1 %v24254_v12 }
 0x422   :  { %17872 = vmatmul.mubr.f32.gmra.mrb[16].mxu1 %v24255_v59 }
 0x423   :  { %17874 = vmatprep.mubr.f32.mxu1 %v24256_v51 }
 0x426   :  { %17875 = vmatmul.mubr.f32.gmra.mrb[18].mxu1 %v24257_v3 }
 0x427   :  { %17877 = vmatprep.mubr.f32.mxu1 %v24258_v25 }
 0x42a   :  { %17878 = vmatmul.mubr.f32.gmra.mrb[20].mxu1 %v24259_v54 }
 0x42b   :  { %17880 = vmatprep.mubr.f32.mxu1 %v24260_v1 }
 0x42e   :  { %17881 = vmatmul.mubr.f32.gmra.mrb[22].mxu1 %v24261_v57 }
 0x42f   :  { %17883 = vmatprep.mubr.f32.mxu1 %v24262_v39 }
 0x432   :  { %17884 = vmatmul.mubr.f32.gmra.mrb[24].mxu1 %v24201_v47 }
 0x433   :  { %17886 = vmatprep.mubr.f32.mxu1 %v24202_v45 }
 0x436   :  { %17887 = vmatmul.mubr.f32.gmra.mrb[26].mxu1 %v24207_v60 }
 0x437   :  { %17889 = vmatprep.mubr.f32.mxu1 %v24208_v8 }
 0x43a   :  { %17890 = vmatmul.mubr.f32.gmra.mrb[28].mxu1 %v24212_v0 }
 0x43b   :  { %17892 = vmatprep.mubr.f32.mxu1 %v24213_v61 }
 0x43e   :  { %17893 = vmatmul.mubr.f32.gmra.mrb[30].mxu1 %v24216_v46 }
 0x43f   :  { %17895 = vmatprep.mubr.f32.mxu1 %v20339_v44 }
 0x442   :  { %17896 = vmatmul.mubr.f32.gmra.mrb[32].mxu1 %v24219_v9 }
 0x443   :  { %17898 = vmatprep.mubr.f32.mxu1 %v24220_v50 }
 0x446   :  { %17899 = vmatmul.mubr.f32.gmra.mrb[34].mxu1 %v24224_v43 }
 0x447   :  { %17901 = vmatprep.mubr.f32.mxu1 %v24225_v27 }
 0x44a   :  { %17902 = vmatmul.mubr.f32.gmra.mrb[36].mxu1 %v24228_v34 }
 0x44b   :  { %17904 = vmatprep.mubr.f32.mxu1 %v20571_v56 }
 0x44e   :  { %17905 = vmatmul.mubr.f32.gmra.mrb[38].mxu1 %v20600_v49 }
 0x44f   :  { %17907 = vmatprep.mubr.f32.mxu1 %v20643_v63 }
 0x452   :  { %17908 = vmatmul.mubr.f32.gmra.mrb[40].mxu1 %v20657_v13 }
 0x453   :  { %17910 = vmatprep.mubr.f32.mxu1 %v20703_v33 }
 0x456   :  { %17911 = vmatmul.mubr.f32.gmra.mrb[42].mxu1 %v20708_v6 }
 0x457   :  { %17913 = vmatprep.mubr.f32.mxu1 %v20734_v26 }
 0x45a   :  { %17914 = vmatmul.mubr.f32.gmra.mrb[44].mxu1 %v20757_v2 }
 0x45b   :  { %17916 = vmatprep.mubr.f32.mxu1 %v20775_v24 }
 0x45e   :  { %17917 = vmatmul.mubr.f32.gmra.mrb[46].mxu1 %v20781_v36 }
 0x45f   :  { %17919 = vmatprep.mubr.f32.mxu1 %v20817_v48 }
 0x462   :  { %17920 = vmatmul.mubr.f32.gmra.mrb[48].mxu1 %v20823_v40 }
 0x463   :  { %17922 = vmatprep.mubr.f32.mxu1 %v20833_v19 }
 0x466   :  { %17923 = vmatmul.mubr.f32.gmra.mrb[50].mxu1 %v20858_v16 }
 0x467   :  { %17925 = vmatprep.mubr.f32.mxu1 %v24263_v14 }
 0x46a   :  { %17926 = vmatmul.mubr.f32.gmra.mrb[0].mxu1 %v24264_v21 }
 0x46b   :  { %17928 = vmatprep.mubr.f32.mxu1 %v24265_v5 }
 0x46e   :  { %17929 = vmatmul.mubr.f32.gmra.mrb[2].mxu1 %v24266_v4 }
 0x46f   :  { %17931 = vmatprep.mubr.f32.mxu1 %v24267_v62 }
 0x472   :  { %17932 = vmatmul.mubr.f32.gmra.mrb[4].mxu1 %v24268_v31 }
 0x473   :  { %v21185_v28 = vpop.f32.mrb[102].mxu0  ;;  %17934 = vmatprep.mubr.f32.mxu1 %v24270_v35 }
 0x474   :  { %24269 = vst [vmem:[#allocation18_spill] sm:$0xff] %v21185_v28  ;;  %v21188_v17 = vpop.f32.mrb[103].mxu0 }
 0x475   :  { %24271 = vst [vmem:[#allocation20_spill] sm:$0xff] %v21188_v17 }
 0x476   :  { %17935 = vmatmul.mubr.f32.gmra.mrb[6].mxu1 %v24272_v29 }
 0x477   :  { %v21191_v7 = vpop.f32.mrb[104].mxu0  ;;  %17937 = vmatprep.mubr.f32.mxu1 %v24274_v22 }
 0x478   :  { %24273 = vst [vmem:[#allocation22_spill] sm:$0xff] %v21191_v7  ;;  %v21194_v10 = vpop.f32.mrb[105].mxu0 }
 0x479   :  { %24275 = vst [vmem:[#allocation24_spill] sm:$0xff] %v21194_v10 }
 0x47a   :  { %17938 = vmatmul.mubr.f32.gmra.mrb[8].mxu1 %v24276_v52 }
 0x47b   :  { %v21197_v37 = vpop.f32.mrb[106].mxu0  ;;  %17940 = vmatprep.mubr.f32.mxu1 %v24278_v42 }
 0x47c   :  { %24277 = vst [vmem:[#allocation26_spill] sm:$0xff] %v21197_v37  ;;  %v21200_v53 = vpop.f32.mrb[107].mxu0 }
 0x47d   :  { %24279 = vst [vmem:[#allocation28_spill] sm:$0xff] %v21200_v53 }
 0x47e   :  { %17941 = vmatmul.mubr.f32.gmra.mrb[10].mxu1 %v24280_v32 }
 0x47f   :  { %v21203_v15 = vpop.f32.mrb[108].mxu0  ;;  %17943 = vmatprep.mubr.f32.mxu1 %v24282_v23 }
 0x480   :  { %24281 = vst [vmem:[#allocation30_spill] sm:$0xff] %v21203_v15  ;;  %v21206_v18 = vpop.f32.mrb[109].mxu0 }
 0x481   :  { %24283 = vst [vmem:[#allocation32_spill] sm:$0xff] %v21206_v18 }
 0x482   :  { %17944 = vmatmul.mubr.f32.gmra.mrb[12].mxu1 %v24284_v30 }
 0x483   :  { %v21209_v11 = vpop.f32.mrb[110].mxu0  ;;  %17950 = vmatprep.mubr.f32.mxu1 %v24166_v41 }
 0x484   :  { %24285 = vst [vmem:[#allocation34_spill] sm:$0xff] %v21209_v11  ;;  %v21212_v38 = vpop.f32.mrb[111].mxu0 }
 0x485   :  { %24286 = vst [vmem:[#allocation4_spill] sm:$0xff] %v21212_v38 }
 0x486   :  { %17951 = vmatmul.mubr.f32.vlgmr.msra.gmra.mrb[14].mxu1 %v24171_v20 }
 0x487   :  { %v21215_v55 = vpop.f32.mrb[112].mxu0  ;;  %17953 = vmatprep.mubr.f32.mxu1 %v24172_v58 }
 0x488   :  { %24287 = vst [vmem:[#allocation10_spill] sm:$0xff] %v21215_v55  ;;  %v21218_v12 = vpop.f32.mrb[113].mxu0 }
 0x489   :  { %24288 = vst [vmem:[#allocation36_spill] sm:$0xff] %v21218_v12 }
 0x48a   :  { %17954 = vmatmul.mubr.f32.gmra.mrb[16].mxu1 %v24255_v59 }
 0x48b   :  { %v21221_v15 = vpop.f32.mrb[114].mxu0  ;;  %17956 = vmatprep.mubr.f32.mxu1 %v24256_v51 }
 0x48c   :  { %24289 = vst [vmem:[#allocation38_spill] sm:$0xff] %v21221_v15  ;;  %v21224_v18 = vpop.f32.mrb[115].mxu0 }
 0x48d   :  { %24290 = vst [vmem:[#allocation40_spill] sm:$0xff] %v21224_v18 }
 0x48e   :  { %17957 = vmatmul.mubr.f32.gmra.mrb[18].mxu1 %v24257_v3 }
 0x48f   :  { %v21227_v41 = vpop.f32.mrb[64].mxu0  ;;  %17959 = vmatprep.mubr.f32.mxu1 %v24258_v25 }
 0x490   :  { %v21230_v20 = vpop.f32.mrb[65].mxu0 }
 0x492   :  { %17960 = vmatmul.mubr.f32.gmra.mrb[20].mxu1 %v24259_v54 }
 0x493   :  { %v21233_v58 = vpop.f32.mrb[66].mxu0  ;;  %17962 = vmatprep.mubr.f32.mxu1 %v24260_v1 }
 0x494   :  { %v21236_v59 = vpop.f32.mrb[67].mxu0 }
 0x496   :  { %17963 = vmatmul.mubr.f32.gmra.mrb[22].mxu1 %v24261_v57 }
 0x497   :  { %v21239_v51 = vpop.f32.mrb[68].mxu0  ;;  %17965 = vmatprep.mubr.f32.mxu1 %v24262_v39 }
 0x498   :  { %v21242_v3 = vpop.f32.mrb[69].mxu0 }
 0x49a   :  { %17966 = vmatmul.mubr.f32.gmra.mrb[24].mxu1 %v24201_v47 }
 0x49b   :  { %v21245_v25 = vpop.f32.mrb[70].mxu0  ;;  %17968 = vmatprep.mubr.f32.mxu1 %v24202_v45 }
 0x49c   :  { %v21248_v54 = vpop.f32.mrb[71].mxu0 }
 0x49e   :  { %17969 = vmatmul.mubr.f32.gmra.mrb[26].mxu1 %v24207_v60 }
 0x49f   :  { %v21251_v1 = vpop.f32.mrb[72].mxu0  ;;  %17971 = vmatprep.mubr.f32.mxu1 %v24208_v8 }
 0x4a0   :  { %v21254_v57 = vpop.f32.mrb[73].mxu0 }
 0x4a2   :  { %17972 = vmatmul.mubr.f32.gmra.mrb[28].mxu1 %v24212_v0 }
 0x4a3   :  { %v21257_v39 = vpop.f32.mrb[74].mxu0  ;;  %17974 = vmatprep.mubr.f32.mxu1 %v24213_v61 }
 0x4a4   :  { %v21260_v47 = vpop.f32.mrb[75].mxu0 }
 0x4a6   :  { %17975 = vmatmul.mubr.f32.gmra.mrb[30].mxu1 %v24216_v46 }
 0x4a7   :  { %v21263_v45 = vpop.f32.mrb[76].mxu0  ;;  %17977 = vmatprep.mubr.f32.mxu1 %v20339_v44 }
 0x4a8   :  { %v21266_v60 = vpop.f32.mrb[77].mxu0 }
 0x4aa   :  { %17978 = vmatmul.mubr.f32.gmra.mrb[32].mxu1 %v24219_v9 }
 0x4ab   :  { %v21269_v8 = vpop.f32.mrb[78].mxu0  ;;  %17980 = vmatprep.mubr.f32.mxu1 %v24220_v50 }
 0x4ac   :  { %v21272_v0 = vpop.f32.mrb[79].mxu0 }
 0x4ae   :  { %17981 = vmatmul.mubr.f32.gmra.mrb[34].mxu1 %v24224_v43 }
 0x4af   :  { %v21275_v61 = vpop.f32.mrb[80].mxu0  ;;  %17983 = vmatprep.mubr.f32.mxu1 %v24225_v27 }
 0x4b0   :  { %v21278_v46 = vpop.f32.mrb[81].mxu0 }
 0x4b2   :  { %17984 = vmatmul.mubr.f32.gmra.mrb[36].mxu1 %v24228_v34 }
 0x4b3   :  { %v21281_v44 = vpop.f32.mrb[82].mxu0  ;;  %17986 = vmatprep.mubr.f32.mxu1 %v20571_v56 }
 0x4b4   :  { %v21284_v9 = vpop.f32.mrb[83].mxu0 }
 0x4b6   :  { %17987 = vmatmul.mubr.f32.gmra.mrb[38].mxu1 %v20600_v49 }
 0x4b7   :  { %v21287_v50 = vpop.f32.mrb[84].mxu0  ;;  %17989 = vmatprep.mubr.f32.mxu1 %v20643_v63 }
 0x4b8   :  { %24291 = vst [vmem:[#allocation42_spill] sm:$0xff] %v21287_v50  ;;  %v21290_v43 = vpop.f32.mrb[85].mxu0 }
 0x4b9   :  { %24292 = vst [vmem:[#allocation44_spill] sm:$0xff] %v21290_v43 }
 0x4ba   :  { %17990 = vmatmul.mubr.f32.gmra.mrb[40].mxu1 %v20657_v13 }
 0x4bb   :  { %v21293_v27 = vpop.f32.mrb[86].mxu0  ;;  %17992 = vmatprep.mubr.f32.mxu1 %v20703_v33 }
 0x4bc   :  { %24293 = vst [vmem:[#allocation8_spill] sm:$0xff] %v21293_v27  ;;  %v21296_v34 = vpop.f32.mrb[87].mxu0 }
 0x4bd   :  { %24294 = vst [vmem:[#allocation6_spill] sm:$0xff] %v21296_v34 }
 0x4be   :  { %17993 = vmatmul.mubr.f32.gmra.mrb[42].mxu1 %v20708_v6 }
 0x4bf   :  { %v21299_v56 = vpop.f32.mrb[88].mxu0  ;;  %17995 = vmatprep.mubr.f32.mxu1 %v20734_v26 }
 0x4c0   :  { %24295 = vst [vmem:[#allocation11_spill] sm:$0xff] %v21299_v56  ;;  %v21302_v49 = vpop.f32.mrb[89].mxu0 }
 0x4c1   :  { %24296 = vst [vmem:[#allocation7_spill] sm:$0xff] %v21302_v49 }
 0x4c2   :  { %17996 = vmatmul.mubr.f32.gmra.mrb[44].mxu1 %v20757_v2 }
 0x4c3   :  { %v21305_v63 = vpop.f32.mrb[90].mxu0  ;;  %17998 = vmatprep.mubr.f32.mxu1 %v20775_v24 }
 0x4c4   :  { %24297 = vst [vmem:[#allocation14_spill] sm:$0xff] %v21305_v63  ;;  %v21308_v13 = vpop.f32.mrb[91].mxu0 }
 0x4c5   :  { %24298 = vst [vmem:[#allocation16_spill] sm:$0xff] %v21308_v13 }
 0x4c6   :  { %17999 = vmatmul.mubr.f32.gmra.mrb[46].mxu1 %v20781_v36 }
 0x4c7   :  { %v21311_v33 = vpop.f32.mrb[92].mxu0  ;;  %18001 = vmatprep.mubr.f32.mxu1 %v20817_v48 }
 0x4c8   :  { %24299 = vst [vmem:[#allocation5_spill] sm:$0xff] %v21311_v33  ;;  %v21314_v6 = vpop.f32.mrb[93].mxu0 }
 0x4c9   :  { %24300 = vst [vmem:[#allocation9_spill] sm:$0xff] %v21314_v6 }
 0x4ca   :  { %18002 = vmatmul.mubr.f32.gmra.mrb[48].mxu1 %v20823_v40 }
 0x4cb   :  { %v21317_v26 = vpop.f32.mrb[94].mxu0  ;;  %18004 = vmatprep.mubr.f32.mxu1 %v20833_v19 }
 0x4cc   :  { %24301 = vst [vmem:[#allocation17_spill] sm:$0xff] %v21317_v26  ;;  %v21320_v2 = vpop.f32.mrb[95].mxu0 }
 0x4cd   :  { %24302 = vst [vmem:[#allocation47_spill] sm:$0xff] %v21320_v2 }
 0x4ce   :  { %18005 = vmatmul.mubr.f32.gmra.mrb[50].mxu1 %v20858_v16 }
 0x4cf   :  { %v21323_v24 = vpop.f32.mrb[96].mxu0  ;;  %18007 = vmatprep.mubr.f32.mxu1 %v24263_v14 }
 0x4d0   :  { %24303 = vst [vmem:[#allocation49_spill] sm:$0xff] %v21323_v24  ;;  %v21326_v36 = vpop.f32.mrb[97].mxu0 }
 0x4d1   :  { %24304 = vst [vmem:[#allocation51_spill] sm:$0xff] %v21326_v36 }
 0x4d2   :  { %18008 = vmatmul.mubr.f32.gmra.mrb[0].mxu1 %v24264_v21 }
 0x4d3   :  { %v21329_v48 = vpop.f32.mrb[98].mxu0  ;;  %18010 = vmatprep.mubr.f32.mxu1 %v24265_v5 }
 0x4d4   :  { %24305 = vst [vmem:[#allocation53_spill] sm:$0xff] %v21329_v48  ;;  %v21332_v40 = vpop.f32.mrb[99].mxu0 }
 0x4d5   :  { %24306 = vst [vmem:[#allocation55_spill] sm:$0xff] %v21332_v40 }
 0x4d6   :  { %18011 = vmatmul.mubr.f32.gmra.mrb[2].mxu1 %v24266_v4 }
 0x4d7   :  { %v21335_v19 = vpop.f32.mrb[100].mxu0  ;;  %18013 = vmatprep.mubr.f32.mxu1 %v24267_v62 }
 0x4d8   :  { %24307 = vst [vmem:[#allocation57_spill] sm:$0xff] %v21335_v19  ;;  %v21338_v16 = vpop.f32.mrb[101].mxu0 }
 0x4d9   :  { %24308 = vst [vmem:[#allocation59_spill] sm:$0xff] %v21338_v16 }
 0x4da   :  { %18014 = vmatmul.mubr.f32.gmra.mrb[4].mxu1 %v24268_v31  ;;  %v24309_v31 = vld [vmem:[#allocation3_spill] sm:$0xff] }
 0x4db   :  { %18016 = vmatprep.mubr.f32.mxu1 %v24270_v35 }
 0x4de   :  { %18017 = vmatmul.mubr.f32.gmra.mrb[6].mxu1 %v24272_v29 }
 0x4df   :  { %18019 = vmatprep.mubr.f32.mxu1 %v24274_v22 }
 0x4e2   :  { %18020 = vmatmul.mubr.f32.gmra.mrb[8].mxu1 %v24276_v52 }
 0x4e3   :  { %18022 = vmatprep.mubr.f32.mxu1 %v24278_v42 }
 0x4e6   :  { %18023 = vmatmul.mubr.f32.gmra.mrb[10].mxu1 %v24280_v32 }
 0x4e7   :  { %18025 = vmatprep.mubr.f32.mxu1 %v24282_v23 }
 0x4ea   :  { %18026 = vmatmul.mubr.f32.gmra.mrb[12].mxu1 %v24284_v30 }
 0x559   :  { %v17952_v14 = vpop.f32.mrb[14].mxu1 }
 0x55a   :  { %v18054_v21 = vadd.f32 %v17952_v14, %v21227_v41  ;;  %v9962_v5 = vpop.f32.mrb[15].mxu1 }
 0x55b   :  { %v18055_v4 = vadd.f32 %v9962_v5, %v21230_v20 }
 0x55c   :  { %v10373_v62 = vcombine.high %v18054_v21, %v18054_v21  ;;  %v10380_v35 = vrot.slane %v18054_v21, %v24309_v31 }
 0x55d   :  { %v10324_v29 = vcombine.high %v18055_v4, %v18055_v4  ;;  %v10331_v22 = vrot.slane %v18055_v4, %v24309_v31  ;;  %v17955_v52 = vpop.f32.mrb[16].mxu1 }
 0x55e   :  { %v10387_v42 = vrot.slane %v10373_v62, %v24309_v31  ;;  %v10388_v32 = vcombine.high %v10380_v35, %v10380_v35  ;;  %v10396_v23 = vrot.slane %v10380_v35, %v24309_v31  ;;  %v18056_v30 = vadd.f32 %v17955_v52, %v21233_v58  ;;  %v9974_v18 = vpop.f32.mrb[17].mxu1 }
 0x55f   :  { %v10338_v41 = vrot.slane %v10324_v29, %v24309_v31  ;;  %v10339_v14 = vcombine.high %v10331_v22, %v10331_v22  ;;  %v21358_v20 = vrot.slane %v10331_v22, %v24309_v31  ;;  %v18057_v21 = vadd.f32 %v9974_v18, %v21236_v59 }
 0x560   :  { %v10389_v5 = vcombine.high %v10387_v42, %v10387_v42  ;;  %v21362_v4 = vrot.slane %v10387_v42, %v24309_v31  ;;  %v10410_v62 = vrot.slane %v10388_v32, %v24309_v31  ;;  %v10471_v15 = vcombine.high %v18056_v30, %v18056_v30 }
 0x561   :  { %v10340_v12 = vcombine.high %v10338_v41, %v10338_v41  ;;  %v21366_v35 = vrot.slane %v10338_v41, %v24309_v31  ;;  %v21369_v58 = vrot.slane %v10339_v14, %v24309_v31  ;;  %v10478_v29 = vrot.slane %v18056_v30, %v24309_v31  ;;  %v17958_v22 = vpop.f32.mrb[18].mxu1 }
 0x562   :  { %v21373_v52 = vrot.slane %v10389_v5, %v24309_v31  ;;  %v12921_v59 = vcombine.low %v10396_v23, %v10410_v62  ;;  %v16962_v42 = vcombine.high %v10396_v23, %v10410_v62  ;;  %v9986_v32 = vpop.f32.mrb[19].mxu1  ;;  %v10485_v30 = vrot.slane %v10471_v15, %v24309_v31 }
 0x563   :  { %v21378_v55 = vrot.slane %v10340_v12, %v24309_v31  ;;  %v10486_v18 = vcombine.high %v10478_v29, %v10478_v29  ;;  %v21392_v23 = vrot.slane %v10478_v29, %v24309_v31  ;;  %v10422_v11 = vcombine.high %v18057_v21, %v18057_v21 }
 0x564   :  { %v21386_v5 = vrot.slane %v12921_v59, %v24309_v31  ;;  %v21389_v38 = vrot.slane %v16962_v42, %v24309_v31  ;;  %v10487_v41 = vcombine.high %v10485_v30, %v10485_v30  ;;  %v21399_v14 = vrot.slane %v10485_v30, %v24309_v31 }
 0x565   :  { %v17961_v15 = vpop.f32.mrb[20].mxu1  ;;  %v21402_v59 = vrot.slane %v10486_v18, %v24309_v31  ;;  %v10421_v42 = vcombine.high %v21373_v52, %v21373_v52  ;;  %v10429_v29 = vrot.slane %v18057_v21, %v24309_v31  ;;  %v18058_v62 = vadd.f32 %v17958_v22, %v21239_v51 }
 0x566   :  { %v9998_v53 = vpop.f32.mrb[21].mxu1  ;;  %v21408_v12 = vrot.slane %v10487_v41, %v24309_v31  ;;  %v18059_v37 = vadd.f32 %v9986_v32, %v21242_v3  ;;  %v18060_v30 = vadd.f32 %v17961_v15, %v21245_v25  ;;  %v10436_v10 = vrot.slane %v10422_v11, %v24309_v31 }
 0x567   :  { %v10437_v7 = vcombine.high %v10429_v29, %v10429_v29  ;;  %v10445_v17 = vrot.slane %v10429_v29, %v24309_v31  ;;  %v10569_v28 = vcombine.high %v18058_v62, %v18058_v62  ;;  %v10576_v51 = vrot.slane %v18058_v62, %v24309_v31 }
 0x568   :  { %v10438_v22 = vcombine.high %v10436_v10, %v10436_v10  ;;  %v10452_v25 = vrot.slane %v10436_v10, %v24309_v31  ;;  %v10527_v2 = vrot.slane %v18059_v37, %v24309_v31  ;;  %v18061_v26 = vadd.f32 %v9998_v53, %v21248_v54 }
 0x569   :  { %v17964_v3 = vpop.f32.mrb[22].mxu1  ;;  %v10459_v32 = vrot.slane %v10437_v7, %v24309_v31  ;;  %v10467_v15 = vcombine.high %v10445_v17, %v10445_v17  ;;  %v21426_v18 = vcombine.low %v10421_v42, %v10445_v17  ;;  %v10583_v29 = vrot.slane %v10569_v28, %v24309_v31 }
 0x56a   :  { %v21424_v11 = vpop.f32.mrb[23].mxu1  ;;  %v10584_v21 = vcombine.high %v10576_v51, %v10576_v51  ;;  %v21430_v16 = vrot.slane %v10576_v51, %v24309_v31  ;;  %v21433_v41 = vrot.slane %v10438_v22, %v24309_v31  ;;  %v10468_v62 = vcombine.high %v10452_v25, %v10452_v25 }
 0x56b   :  { %v10469_v19 = vcombine.high %v10459_v32, %v10459_v32  ;;  %v21435_v40 = vcombine.low %v10459_v32, %v10467_v15  ;;  %v10585_v10 = vcombine.high %v10583_v29, %v10583_v29  ;;  %v21438_v7 = vrot.slane %v10583_v29, %v24309_v31 }
 0x56c   :  { %v10606_v17 = vrot.slane %v10584_v21, %v24309_v31  ;;  %v10614_v28 = vcombine.high %v21430_v16, %v21430_v16  ;;  %v21450_v48 = vcombine.low %v21433_v41, %v10468_v62  ;;  %v10520_v32 = vcombine.high %v18059_v37, %v18059_v37 }
 0x56d   :  { %v21443_v42 = vpop.f32.mrb[24].mxu1  ;;  %v21447_v22 = vcombine.low %v10469_v19, %v10452_v25  ;;  %v21455_v29 = vrot.slane %v10585_v10, %v24309_v31  ;;  %v10667_v25 = vcombine.high %v18060_v30, %v18060_v30  ;;  %v10674_v62 = vrot.slane %v18060_v30, %v24309_v31 }
 0x56e   :  { %v21452_v15 = vpop.f32.mrb[25].mxu1  ;;  %v10616_v36 = vcombine.high %v10606_v17, %v10606_v17  ;;  %v21459_v24 = vcombine.low %v10606_v17, %v10614_v28  ;;  %v10534_v19 = vrot.slane %v10520_v32, %v24309_v31  ;;  %v18062_v21 = vadd.f32 %v17964_v3, %v21251_v1 }
 0x56f   :  { %v10617_v10 = vcombine.high %v21455_v29, %v21455_v29  ;;  %v10535_v17 = vcombine.high %v10527_v2, %v10527_v2  ;;  %v21474_v37 = vrot.slane %v10527_v2, %v24309_v31  ;;  %v10682_v53 = vcombine.high %v10674_v62, %v10674_v62 }
 0x570   :  { %v21465_v51 = vcombine.low %v10616_v36, %v21438_v7  ;;  %v10536_v28 = vcombine.high %v10534_v19, %v10534_v19  ;;  %v21477_v32 = vrot.slane %v10534_v19, %v24309_v31  ;;  %v10681_v36 = vrot.slane %v10667_v25, %v24309_v31 }
 0x571   :  { %v21471_v6 = vpop.f32.mrb[26].mxu1  ;;  %v21483_v54 = vrot.slane %v10674_v62, %v24309_v31  ;;  %v10618_v33 = vcombine.high %v18061_v26, %v18061_v26  ;;  %v21486_v1 = vrot.slane %v10535_v17, %v24309_v31  ;;  %v10625_v19 = vrot.slane %v18061_v26, %v24309_v31 }
 0x572   :  { %v21479_v30 = vpop.f32.mrb[27].mxu1  ;;  %v21489_v3 = vrot.slane %v10536_v28, %v24309_v31  ;;  %v10683_v13 = vcombine.high %v10681_v36, %v10681_v36  ;;  %v21495_v63 = vrot.slane %v10681_v36, %v24309_v31  ;;  %v21498_v25 = vrot.slane %v10682_v53, %v24309_v31 }
 0x573   :  { %24310 = vst [vmem:[#allocation61_spill] sm:$0xff] %v21483_v54  ;;  %v10632_v62 = vrot.slane %v10618_v33, %v24309_v31  ;;  %v16965_v26 = vcombine.high %v21474_v37, %v21486_v1  ;;  %v10633_v56 = vcombine.high %v10625_v19, %v10625_v19  ;;  %v10641_v27 = vrot.slane %v10625_v19, %v24309_v31 }
 0x574   :  { %24311 = vst [vmem:[#allocation63_spill] sm:$0xff] %v21495_v63  ;;  %24312 = vst [vmem:[#allocation56_spill] sm:$0xff] %v21498_v25  ;;  %v21514_v53 = vrot.slane %v10683_v13, %v24309_v31  ;;  %v10765_v17 = vcombine.high %v18062_v21, %v18062_v21 }
 0x575   :  { %v21501_v49 = vpop.f32.mrb[28].mxu1  ;;  %v21521_v28 = vrot.slane %v16965_v26, %v24309_v31  ;;  %v10634_v34 = vcombine.high %v10632_v62, %v10632_v62  ;;  %v21525_v36 = vrot.slane %v10632_v62, %v24309_v31  ;;  %v21532_v33 = vrot.slane %v10633_v56, %v24309_v31 }
 0x576   :  { %v21511_v2 = vpop.f32.mrb[29].mxu1  ;;  %24313 = vst [vmem:[#allocation58_spill] sm:$0xff] %v21514_v53  ;;  %v10663_v25 = vcombine.high %v10641_v27, %v10641_v27  ;;  %v21539_v19 = vcombine.low %v10617_v10, %v10641_v27  ;;  %v10772_v62 = vrot.slane %v18062_v21, %v24309_v31  ;;  %v10779_v43 = vrot.slane %v10765_v17, %v24309_v31 }
 0x577   :  { %24314 = vst [vmem:[#allocation65_spill] sm:$0xff] %v21525_v36  ;;  %24315 = vst [vmem:[#allocation67_spill] sm:$0xff] %v21532_v33  ;;  %v21537_v26 = vrot.slane %v10634_v34, %v24309_v31  ;;  %v18063_v56 = vadd.f32 %v21424_v11, %v21254_v57  ;;  %v18064_v53 = vadd.f32 %v21443_v42, %v21257_v39 }
 0x578   :  { %24317 = vst [vmem:[#allocation62_spill] sm:$0xff] %v21539_v19  ;;  %v21552_v34 = vcombine.low %v21532_v33, %v10663_v25  ;;  %v10780_v13 = vcombine.high %v10772_v62, %v10772_v62  ;;  %v10781_v17 = vcombine.high %v10779_v43, %v10779_v43  ;;  %v21561_v63 = vrot.slane %v10772_v62, %v24309_v31 }
 0x579   :  { %v21534_v50 = vpop.f32.mrb[30].mxu1  ;;  %24316 = vst [vmem:[#allocation60_spill] sm:$0xff] %v21537_v26  ;;  %v21564_v57 = vrot.slane %v10779_v43, %v24309_v31  ;;  %v10716_v11 = vcombine.high %v18063_v56, %v18063_v56  ;;  %v10723_v42 = vrot.slane %v18063_v56, %v24309_v31  ;;  %v10863_v25 = vcombine.high %v18064_v53, %v18064_v53 }
 0x57a   :  { %v21542_v54 = vpop.f32.mrb[31].mxu1  ;;  %24318 = vst [vmem:[#allocation69_spill] sm:$0xff] %v21552_v34  ;;  %24319 = vst [vmem:[#allocation64_spill] sm:$0xff] %v21561_v63  ;;  %v10870_v27 = vrot.slane %v18064_v53, %v24309_v31  ;;  %v10802_v10 = vrot.slane %v10780_v13, %v24309_v31  ;;  %v21574_v19 = vrot.slane %v10781_v17, %v24309_v31 }
 0x57b   :  { %24320 = vst [vmem:[#allocation66_spill] sm:$0xff] %v21564_v57  ;;  %v10810_v62 = vcombine.high %v21561_v63, %v21561_v63  ;;  %v18065_v43 = vadd.f32 %v21452_v15, %v21260_v47  ;;  %v10730_v26 = vrot.slane %v10716_v11, %v24309_v31  ;;  %v10731_v36 = vcombine.high %v10723_v42, %v10723_v42 }
 0x57c   :  { %24322 = vst [vmem:[#allocation70_spill] sm:$0xff] %v21574_v19  ;;  %v21582_v56 = vrot.slane %v10723_v42, %v24309_v31  ;;  %v10877_v53 = vrot.slane %v10863_v25, %v24309_v31  ;;  %v10812_v33 = vcombine.high %v10802_v10, %v10802_v10  ;;  %v10878_v17 = vcombine.high %v10870_v27, %v10870_v27 }
 0x57d   :  { %v21566_v39 = vpop.f32.mrb[32].mxu1  ;;  %v21585_v34 = vcombine.low %v10802_v10, %v10810_v62  ;;  %v10732_v63 = vcombine.high %v10730_v26, %v10730_v26  ;;  %v21592_v47 = vrot.slane %v10730_v26, %v24309_v31  ;;  %v10753_v15 = vrot.slane %v10731_v36, %v24309_v31 }
 0x57e   :  { %v21570_v21 = vpop.f32.mrb[33].mxu1  ;;  %v10761_v11 = vcombine.high %v21582_v56, %v21582_v56  ;;  %v21600_v10 = vcombine.low %v10812_v33, %v21564_v57  ;;  %v10879_v62 = vcombine.high %v10877_v53, %v10877_v53  ;;  %v21605_v13 = vrot.slane %v10870_v27, %v24309_v31 }
 0x57f   :  { %24321 = vst [vmem:[#allocation68_spill] sm:$0xff] %v21570_v21  ;;  %24323 = vst [vmem:[#allocation71_spill] sm:$0xff] %v21585_v34  ;;  %v21608_v26 = vrot.slane %v10732_v63, %v24309_v31  ;;  %v10763_v19 = vcombine.high %v10753_v15, %v10753_v15  ;;  %v10900_v33 = vrot.slane %v10878_v17, %v24309_v31 }
 0x580   :  { %24325 = vst [vmem:[#allocation72_spill] sm:$0xff] %v21600_v10  ;;  %24326 = vst [vmem:[#allocation73_spill] sm:$0xff] %v21605_v13  ;;  %v21612_v34 = vcombine.low %v10753_v15, %v10761_v11  ;;  %v21619_v25 = vrot.slane %v10879_v62, %v24309_v31  ;;  %v10814_v15 = vcombine.high %v18065_v43, %v18065_v43 }
 0x581   :  { %v21589_v21 = vpop.f32.mrb[34].mxu1  ;;  %v21628_v36 = vcombine.low %v10763_v19, %v21592_v47  ;;  %v10910_v62 = vcombine.high %v10900_v33, %v10900_v33  ;;  %v13450_v10 = vcombine.low %v21605_v13, %v10900_v33  ;;  %v24333_v27 = vcombine.low %v21358_v20, %v21369_v58 }
 0x582   :  { %v21597_v42 = vpop.f32.mrb[35].mxu1  ;;  %24327 = vst [vmem:[#allocation74_spill] sm:$0xff] %v21612_v34  ;;  %24329 = vst [vmem:[#allocation12_spill] sm:$0xff] %v21619_v25  ;;  %v10828_v63 = vrot.slane %v10814_v15, %v24309_v31 }
 0x583   :  { %24324 = vst [vmem:[#allocation75_spill] sm:$0xff] %v21597_v42  ;;  %v21615_v42 = vrot.slane %v10877_v53, %v24309_v31  ;;  %24331 = vst [vmem:[#allocation15_spill] sm:$0xff] %v21628_v36  ;;  %v10821_v53 = vrot.slane %v18065_v43, %v24309_v31  ;;  %v24334_v43 = vcombine.high %v21358_v20, %v21369_v58 }
 0x584   :  { %v21649_v17 = vrot.slane %v13450_v10, %v24309_v31  ;;  %v10830_v20 = vcombine.high %v10828_v63, %v10828_v63  ;;  %v21665_v58 = vrot.slane %v10828_v63, %v24309_v31 }
 0x585   :  { %24328 = vst [vmem:[#allocation2_spill] sm:$0xff] %v21615_v42  ;;  %v21623_v57 = vpop.f32.mrb[36].mxu1  ;;  %v10829_v19 = vcombine.high %v10821_v53, %v10821_v53  ;;  %v21642_v36 = vrot.slane %v10821_v53, %v24309_v31  ;;  %v21652_v33 = vcombine.low %v10910_v62, %v21615_v42  ;;  %v24338_v53 = vcombine.high %v21366_v35, %v21378_v55 }
 0x586   :  { %24330 = vst [vmem:[#allocation13_spill] sm:$0xff] %v21623_v57  ;;  %v21631_v11 = vpop.f32.mrb[37].mxu1  ;;  %v12882_v57 = vrot.slane %v24333_v27, %v24309_v31  ;;  %24335 = vst [vmem:[#allocation48_spill] sm:$0xff] %v21649_v17  ;;  %v24337_v27 = vcombine.low %v21366_v35, %v21378_v55  ;;  %v18067_v55 = vadd.f32 %v21479_v30, %v21266_v60 }
 0x587   :  { %24332 = vst [vmem:[#allocation46_spill] sm:$0xff] %v21631_v11  ;;  %v12889_v11 = vrot.slane %v24334_v43, %v24309_v31  ;;  %24336 = vst [vmem:[#allocation50_spill] sm:$0xff] %v21652_v33  ;;  %v12903_v13 = vrot.slane %v24338_v53, %v24309_v31  ;;  %v21668_v10 = vrot.slane %v10829_v19, %v24309_v31 }
 0x588   :  { %v12896_v15 = vrot.slane %v24337_v27, %v24309_v31  ;;  %v18066_v27 = vadd.f32 %v21471_v6, %v21263_v45  ;;  %v10911_v35 = vcombine.high %v21619_v25, %v21619_v25  ;;  %v21679_v53 = vrot.slane %v10830_v20, %v24309_v31 }
 0x589   :  { %v21662_v34 = vpop.f32.mrb[38].mxu1  ;;  %v12904_v62 = vcombine.low %v12882_v57, %v12889_v11  ;;  %v10912_v60 = vcombine.high %v18067_v55, %v18067_v55  ;;  %v10919_v20 = vrot.slane %v18067_v55, %v24309_v31  ;;  %v12943_v57 = vrot.slane %v21362_v4, %v24309_v31 }
 0x58a   :  { %v21670_v43 = vpop.f32.mrb[39].mxu1  ;;  %v12905_v33 = vcombine.low %v12896_v15, %v12903_v13  ;;  %v10961_v45 = vcombine.high %v18066_v27, %v18066_v27  ;;  %v10968_v6 = vrot.slane %v18066_v27, %v24309_v31  ;;  %v12944_v55 = vcombine.low %v21386_v5, %v21389_v38 }
 0x58b   :  { %24339 = vst [vmem:[#allocation52_spill] sm:$0xff] %v21670_v43  ;;  %v12912_v13 = vrot.slane %v12904_v62, %v24309_v31  ;;  %v10927_v19 = vcombine.high %v10919_v20, %v10919_v20  ;;  %v10935_v25 = vrot.slane %v10919_v20, %v24309_v31 }
 0x58c   :  { %v12919_v11 = vrot.slane %v12905_v33, %v24309_v31  ;;  %v10975_v63 = vrot.slane %v10961_v45, %v24309_v31  ;;  %v10976_v27 = vcombine.high %v10968_v6, %v10968_v6  ;;  %v21701_v17 = vrot.slane %v10968_v6, %v24309_v31 }
 0x58d   :  { %v21688_v30 = vpop.f32.mrb[40].mxu1  ;;  %v10949_v20 = vrot.slane %v10927_v19, %v24309_v31  ;;  %v12951_v5 = vrot.slane %v12944_v55, %v24309_v31 }
 0x58e   :  { %24340 = vst [vmem:[#allocation54_spill] sm:$0xff] %v21688_v30  ;;  %v21697_v62 = vpop.f32.mrb[41].mxu1  ;;  %v12920_v33 = vcombine.low %v12912_v13, %v12919_v11  ;;  %v10926_v30 = vrot.slane %v10912_v60, %v24309_v31  ;;  %v10977_v15 = vcombine.high %v10975_v63, %v10975_v63  ;;  %v21708_v42 = vrot.slane %v10975_v63, %v24309_v31 }
 0x58f   :  { %24341 = vst [vmem:[#allocation19_spill] sm:$0xff] %v21697_v62  ;;  %v21711_v13 = vrot.slane %v10976_v27, %v24309_v31  ;;  %v12958_v11 = vrot.slane %v12943_v57, %v24309_v31  ;;  %v10957_v62 = vcombine.high %v10935_v25, %v10935_v25  ;;  %v21727_v57 = vcombine.low %v10911_v35, %v10935_v25 }
 0x590   :  { %15752 = vxpose.xlu0.b32.start [1/2] (short) (narrow) %v12920_v33, 8  ;;  %v10928_v6 = vcombine.high %v10926_v30, %v10926_v30  ;;  %v10942_v60 = vrot.slane %v10926_v30, %v24309_v31  ;;  %v21721_v38 = vrot.slane %v10977_v15, %v24309_v31  ;;  %v10959_v27 = vcombine.high %v10949_v20, %v10949_v20 }
 0x591   :  { %v21714_v45 = vpop.f32.mrb[42].mxu1  ;;  %v21732_v19 = vcombine.low %v10949_v20, %v10957_v62  ;;  %v24343_v63 = vcombine.high %v21362_v4, %v21362_v4  ;;  %v12977_v20 = vrot.slane %v21426_v18, %v24309_v31  ;;  %v12984_v15 = vrot.slane %v21435_v40, %v24309_v31 }
 0x592   :  { %v21718_v43 = vpop.f32.mrb[43].mxu1  ;;  %v21730_v33 = vrot.slane %v10928_v6, %v24309_v31  ;;  %v10958_v30 = vcombine.high %v10942_v60, %v10942_v60  ;;  %v21745_v6 = vcombine.low %v10959_v27, %v10942_v60  ;;  %v12959_v55 = vcombine.low %v12951_v5, %v12958_v11 }
 0x593   :  { %24342 = vst [vmem:[#allocation21_spill] sm:$0xff] %v21718_v43  ;;  %v12960_v25 = vcombine.low %v21373_v52, %v24343_v63  ;;  %v12991_v52 = vrot.slane %v21447_v22, %v24309_v31  ;;  %v18068_v60 = vadd.f32 %v21501_v49, %v21269_v8  ;;  %v18069_v63 = vadd.f32 %v21511_v2, %v21272_v0 }
 0x594   :  { %v21748_v62 = vcombine.low %v21730_v33, %v10958_v30  ;;  %v24346_v18 = vcombine.high %v21433_v41, %v21433_v41  ;;  %v13017_v40 = vrot.slane %v21450_v48, %v24309_v31  ;;  %v13031_v11 = vrot.slane %v21402_v59, %v24309_v31  ;;  %15753 = vxpose.xlu0.b32.end [2/2] (short) (narrow) %v12959_v55, 8 }
 0x595   :  { %v21743_v35 = vpop.f32.mrb[44].mxu1  ;;  %v12970_v4 = vrot.slane %v12960_v25, %v24309_v31  ;;  %v12993_v22 = vcombine.low %v12984_v15, %v12991_v52  ;;  %v11059_v27 = vcombine.high %v18068_v60, %v18068_v60  ;;  %v11066_v8 = vrot.slane %v18068_v60, %v24309_v31 }
 0x596   :  { %24344 = vst [vmem:[#allocation23_spill] sm:$0xff] %v21743_v35  ;;  %v21754_v43 = vpop.f32.mrb[45].mxu1  ;;  %v13010_v30 = vcombine.low %v24346_v18, %v21392_v23  ;;  %v11010_v0 = vcombine.high %v18069_v63, %v18069_v63  ;;  %v11017_v2 = vrot.slane %v18069_v63, %v24309_v31  ;;  %v13046_v25 = vrot.slane %v13031_v11, %v24309_v31 }
 0x597   :  { %24345 = vst [vmem:[#allocation25_spill] sm:$0xff] %v21754_v43  ;;  %v12992_v5 = vcombine.low %v12970_v4, %v12977_v20  ;;  %v13007_v55 = vrot.slane %v12993_v22, %v24309_v31  ;;  %v11073_v15 = vrot.slane %v11059_v27, %v24309_v31  ;;  %v11074_v20 = vcombine.high %v11066_v8, %v11066_v8 }
 0x598   :  { %v13024_v41 = vrot.slane %v13010_v30, %v24309_v31  ;;  %v21783_v4 = vrot.slane %v11066_v8, %v24309_v31  ;;  %v11024_v52 = vrot.slane %v11010_v0, %v24309_v31  ;;  %v11025_v60 = vcombine.high %v11017_v2, %v11017_v2 }
 0x599   :  { %v21772_v49 = vpop.f32.mrb[46].mxu1  ;;  %v13000_v48 = vrot.slane %v12992_v5, %v24309_v31  ;;  %v11033_v63 = vrot.slane %v11017_v2, %v24309_v31  ;;  %v11089_v11 = vrot.slane %v11073_v15, %v24309_v31 }
 0x59a   :  { %24347 = vst [vmem:[#allocation27_spill] sm:$0xff] %v21772_v49  ;;  %v21777_v18 = vpop.f32.mrb[47].mxu1  ;;  %24349 = vst [vmem:[#allocation31_spill] sm:$0xff] %v21783_v4  ;;  %v11075_v49 = vcombine.high %v11073_v15, %v11073_v15  ;;  %v11104_v22 = vcombine.high %v21783_v4, %v21783_v4  ;;  %v11026_v27 = vcombine.high %v11024_v52, %v11024_v52 }
 0x59b   :  { %24348 = vst [vmem:[#allocation29_spill] sm:$0xff] %v21777_v18  ;;  %v13008_v30 = vcombine.low %v13000_v48, %v13007_v55  ;;  %v11096_v18 = vrot.slane %v11074_v20, %v24309_v31  ;;  %v21794_v8 = vrot.slane %v11024_v52, %v24309_v31  ;;  %v11047_v0 = vrot.slane %v11025_v60, %v24309_v31 }
 0x59c   :  { %v11103_v2 = vrot.slane %v11075_v49, %v24309_v31  ;;  %v11105_v48 = vcombine.high %v11089_v11, %v11089_v11  ;;  %v13032_v15 = vcombine.low %v13017_v40, %v13024_v41  ;;  %v24352_v41 = vcombine.high %v21392_v23, %v21402_v59 }
 0x59d   :  { %v21789_v5 = vpop.f32.mrb[48].mxu1  ;;  %15784 = vxpose.xlu1.b32.start [1/2] (short) (narrow) %v13008_v30, 8  ;;  %v11106_v55 = vcombine.high %v11096_v18, %v11096_v18  ;;  %v21800_v20 = vcombine.low %v11096_v18, %v11104_v22  ;;  %v13625_v52 = vcombine.low %v11033_v63, %v11047_v0  ;;  %v24356_v23 = vcombine.low %v21474_v37, %v21486_v1 }
 0x59e   :  { %24350 = vst [vmem:[#allocation33_spill] sm:$0xff] %v21789_v5  ;;  %v21797_v43 = vpop.f32.mrb[49].mxu1  ;;  %v21803_v5 = vrot.slane %v11026_v27, %v24309_v31  ;;  %v21809_v60 = vcombine.low %v11103_v2, %v11105_v48  ;;  %v13039_v30 = vrot.slane %v13032_v15, %v24309_v31  ;;  %v13058_v18 = vrot.slane %v24352_v41, %v24309_v31 }
 0x59f   :  { %24351 = vst [vmem:[#allocation35_spill] sm:$0xff] %v21797_v43  ;;  %v21807_v4 = vcombine.low %v11106_v55, %v11089_v11  ;;  %v16974_v43 = vcombine.high %v11033_v63, %v11047_v0  ;;  %v21815_v40 = vrot.slane %v13625_v52, %v24309_v31  ;;  %v24353_v11 = vcombine.low %v21399_v14, %v21408_v12 }
 0x5a0   :  { %v13047_v0 = vcombine.low %v13039_v30, %v13046_v25  ;;  %v24355_v48 = vcombine.high %v21399_v14, %v21408_v12  ;;  %v13079_v59 = vrot.slane %v24356_v23, %v24309_v31  ;;  %v18070_v52 = vadd.f32 %v21534_v50, %v21275_v61 }
 0x5a1   :  { %v13065_v22 = vrot.slane %v24353_v11, %v24309_v31  ;;  %v21825_v27 = vpop.f32.mrb[50].mxu1  ;;  %v21828_v63 = vrot.slane %v16974_v43, %v24309_v31  ;;  %v18071_v41 = vadd.f32 %v21542_v54, %v21278_v46  ;;  %v11107_v43 = vcombine.high %v11103_v2, %v11103_v2 }
 0x5a2   :  { %24354 = vst [vmem:[#allocation37_spill] sm:$0xff] %v21825_v27  ;;  %v13072_v55 = vrot.slane %v24355_v48, %v24309_v31  ;;  %v21842_v11 = vpop.f32.mrb[51].mxu1  ;;  %15785 = vxpose.xlu1.b32.end [2/2] (short) (narrow) %v13047_v0, 8  ;;  %v24358_v14 = vcombine.low %v21477_v32, %v21489_v3  ;;  %v24359_v37 = vcombine.high %v21477_v32, %v21477_v32  ;;  %v24386_v27 = vld [vmem:[#allocation58_spill] sm:$0xff] }
 0x5a3   :  { %v13080_v15 = vcombine.low %v13058_v18, %v13065_v22  ;;  %24357 = vst [vmem:[#allocation39_spill] sm:$0xff] %v21842_v11  ;;  %v24360_v61 = vcombine.high %v21489_v3, %v21489_v3  ;;  %v11157_v54 = vcombine.high %v18070_v52, %v18070_v52  ;;  %v11164_v2 = vrot.slane %v18070_v52, %v24309_v31 }
 0x5a4   :  { %v13081_v25 = vcombine.low %v13072_v55, %v13079_v59  ;;  %v13112_v12 = vrot.slane %v24358_v14, %v24309_v31  ;;  %v13119_v1 = vrot.slane %v24359_v37, %v24309_v31  ;;  %v11108_v30 = vcombine.high %v18071_v41, %v18071_v41 }
 0x5a5   :  { %v13136_v46 = vcombine.low %v24360_v61, %v21430_v16  ;;  %v13088_v50 = vrot.slane %v13080_v15, %v24309_v31  ;;  %v11115_v22 = vrot.slane %v18071_v41, %v24309_v31  ;;  %v11171_v48 = vrot.slane %v11157_v54, %v24309_v31 }
 0x5a6   :  { %v13095_v18 = vrot.slane %v13081_v25, %v24309_v31  ;;  %v13120_v0 = vcombine.low %v21521_v28, %v13112_v12  ;;  %v13134_v32 = vrot.slane %v13119_v1, %v24309_v31  ;;  %v11172_v55 = vcombine.high %v11164_v2, %v11164_v2 }
 0x5a7   :  { %v21864_v3 = vrot.slane %v11164_v2, %v24309_v31  ;;  %v11122_v16 = vrot.slane %v11108_v30, %v24309_v31  ;;  %v11123_v59 = vcombine.high %v11115_v22, %v11115_v22  ;;  %v21868_v15 = vrot.slane %v11115_v22, %v24309_v31 }
 0x5a8   :  { %v13096_v23 = vcombine.low %v13088_v50, %v13095_v18  ;;  %v13127_v52 = vrot.slane %v13120_v0, %v24309_v31  ;;  %v11173_v41 = vcombine.high %v11171_v48, %v11171_v48  ;;  %v21872_v28 = vrot.slane %v11171_v48, %v24309_v31 }
 0x5a9   :  { %v21875_v25 = vrot.slane %v11172_v55, %v24309_v31  ;;  %v11124_v14 = vcombine.high %v11122_v16, %v11122_v16  ;;  %v21878_v12 = vrot.slane %v11122_v16, %v24309_v31  ;;  %v21881_v37 = vrot.slane %v11123_v59, %v24309_v31  ;;  %v21914_v59 = vpop.f32.mrb[0].mxu1 }
 0x5aa   :  { %15816 = vxpose.xlu0.b32.start [1/2] (short) (narrow) %v13096_v23, 8  ;;  %v21884_v1 = vcombine.low %v11107_v43, %v21868_v15  ;;  %v13135_v61 = vcombine.low %v13127_v52, %v13134_v32  ;;  %v21887_v50 = vrot.slane %v11173_v41, %v24309_v31  ;;  %v24361_v0 = vcombine.high %v21438_v7, %v21438_v7  ;;  %v21929_v54 = vpop.f32.mrb[1].mxu1 }
 0x5ab   :  { %v16977_v30 = vcombine.high %v21864_v3, %v21875_v25  ;;  %v21896_v18 = vrot.slane %v11124_v14, %v24309_v31  ;;  %v13146_v16 = vrot.slane %v13136_v46, %v24309_v31  ;;  %v13153_v23 = vrot.slane %v21459_v24, %v24309_v31  ;;  %24362 = vst [vmem:[#allocation41_spill] sm:$0xff] %v21914_v59  ;;  %v24363_v24 = vld [vmem:[#allocation68_spill] sm:$0xff] }
 0x5ac   :  { %v13139_v32 = vcombine.low %v21455_v29, %v24361_v0  ;;  %v13160_v29 = vrot.slane %v21465_v51, %v24309_v31  ;;  %v18072_v46 = vadd.f32 %v21566_v39, %v21281_v44  ;;  %v11205_v0 = vcombine.high %v21887_v50, %v21887_v50  ;;  %24364 = vst [vmem:[#allocation43_spill] sm:$0xff] %v21929_v54  ;;  %v24366_v51 = vld [vmem:[#allocation67_spill] sm:$0xff]  ;;  %v24369_v44 = vld [vmem:[#allocation60_spill] sm:$0xff] }
 0x5ad   :  { %v21909_v55 = vrot.slane %v16977_v30, %v24309_v31  ;;  %v13168_v14 = vcombine.low %v13146_v16, %v13153_v23  ;;  %v18073_v30 = vadd.f32 %v24363_v24, %v21284_v9  ;;  %v24368_v23 = vld [vmem:[#allocation65_spill] sm:$0xff] }
 0x5ae   :  { %15817 = vxpose.xlu0.b32.end [2/2] (short) (narrow) %v13135_v61, 8  ;;  %v13167_v41 = vrot.slane %v13139_v32, %v24309_v31  ;;  %v24365_v61 = vld [vmem:[#allocation69_spill] sm:$0xff]  ;;  %v24367_v32 = vcombine.high %v24366_v51, %v24366_v51  ;;  %v24370_v39 = vcombine.low %v24368_v23, %v24369_v44  ;;  %v11255_v24 = vcombine.high %v18072_v46, %v18072_v46 }
 0x5af   :  { %v13200_v2 = vrot.slane %v24365_v61, %v24309_v31  ;;  %v13176_v9 = vrot.slane %v13168_v14, %v24309_v31  ;;  %v11262_v43 = vrot.slane %v18072_v46, %v24309_v31  ;;  %v11206_v52 = vcombine.high %v18073_v30, %v18073_v30  ;;  %v24371_v61 = vld [vmem:[#allocation62_spill] sm:$0xff] }
 0x5b0   :  { %v13169_v48 = vcombine.low %v13160_v29, %v13167_v41  ;;  %v13207_v16 = vrot.slane %v24367_v32, %v24309_v31  ;;  %v13234_v7 = vrot.slane %v24370_v39, %v24309_v31  ;;  %v11213_v41 = vrot.slane %v18073_v30, %v24309_v31 }
 0x5b1   :  { %v24372_v22 = vrot.slane %v24371_v61, %v24309_v31  ;;  %v11269_v49 = vrot.slane %v11255_v24, %v24309_v31  ;;  %v11270_v35 = vcombine.high %v11262_v43, %v11262_v43  ;;  %v21951_v39 = vrot.slane %v11262_v43, %v24309_v31 }
 0x5b2   :  { %v13183_v29 = vrot.slane %v13169_v48, %v24309_v31  ;;  %v13222_v32 = vrot.slane %v13207_v16, %v24309_v31  ;;  %v11220_v14 = vrot.slane %v11206_v52, %v24309_v31  ;;  %v11221_v54 = vcombine.high %v11213_v41, %v11213_v41 }
 0x5b3   :  { %v13208_v51 = vcombine.low %v24372_v22, %v13200_v2  ;;  %v11229_v48 = vrot.slane %v11213_v41, %v24309_v31  ;;  %v11271_v59 = vcombine.high %v11269_v49, %v11269_v49  ;;  %v21957_v61 = vrot.slane %v11269_v49, %v24309_v31 }
 0x5b4   :  { %v13184_v46 = vcombine.low %v13176_v9, %v13183_v29  ;;  %v21960_v2 = vrot.slane %v11270_v35, %v24309_v31  ;;  %v11300_v22 = vcombine.high %v21951_v39, %v21951_v39  ;;  %v11222_v43 = vcombine.high %v11220_v14, %v11220_v14 }
 0x5b5   :  { %v13215_v30 = vrot.slane %v13208_v51, %v24309_v31  ;;  %24373 = vst [vmem:[#allocation45_spill] sm:$0xff] %v21957_v61  ;;  %v21965_v52 = vrot.slane %v11220_v14, %v24309_v31  ;;  %v11243_v16 = vrot.slane %v11221_v54, %v24309_v31  ;;  %v11251_v9 = vcombine.high %v11229_v48, %v11229_v48  ;;  %v24379_v51 = vld [vmem:[#allocation56_spill] sm:$0xff] }
 0x5b6   :  { %24374 = vst [vmem:[#allocation3_spill] sm:$0xff] %v21960_v2  ;;  %15848 = vxpose.xlu1.b32.start [1/2] (short) (narrow) %v13184_v46, 8  ;;  %v21969_v24 = vrot.slane %v11271_v59, %v24309_v31  ;;  %v21974_v35 = vcombine.low %v21960_v2, %v11300_v22  ;;  %v21976_v29 = vcombine.low %v11205_v0, %v11229_v48  ;;  %v21985_v46 = vpop.f32.mrb[2].mxu1 }
 0x5b7   :  { %v21979_v41 = vrot.slane %v11222_v43, %v24309_v31  ;;  %v11253_v14 = vcombine.high %v11243_v16, %v11243_v16  ;;  %v21983_v54 = vcombine.low %v11243_v16, %v11251_v9  ;;  %24376 = vst [vmem:[#allocation69_spill] sm:$0xff] %v21985_v46  ;;  %v13223_v49 = vcombine.low %v13215_v30, %v13222_v32  ;;  %v24378_v9 = vld [vmem:[#allocation61_spill] sm:$0xff]  ;;  %v24384_v43 = vld [vmem:[#allocation75_spill] sm:$0xff]  ;;  %v22016_v2 = vpop.f32.mrb[3].mxu1 }
 0x5b8   :  { %24375 = vst [vmem:[#allocation68_spill] sm:$0xff] %v21969_v24  ;;  %v24377_v0 = vcombine.high %v24368_v23, %v24369_v44  ;;  %v24380_v46 = vcombine.low %v24378_v9, %v24379_v51  ;;  %v24381_v32 = vcombine.high %v24378_v9, %v24379_v51  ;;  %v24382_v23 = vld [vmem:[#allocation42_spill] sm:$0xff]  ;;  %24388 = vst [vmem:[#allocation67_spill] sm:$0xff] %v22016_v2 }
 0x5b9   :  { %v21998_v16 = vcombine.low %v11253_v14, %v21965_v52  ;;  %v18074_v44 = vadd.f32 %v21589_v21, %v24382_v23  ;;  %v24385_v14 = vld [vmem:[#allocation63_spill] sm:$0xff]  ;;  %v24390_v21 = vrot.slane %v21582_v56, %v24309_v31  ;;  %v24393_v56 = vcombine.high %v21608_v26, %v21608_v26 }
 0x5ba   :  { %v13241_v48 = vrot.slane %v24377_v0, %v24309_v31  ;;  %v13248_v59 = vrot.slane %v24380_v46, %v24309_v31  ;;  %v13255_v30 = vrot.slane %v24381_v32, %v24309_v31  ;;  %15849 = vxpose.xlu1.b32.end [2/2] (short) (narrow) %v13223_v49, 8  ;;  %v24383_v0 = vld [vmem:[#allocation44_spill] sm:$0xff]  ;;  %v24387_v24 = vcombine.low %v24385_v14, %v24386_v27 }
 0x5bb   :  { %v18075_v11 = vadd.f32 %v24384_v43, %v24383_v0  ;;  %v24389_v51 = vcombine.high %v24385_v14, %v24386_v27  ;;  %v11353_v9 = vcombine.high %v18074_v44, %v18074_v44  ;;  %v24392_v0 = vld [vmem:[#allocation64_spill] sm:$0xff] }
 0x5bc   :  { %v13256_v22 = vcombine.low %v13234_v7, %v13241_v48  ;;  %v13281_v61 = vrot.slane %v24387_v24, %v24309_v31  ;;  %v13257_v46 = vcombine.low %v13248_v59, %v13255_v30  ;;  %v13310_v7 = vrot.slane %v24390_v21, %v24309_v31 }
 0x5bd   :  { %v13288_v49 = vrot.slane %v24389_v51, %v24309_v31  ;;  %v24391_v48 = vcombine.high %v21592_v47, %v21592_v47  ;;  %v11360_v59 = vrot.slane %v18074_v44, %v24309_v31  ;;  %v11304_v32 = vcombine.high %v18075_v11, %v18075_v11 }
 0x5be   :  { %v13264_v24 = vrot.slane %v13256_v22, %v24309_v31  ;;  %v13271_v30 = vrot.slane %v13257_v46, %v24309_v31  ;;  %v11311_v27 = vrot.slane %v18075_v11, %v24309_v31  ;;  %v13315_v14 = vcombine.low %v24393_v56, %v24392_v0 }
 0x5bf   :  { %v13314_v43 = vcombine.low %v21608_v26, %v24391_v48  ;;  %v13296_v23 = vcombine.low %v13281_v61, %v13288_v49  ;;  %v11367_v47 = vrot.slane %v11353_v9, %v24309_v31  ;;  %v11368_v51 = vcombine.high %v11360_v59, %v11360_v59 }
 0x5c0   :  { %v22040_v21 = vrot.slane %v11360_v59, %v24309_v31  ;;  %v11318_v22 = vrot.slane %v11304_v32, %v24309_v31  ;;  %v13272_v44 = vcombine.low %v13264_v24, %v13271_v30  ;;  %v11319_v48 = vcombine.high %v11311_v27, %v11311_v27 }
 0x5c1   :  { %v22044_v46 = vrot.slane %v11311_v27, %v24309_v31  ;;  %v13303_v11 = vrot.slane %v13296_v23, %v24309_v31  ;;  %v11369_v61 = vcombine.high %v11367_v47, %v11367_v47  ;;  %v22048_v49 = vrot.slane %v11367_v47, %v24309_v31  ;;  %v24404_v23 = vld [vmem:[#allocation15_spill] sm:$0xff] }
 0x5c2   :  { %24394 = vst [vmem:[#allocation65_spill] sm:$0xff] %v22040_v21  ;;  %v11390_v26 = vrot.slane %v11368_v51, %v24309_v31  ;;  %v11398_v9 = vcombine.high %v22040_v21, %v22040_v21  ;;  %15880 = vxpose.xlu0.b32.start [1/2] (short) (narrow) %v13272_v44, 8  ;;  %v11320_v24 = vcombine.high %v11318_v22, %v11318_v22 }
 0x5c3   :  { %24395 = vst [vmem:[#allocation60_spill] sm:$0xff] %v22044_v46  ;;  %24396 = vst [vmem:[#allocation62_spill] sm:$0xff] %v22048_v49  ;;  %v22056_v32 = vrot.slane %v11318_v22, %v24309_v31  ;;  %v22059_v30 = vrot.slane %v11319_v48, %v24309_v31  ;;  %v22062_v27 = vrot.slane %v11369_v61, %v24309_v31  ;;  %v24403_v61 = vld [vmem:[#allocation74_spill] sm:$0xff] }
 0x5c4   :  { %v11400_v0 = vcombine.high %v11390_v26, %v11390_v26  ;;  %v22066_v56 = vcombine.low %v11390_v26, %v11398_v9  ;;  %v22069_v47 = vrot.slane %v11320_v24, %v24309_v31  ;;  %v13311_v44 = vcombine.low %v13303_v11, %v13310_v7  ;;  %v22083_v24 = vpop.f32.mrb[4].mxu1  ;;  %v24406_v11 = vld [vmem:[#allocation8_spill] sm:$0xff] }
 0x5c5   :  { %24397 = vst [vmem:[#allocation61_spill] sm:$0xff] %v22056_v32  ;;  %24398 = vst [vmem:[#allocation56_spill] sm:$0xff] %v22059_v30  ;;  %v13322_v59 = vrot.slane %v24403_v61, %v24309_v31  ;;  %v13329_v26 = vrot.slane %v24404_v23, %v24309_v31  ;;  %v13336_v9 = vrot.slane %v13314_v43, %v24309_v31  ;;  %v22098_v51 = vpop.f32.mrb[5].mxu1 }
 0x5c6   :  { %24399 = vst [vmem:[#allocation42_spill] sm:$0xff] %v22062_v27  ;;  %24400 = vst [vmem:[#allocation44_spill] sm:$0xff] %v22066_v56  ;;  %v22076_v48 = vcombine.low %v11400_v0, %v22048_v49  ;;  %15881 = vxpose.xlu0.b32.end [2/2] (short) (narrow) %v13311_v44, 8  ;;  %v13343_v7 = vrot.slane %v13315_v14, %v24309_v31  ;;  %v24407_v0 = vld [vmem:[#allocation13_spill] sm:$0xff]  ;;  %v24409_v56 = vld [vmem:[#allocation46_spill] sm:$0xff]  ;;  %v11401_v43 = vcombine.high %v22062_v27, %v22062_v27 }
 0x5c7   :  { %24401 = vst [vmem:[#allocation75_spill] sm:$0xff] %v22069_v47  ;;  %24405 = vst [vmem:[#allocation58_spill] sm:$0xff] %v22083_v24  ;;  %v18076_v2 = vadd.f32 %v24407_v0, %v24406_v11  ;;  %v13344_v61 = vcombine.low %v13322_v59, %v13329_v26  ;;  %v24410_v24 = vld [vmem:[#allocation71_spill] sm:$0xff]  ;;  %v24412_v14 = vld [vmem:[#allocation72_spill] sm:$0xff] }
 0x5c8   :  { %24402 = vst [vmem:[#allocation63_spill] sm:$0xff] %v22076_v48  ;;  %v24408_v48 = vld [vmem:[#allocation6_spill] sm:$0xff]  ;;  %v13369_v49 = vrot.slane %v24410_v24, %v24309_v31  ;;  %24411 = vst [vmem:[#allocation64_spill] sm:$0xff] %v22098_v51  ;;  %v13345_v21 = vcombine.low %v13336_v9, %v13343_v7  ;;  %v13376_v47 = vrot.slane %v24412_v14, %v24309_v31 }
 0x5c9   :  { %v18077_v23 = vadd.f32 %v24409_v56, %v24408_v48  ;;  %v11451_v22 = vcombine.high %v18076_v2, %v18076_v2  ;;  %v11458_v44 = vrot.slane %v18076_v2, %v24309_v31  ;;  %v13352_v59 = vrot.slane %v13344_v61, %v24309_v31  ;;  %v24413_v48 = vld [vmem:[#allocation70_spill] sm:$0xff] }
 0x5ca   :  { %v13383_v11 = vrot.slane %v24413_v48, %v24309_v31  ;;  %v13359_v0 = vrot.slane %v13345_v21, %v24309_v31  ;;  %v13384_v61 = vcombine.low %v13369_v49, %v13376_v47  ;;  %v24424_v49 = vld [vmem:[#allocation7_spill] sm:$0xff] }
 0x5cb   :  { %v11402_v26 = vcombine.high %v18077_v23, %v18077_v23  ;;  %v11409_v56 = vrot.slane %v18077_v23, %v24309_v31  ;;  %v11465_v24 = vrot.slane %v11451_v22, %v24309_v31  ;;  %v11466_v51 = vcombine.high %v11458_v44, %v11458_v44 }
 0x5cc   :  { %v22110_v9 = vrot.slane %v11458_v44, %v24309_v31  ;;  %v13360_v27 = vcombine.low %v13352_v59, %v13359_v0 }
 0x5cd   :  { %v11416_v2 = vrot.slane %v11402_v26, %v24309_v31  ;;  %v11417_v7 = vcombine.high %v11409_v56, %v11409_v56  ;;  %v11425_v14 = vrot.slane %v11409_v56, %v24309_v31  ;;  %v11467_v32 = vcombine.high %v11465_v24, %v11465_v24 }
 0x5ce   :  { %v22115_v23 = vrot.slane %v11465_v24, %v24309_v31  ;;  %v22118_v30 = vrot.slane %v11466_v51, %v24309_v31  ;;  %15912 = vxpose.xlu1.b32.start [1/2] (short) (narrow) %v13360_v27, 8  ;;  %v13391_v24 = vrot.slane %v13384_v61, %v24309_v31  ;;  %v24419_v61 = vcombine.low %v21642_v36, %v21668_v10 }
 0x5cf   :  { %v11418_v21 = vcombine.high %v11416_v2, %v11416_v2  ;;  %v22121_v22 = vrot.slane %v11416_v2, %v24309_v31  ;;  %v11439_v44 = vrot.slane %v11417_v7, %v24309_v31  ;;  %v11447_v46 = vcombine.high %v11425_v14, %v11425_v14  ;;  %v24416_v7 = vld [vmem:[#allocation66_spill] sm:$0xff] }
 0x5d0   :  { %v22125_v26 = vrot.slane %v11467_v32, %v24309_v31  ;;  %v22131_v59 = vcombine.low %v11401_v43, %v11425_v14  ;;  %v13398_v2 = vrot.slane %v13383_v11, %v24309_v31  ;;  %v24417_v43 = vcombine.high %v24416_v7, %v24413_v48  ;;  %v22161_v32 = vpop.f32.mrb[6].mxu1 }
 0x5d1   :  { %v22134_v51 = vrot.slane %v11418_v21, %v24309_v31  ;;  %v11449_v56 = vcombine.high %v11439_v44, %v11439_v44  ;;  %v22136_v0 = vcombine.low %v11439_v44, %v11447_v46  ;;  %v13417_v44 = vrot.slane %v24419_v61, %v24309_v31  ;;  %24421 = vst [vmem:[#allocation13_spill] sm:$0xff] %v22161_v32  ;;  %v24425_v46 = vld [vmem:[#allocation52_spill] sm:$0xff]  ;;  %v24429_v32 = vld [vmem:[#allocation2_spill] sm:$0xff] }
 0x5d2   :  { %24414 = vst [vmem:[#allocation74_spill] sm:$0xff] %v22125_v26  ;;  %v13410_v14 = vrot.slane %v24417_v43, %v24309_v31  ;;  %v24420_v11 = vcombine.high %v21642_v36, %v21668_v10  ;;  %v13399_v48 = vcombine.low %v13391_v24, %v13398_v2  ;;  %v24423_v43 = vld [vmem:[#allocation11_spill] sm:$0xff]  ;;  %v24426_v36 = vcombine.high %v21665_v58, %v21679_v53 }
 0x5d3   :  { %24415 = vst [vmem:[#allocation15_spill] sm:$0xff] %v22136_v0  ;;  %v22149_v21 = vcombine.low %v11449_v56, %v22121_v22  ;;  %v24422_v56 = vcombine.low %v21665_v58, %v21679_v53  ;;  %v18078_v47 = vadd.f32 %v21662_v34, %v24423_v43  ;;  %v24431_v0 = vld [vmem:[#allocation12_spill] sm:$0xff]  ;;  %v22183_v34 = vpop.f32.mrb[7].mxu1 }
 0x5d4   :  { %v13424_v27 = vrot.slane %v24420_v11, %v24309_v31  ;;  %v13432_v61 = vcombine.low %v13410_v14, %v13417_v44  ;;  %v13457_v10 = vrot.slane %v24426_v36, %v24309_v31  ;;  %v24427_v11 = vld [vmem:[#allocation73_spill] sm:$0xff]  ;;  %24432 = vst [vmem:[#allocation6_spill] sm:$0xff] %v22183_v34  ;;  %15913 = vxpose.xlu1.b32.end [2/2] (short) (narrow) %v13399_v48, 8  ;;  %v24433_v43 = vld [vmem:[#allocation48_spill] sm:$0xff] }
 0x5d5   :  { %24418 = vst [vmem:[#allocation8_spill] sm:$0xff] %v22149_v21  ;;  %v13431_v7 = vrot.slane %v24422_v56, %v24309_v31  ;;  %v18079_v21 = vadd.f32 %v24425_v46, %v24424_v49  ;;  %v24428_v24 = vcombine.high %v24427_v11, %v24427_v11  ;;  %v24430_v56 = vcombine.high %v24429_v32, %v24429_v32 }
 0x5d6   :  { %v11549_v14 = vcombine.high %v18078_v47, %v18078_v47  ;;  %v11556_v46 = vrot.slane %v18078_v47, %v24309_v31  ;;  %v13440_v58 = vrot.slane %v13432_v61, %v24309_v31  ;;  %v13472_v36 = vcombine.low %v13457_v10, %v24433_v43 }
 0x5d7   :  { %v13471_v2 = vrot.slane %v24428_v24, %v24309_v31  ;;  %v13489_v26 = vcombine.low %v24431_v0, %v24430_v56  ;;  %v13433_v49 = vcombine.low %v13424_v27, %v13431_v7  ;;  %v11500_v44 = vcombine.high %v18079_v21, %v18079_v21 }
 0x5d8   :  { %v11507_v53 = vrot.slane %v18079_v21, %v24309_v31  ;;  %v11563_v0 = vrot.slane %v11549_v14, %v24309_v31  ;;  %v11564_v24 = vcombine.high %v11556_v46, %v11556_v46  ;;  %v22193_v48 = vrot.slane %v11556_v46, %v24309_v31 }
 0x5d9   :  { %v13486_v11 = vrot.slane %v13471_v2, %v24309_v31  ;;  %v13447_v32 = vrot.slane %v13433_v49, %v24309_v31  ;;  %v11514_v27 = vrot.slane %v11500_v44, %v24309_v31  ;;  %v13479_v21 = vrot.slane %v13472_v36, %v24309_v31 }
 0x5da   :  { %v11515_v47 = vcombine.high %v11507_v53, %v11507_v53  ;;  %v22197_v7 = vrot.slane %v11507_v53, %v24309_v31  ;;  %v11565_v10 = vcombine.high %v11563_v0, %v11563_v0  ;;  %v11579_v2 = vrot.slane %v11563_v0, %v24309_v31 }
 0x5db   :  { %v13448_v61 = vcombine.low %v13440_v58, %v13447_v32  ;;  %v11586_v56 = vrot.slane %v11564_v24, %v24309_v31  ;;  %v11594_v49 = vcombine.high %v22193_v48, %v22193_v48  ;;  %v11516_v14 = vcombine.high %v11514_v27, %v11514_v27 }
 0x5dc   :  { %v22205_v46 = vrot.slane %v11514_v27, %v24309_v31  ;;  %v11537_v44 = vrot.slane %v11515_v47, %v24309_v31  ;;  %v22209_v53 = vrot.slane %v11565_v10, %v24309_v31  ;;  %v11595_v43 = vcombine.high %v11579_v2, %v11579_v2 }
 0x5dd   :  { %15944 = vxpose.xlu0.b32.start [1/2] (short) (narrow) %v13448_v61, 8  ;;  %v11596_v58 = vcombine.high %v11586_v56, %v11586_v56  ;;  %v22213_v32 = vcombine.low %v11586_v56, %v11594_v49  ;;  %v22216_v0 = vrot.slane %v11516_v14, %v24309_v31  ;;  %v13487_v10 = vcombine.low %v13479_v21, %v13486_v11  ;;  %v24439_v49 = vld [vmem:[#allocation50_spill] sm:$0xff] }
 0x5de   :  { %24434 = vst [vmem:[#allocation46_spill] sm:$0xff] %v22209_v53  ;;  %v11547_v27 = vcombine.high %v11537_v44, %v11537_v44  ;;  %v22223_v47 = vcombine.low %v22209_v53, %v11595_v43  ;;  %v14154_v61 = vcombine.low %v22197_v7, %v11537_v44  ;;  %v13498_v14 = vrot.slane %v24439_v49, %v24309_v31  ;;  %v24440_v21 = vld [vmem:[#allocation14_spill] sm:$0xff]  ;;  %v24444_v49 = vld [vmem:[#allocation19_spill] sm:$0xff] }
 0x5df   :  { %24435 = vst [vmem:[#allocation71_spill] sm:$0xff] %v22213_v32  ;;  %v22220_v34 = vcombine.low %v11596_v58, %v11579_v2  ;;  %v13505_v24 = vrot.slane %v13489_v26, %v24309_v31  ;;  %v13512_v43 = vrot.slane %v21727_v57, %v24309_v31  ;;  %v13519_v11 = vrot.slane %v21732_v19, %v24309_v31  ;;  %v24441_v44 = vld [vmem:[#allocation54_spill] sm:$0xff] }
 0x5e0   :  { %24437 = vst [vmem:[#allocation70_spill] sm:$0xff] %v22223_v47  ;;  %v22229_v56 = vcombine.low %v11547_v27, %v22205_v46  ;;  %v22235_v2 = vrot.slane %v14154_v61, %v24309_v31  ;;  %v18080_v58 = vadd.f32 %v24441_v44, %v24440_v21  ;;  %v22243_v27 = vpop.f32.mrb[8].mxu1  ;;  %v24443_v47 = vld [vmem:[#allocation16_spill] sm:$0xff]  ;;  %v24445_v26 = vcombine.low %v21701_v17, %v21711_v13 }
 0x5e1   :  { %24436 = vst [vmem:[#allocation72_spill] sm:$0xff] %v22220_v34  ;;  %15945 = vxpose.xlu0.b32.end [2/2] (short) (narrow) %v13487_v10, 8  ;;  %24442 = vst [vmem:[#allocation11_spill] sm:$0xff] %v22243_v27  ;;  %v13520_v36 = vcombine.low %v13498_v14, %v13505_v24  ;;  %v18081_v34 = vadd.f32 %v24444_v49, %v24443_v47  ;;  %v24446_v57 = vcombine.high %v21701_v17, %v21711_v13  ;;  %v22255_v19 = vpop.f32.mrb[9].mxu1 }
 0x5e2   :  { %24438 = vst [vmem:[#allocation66_spill] sm:$0xff] %v22229_v56  ;;  %v13586_v61 = vrot.slane %v24445_v26, %v24309_v31  ;;  %24447 = vst [vmem:[#allocation7_spill] sm:$0xff] %v22255_v19  ;;  %v13521_v53 = vcombine.low %v13512_v43, %v13519_v11  ;;  %v11647_v21 = vcombine.high %v18080_v58, %v18080_v58 }
 0x5e3   :  { %v13593_v10 = vrot.slane %v24446_v57, %v24309_v31  ;;  %v11654_v44 = vrot.slane %v18080_v58, %v24309_v31  ;;  %v24448_v24 = vcombine.low %v21708_v42, %v21721_v38  ;;  %v13528_v14 = vrot.slane %v13520_v36, %v24309_v31 }
 0x5e4   :  { %v11598_v49 = vcombine.high %v18081_v34, %v18081_v34  ;;  %v11605_v26 = vrot.slane %v18081_v34, %v24309_v31  ;;  %v24449_v17 = vcombine.high %v21708_v42, %v21721_v38  ;;  %v13535_v43 = vrot.slane %v13521_v53, %v24309_v31 }
 0x5e5   :  { %v13600_v47 = vrot.slane %v24448_v24, %v24309_v31  ;;  %v11661_v11 = vrot.slane %v11647_v21, %v24309_v31  ;;  %v11662_v58 = vcombine.high %v11654_v44, %v11654_v44  ;;  %v11670_v57 = vrot.slane %v11654_v44, %v24309_v31 }
 0x5e6   :  { %v13607_v13 = vrot.slane %v24449_v17, %v24309_v31  ;;  %v11612_v19 = vrot.slane %v11598_v49, %v24309_v31  ;;  %v11613_v24 = vcombine.high %v11605_v26, %v11605_v26  ;;  %v22273_v36 = vrot.slane %v11605_v26, %v24309_v31 }
 0x5e7   :  { %v13608_v27 = vcombine.low %v13586_v61, %v13593_v10  ;;  %v13536_v34 = vcombine.low %v13528_v14, %v13535_v43  ;;  %v11663_v32 = vcombine.high %v11661_v11, %v11661_v11  ;;  %v22276_v56 = vrot.slane %v11661_v11, %v24309_v31 }
 0x5e8   :  { %v11684_v42 = vrot.slane %v11662_v58, %v24309_v31  ;;  %v11614_v38 = vcombine.high %v11612_v19, %v11612_v19  ;;  %v22280_v53 = vrot.slane %v11612_v19, %v24309_v31  ;;  %v22283_v21 = vrot.slane %v11613_v24, %v24309_v31 }
 0x5e9   :  { %v13609_v44 = vcombine.low %v13600_v47, %v13607_v13  ;;  %15976 = vxpose.xlu1.b32.start [1/2] (short) (narrow) %v13536_v34, 8  ;;  %v22286_v49 = vrot.slane %v11663_v32, %v24309_v31  ;;  %v13616_v47 = vrot.slane %v13608_v27, %v24309_v31  ;;  %v22298_v13 = vpop.f32.mrb[10].mxu1  ;;  %v10960_v58 = vcombine.high %v21730_v33, %v21730_v33  ;;  %v24453_v33 = vld [vmem:[#allocation21_spill] sm:$0xff] }
 0x5ea   :  { %v14329_v10 = vcombine.low %v11670_v57, %v11684_v42  ;;  %v16986_v14 = vcombine.high %v11670_v57, %v11684_v42  ;;  %v22291_v26 = vrot.slane %v11614_v38, %v24309_v31  ;;  %24450 = vst [vmem:[#allocation52_spill] sm:$0xff] %v22298_v13  ;;  %v13545_v27 = vrot.slane %v21745_v6, %v24309_v31 }
 0x5eb   :  { %v13623_v11 = vrot.slane %v13609_v44, %v24309_v31  ;;  %v13552_v34 = vrot.slane %v21748_v62, %v24309_v31  ;;  %v13559_v38 = vrot.slane %v10960_v58, %v24309_v31  ;;  %v11695_v57 = vcombine.high %v22286_v49, %v22286_v49  ;;  %v22328_v62 = vpop.f32.mrb[11].mxu1 }
 0x5ec   :  { %v22301_v32 = vrot.slane %v14329_v10, %v24309_v31  ;;  %v22304_v43 = vrot.slane %v16986_v14, %v24309_v31  ;;  %v24451_v10 = vld [vmem:[#allocation5_spill] sm:$0xff]  ;;  %v13647_v24 = vrot.slane %v21794_v8, %v24309_v31  ;;  %v13648_v6 = vcombine.low %v21815_v40, %v21828_v63  ;;  %24454 = vst [vmem:[#allocation73_spill] sm:$0xff] %v22328_v62 }
 0x5ed   :  { %v13624_v42 = vcombine.low %v13616_v47, %v13623_v11  ;;  %v18082_v44 = vadd.f32 %v21714_v45, %v24451_v10  ;;  %v24452_v14 = vld [vmem:[#allocation9_spill] sm:$0xff]  ;;  %v13560_v17 = vcombine.low %v13545_v27, %v13552_v34  ;;  %v13574_v47 = vrot.slane %v13559_v38, %v24309_v31 }
 0x5ee   :  { %v18083_v61 = vadd.f32 %v24453_v33, %v24452_v14  ;;  %v13655_v10 = vrot.slane %v13648_v6, %v24309_v31  ;;  %v13662_v14 = vrot.slane %v13647_v24, %v24309_v31 }
 0x5ef   :  { %16008 = vxpose.xlu0.b32.start [1/2] (short) (narrow) %v13624_v42, 8  ;;  %v11745_v11 = vcombine.high %v18082_v44, %v18082_v44  ;;  %v11752_v45 = vrot.slane %v18082_v44, %v24309_v31  ;;  %v13567_v27 = vrot.slane %v13560_v17, %v24309_v31 }
 0x5f0   :  { %v11696_v58 = vcombine.high %v18083_v61, %v18083_v61  ;;  %v11703_v34 = vrot.slane %v18083_v61, %v24309_v31  ;;  %v13663_v62 = vcombine.low %v13655_v10, %v13662_v14  ;;  %v24456_v10 = vcombine.high %v21794_v8, %v21794_v8 }
 0x5f1   :  { %v11759_v33 = vrot.slane %v11745_v11, %v24309_v31  ;;  %v11760_v40 = vcombine.high %v11752_v45, %v11752_v45  ;;  %v22338_v63 = vrot.slane %v11752_v45, %v24309_v31  ;;  %v13575_v38 = vcombine.low %v13567_v27, %v13574_v47  ;;  %v24462_v27 = vld [vmem:[#allocation47_spill] sm:$0xff] }
 0x5f2   :  { %v11710_v42 = vrot.slane %v11696_v58, %v24309_v31  ;;  %v11711_v19 = vcombine.high %v11703_v34, %v11703_v34  ;;  %v11719_v44 = vrot.slane %v11703_v34, %v24309_v31  ;;  %v13664_v14 = vcombine.low %v21803_v5, %v24456_v10  ;;  %v22385_v10 = vpop.f32.mrb[12].mxu1 }
 0x5f3   :  { %v11761_v17 = vcombine.high %v11759_v33, %v11759_v33  ;;  %v22343_v61 = vrot.slane %v11759_v33, %v24309_v31  ;;  %v22346_v6 = vrot.slane %v11760_v40, %v24309_v31  ;;  %15977 = vxpose.xlu1.b32.end [2/2] (short) (narrow) %v13575_v38, 8  ;;  %16009 = vxpose.xlu0.b32.end [2/2] (short) (narrow) %v13663_v62, 8  ;;  %v24461_v62 = vld [vmem:[#allocation23_spill] sm:$0xff] }
 0x5f4   :  { %v11712_v24 = vcombine.high %v11710_v42, %v11710_v42  ;;  %v11726_v11 = vrot.slane %v11710_v42, %v24309_v31  ;;  %v11733_v45 = vrot.slane %v11711_v19, %v24309_v31  ;;  %v11741_v13 = vcombine.high %v11719_v44, %v11719_v44  ;;  %24459 = vst [vmem:[#allocation12_spill] sm:$0xff] %v22385_v10 }
 0x5f5   :  { %v22350_v58 = vcombine.low %v11695_v57, %v11719_v44  ;;  %v22353_v47 = vrot.slane %v11761_v17, %v24309_v31  ;;  %v24457_v57 = vld [vmem:[#allocation31_spill] sm:$0xff]  ;;  %v24458_v42 = vcombine.high %v21803_v5, %v21803_v5  ;;  %v13674_v17 = vrot.slane %v13664_v14, %v24309_v31  ;;  %v24463_v14 = vld [vmem:[#allocation25_spill] sm:$0xff] }
 0x5f6   :  { %v22358_v34 = vrot.slane %v11712_v24, %v24309_v31  ;;  %v11742_v33 = vcombine.high %v11726_v11, %v11726_v11  ;;  %v11743_v19 = vcombine.high %v11733_v45, %v11733_v45  ;;  %v22364_v40 = vcombine.low %v11733_v45, %v11741_v13 }
 0x5f7   :  { %24455 = vst [vmem:[#allocation2_spill] sm:$0xff] %v22353_v47  ;;  %v13665_v38 = vcombine.low %v24458_v42, %v24457_v57  ;;  %v13688_v5 = vrot.slane %v21800_v20, %v24309_v31  ;;  %v13695_v57 = vrot.slane %v21807_v4, %v24309_v31  ;;  %v24460_v42 = vld [vmem:[#allocation17_spill] sm:$0xff]  ;;  %v24464_v20 = vcombine.high %v21868_v15, %v21881_v37 }
 0x5f8   :  { %v22377_v24 = vcombine.low %v11743_v19, %v11726_v11  ;;  %v22380_v13 = vcombine.low %v22358_v34, %v11742_v33  ;;  %v18084_v44 = vadd.f32 %v24461_v62, %v24460_v42  ;;  %v18085_v11 = vadd.f32 %v24463_v14, %v24462_v27  ;;  %v22405_v42 = vpop.f32.mrb[13].mxu1 }
 0x5f9   :  { %v13681_v45 = vrot.slane %v13665_v38, %v24309_v31  ;;  %v13721_v33 = vrot.slane %v21809_v60, %v24309_v31  ;;  %v13735_v38 = vrot.slane %v21881_v37, %v24309_v31  ;;  %v13762_v8 = vrot.slane %v24464_v20, %v24309_v31  ;;  %24466 = vst [vmem:[#allocation48_spill] sm:$0xff] %v22405_v42 }
 0x5fa   :  { %v24465_v4 = vcombine.low %v21878_v12, %v21896_v18  ;;  %v13697_v27 = vcombine.low %v13688_v5, %v13695_v57  ;;  %v11843_v14 = vcombine.high %v18084_v44, %v18084_v44  ;;  %v11850_v60 = vrot.slane %v18084_v44, %v24309_v31 }
 0x5fb   :  { %v13696_v19 = vcombine.low %v13674_v17, %v13681_v45  ;;  %v11794_v17 = vcombine.high %v18085_v11, %v18085_v11  ;;  %v11801_v10 = vrot.slane %v18085_v11, %v24309_v31  ;;  %v24467_v15 = vrot.slane %v21884_v1, %v24309_v31 }
 0x5fc   :  { %v13769_v62 = vrot.slane %v24465_v4, %v24309_v31  ;;  %v13750_v20 = vrot.slane %v13735_v38, %v24309_v31  ;;  %v13711_v47 = vrot.slane %v13697_v27, %v24309_v31  ;;  %v11857_v4 = vrot.slane %v11843_v14, %v24309_v31 }
 0x5fd   :  { %v13704_v45 = vrot.slane %v13696_v19, %v24309_v31  ;;  %v13736_v37 = vcombine.low %v13721_v33, %v24467_v15  ;;  %v11858_v42 = vcombine.high %v11850_v60, %v11850_v60  ;;  %v22417_v5 = vrot.slane %v11850_v60, %v24309_v31 }
 0x5fe   :  { %v11808_v44 = vrot.slane %v11794_v17, %v24309_v31  ;;  %v11809_v57 = vcombine.high %v11801_v10, %v11801_v10  ;;  %v22421_v19 = vrot.slane %v11801_v10, %v24309_v31  ;;  %v11859_v33 = vcombine.high %v11857_v4, %v11857_v4 }
 0x5ff   :  { %v13743_v11 = vrot.slane %v13736_v37, %v24309_v31  ;;  %v13712_v1 = vcombine.low %v13704_v45, %v13711_v47  ;;  %v22425_v38 = vrot.slane %v11857_v4, %v24309_v31  ;;  %v11880_v27 = vrot.slane %v11858_v42, %v24309_v31 }
 0x600   :  { %v11888_v14 = vcombine.high %v22417_v5, %v22417_v5  ;;  %v11810_v60 = vcombine.high %v11808_v44, %v11808_v44  ;;  %v22431_v15 = vrot.slane %v11808_v44, %v24309_v31  ;;  %v22434_v17 = vrot.slane %v11809_v57, %v24309_v31  ;;  %v24473_v44 = vld [vmem:[#allocation49_spill] sm:$0xff]  ;;  %v24474_v57 = vld [vmem:[#allocation27_spill] sm:$0xff] }
 0x601   :  { %24468 = vst [vmem:[#allocation50_spill] sm:$0xff] %v22425_v38  ;;  %16040 = vxpose.xlu1.b32.start [1/2] (short) (narrow) %v13712_v1, 8  ;;  %v22437_v10 = vrot.slane %v11859_v33, %v24309_v31  ;;  %v11890_v45 = vcombine.high %v11880_v27, %v11880_v27  ;;  %v13751_v37 = vcombine.low %v13743_v11, %v13750_v20 }
 0x602   :  { %v22441_v42 = vcombine.low %v11880_v27, %v11888_v14  ;;  %v22444_v4 = vrot.slane %v11810_v60, %v24309_v31  ;;  %v16989_v33 = vcombine.high %v22421_v19, %v22434_v17  ;;  %v24471_v20 = vcombine.high %v21878_v12, %v21896_v18  ;;  %v24475_v18 = vld [vmem:[#allocation51_spill] sm:$0xff] }
 0x603   :  { %v22451_v1 = vcombine.low %v11890_v45, %v22425_v38  ;;  %v24472_v27 = vcombine.low %v21864_v3, %v21875_v25  ;;  %v13784_v47 = vcombine.low %v13762_v8, %v13769_v62  ;;  %v11891_v3 = vcombine.high %v22437_v10, %v22437_v10 }
 0x604   :  { %24469 = vst [vmem:[#allocation14_spill] sm:$0xff] %v22441_v42  ;;  %v13776_v11 = vrot.slane %v24471_v20, %v24309_v31  ;;  %v22470_v42 = vrot.slane %v16989_v33, %v24309_v31  ;;  %v24476_v20 = vld [vmem:[#allocation29_spill] sm:$0xff]  ;;  %v24477_v8 = vcombine.low %v21872_v28, %v21887_v50  ;;  %v24478_v33 = vcombine.high %v21872_v28, %v21872_v28 }
 0x605   :  { %24470 = vst [vmem:[#allocation54_spill] sm:$0xff] %v22451_v1  ;;  %v13783_v14 = vrot.slane %v24472_v27, %v24309_v31  ;;  %v18086_v1 = vadd.f32 %v24474_v57, %v24473_v44  ;;  %16041 = vxpose.xlu1.b32.end [2/2] (short) (narrow) %v13751_v37, 8  ;;  %v18087_v38 = vadd.f32 %v24476_v20, %v24475_v18 }
 0x606   :  { %v13792_v25 = vrot.slane %v13784_v47, %v24309_v31  ;;  %v13816_v62 = vrot.slane %v24477_v8, %v24309_v31 }
 0x607   :  { %v13785_v12 = vcombine.low %v13776_v11, %v13783_v14  ;;  %v11941_v27 = vcombine.high %v18086_v1, %v18086_v1  ;;  %v11948_v60 = vrot.slane %v18086_v1, %v24309_v31  ;;  %v11892_v37 = vcombine.high %v18087_v38, %v18087_v38 }
 0x608   :  { %v11899_v57 = vrot.slane %v18087_v38, %v24309_v31  ;;  %v13823_v11 = vrot.slane %v24478_v33, %v24309_v31  ;;  %v13824_v18 = vcombine.low %v21909_v55, %v13816_v62 }
 0x609   :  { %v13799_v44 = vrot.slane %v13785_v12, %v24309_v31  ;;  %v11955_v47 = vrot.slane %v11941_v27, %v24309_v31  ;;  %v11956_v14 = vcombine.high %v11948_v60, %v11948_v60  ;;  %v22490_v1 = vrot.slane %v11948_v60, %v24309_v31 }
 0x60a   :  { %v11906_v20 = vrot.slane %v11892_v37, %v24309_v31  ;;  %v11907_v12 = vcombine.high %v11899_v57, %v11899_v57  ;;  %v11915_v8 = vrot.slane %v11899_v57, %v24309_v31  ;;  %v13831_v27 = vrot.slane %v13824_v18, %v24309_v31 }
 0x60b   :  { %v13800_v50 = vcombine.low %v13792_v25, %v13799_v44  ;;  %v11957_v38 = vcombine.high %v11955_v47, %v11955_v47  ;;  %v22496_v45 = vrot.slane %v11955_v47, %v24309_v31  ;;  %v22499_v28 = vrot.slane %v11956_v14, %v24309_v31  ;;  %v24483_v44 = vld [vmem:[#allocation53_spill] sm:$0xff]  ;;  %v24486_v14 = vld [vmem:[#allocation35_spill] sm:$0xff] }
 0x60c   :  { %v11908_v60 = vcombine.high %v11906_v20, %v11906_v20  ;;  %v22503_v33 = vrot.slane %v11906_v20, %v24309_v31  ;;  %v22506_v55 = vrot.slane %v11907_v12, %v24309_v31  ;;  %v11937_v25 = vcombine.high %v11915_v8, %v11915_v8 }
 0x60d   :  { %24479 = vst [vmem:[#allocation16_spill] sm:$0xff] %v22496_v45  ;;  %24480 = vst [vmem:[#allocation19_spill] sm:$0xff] %v22499_v28  ;;  %16072 = vxpose.xlu0.b32.start [1/2] (short) (narrow) %v13800_v50, 8  ;;  %v22509_v62 = vrot.slane %v11957_v38, %v24309_v31  ;;  %v22515_v57 = vcombine.low %v11891_v3, %v11915_v8  ;;  %v13838_v50 = vrot.slane %v13823_v11, %v24309_v31 }
 0x60e   :  { %v22518_v47 = vrot.slane %v11908_v60, %v24309_v31  ;;  %v22523_v18 = vcombine.low %v22506_v55, %v11937_v25  ;;  %v24482_v8 = vcombine.high %v21965_v52, %v21965_v52  ;;  %v13850_v20 = vrot.slane %v21976_v29, %v24309_v31  ;;  %v24485_v60 = vld [vmem:[#allocation55_spill] sm:$0xff] }
 0x60f   :  { %24481 = vst [vmem:[#allocation5_spill] sm:$0xff] %v22509_v62  ;;  %v13839_v25 = vcombine.low %v13831_v27, %v13838_v50  ;;  %v13857_v12 = vrot.slane %v21983_v54, %v24309_v31  ;;  %v13864_v37 = vrot.slane %v21998_v16, %v24309_v31  ;;  %v18089_v62 = vadd.f32 %v24486_v14, %v24485_v60  ;;  %v24488_v50 = vld [vmem:[#allocation3_spill] sm:$0xff] }
 0x610   :  { %v13843_v38 = vcombine.low %v21979_v41, %v24482_v8  ;;  %v24484_v8 = vld [vmem:[#allocation33_spill] sm:$0xff]  ;;  %v24487_v27 = vcombine.high %v21979_v41, %v21979_v41  ;;  %v13904_v54 = vrot.slane %v21974_v35, %v24309_v31  ;;  %v24489_v16 = vcombine.high %v24488_v50, %v24488_v50 }
 0x611   :  { %v18088_v3 = vadd.f32 %v24484_v8, %v24483_v44  ;;  %16073 = vxpose.xlu0.b32.end [2/2] (short) (narrow) %v13839_v25, 8  ;;  %v13872_v11 = vcombine.low %v13850_v20, %v13857_v12  ;;  %v11990_v8 = vcombine.high %v18089_v62, %v18089_v62  ;;  %v11997_v14 = vrot.slane %v18089_v62, %v24309_v31 }
 0x612   :  { %v13871_v52 = vrot.slane %v13843_v38, %v24309_v31  ;;  %v13889_v29 = vcombine.low %v24487_v27, %v21951_v39  ;;  %v13911_v38 = vrot.slane %v24489_v16, %v24309_v31 }
 0x613   :  { %v12039_v44 = vcombine.high %v18088_v3, %v18088_v3  ;;  %v12046_v25 = vrot.slane %v18088_v3, %v24309_v31  ;;  %v13880_v41 = vrot.slane %v13872_v11, %v24309_v31  ;;  %v12005_v12 = vcombine.high %v11997_v14, %v11997_v14 }
 0x614   :  { %v13873_v45 = vcombine.low %v13864_v37, %v13871_v52  ;;  %v13897_v60 = vrot.slane %v13889_v29, %v24309_v31  ;;  %v13926_v39 = vrot.slane %v13911_v38, %v24309_v31  ;;  %v12004_v37 = vrot.slane %v11990_v8, %v24309_v31 }
 0x615   :  { %v12053_v27 = vrot.slane %v12039_v44, %v24309_v31  ;;  %v12054_v50 = vcombine.high %v12046_v25, %v12046_v25  ;;  %v22569_v20 = vrot.slane %v12046_v25, %v24309_v31  ;;  %v22573_v3 = vrot.slane %v11997_v14, %v24309_v31 }
 0x616   :  { %v13887_v35 = vrot.slane %v13873_v45, %v24309_v31  ;;  %v12006_v16 = vcombine.high %v12004_v37, %v12004_v37  ;;  %v22582_v38 = vrot.slane %v12004_v37, %v24309_v31  ;;  %v12027_v44 = vrot.slane %v12005_v12, %v24309_v31 }
 0x617   :  { %24490 = vst [vmem:[#allocation9_spill] sm:$0xff] %v22569_v20  ;;  %24491 = vst [vmem:[#allocation21_spill] sm:$0xff] %v22573_v3  ;;  %v12055_v52 = vcombine.high %v12053_v27, %v12053_v27  ;;  %v22576_v29 = vrot.slane %v12053_v27, %v24309_v31  ;;  %v12076_v11 = vrot.slane %v12054_v50, %v24309_v31 }
 0x618   :  { %v13888_v62 = vcombine.low %v13880_v41, %v13887_v35  ;;  %v12084_v45 = vcombine.high %v22569_v20, %v22569_v20  ;;  %24493 = vst [vmem:[#allocation17_spill] sm:$0xff] %v22582_v38  ;;  %v12035_v14 = vcombine.high %v22573_v3, %v22573_v3  ;;  %v22595_v27 = vrot.slane %v12006_v16, %v24309_v31  ;;  %v24500_v16 = vld [vmem:[#allocation45_spill] sm:$0xff]  ;;  %v24501_v41 = vld [vmem:[#allocation68_spill] sm:$0xff] }
 0x619   :  { %24492 = vst [vmem:[#allocation31_spill] sm:$0xff] %v22576_v29  ;;  %v22586_v25 = vrot.slane %v12055_v52, %v24309_v31  ;;  %v12086_v8 = vcombine.high %v12076_v11, %v12076_v11  ;;  %v12037_v37 = vcombine.high %v12027_v44, %v12027_v44  ;;  %v13912_v20 = vcombine.low %v13897_v60, %v13904_v54  ;;  %v24504_v54 = vld [vmem:[#allocation60_spill] sm:$0xff] }
 0x61a   :  { %16104 = vxpose.xlu1.b32.start [1/2] (short) (narrow) %v13888_v62, 8  ;;  %v22592_v35 = vcombine.low %v12076_v11, %v12084_v45  ;;  %24496 = vst [vmem:[#allocation25_spill] sm:$0xff] %v22595_v27  ;;  %v22604_v52 = vcombine.low %v12027_v44, %v12035_v14  ;;  %v24502_v50 = vcombine.low %v24500_v16, %v24501_v41  ;;  %v24505_v60 = vld [vmem:[#allocation56_spill] sm:$0xff]  ;;  %v24511_v27 = vld [vmem:[#allocation39_spill] sm:$0xff] }
 0x61b   :  { %24494 = vst [vmem:[#allocation23_spill] sm:$0xff] %v22586_v25  ;;  %v22600_v12 = vcombine.low %v12086_v8, %v22576_v29  ;;  %v22609_v45 = vcombine.low %v12037_v37, %v22582_v38  ;;  %v24503_v8 = vcombine.high %v24500_v16, %v24501_v41  ;;  %v13919_v44 = vrot.slane %v13912_v20, %v24309_v31  ;;  %v24508_v29 = vld [vmem:[#allocation57_spill] sm:$0xff]  ;;  %v24513_v20 = vld [vmem:[#allocation75_spill] sm:$0xff] }
 0x61c   :  { %24495 = vst [vmem:[#allocation47_spill] sm:$0xff] %v22592_v35  ;;  %24498 = vst [vmem:[#allocation27_spill] sm:$0xff] %v22604_v52  ;;  %v13938_v35 = vrot.slane %v24502_v50, %v24309_v31  ;;  %v24506_v14 = vcombine.low %v24504_v54, %v24505_v60  ;;  %v24507_v37 = vcombine.high %v24504_v54, %v24505_v60  ;;  %v24509_v25 = vld [vmem:[#allocation37_spill] sm:$0xff]  ;;  %v24510_v52 = vld [vmem:[#allocation59_spill] sm:$0xff] }
 0x61d   :  { %24497 = vst [vmem:[#allocation49_spill] sm:$0xff] %v22600_v12  ;;  %24499 = vst [vmem:[#allocation51_spill] sm:$0xff] %v22609_v45  ;;  %v13945_v12 = vrot.slane %v24503_v8, %v24309_v31  ;;  %v18090_v50 = vadd.f32 %v24509_v25, %v24508_v29  ;;  %v18091_v41 = vadd.f32 %v24511_v27, %v24510_v52  ;;  %v24512_v16 = vld [vmem:[#allocation61_spill] sm:$0xff] }
 0x61e   :  { %v13952_v62 = vrot.slane %v24506_v14, %v24309_v31  ;;  %v13959_v11 = vrot.slane %v24507_v37, %v24309_v31  ;;  %v24514_v8 = vcombine.low %v24512_v16, %v24513_v20  ;;  %v24515_v14 = vcombine.high %v24512_v16, %v24513_v20 }
 0x61f   :  { %v13960_v45 = vcombine.low %v13938_v35, %v13945_v12  ;;  %v13927_v28 = vcombine.low %v13919_v44, %v13926_v39  ;;  %v12137_v60 = vcombine.high %v18090_v50, %v18090_v50  ;;  %v12144_v37 = vrot.slane %v18090_v50, %v24309_v31 }
 0x620   :  { %v13985_v38 = vrot.slane %v24514_v8, %v24309_v31  ;;  %v13992_v3 = vrot.slane %v24515_v14, %v24309_v31  ;;  %v13961_v54 = vcombine.low %v13952_v62, %v13959_v11  ;;  %v12088_v25 = vcombine.high %v18091_v41, %v18091_v41 }
 0x621   :  { %v13968_v29 = vrot.slane %v13960_v45, %v24309_v31  ;;  %v12095_v35 = vrot.slane %v18091_v41, %v24309_v31  ;;  %16105 = vxpose.xlu1.b32.end [2/2] (short) (narrow) %v13927_v28, 8  ;;  %v12151_v52 = vrot.slane %v12137_v60, %v24309_v31  ;;  %v12152_v8 = vcombine.high %v12144_v37, %v12144_v37 }
 0x622   :  { %v14000_v27 = vcombine.low %v13985_v38, %v13992_v3  ;;  %v13975_v12 = vrot.slane %v13961_v54, %v24309_v31  ;;  %v22646_v16 = vrot.slane %v12144_v37, %v24309_v31  ;;  %v12102_v39 = vrot.slane %v12088_v25, %v24309_v31  ;;  %v24528_v38 = vld [vmem:[#allocation44_spill] sm:$0xff] }
 0x623   :  { %v12103_v62 = vcombine.high %v12095_v35, %v12095_v35  ;;  %v22650_v11 = vrot.slane %v12095_v35, %v24309_v31  ;;  %v12153_v50 = vcombine.high %v12151_v52, %v12151_v52  ;;  %v22654_v28 = vrot.slane %v12151_v52, %v24309_v31 }
 0x624   :  { %24516 = vst [vmem:[#allocation29_spill] sm:$0xff] %v22646_v16  ;;  %v14007_v45 = vrot.slane %v14000_v27, %v24309_v31  ;;  %v13976_v44 = vcombine.low %v13968_v29, %v13975_v12  ;;  %v12174_v3 = vrot.slane %v12152_v8, %v24309_v31  ;;  %v12104_v41 = vcombine.high %v12102_v39, %v12102_v39  ;;  %v24521_v12 = vld [vmem:[#allocation65_spill] sm:$0xff] }
 0x625   :  { %24517 = vst [vmem:[#allocation53_spill] sm:$0xff] %v22654_v28  ;;  %v22660_v20 = vrot.slane %v12102_v39, %v24309_v31  ;;  %v22663_v14 = vrot.slane %v12103_v62, %v24309_v31  ;;  %v22666_v54 = vrot.slane %v12153_v50, %v24309_v31  ;;  %v24522_v52 = vrot.slane %v24521_v12, %v24309_v31 }
 0x626   :  { %16136 = vxpose.xlu0.b32.start [1/2] (short) (narrow) %v13976_v44, 8  ;;  %v12184_v37 = vcombine.high %v12174_v3, %v12174_v3  ;;  %v14858_v29 = vcombine.low %v22646_v16, %v12174_v3  ;;  %v22672_v25 = vrot.slane %v12104_v41, %v24309_v31  ;;  %v24525_v44 = vld [vmem:[#allocation62_spill] sm:$0xff]  ;;  %v14026_v60 = vrot.slane %v24528_v38, %v24309_v31  ;;  %v24532_v16 = vld [vmem:[#allocation20_spill] sm:$0xff]  ;;  %v24533_v38 = vld [vmem:[#allocation43_spill] sm:$0xff] }
 0x627   :  { %24518 = vst [vmem:[#allocation33_spill] sm:$0xff] %v22660_v20  ;;  %24519 = vst [vmem:[#allocation55_spill] sm:$0xff] %v22666_v54  ;;  %v14014_v8 = vrot.slane %v24522_v52, %v24309_v31  ;;  %v24526_v50 = vcombine.high %v24525_v44, %v24525_v44  ;;  %v24527_v3 = vld [vmem:[#allocation42_spill] sm:$0xff]  ;;  %v14047_v44 = vrot.slane %v22131_v59, %v24309_v31 }
 0x628   :  { %24520 = vst [vmem:[#allocation35_spill] sm:$0xff] %v22672_v25  ;;  %v22683_v39 = vrot.slane %v14858_v29, %v24309_v31  ;;  %v22686_v62 = vcombine.low %v12184_v37, %v22654_v28  ;;  %v24529_v29 = vld [vmem:[#allocation63_spill] sm:$0xff]  ;;  %v12185_v12 = vcombine.high %v22666_v54, %v22666_v54  ;;  %v24535_v59 = vcombine.low %v22110_v9, %v22118_v30 }
 0x629   :  { %v14018_v41 = vcombine.low %v24527_v3, %v24526_v50  ;;  %v14015_v52 = vcombine.low %v14007_v45, %v14014_v8  ;;  %v14033_v35 = vrot.slane %v24529_v29, %v24309_v31  ;;  %v24531_v50 = vld [vmem:[#allocation41_spill] sm:$0xff]  ;;  %v24534_v45 = vcombine.high %v22121_v22, %v22134_v51 }
 0x62a   :  { %24523 = vst [vmem:[#allocation3_spill] sm:$0xff] %v22683_v39  ;;  %24524 = vst [vmem:[#allocation45_spill] sm:$0xff] %v22686_v62  ;;  %v24530_v39 = vld [vmem:[#allocation18_spill] sm:$0xff]  ;;  %v18093_v62 = vadd.f32 %v24533_v38, %v24532_v16 }
 0x62b   :  { %v14040_v37 = vrot.slane %v14018_v41, %v24309_v31  ;;  %v18092_v3 = vadd.f32 %v24531_v50, %v24530_v39  ;;  %16137 = vxpose.xlu0.b32.end [2/2] (short) (narrow) %v14015_v52, 8  ;;  %v14048_v27 = vcombine.low %v14026_v60, %v14033_v35  ;;  %v14114_v8 = vrot.slane %v24534_v45, %v24309_v31  ;;  %v24537_v38 = vld [vmem:[#allocation74_spill] sm:$0xff] }
 0x62c   :  { %v14121_v41 = vrot.slane %v24535_v59, %v24309_v31  ;;  %v12186_v16 = vcombine.high %v18093_v62, %v18093_v62  ;;  %v12193_v35 = vrot.slane %v18093_v62, %v24309_v31  ;;  %v24536_v52 = vcombine.high %v22110_v9, %v22118_v30 }
 0x62d   :  { %v14049_v29 = vcombine.low %v14040_v37, %v14047_v44  ;;  %v12235_v39 = vcombine.high %v18092_v3, %v18092_v3  ;;  %v12242_v50 = vrot.slane %v18092_v3, %v24309_v31  ;;  %v14056_v60 = vrot.slane %v14048_v27, %v24309_v31 }
 0x62e   :  { %v14128_v22 = vrot.slane %v24536_v52, %v24309_v31  ;;  %v24538_v45 = vcombine.low %v22115_v23, %v24537_v38  ;;  %v12200_v27 = vrot.slane %v12186_v16, %v24309_v31  ;;  %v12201_v62 = vcombine.high %v12193_v35, %v12193_v35 }
 0x62f   :  { %v14063_v37 = vrot.slane %v14049_v29, %v24309_v31  ;;  %v12249_v44 = vrot.slane %v12235_v39, %v24309_v31  ;;  %v12250_v3 = vcombine.high %v12242_v50, %v12242_v50  ;;  %v22731_v59 = vrot.slane %v12242_v50, %v24309_v31 }
 0x630   :  { %v14135_v54 = vrot.slane %v24538_v45, %v24309_v31  ;;  %v12209_v28 = vrot.slane %v12193_v35, %v24309_v31  ;;  %v14136_v30 = vcombine.low %v14114_v8, %v14121_v41  ;;  %v12202_v29 = vcombine.high %v12200_v27, %v12200_v27 }
 0x631   :  { %v14064_v9 = vcombine.low %v14056_v60, %v14063_v37  ;;  %v12251_v52 = vcombine.high %v12249_v44, %v12249_v44  ;;  %v22736_v25 = vrot.slane %v12249_v44, %v24309_v31  ;;  %v22739_v45 = vrot.slane %v12250_v3, %v24309_v31 }
 0x632   :  { %v12216_v39 = vrot.slane %v12200_v27, %v24309_v31  ;;  %v12223_v50 = vrot.slane %v12201_v62, %v24309_v31  ;;  %v12231_v20 = vcombine.high %v12209_v28, %v12209_v28  ;;  %v22750_v60 = vcombine.low %v12185_v12, %v12209_v28  ;;  %v24541_v12 = vld [vmem:[#allocation15_spill] sm:$0xff]  ;;  %v24543_v62 = vld [vmem:[#allocation22_spill] sm:$0xff] }
 0x633   :  { %24539 = vst [vmem:[#allocation68_spill] sm:$0xff] %v22736_v25  ;;  %16168 = vxpose.xlu1.b32.start [1/2] (short) (narrow) %v14064_v9, 8  ;;  %v22744_v16 = vrot.slane %v12251_v52, %v24309_v31  ;;  %v22753_v35 = vrot.slane %v12202_v29, %v24309_v31  ;;  %v14137_v9 = vcombine.low %v14128_v22, %v14135_v54  ;;  %v24544_v54 = vld [vmem:[#allocation69_spill] sm:$0xff] }
 0x634   :  { %v12232_v37 = vcombine.high %v12216_v39, %v12216_v39  ;;  %v12233_v44 = vcombine.high %v12223_v50, %v12223_v50  ;;  %v22755_v3 = vcombine.low %v12223_v50, %v12231_v20  ;;  %v14144_v52 = vrot.slane %v14136_v30, %v24309_v31  ;;  %v24542_v20 = vld [vmem:[#allocation8_spill] sm:$0xff] }
 0x635   :  { %24540 = vst [vmem:[#allocation60_spill] sm:$0xff] %v22744_v16  ;;  %v14073_v29 = vrot.slane %v24541_v12, %v24309_v31  ;;  %v14080_v50 = vrot.slane %v24542_v20, %v24309_v31  ;;  %v14151_v41 = vrot.slane %v14137_v9, %v24309_v31  ;;  %v14087_v27 = vrot.slane %v22134_v51, %v24309_v31  ;;  %v24545_v30 = vld [vmem:[#allocation24_spill] sm:$0xff] }
 0x636   :  { %v22762_v8 = vcombine.low %v12233_v44, %v12216_v39  ;;  %v22765_v28 = vcombine.low %v22753_v35, %v12232_v37  ;;  %v18094_v22 = vadd.f32 %v24544_v54, %v24543_v62  ;;  %v24546_v39 = vld [vmem:[#allocation67_spill] sm:$0xff]  ;;  %v24547_v37 = vcombine.high %v22115_v23, %v24537_v38 }
 0x637   :  { %v18095_v44 = vadd.f32 %v24546_v39, %v24545_v30  ;;  %v14088_v16 = vcombine.low %v14073_v29, %v14080_v50  ;;  %v24548_v20 = vcombine.high %v22197_v7, %v22197_v7  ;;  %v24549_v51 = vcombine.high %v22205_v46, %v22205_v46 }
 0x638   :  { %v14161_v12 = vrot.slane %v24547_v37, %v24309_v31  ;;  %v14152_v62 = vcombine.low %v14144_v52, %v14151_v41  ;;  %v14102_v54 = vrot.slane %v14087_v27, %v24309_v31  ;;  %v12333_v30 = vcombine.high %v18094_v22, %v18094_v22 }
 0x639   :  { %v14175_v9 = vrot.slane %v24548_v20, %v24309_v31  ;;  %v14193_v25 = vcombine.low %v22216_v0, %v24549_v51  ;;  %v12340_v29 = vrot.slane %v18094_v22, %v24309_v31  ;;  %v14095_v50 = vrot.slane %v14088_v16, %v24309_v31 }
 0x63a   :  { %v12284_v23 = vcombine.high %v18095_v44, %v18095_v44  ;;  %v12291_v38 = vrot.slane %v18095_v44, %v24309_v31  ;;  %v14176_v39 = vcombine.low %v14161_v12, %v22235_v2  ;;  %16200 = vxpose.xlu0.b32.start [1/2] (short) (narrow) %v14152_v62, 8  ;;  %v12347_v7 = vrot.slane %v12333_v30, %v24309_v31 }
 0x63b   :  { %v12348_v37 = vcombine.high %v12340_v29, %v12340_v29  ;;  %v22797_v46 = vrot.slane %v12340_v29, %v24309_v31  ;;  %v14190_v41 = vrot.slane %v14175_v9, %v24309_v31  ;;  %v14103_v27 = vcombine.low %v14095_v50, %v14102_v54 }
 0x63c   :  { %v12298_v52 = vrot.slane %v12284_v23, %v24309_v31  ;;  %v12299_v22 = vcombine.high %v12291_v38, %v12291_v38  ;;  %v12307_v16 = vrot.slane %v12291_v38, %v24309_v31  ;;  %v12349_v20 = vcombine.high %v12347_v7, %v12347_v7 }
 0x63d   :  { %24550 = vst [vmem:[#allocation56_spill] sm:$0xff] %v22797_v46  ;;  %v12363_v44 = vrot.slane %v12347_v7, %v24309_v31  ;;  %v12370_v2 = vrot.slane %v12348_v37, %v24309_v31  ;;  %v12378_v12 = vcombine.high %v22797_v46, %v22797_v46  ;;  %16169 = vxpose.xlu1.b32.end [2/2] (short) (narrow) %v14103_v27, 8 }
 0x63e   :  { %v12300_v51 = vcombine.high %v12298_v52, %v12298_v52  ;;  %v22807_v62 = vrot.slane %v12298_v52, %v24309_v31  ;;  %v12321_v9 = vrot.slane %v12299_v22, %v24309_v31  ;;  %v14183_v54 = vrot.slane %v14176_v39, %v24309_v31 }
 0x63f   :  { %v12377_v30 = vrot.slane %v12349_v20, %v24309_v31  ;;  %v12379_v29 = vcombine.high %v12363_v44, %v12363_v44  ;;  %v12380_v50 = vcombine.high %v12370_v2, %v12370_v2  ;;  %v22812_v23 = vcombine.low %v12370_v2, %v12378_v12 }
 0x640   :  { %v22815_v38 = vrot.slane %v12300_v51, %v24309_v31  ;;  %v15033_v37 = vcombine.low %v12307_v16, %v12321_v9  ;;  %v16998_v27 = vcombine.high %v12307_v16, %v12321_v9  ;;  %v14191_v22 = vcombine.low %v14183_v54, %v14190_v41  ;;  %v24556_v16 = vld [vmem:[#allocation66_spill] sm:$0xff] }
 0x641   :  { %v22819_v52 = vcombine.low %v12380_v50, %v12363_v44  ;;  %v22821_v46 = vcombine.low %v12377_v30, %v12379_v29  ;;  %v24553_v39 = vcombine.high %v22216_v0, %v22216_v0  ;;  %v14202_v44 = vrot.slane %v24556_v16, %v24309_v31  ;;  %v24557_v0 = vld [vmem:[#allocation71_spill] sm:$0xff]  ;;  %v24558_v54 = vld [vmem:[#allocation26_spill] sm:$0xff]  ;;  %v24563_v16 = vld [vmem:[#allocation72_spill] sm:$0xff] }
 0x642   :  { %v22830_v12 = vrot.slane %v15033_v37, %v24309_v31  ;;  %v22833_v51 = vrot.slane %v16998_v27, %v24309_v31  ;;  %16201 = vxpose.xlu0.b32.end [2/2] (short) (narrow) %v14191_v22, 8  ;;  %v14209_v41 = vrot.slane %v14193_v25, %v24309_v31  ;;  %v24559_v29 = vld [vmem:[#allocation58_spill] sm:$0xff]  ;;  %v24561_v37 = vld [vmem:[#allocation64_spill] sm:$0xff]  ;;  %v12381_v7 = vcombine.high %v12377_v30, %v12377_v30 }
 0x643   :  { %24551 = vst [vmem:[#allocation57_spill] sm:$0xff] %v22819_v52  ;;  %24552 = vst [vmem:[#allocation37_spill] sm:$0xff] %v22821_v46  ;;  %v14194_v20 = vcombine.low %v24553_v39, %v22193_v48  ;;  %v14223_v48 = vrot.slane %v24557_v0, %v24309_v31  ;;  %v18096_v50 = vadd.f32 %v24559_v29, %v24558_v54  ;;  %v24560_v39 = vld [vmem:[#allocation28_spill] sm:$0xff]  ;;  %v24562_v27 = vld [vmem:[#allocation46_spill] sm:$0xff] }
 0x644   :  { %24554 = vst [vmem:[#allocation59_spill] sm:$0xff] %v22830_v12  ;;  %24555 = vst [vmem:[#allocation39_spill] sm:$0xff] %v22833_v51  ;;  %v18097_v2 = vadd.f32 %v24561_v37, %v24560_v39  ;;  %v11597_v46 = vcombine.high %v24562_v27, %v24562_v27  ;;  %v14249_v22 = vrot.slane %v24563_v16, %v24309_v31  ;;  %v24564_v54 = vld [vmem:[#allocation70_spill] sm:$0xff] }
 0x645   :  { %v14216_v9 = vrot.slane %v14194_v20, %v24309_v31  ;;  %v14224_v12 = vcombine.low %v14202_v44, %v14209_v41  ;;  %v12431_v51 = vcombine.high %v18096_v50, %v18096_v50  ;;  %v12438_v20 = vrot.slane %v18096_v50, %v24309_v31 }
 0x646   :  { %v12382_v52 = vcombine.high %v18097_v2, %v18097_v2  ;;  %v12389_v0 = vrot.slane %v18097_v2, %v24309_v31  ;;  %v14256_v29 = vrot.slane %v24564_v54, %v24309_v31  ;;  %v14263_v39 = vrot.slane %v11597_v46, %v24309_v31 }
 0x647   :  { %v14225_v25 = vcombine.low %v14216_v9, %v14223_v48  ;;  %v14232_v30 = vrot.slane %v14224_v12, %v24309_v31  ;;  %v12445_v27 = vrot.slane %v12431_v51, %v24309_v31  ;;  %v12446_v16 = vcombine.high %v12438_v20, %v12438_v20 }
 0x648   :  { %v22858_v44 = vrot.slane %v12438_v20, %v24309_v31  ;;  %v12396_v41 = vrot.slane %v12382_v52, %v24309_v31  ;;  %v12397_v9 = vcombine.high %v12389_v0, %v12389_v0  ;;  %v22862_v2 = vrot.slane %v12389_v0, %v24309_v31 }
 0x649   :  { %v14239_v37 = vrot.slane %v14225_v25, %v24309_v31  ;;  %v12447_v50 = vcombine.high %v12445_v27, %v12445_v27  ;;  %v22865_v46 = vrot.slane %v12445_v27, %v24309_v31  ;;  %v22868_v12 = vrot.slane %v12446_v16, %v24309_v31  ;;  %v24575_v16 = vld [vmem:[#allocation30_spill] sm:$0xff] }
 0x64a   :  { %24565 = vst [vmem:[#allocation61_spill] sm:$0xff] %v22858_v44  ;;  %v12398_v25 = vcombine.high %v12396_v41, %v12396_v41  ;;  %v22871_v51 = vrot.slane %v12396_v41, %v24309_v31  ;;  %v22874_v20 = vrot.slane %v12397_v9, %v24309_v31  ;;  %v22877_v52 = vcombine.low %v12381_v7, %v22862_v2 }
 0x64b   :  { %v14240_v48 = vcombine.low %v14232_v30, %v14239_v37  ;;  %24566 = vst [vmem:[#allocation75_spill] sm:$0xff] %v22865_v46  ;;  %24567 = vst [vmem:[#allocation65_spill] sm:$0xff] %v22868_v12  ;;  %v22880_v0 = vrot.slane %v12447_v50, %v24309_v31  ;;  %v17001_v37 = vcombine.high %v22858_v44, %v22868_v12  ;;  %v24577_v46 = vld [vmem:[#allocation32_spill] sm:$0xff] }
 0x64c   :  { %24568 = vst [vmem:[#allocation62_spill] sm:$0xff] %v22871_v51  ;;  %v22889_v27 = vrot.slane %v12398_v25, %v24309_v31  ;;  %v14264_v41 = vcombine.low %v14249_v22, %v14256_v29  ;;  %v14278_v50 = vrot.slane %v14263_v39, %v24309_v31  ;;  %v24571_v25 = vcombine.low %v22273_v36, %v22283_v21 }
 0x64d   :  { %16232 = vxpose.xlu1.b32.start [1/2] (short) (narrow) %v14240_v48, 8  ;;  %v22898_v48 = vrot.slane %v17001_v37, %v24309_v31  ;;  %v24572_v29 = vcombine.high %v22273_v36, %v22283_v21  ;;  %v24573_v39 = vcombine.low %v22280_v53, %v22291_v26  ;;  %v12479_v36 = vcombine.high %v22880_v0, %v22880_v0 }
 0x64e   :  { %24569 = vst [vmem:[#allocation42_spill] sm:$0xff] %v22889_v27  ;;  %v14290_v54 = vrot.slane %v24571_v25, %v24309_v31  ;;  %v14271_v22 = vrot.slane %v14264_v41, %v24309_v31  ;;  %v24574_v25 = vcombine.high %v22280_v53, %v22291_v26  ;;  %v24578_v41 = vld [vmem:[#allocation6_spill] sm:$0xff]  ;;  %v14351_v21 = vrot.slane %v22276_v56, %v24309_v31 }
 0x64f   :  { %24570 = vst [vmem:[#allocation44_spill] sm:$0xff] %v22898_v48  ;;  %v14297_v37 = vrot.slane %v24572_v29, %v24309_v31  ;;  %v14304_v9 = vrot.slane %v24573_v39, %v24309_v31  ;;  %v24576_v48 = vld [vmem:[#allocation13_spill] sm:$0xff]  ;;  %v18099_v12 = vadd.f32 %v24578_v41, %v24577_v46  ;;  %v14352_v46 = vcombine.low %v22301_v32, %v22304_v43 }
 0x650   :  { %v14311_v30 = vrot.slane %v24574_v25, %v24309_v31  ;;  %v18098_v7 = vadd.f32 %v24576_v48, %v24575_v16  ;;  %v14279_v44 = vcombine.low %v14271_v22, %v14278_v50 }
 0x651   :  { %v14312_v27 = vcombine.low %v14290_v54, %v14297_v37  ;;  %v12480_v53 = vcombine.high %v18099_v12, %v18099_v12  ;;  %v12487_v16 = vrot.slane %v18099_v12, %v24309_v31  ;;  %v14366_v54 = vrot.slane %v14351_v21, %v24309_v31 }
 0x652   :  { %v14313_v29 = vcombine.low %v14304_v9, %v14311_v30  ;;  %v12529_v39 = vcombine.high %v18098_v7, %v18098_v7  ;;  %v12536_v51 = vrot.slane %v18098_v7, %v24309_v31  ;;  %16233 = vxpose.xlu1.b32.end [2/2] (short) (narrow) %v14279_v44, 8  ;;  %v14359_v12 = vrot.slane %v14352_v46, %v24309_v31 }
 0x653   :  { %v14320_v26 = vrot.slane %v14312_v27, %v24309_v31  ;;  %v12494_v7 = vrot.slane %v12480_v53, %v24309_v31  ;;  %v12495_v44 = vcombine.high %v12487_v16, %v12487_v16  ;;  %v12503_v27 = vrot.slane %v12487_v16, %v24309_v31 }
 0x654   :  { %v14327_v48 = vrot.slane %v14313_v29, %v24309_v31  ;;  %v12543_v50 = vrot.slane %v12529_v39, %v24309_v31  ;;  %v12544_v22 = vcombine.high %v12536_v51, %v12536_v51  ;;  %v22939_v30 = vrot.slane %v12536_v51, %v24309_v31 }
 0x655   :  { %v12496_v51 = vcombine.high %v12494_v7, %v12494_v7  ;;  %v22953_v41 = vrot.slane %v12494_v7, %v24309_v31  ;;  %v12517_v21 = vrot.slane %v12495_v44, %v24309_v31  ;;  %v12525_v53 = vcombine.high %v12503_v27, %v12503_v27 }
 0x656   :  { %v14328_v9 = vcombine.low %v14320_v26, %v14327_v48  ;;  %v12545_v37 = vcombine.high %v12543_v50, %v12543_v50  ;;  %v22945_v32 = vrot.slane %v12543_v50, %v24309_v31  ;;  %v22948_v43 = vrot.slane %v12544_v22, %v24309_v31  ;;  %v24584_v22 = vld [vmem:[#allocation7_spill] sm:$0xff] }
 0x657   :  { %v12574_v25 = vcombine.high %v22939_v30, %v22939_v30  ;;  %v22961_v26 = vcombine.low %v12479_v36, %v12503_v27  ;;  %v22967_v46 = vrot.slane %v12496_v51, %v24309_v31  ;;  %v12527_v50 = vcombine.high %v12517_v21, %v12517_v21 }
 0x658   :  { %16264 = vxpose.xlu0.b32.start [1/2] (short) (narrow) %v14328_v9, 8  ;;  %v22957_v29 = vrot.slane %v12545_v37, %v24309_v31  ;;  %v22975_v44 = vcombine.low %v12517_v21, %v12525_v53  ;;  %v14367_v36 = vcombine.low %v14359_v12, %v14366_v54  ;;  %v24580_v37 = vcombine.high %v22276_v56, %v22276_v56  ;;  %v24581_v12 = vld [vmem:[#allocation34_spill] sm:$0xff]  ;;  %v24582_v53 = vld [vmem:[#allocation11_spill] sm:$0xff] }
 0x659   :  { %v22964_v16 = vcombine.low %v22948_v43, %v12574_v25  ;;  %v22980_v9 = vcombine.low %v12527_v50, %v22953_v41  ;;  %v14385_v51 = vrot.slane %v22350_v58, %v24309_v31  ;;  %v14392_v21 = vrot.slane %v22364_v40, %v24309_v31  ;;  %v24583_v50 = vld [vmem:[#allocation4_spill] sm:$0xff] }
 0x65a   :  { %24579 = vst [vmem:[#allocation63_spill] sm:$0xff] %v22957_v29  ;;  %v14368_v25 = vcombine.low %v22286_v49, %v24580_v37  ;;  %v14399_v54 = vrot.slane %v22377_v24, %v24309_v31  ;;  %v18100_v7 = vadd.f32 %v24582_v53, %v24581_v12  ;;  %v18101_v39 = vadd.f32 %v24584_v22, %v24583_v50 }
 0x65b   :  { %v24585_v49 = vcombine.high %v22358_v34, %v22358_v34  ;;  %v14439_v40 = vrot.slane %v22346_v6, %v24309_v31 }
 0x65c   :  { %16265 = vxpose.xlu0.b32.end [2/2] (short) (narrow) %v14367_v36, 8  ;;  %v14378_v56 = vrot.slane %v14368_v25, %v24309_v31  ;;  %v14425_v36 = vrot.slane %v22380_v13, %v24309_v31  ;;  %v14401_v24 = vcombine.low %v14392_v21, %v14399_v54  ;;  %v12627_v37 = vcombine.high %v18100_v7, %v18100_v7 }
 0x65d   :  { %v14418_v58 = vcombine.low %v24585_v49, %v22338_v63  ;;  %v12634_v12 = vrot.slane %v18100_v7, %v24309_v31  ;;  %v12578_v53 = vcombine.high %v18101_v39, %v18101_v39  ;;  %v12585_v22 = vrot.slane %v18101_v39, %v24309_v31 }
 0x65e   :  { %v14400_v27 = vcombine.low %v14378_v56, %v14385_v51  ;;  %v14454_v50 = vrot.slane %v14439_v40, %v24309_v31  ;;  %v14415_v34 = vrot.slane %v14401_v24, %v24309_v31  ;;  %v12641_v49 = vrot.slane %v12627_v37, %v24309_v31 }
 0x65f   :  { %v14432_v25 = vrot.slane %v14418_v58, %v24309_v31  ;;  %v12642_v13 = vcombine.high %v12634_v12, %v12634_v12  ;;  %v23012_v48 = vrot.slane %v12634_v12, %v24309_v31  ;;  %v12592_v7 = vrot.slane %v12578_v53, %v24309_v31 }
 0x660   :  { %v14408_v21 = vrot.slane %v14400_v27, %v24309_v31  ;;  %v12593_v54 = vcombine.high %v12585_v22, %v12585_v22  ;;  %v23017_v51 = vrot.slane %v12585_v22, %v24309_v31  ;;  %v12643_v39 = vcombine.high %v12641_v49, %v12641_v49  ;;  %v24594_v22 = vld [vmem:[#allocation52_spill] sm:$0xff] }
 0x661   :  { %24586 = vst [vmem:[#allocation18_spill] sm:$0xff] %v23012_v48  ;;  %v23020_v56 = vrot.slane %v12641_v49, %v24309_v31  ;;  %v12664_v58 = vrot.slane %v12642_v13, %v24309_v31  ;;  %v12672_v40 = vcombine.high %v23012_v48, %v23012_v48  ;;  %v12594_v27 = vcombine.high %v12592_v7, %v12592_v7 }
 0x662   :  { %v14416_v24 = vcombine.low %v14408_v21, %v14415_v34  ;;  %v23028_v12 = vrot.slane %v12592_v7, %v24309_v31  ;;  %v23031_v53 = vrot.slane %v12643_v39, %v24309_v31  ;;  %v23038_v13 = vrot.slane %v12593_v54, %v24309_v31 }
 0x663   :  { %v12674_v49 = vcombine.high %v12664_v58, %v12664_v58  ;;  %v23035_v29 = vcombine.low %v12664_v58, %v12672_v40  ;;  %v23041_v34 = vrot.slane %v12594_v27, %v24309_v31  ;;  %v14440_v21 = vcombine.low %v14425_v36, %v14432_v25  ;;  %v24589_v58 = vld [vmem:[#allocation2_spill] sm:$0xff] }
 0x664   :  { %16296 = vxpose.xlu1.b32.start [1/2] (short) (narrow) %v14416_v24, 8  ;;  %v24588_v7 = vcombine.high %v22338_v63, %v22346_v6  ;;  %v24590_v40 = vcombine.low %v22343_v61, %v24589_v58  ;;  %v24591_v54 = vcombine.high %v22343_v61, %v24589_v58  ;;  %v24592_v36 = vcombine.low %v22421_v19, %v22434_v17  ;;  %v24595_v17 = vld [vmem:[#allocation36_spill] sm:$0xff] }
 0x665   :  { %24587 = vst [vmem:[#allocation41_spill] sm:$0xff] %v23041_v34  ;;  %v23048_v37 = vcombine.low %v12674_v49, %v23020_v56  ;;  %v14447_v61 = vrot.slane %v14440_v21, %v24309_v31  ;;  %v12675_v63 = vcombine.high %v23031_v53, %v23031_v53  ;;  %v24597_v49 = vcombine.low %v22431_v15, %v22444_v4 }
 0x666   :  { %v14466_v39 = vrot.slane %v24588_v7, %v24309_v31  ;;  %v14473_v24 = vrot.slane %v24590_v40, %v24309_v31  ;;  %v14480_v27 = vrot.slane %v24591_v54, %v24309_v31  ;;  %v14487_v25 = vrot.slane %v24592_v36, %v24309_v31  ;;  %v24593_v54 = vld [vmem:[#allocation10_spill] sm:$0xff]  ;;  %v24596_v36 = vld [vmem:[#allocation73_spill] sm:$0xff] }
 0x667   :  { %v18102_v19 = vadd.f32 %v24594_v22, %v24593_v54  ;;  %v18103_v48 = vadd.f32 %v24596_v36, %v24595_v17  ;;  %v14520_v6 = vrot.slane %v24597_v49, %v24309_v31  ;;  %v24598_v21 = vcombine.high %v22431_v15, %v22431_v15 }
 0x668   :  { %v14488_v58 = vcombine.low %v14466_v39, %v14473_v24  ;;  %v14489_v40 = vcombine.low %v14480_v27, %v14487_v25  ;;  %v14455_v24 = vcombine.low %v14447_v61, %v14454_v50  ;;  %v24599_v50 = vcombine.high %v22444_v4, %v22444_v4 }
 0x669   :  { %v14527_v39 = vrot.slane %v24598_v21, %v24309_v31  ;;  %v12725_v25 = vcombine.high %v18102_v19, %v18102_v19  ;;  %v12732_v54 = vrot.slane %v18102_v19, %v24309_v31  ;;  %v12676_v17 = vcombine.high %v18103_v48, %v18103_v48 }
 0x66a   :  { %v14496_v27 = vrot.slane %v14488_v58, %v24309_v31  ;;  %v14503_v22 = vrot.slane %v14489_v40, %v24309_v31  ;;  %v12683_v36 = vrot.slane %v18103_v48, %v24309_v31  ;;  %v14528_v7 = vcombine.low %v22470_v42, %v14520_v6  ;;  %16297 = vxpose.xlu1.b32.end [2/2] (short) (narrow) %v14455_v24, 8 }
 0x66b   :  { %v12739_v34 = vrot.slane %v12725_v25, %v24309_v31  ;;  %v14542_v15 = vrot.slane %v14527_v39, %v24309_v31  ;;  %v14544_v61 = vcombine.low %v24599_v50, %v22417_v5  ;;  %v12740_v58 = vcombine.high %v12732_v54, %v12732_v54 }
 0x66c   :  { %v14504_v49 = vcombine.low %v14496_v27, %v14503_v22  ;;  %v23097_v40 = vrot.slane %v12732_v54, %v24309_v31  ;;  %v12690_v19 = vrot.slane %v12676_v17, %v24309_v31  ;;  %v12691_v48 = vcombine.high %v12683_v36, %v12683_v36 }
 0x66d   :  { %v12741_v42 = vcombine.high %v12739_v34, %v12739_v34  ;;  %v23101_v6 = vrot.slane %v12739_v34, %v24309_v31  ;;  %v12699_v21 = vrot.slane %v12683_v36, %v24309_v31  ;;  %v14535_v39 = vrot.slane %v14528_v7, %v24309_v31 }
 0x66e   :  { %16328 = vxpose.xlu0.b32.start [1/2] (short) (narrow) %v14504_v49, 8  ;;  %v23106_v24 = vrot.slane %v12740_v58, %v24309_v31  ;;  %v12692_v5 = vcombine.high %v12690_v19, %v12690_v19  ;;  %v23109_v4 = vrot.slane %v12690_v19, %v24309_v31  ;;  %v12713_v27 = vrot.slane %v12691_v48, %v24309_v31  ;;  %v24607_v58 = vld [vmem:[#allocation38_spill] sm:$0xff] }
 0x66f   :  { %24600 = vst [vmem:[#allocation20_spill] sm:$0xff] %v23101_v6  ;;  %v23113_v22 = vrot.slane %v12741_v42, %v24309_v31  ;;  %v12721_v25 = vcombine.high %v12699_v21, %v12699_v21  ;;  %v23115_v54 = vcombine.low %v12675_v63, %v12699_v21  ;;  %v14543_v34 = vcombine.low %v14535_v39, %v14542_v15  ;;  %v24603_v63 = vld [vmem:[#allocation50_spill] sm:$0xff] }
 0x670   :  { %24601 = vst [vmem:[#allocation43_spill] sm:$0xff] %v23106_v24  ;;  %v23122_v36 = vrot.slane %v12692_v5, %v24309_v31  ;;  %v12723_v49 = vcombine.high %v12713_v27, %v12713_v27  ;;  %v24604_v15 = vcombine.high %v24603_v63, %v24603_v63  ;;  %v14554_v39 = vrot.slane %v14544_v61, %v24309_v31  ;;  %v24605_v5 = vld [vmem:[#allocation14_spill] sm:$0xff]  ;;  %v24608_v63 = vld [vmem:[#allocation12_spill] sm:$0xff] }
 0x671   :  { %24602 = vst [vmem:[#allocation74_spill] sm:$0xff] %v23113_v22  ;;  %v23128_v19 = vcombine.low %v12713_v27, %v12721_v25  ;;  %v14561_v50 = vrot.slane %v24605_v5, %v24309_v31  ;;  %v24606_v27 = vld [vmem:[#allocation54_spill] sm:$0xff]  ;;  %v18104_v7 = vadd.f32 %v24608_v63, %v24607_v58  ;;  %v14608_v21 = vrot.slane %v22523_v18, %v24309_v31 }
 0x672   :  { %16329 = vxpose.xlu0.b32.end [2/2] (short) (narrow) %v14543_v34, 8  ;;  %v14547_v48 = vcombine.low %v22437_v10, %v24604_v15  ;;  %v23135_v42 = vcombine.low %v12723_v49, %v23109_v4  ;;  %v14568_v25 = vrot.slane %v24606_v27, %v24309_v31  ;;  %v24609_v10 = vld [vmem:[#allocation40_spill] sm:$0xff]  ;;  %v24611_v61 = vcombine.high %v22506_v55, %v22506_v55 }
 0x673   :  { %v24610_v15 = vld [vmem:[#allocation48_spill] sm:$0xff]  ;;  %v14576_v17 = vcombine.low %v14554_v39, %v14561_v50  ;;  %v24612_v27 = vcombine.low %v22503_v33, %v22518_v47  ;;  %v12823_v6 = vcombine.high %v18104_v7, %v18104_v7  ;;  %v12830_v58 = vrot.slane %v18104_v7, %v24309_v31 }
 0x674   :  { %v14575_v34 = vrot.slane %v14547_v48, %v24309_v31  ;;  %v18105_v49 = vadd.f32 %v24610_v15, %v24609_v10  ;;  %v14615_v5 = vrot.slane %v24611_v61, %v24309_v31  ;;  %v24613_v18 = vrot.slane %v22515_v57, %v24309_v31 }
 0x675   :  { %v14642_v48 = vrot.slane %v24612_v27, %v24309_v31  ;;  %v14584_v50 = vrot.slane %v14576_v17, %v24309_v31  ;;  %v12837_v61 = vrot.slane %v12823_v6, %v24309_v31  ;;  %v12838_v27 = vcombine.high %v12830_v58, %v12830_v58 }
 0x676   :  { %v14577_v22 = vcombine.low %v14568_v25, %v14575_v34  ;;  %v12774_v63 = vcombine.high %v18105_v49, %v18105_v49  ;;  %v12781_v39 = vrot.slane %v18105_v49, %v24309_v31  ;;  %v14616_v10 = vcombine.low %v24613_v18, %v14608_v21 }
 0x677   :  { %v14630_v55 = vrot.slane %v14615_v5, %v24309_v31  ;;  %v23169_v25 = vrot.slane %v12830_v58, %v24309_v31  ;;  %v12839_v21 = vcombine.high %v12837_v61, %v12837_v61  ;;  %v12853_v5 = vrot.slane %v12837_v61, %v24309_v31 }
 0x678   :  { %v14591_v15 = vrot.slane %v14577_v22, %v24309_v31  ;;  %v12788_v7 = vrot.slane %v12774_v63, %v24309_v31  ;;  %v12789_v34 = vcombine.high %v12781_v39, %v12781_v39  ;;  %v23173_v17 = vrot.slane %v12781_v39, %v24309_v31 }
 0x679   :  { %24614 = vst [vmem:[#allocation15_spill] sm:$0xff] %v23169_v25  ;;  %v14623_v49 = vrot.slane %v14616_v10, %v24309_v31  ;;  %v12860_v22 = vrot.slane %v12838_v27, %v24309_v31  ;;  %v12868_v6 = vcombine.high %v23169_v25, %v23169_v25  ;;  %v23185_v39 = vrot.slane %v12839_v21, %v24309_v31 }
 0x67a   :  { %24615 = vst [vmem:[#allocation8_spill] sm:$0xff] %v23173_v17  ;;  %v14592_v57 = vcombine.low %v14584_v50, %v14591_v15  ;;  %v12790_v18 = vcombine.high %v12788_v7, %v12788_v7  ;;  %v23181_v58 = vrot.slane %v12788_v7, %v24309_v31  ;;  %v12811_v63 = vrot.slane %v12789_v34, %v24309_v31 }
 0x67b   :  { %24616 = vst [vmem:[#allocation22_spill] sm:$0xff] %v23185_v39  ;;  %v12869_v10 = vcombine.high %v12853_v5, %v12853_v5  ;;  %v12870_v50 = vcombine.high %v12860_v22, %v12860_v22  ;;  %v23189_v61 = vcombine.low %v12860_v22, %v12868_v6  ;;  %v14631_v21 = vcombine.low %v14623_v49, %v14630_v55  ;;  %v24627_v49 = vld [vmem:[#allocation16_spill] sm:$0xff] }
 0x67c   :  { %16360 = vxpose.xlu1.b32.start [1/2] (short) (narrow) %v14592_v57, 8  ;;  %v23192_v27 = vrot.slane %v12790_v18, %v24309_v31  ;;  %v12821_v25 = vcombine.high %v12811_v63, %v12811_v63  ;;  %v15562_v57 = vcombine.low %v23173_v17, %v12811_v63  ;;  %v24622_v6 = vcombine.high %v22503_v33, %v22518_v47  ;;  %v24628_v63 = vld [vmem:[#allocation5_spill] sm:$0xff] }
 0x67d   :  { %24617 = vst [vmem:[#allocation69_spill] sm:$0xff] %v23189_v61  ;;  %v23196_v24 = vcombine.low %v12870_v50, %v12853_v5  ;;  %v23199_v34 = vcombine.low %v23185_v39, %v12869_v10  ;;  %v24623_v5 = vld [vmem:[#allocation19_spill] sm:$0xff]  ;;  %v24629_v15 = vcombine.low %v24627_v49, %v24628_v63  ;;  %v24630_v47 = vcombine.high %v24627_v49, %v24628_v63  ;;  %v24636_v39 = vld [vmem:[#allocation9_spill] sm:$0xff] }
 0x67e   :  { %24618 = vst [vmem:[#allocation24_spill] sm:$0xff] %v23192_v27  ;;  %v23205_v22 = vcombine.low %v12821_v25, %v23181_v58  ;;  %v14649_v18 = vrot.slane %v24622_v6, %v24309_v31  ;;  %v24624_v50 = vcombine.low %v22490_v1, %v24623_v5  ;;  %v23216_v7 = vrot.slane %v15562_v57, %v24309_v31  ;;  %v24631_v57 = vld [vmem:[#allocation21_spill] sm:$0xff]  ;;  %v24638_v49 = vld [vmem:[#allocation27_spill] sm:$0xff] }
 0x67f   :  { %24619 = vst [vmem:[#allocation67_spill] sm:$0xff] %v23196_v24  ;;  %24620 = vst [vmem:[#allocation66_spill] sm:$0xff] %v23199_v34  ;;  %v24626_v55 = vcombine.high %v22490_v1, %v24623_v5  ;;  %v14689_v33 = vrot.slane %v24629_v15, %v24309_v31  ;;  %v14696_v6 = vrot.slane %v24630_v47, %v24309_v31  ;;  %v24633_v24 = vld [vmem:[#allocation17_spill] sm:$0xff] }
 0x680   :  { %24621 = vst [vmem:[#allocation71_spill] sm:$0xff] %v23205_v22  ;;  %v14656_v10 = vrot.slane %v24624_v50, %v24309_v31  ;;  %24625 = vst [vmem:[#allocation26_spill] sm:$0xff] %v23216_v7  ;;  %16361 = vxpose.xlu1.b32.end [2/2] (short) (narrow) %v14631_v21, 8  ;;  %v14664_v50 = vcombine.low %v14642_v48, %v14649_v18  ;;  %v24632_v21 = vrot.slane %v24631_v57, %v24309_v31  ;;  %v24635_v5 = vld [vmem:[#allocation25_spill] sm:$0xff]  ;;  %v24639_v18 = vld [vmem:[#allocation51_spill] sm:$0xff] }
 0x681   :  { %v14663_v25 = vrot.slane %v24626_v55, %v24309_v31  ;;  %v24634_v1 = vcombine.high %v24633_v24, %v24633_v24  ;;  %v24637_v15 = vcombine.high %v24635_v5, %v24635_v5  ;;  %v14704_v61 = vcombine.low %v14689_v33, %v14696_v6 }
 0x682   :  { %v14718_v34 = vrot.slane %v24632_v21, %v24309_v31  ;;  %v14730_v48 = vrot.slane %v24638_v49, %v24309_v31  ;;  %v14737_v63 = vrot.slane %v24639_v18, %v24309_v31  ;;  %v14672_v47 = vrot.slane %v14664_v50, %v24309_v31  ;;  %v24640_v21 = vld [vmem:[#allocation47_spill] sm:$0xff] }
 0x683   :  { %v14722_v55 = vcombine.low %v24635_v5, %v24634_v1  ;;  %v14723_v7 = vcombine.low %v24637_v15, %v24636_v39  ;;  %v14665_v17 = vcombine.low %v14656_v10, %v14663_v25  ;;  %v14777_v1 = vrot.slane %v24640_v21, %v24309_v31  ;;  %v24641_v25 = vld [vmem:[#allocation49_spill] sm:$0xff]  ;;  %v24642_v15 = vld [vmem:[#allocation23_spill] sm:$0xff] }
 0x684   :  { %v14711_v39 = vrot.slane %v14704_v61, %v24309_v31  ;;  %v14752_v10 = vcombine.low %v14730_v48, %v14737_v63  ;;  %v14784_v33 = vrot.slane %v24641_v25, %v24309_v31  ;;  %v14791_v49 = vrot.slane %v24642_v15, %v24309_v31  ;;  %v24643_v50 = vld [vmem:[#allocation31_spill] sm:$0xff] }
 0x685   :  { %v14744_v57 = vrot.slane %v14722_v55, %v24309_v31  ;;  %v14751_v24 = vrot.slane %v14723_v7, %v24309_v31  ;;  %v14679_v5 = vrot.slane %v14665_v17, %v24309_v31  ;;  %v24644_v55 = vcombine.high %v24643_v50, %v24642_v15  ;;  %v24647_v50 = vld [vmem:[#allocation33_spill] sm:$0xff] }
 0x686   :  { %v24645_v18 = vcombine.low %v22650_v11, %v22663_v14  ;;  %v14719_v61 = vcombine.low %v14711_v39, %v14718_v34  ;;  %v14760_v48 = vrot.slane %v14752_v10, %v24309_v31  ;;  %v14792_v63 = vcombine.low %v14777_v1, %v14784_v33  ;;  %v24652_v39 = vld [vmem:[#allocation55_spill] sm:$0xff]  ;;  %v24653_v33 = vld [vmem:[#allocation45_spill] sm:$0xff] }
 0x687   :  { %v14753_v6 = vcombine.low %v14744_v57, %v14751_v24  ;;  %v14818_v7 = vrot.slane %v24644_v55, %v24309_v31  ;;  %v14680_v21 = vcombine.low %v14672_v47, %v14679_v5  ;;  %v14806_v24 = vrot.slane %v14791_v49, %v24309_v31  ;;  %v24648_v55 = vld [vmem:[#allocation35_spill] sm:$0xff]  ;;  %v24650_v5 = vld [vmem:[#allocation53_spill] sm:$0xff] }
 0x688   :  { %v14825_v17 = vrot.slane %v24645_v18, %v24309_v31  ;;  %v24646_v25 = vcombine.high %v22650_v11, %v22663_v14  ;;  %v24649_v22 = vcombine.low %v24647_v50, %v24648_v55  ;;  %v14799_v34 = vrot.slane %v14792_v63, %v24309_v31 }
 0x689   :  { %v14767_v57 = vrot.slane %v14753_v6, %v24309_v31  ;;  %16392 = vxpose.xlu0.b32.start [1/2] (short) (narrow) %v14680_v21, 8  ;;  %v24651_v1 = vcombine.high %v24650_v5, %v24650_v5  ;;  %v14906_v6 = vrot.slane %v24653_v33, %v24309_v31  ;;  %v14920_v14 = vrot.slane %v22750_v60, %v24309_v31 }
 0x68a   :  { %v14832_v15 = vrot.slane %v24646_v25, %v24309_v31  ;;  %v14839_v27 = vrot.slane %v24649_v22, %v24309_v31  ;;  %v14840_v47 = vcombine.low %v14818_v7, %v14825_v17  ;;  %v14927_v22 = vrot.slane %v22755_v3, %v24309_v31 }
 0x68b   :  { %v14897_v10 = vcombine.low %v24652_v39, %v24651_v1  ;;  %v14768_v49 = vcombine.low %v14760_v48, %v14767_v57  ;;  %v14807_v18 = vcombine.low %v14799_v34, %v14806_v24  ;;  %v24654_v17 = vcombine.high %v24647_v50, %v24648_v55  ;;  %v24655_v57 = vld [vmem:[#allocation29_spill] sm:$0xff] }
 0x68c   :  { %v14841_v11 = vcombine.low %v14832_v15, %v14839_v27  ;;  %v14848_v21 = vrot.slane %v14840_v47, %v24309_v31  ;;  %v14929_v27 = vcombine.low %v14920_v14, %v14927_v22  ;;  %v24656_v60 = vcombine.high %v24655_v57, %v24655_v57  ;;  %v24657_v15 = vld [vmem:[#allocation3_spill] sm:$0xff]  ;;  %v23305_v47 = vpop.trf.xlu0  ;;  %v24660_v14 = vld [vmem:[#allocation68_spill] sm:$0xff] }
 0x68d   :  { %v14913_v7 = vrot.slane %v14897_v10, %v24309_v31  ;;  %v14865_v63 = vrot.slane %v24654_v17, %v24309_v31  ;;  %16424 = vxpose.xlu1.b32.start [1/2] (short) (narrow) %v14768_v49, 8  ;;  %v12234_v3 = vcombine.high %v22753_v35, %v22753_v35  ;;  %16393 = vxpose.xlu0.b32.end [2/2] (short) (narrow) %v14719_v61, 8  ;;  %v24661_v22 = vld [vmem:[#allocation60_spill] sm:$0xff] }
 0x68e   :  { %v14855_v48 = vrot.slane %v14841_v11, %v24309_v31  ;;  %v14879_v25 = vrot.slane %v24656_v60, %v24309_v31  ;;  %v14953_v50 = vrot.slane %v22762_v8, %v24309_v31  ;;  %v14960_v55 = vrot.slane %v22765_v28, %v24309_v31 }
 0x68f   :  { %v14928_v24 = vcombine.low %v14906_v6, %v14913_v7  ;;  %v14880_v34 = vcombine.low %v14865_v63, %v24657_v15  ;;  %v14943_v1 = vrot.slane %v14929_v27, %v24309_v31  ;;  %v14967_v10 = vrot.slane %v12234_v3, %v24309_v31 }
 0x690   :  { %v14856_v5 = vcombine.low %v14848_v21, %v14855_v48  ;;  %v14894_v39 = vrot.slane %v14879_v25, %v24309_v31  ;;  %v14968_v33 = vcombine.low %v14953_v50, %v14960_v55  ;;  %v24658_v8 = vcombine.low %v22731_v59, %v22739_v45  ;;  %v24665_v25 = vld [vmem:[#allocation56_spill] sm:$0xff]  ;;  %v24667_v55 = vld [vmem:[#allocation57_spill] sm:$0xff] }
 0x691   :  { %v14936_v35 = vrot.slane %v14928_v24, %v24309_v31  ;;  %v14887_v61 = vrot.slane %v14880_v34, %v24309_v31  ;;  %16425 = vxpose.xlu1.b32.end [2/2] (short) (narrow) %v14807_v18, 8  ;;  %v14982_v28 = vrot.slane %v14967_v10, %v24309_v31  ;;  %v24659_v49 = vcombine.high %v22731_v59, %v22739_v45  ;;  %v23347_v10 = vpop.trf.xlu0 }
 0x692   :  { %v14994_v6 = vrot.slane %v24658_v8, %v24309_v31  ;;  %v24662_v21 = vcombine.low %v24660_v14, %v24661_v22  ;;  %v24663_v17 = vcombine.high %v24660_v14, %v24661_v22  ;;  %16456 = vxpose.xlu0.b32.start [1/2] (short) (narrow) %v14856_v5, 8  ;;  %v14975_v27 = vrot.slane %v14968_v33, %v24309_v31  ;;  %v24669_v33 = vld [vmem:[#allocation59_spill] sm:$0xff] }
 0x693   :  { %v15001_v11 = vrot.slane %v24659_v49, %v24309_v31  ;;  %v14944_v48 = vcombine.low %v14936_v35, %v14943_v1  ;;  %v14895_v18 = vcombine.low %v14887_v61, %v14894_v39  ;;  %v24664_v57 = vcombine.high %v22807_v62, %v22807_v62  ;;  %v23345_v39 = vpop.trf.xlu1  ;;  %v24668_v61 = vld [vmem:[#allocation39_spill] sm:$0xff] }
 0x694   :  { %v15008_v7 = vrot.slane %v24662_v21, %v24309_v31  ;;  %v15015_v63 = vrot.slane %v24663_v17, %v24309_v31  ;;  %v24666_v3 = vcombine.high %v22815_v38, %v22815_v38  ;;  %v15096_v15 = vrot.slane %v22812_v23, %v24309_v31 }
 0x695   :  { %v15072_v59 = vcombine.low %v22815_v38, %v24664_v57  ;;  %v15016_v45 = vcombine.low %v14994_v6, %v15001_v11  ;;  %v14983_v34 = vcombine.low %v14975_v27, %v14982_v28  ;;  %v15103_v5 = vrot.slane %v24667_v55, %v24309_v31  ;;  %16488 = vxpose.xlu1.b32.start [1/2] (short) (narrow) %v14944_v48, 8  ;;  %v24673_v57 = vld [vmem:[#allocation62_spill] sm:$0xff] }
 0x696   :  { %v15017_v60 = vcombine.low %v15008_v7, %v15015_v63  ;;  %v15073_v24 = vcombine.low %v24666_v3, %v24665_v25  ;;  %v15055_v1 = vrot.slane %v22807_v62, %v24309_v31  ;;  %v15056_v8 = vcombine.low %v24669_v33, %v24668_v61  ;;  %16457 = vxpose.xlu0.b32.end [2/2] (short) (narrow) %v14895_v18, 8  ;;  %v24670_v62 = vld [vmem:[#allocation37_spill] sm:$0xff] }
 0x697   :  { %v15082_v50 = vrot.slane %v15072_v59, %v24309_v31  ;;  %v15024_v38 = vrot.slane %v15016_v45, %v24309_v31  ;;  %v15105_v6 = vcombine.low %v15096_v15, %v15103_v5  ;;  %v15129_v49 = vrot.slane %v24670_v62, %v24309_v31  ;;  %v24674_v59 = vld [vmem:[#allocation42_spill] sm:$0xff] }
 0x698   :  { %v15031_v35 = vrot.slane %v15017_v60, %v24309_v31  ;;  %v15089_v23 = vrot.slane %v15073_v24, %v24309_v31  ;;  %v15070_v28 = vrot.slane %v15055_v1, %v24309_v31  ;;  %v15143_v11 = vrot.slane %v22874_v20, %v24309_v31  ;;  %v24677_v24 = vld [vmem:[#allocation61_spill] sm:$0xff] }
 0x699   :  { %v15063_v21 = vrot.slane %v15056_v8, %v24309_v31  ;;  %v24671_v7 = vcombine.high %v22862_v2, %v22874_v20  ;;  %v15119_v63 = vrot.slane %v15105_v6, %v24309_v31  ;;  %v24672_v48 = vrot.slane %v22877_v52, %v24309_v31  ;;  %16489 = vxpose.xlu1.b32.end [2/2] (short) (narrow) %v14983_v34, 8  ;;  %v24678_v52 = vld [vmem:[#allocation65_spill] sm:$0xff] }
 0x69a   :  { %v15032_v14 = vcombine.low %v15024_v38, %v15031_v35  ;;  %v15104_v22 = vcombine.low %v15082_v50, %v15089_v23  ;;  %v15158_v27 = vrot.slane %v15143_v11, %v24309_v31  ;;  %v24675_v45 = vcombine.low %v24673_v57, %v24674_v59  ;;  %v23389_v35 = vpop.trf.xlu1  ;;  %v23391_v23 = vpop.trf.xlu0 }
 0x69b   :  { %v15170_v17 = vrot.slane %v24671_v7, %v24309_v31  ;;  %v15144_v18 = vcombine.low %v15129_v49, %v24672_v48  ;;  %v15071_v3 = vcombine.low %v15063_v21, %v15070_v28  ;;  %v24676_v2 = vcombine.high %v24673_v57, %v24674_v59  ;;  %v24681_v49 = vld [vmem:[#allocation75_spill] sm:$0xff] }
 0x69c   :  { %v15177_v60 = vrot.slane %v24675_v45, %v24309_v31  ;;  %v15112_v25 = vrot.slane %v15104_v22, %v24309_v31  ;;  %v24679_v15 = vcombine.low %v24677_v24, %v24678_v52  ;;  %16520 = vxpose.xlu0.b32.start [1/2] (short) (narrow) %v15032_v14, 8  ;;  %v24680_v34 = vcombine.high %v22953_v41, %v22953_v41 }
 0x69d   :  { %v15184_v20 = vrot.slane %v24676_v2, %v24309_v31  ;;  %v15151_v55 = vrot.slane %v15144_v18, %v24309_v31  ;;  %v15258_v38 = vrot.slane %v22961_v26, %v24309_v31  ;;  %v15265_v8 = vrot.slane %v22975_v44, %v24309_v31 }
 0x69e   :  { %v15191_v50 = vrot.slane %v24679_v15, %v24309_v31  ;;  %v15192_v5 = vcombine.low %v15170_v17, %v15177_v60  ;;  %v15251_v1 = vcombine.low %v22967_v46, %v24680_v34  ;;  %v15120_v61 = vcombine.low %v15112_v25, %v15119_v63  ;;  %v24685_v63 = vld [vmem:[#allocation44_spill] sm:$0xff] }
 0x69f   :  { %v15272_v6 = vrot.slane %v22980_v9, %v24309_v31  ;;  %v15159_v28 = vcombine.low %v15151_v55, %v15158_v27  ;;  %v24682_v26 = vcombine.low %v24681_v49, %v22880_v0  ;;  %v15280_v22 = vcombine.low %v15258_v38, %v15265_v8 }
 0x6a0   :  { %v15193_v33 = vcombine.low %v15184_v20, %v15191_v50  ;;  %v15200_v41 = vrot.slane %v15192_v5, %v24309_v31  ;;  %v15279_v62 = vrot.slane %v15251_v1, %v24309_v31  ;;  %16552 = vxpose.xlu1.b32.start [1/2] (short) (narrow) %v15120_v61, 8  ;;  %v24683_v44 = vcombine.high %v24681_v49, %v24681_v49  ;;  %v23431_v20 = vpop.trf.xlu0 }
 0x6a1   :  { %v15224_v11 = vrot.slane %v24682_v26, %v24309_v31  ;;  %v24684_v9 = vcombine.high %v22967_v46, %v22967_v46  ;;  %16521 = vxpose.xlu0.b32.end [2/2] (short) (narrow) %v15071_v3, 8  ;;  %v15312_v0 = vrot.slane %v22964_v16, %v24309_v31  ;;  %v24686_v18 = vcombine.high %v22948_v43, %v22948_v43  ;;  %v24687_v16 = vld [vmem:[#allocation63_spill] sm:$0xff]  ;;  %v23429_v43 = vpop.trf.xlu1 }
 0x6a2   :  { %v15207_v14 = vrot.slane %v15193_v33, %v24309_v31  ;;  %v15231_v21 = vrot.slane %v24683_v44, %v24309_v31  ;;  %v15281_v17 = vcombine.low %v15272_v6, %v15279_v62  ;;  %v15288_v59 = vrot.slane %v15280_v22, %v24309_v31  ;;  %v24696_v44 = vld [vmem:[#allocation18_spill] sm:$0xff] }
 0x6a3   :  { %v15297_v7 = vcombine.low %v24684_v9, %v22939_v30  ;;  %v15232_v48 = vcombine.low %v24685_v63, %v15224_v11  ;;  %v15319_v27 = vrot.slane %v24686_v18, %v24309_v31  ;;  %v24688_v3 = vcombine.low %v22945_v32, %v24687_v16 }
 0x6a4   :  { %v15208_v57 = vcombine.low %v15200_v41, %v15207_v14  ;;  %v15246_v45 = vrot.slane %v15231_v21, %v24309_v31  ;;  %v15295_v30 = vrot.slane %v15281_v17, %v24309_v31  ;;  %16553 = vxpose.xlu1.b32.end [2/2] (short) (narrow) %v15159_v28, 8  ;;  %v24689_v52 = vcombine.high %v22945_v32, %v24687_v16  ;;  %v23475_v17 = vpop.trf.xlu0 }
 0x6a5   :  { %v15305_v46 = vrot.slane %v15297_v7, %v24309_v31  ;;  %v15239_v60 = vrot.slane %v15232_v48, %v24309_v31  ;;  %v15334_v25 = vrot.slane %v15319_v27, %v24309_v31  ;;  %v15346_v2 = vrot.slane %v24688_v3, %v24309_v31  ;;  %v24702_v3 = vld [vmem:[#allocation20_spill] sm:$0xff] }
 0x6a6   :  { %v15353_v15 = vrot.slane %v24689_v52, %v24309_v31  ;;  %v24690_v50 = vcombine.low %v23017_v51, %v23038_v13  ;;  %v24691_v5 = vcombine.high %v23017_v51, %v23038_v13  ;;  %16584 = vxpose.xlu0.b32.start [1/2] (short) (narrow) %v15208_v57, 8  ;;  %v15296_v1 = vcombine.low %v15288_v59, %v15295_v30 }
 0x6a7   :  { %v15320_v24 = vcombine.low %v15305_v46, %v15312_v0  ;;  %v15247_v38 = vcombine.low %v15239_v60, %v15246_v45  ;;  %v24692_v61 = vcombine.high %v23020_v56, %v23020_v56  ;;  %v15434_v32 = vrot.slane %v23035_v29, %v24309_v31  ;;  %v24693_v56 = vld [vmem:[#allocation41_spill] sm:$0xff]  ;;  %v24699_v45 = vld [vmem:[#allocation43_spill] sm:$0xff] }
 0x6a8   :  { %v15360_v55 = vrot.slane %v24690_v50, %v24309_v31  ;;  %v15367_v34 = vrot.slane %v24691_v5, %v24309_v31  ;;  %v15368_v6 = vcombine.low %v15346_v2, %v15353_v15  ;;  %v15441_v41 = vrot.slane %v23048_v37, %v24309_v31  ;;  %16616 = vxpose.xlu1.b32.start [1/2] (short) (narrow) %v15296_v1, 8  ;;  %v24703_v2 = vld [vmem:[#allocation74_spill] sm:$0xff] }
 0x6a9   :  { %v15426_v33 = vcombine.low %v23031_v53, %v24692_v61  ;;  %v15327_v8 = vrot.slane %v15320_v24, %v24309_v31  ;;  %v15455_v13 = vrot.slane %v23115_v54, %v24309_v31  ;;  %v24694_v62 = vcombine.low %v23028_v12, %v24693_v56 }
 0x6aa   :  { %v15369_v28 = vcombine.low %v15360_v55, %v15367_v34  ;;  %v24695_v29 = vcombine.high %v23028_v12, %v24693_v56  ;;  %v15376_v11 = vrot.slane %v15368_v6, %v24309_v31  ;;  %v15456_v14 = vcombine.low %v15434_v32, %v15441_v41  ;;  %16585 = vxpose.xlu0.b32.end [2/2] (short) (narrow) %v15247_v38, 8  ;;  %v23473_v12 = vpop.trf.xlu1  ;;  %v24706_v55 = vld [vmem:[#allocation24_spill] sm:$0xff]  ;;  %v24707_v38 = vld [vmem:[#allocation15_spill] sm:$0xff]  ;;  %v16088_v56 = vpop.trf.xlu0 }
 0x6ab   :  { %v15448_v51 = vrot.slane %v15426_v33, %v24309_v31  ;;  %v15393_v53 = vrot.slane %v24694_v62, %v24309_v31  ;;  %v15335_v26 = vcombine.low %v15327_v8, %v15334_v25  ;;  %v24697_v21 = vrot.slane %v24696_v44, %v24309_v31  ;;  %v24709_v33 = vld [vmem:[#allocation71_spill] sm:$0xff] }
 0x6ac   :  { %v15400_v49 = vrot.slane %v24695_v29, %v24309_v31  ;;  %v15383_v37 = vrot.slane %v15369_v28, %v24309_v31  ;;  %v15481_v7 = vrot.slane %v23128_v19, %v24309_v31  ;;  %v15464_v48 = vrot.slane %v15456_v14, %v24309_v31  ;;  %v24710_v28 = vld [vmem:[#allocation69_spill] sm:$0xff]  ;;  %v24714_v14 = vld [vmem:[#allocation26_spill] sm:$0xff] }
 0x6ad   :  { %v15457_v22 = vcombine.low %v15448_v51, %v15455_v13  ;;  %v15422_v9 = vrot.slane %v24697_v21, %v24309_v31  ;;  %v15488_v0 = vrot.slane %v23135_v42, %v24309_v31  ;;  %v15495_v18 = vrot.slane %v23122_v36, %v24309_v31  ;;  %16617 = vxpose.xlu1.b32.end [2/2] (short) (narrow) %v15335_v26, 8  ;;  %v24716_v21 = vld [vmem:[#allocation67_spill] sm:$0xff] }
 0x6ae   :  { %v15408_v54 = vcombine.low %v15393_v53, %v15400_v49  ;;  %v15384_v63 = vcombine.low %v15376_v11, %v15383_v37  ;;  %v24698_v19 = vcombine.high %v23109_v4, %v23122_v36  ;;  %v24700_v46 = vcombine.low %v23097_v40, %v24699_v45  ;;  %v16056_v13 = vpop.trf.xlu1  ;;  %v24712_v49 = vld [vmem:[#allocation8_spill] sm:$0xff] }
 0x6af   :  { %v15471_v27 = vrot.slane %v15457_v22, %v24309_v31  ;;  %v15496_v60 = vcombine.low %v15481_v7, %v15488_v0  ;;  %v15510_v42 = vrot.slane %v15495_v18, %v24309_v31  ;;  %v24701_v25 = vcombine.high %v23097_v40, %v24699_v45  ;;  %v23534_v7 = vld [vmem:[%s23717_s3] sm:$0x7f] }
 0x6b0   :  { %v15415_v57 = vrot.slane %v15408_v54, %v24309_v31  ;;  %v15522_v59 = vrot.slane %v24698_v19, %v24309_v31  ;;  %v15529_v30 = vrot.slane %v24700_v46, %v24309_v31  ;;  %v24704_v24 = vcombine.low %v24702_v3, %v24703_v2  ;;  %16648 = vxpose.xlu0.b32.start [1/2] (short) (narrow) %v15384_v63, 8  ;;  %v24715_v54 = vld [vmem:[#allocation22_spill] sm:$0xff] }
 0x6b1   :  { %v15536_v16 = vrot.slane %v24701_v25, %v24309_v31  ;;  %v15472_v36 = vcombine.low %v15464_v48, %v15471_v27  ;;  %v24705_v50 = vcombine.high %v23181_v58, %v23181_v58  ;;  %v15503_v34 = vrot.slane %v15496_v60, %v24309_v31  ;;  %v24717_v18 = vld [vmem:[#allocation66_spill] sm:$0xff] }
 0x6b2   :  { %v15543_v4 = vrot.slane %v24704_v24, %v24309_v31  ;;  %v15423_v52 = vcombine.low %v15415_v57, %v15422_v9  ;;  %v15544_v15 = vcombine.low %v15522_v59, %v15529_v30  ;;  %v24708_v40 = vcombine.high %v24706_v55, %v24706_v55 }
 0x6b3   :  { %v15601_v5 = vcombine.low %v24706_v55, %v24705_v50  ;;  %v15610_v32 = vrot.slane %v24709_v33, %v24309_v31  ;;  %v15631_v58 = vrot.slane %v24710_v28, %v24309_v31  ;;  %v24711_v41 = vcombine.high %v24702_v3, %v24703_v2  ;;  %16680 = vxpose.xlu1.b32.start [1/2] (short) (narrow) %v15472_v36, 8  ;;  %v16120_v3 = vpop.trf.xlu1  ;;  %v16152_v2 = vpop.trf.xlu0 }
 0x6b4   :  { %v15545_v1 = vcombine.low %v15536_v16, %v15543_v4  ;;  %v15602_v61 = vcombine.low %v24708_v40, %v24707_v38  ;;  %v15552_v8 = vrot.slane %v15544_v15, %v24309_v31  ;;  %v15511_v62 = vcombine.low %v15503_v34, %v15510_v42  ;;  %16649 = vxpose.xlu0.b32.end [2/2] (short) (narrow) %v15423_v52, 8 }
 0x6b5   :  { %v15617_v6 = vrot.slane %v15601_v5, %v24309_v31  ;;  %v15569_v51 = vrot.slane %v24711_v41, %v24309_v31  ;;  %v24713_v26 = vcombine.high %v24712_v49, %v24712_v49  ;;  %v12871_v44 = vcombine.high %v24715_v54, %v24715_v54 }
 0x6b6   :  { %v15559_v53 = vrot.slane %v15545_v1, %v24309_v31  ;;  %v15624_v29 = vrot.slane %v15602_v61, %v24309_v31  ;;  %v15657_v9 = vrot.slane %v24716_v21, %v24309_v31  ;;  %v15664_v27 = vrot.slane %v24717_v18, %v24309_v31 }
 0x6b7   :  { %v15583_v11 = vrot.slane %v24713_v26, %v24309_v31  ;;  %v15632_v37 = vcombine.low %v15610_v32, %v15617_v6  ;;  %v15584_v22 = vcombine.low %v15569_v51, %v24714_v14  ;;  %v15671_v59 = vrot.slane %v12871_v44, %v24309_v31  ;;  %16681 = vxpose.xlu1.b32.end [2/2] (short) (narrow) %v15511_v62, 8 }
 0x6b8   :  { %v15560_v63 = vcombine.low %v15552_v8, %v15559_v53  ;;  %v15633_v48 = vcombine.low %v15624_v29, %v15631_v58  ;;  %v15672_v46 = vcombine.low %v15657_v9, %v15664_v27  ;;  %v16777_v30 = vmul.f32 %v23534_v7, %v23305_v47 }
 0x6b9   :  { %v15598_v0 = vrot.slane %v15583_v11, %v24309_v31  ;;  %v15640_v57 = vrot.slane %v15632_v37, %v24309_v31  ;;  %v15591_v19 = vrot.slane %v15584_v22, %v24309_v31  ;;  %v16778_v60 = vmul.f32 %v23534_v7, %v23345_v39  ;;  %v16184_v52 = vpop.trf.xlu1 }
 0x6ba   :  { %v15647_v45 = vrot.slane %v15633_v48, %v24309_v31  ;;  %16712 = vxpose.xlu0.b32.start [1/2] (short) (narrow) %v15560_v63, 8  ;;  %v16779_v25 = vmul.f32 %v23534_v7, %v23347_v10  ;;  %v16780_v16 = vmul.f32 %v23534_v7, %v23389_v35  ;;  %v15679_v4 = vrot.slane %v15672_v46, %v24309_v31 }
 0x6bb   :  { %v15599_v42 = vcombine.low %v15591_v19, %v15598_v0  ;;  %16810 = vst.msk [vmem:[%s23718_s4] sm:$0x7f] %vm16809_vm3, %v16777_v30  ;;  %16811 = vst.msk [vmem:[%s23718_s4 + $0x8] sm:$0x7f] %vm16809_vm3, %v16778_v60  ;;  %v16781_v47 = vmul.f32 %v23534_v7, %v23391_v23  ;;  %v16782_v39 = vmul.f32 %v23534_v7, %v23429_v43 }
 0x6bc   :  { %v15648_v24 = vcombine.low %v15640_v57, %v15647_v45  ;;  %16812 = vst.msk [vmem:[%s23718_s4 + $0x10] sm:$0x7f] %vm16809_vm3, %v16779_v25  ;;  %16813 = vst.msk [vmem:[%s23718_s4 + $0x18] sm:$0x7f] %vm16809_vm3, %v16780_v16  ;;  %v16783_v10 = vmul.f32 %v23534_v7, %v23431_v20  ;;  %v16784_v35 = vmul.f32 %v23534_v7, %v23473_v12 }
 0x6bd   :  { %v16785_v23 = vmul.f32 %v23534_v7, %v23475_v17  ;;  %v16786_v43 = vmul.f32 %v23534_v7, %v16056_v13  ;;  %v15686_v36 = vrot.slane %v15671_v59, %v24309_v31  ;;  %16814 = vst.msk [vmem:[%s23718_s4 + $0x20] sm:$0x7f] %vm16809_vm3, %v16781_v47  ;;  %16815 = vst.msk [vmem:[%s23718_s4 + $0x28] sm:$0x7f] %vm16809_vm3, %v16782_v39 }
 0x6be   :  { %16744 = vxpose.xlu1.b32.start [1/2] (short) (narrow) %v15648_v24, 8  ;;  %v16787_v20 = vmul.f32 %v23534_v7, %v16088_v56  ;;  %v16788_v12 = vmul.f32 %v23534_v7, %v16120_v3  ;;  %v16789_v17 = vmul.f32 %v23534_v7, %v16152_v2  ;;  %16713 = vxpose.xlu0.b32.end [2/2] (short) (narrow) %v15599_v42, 8  ;;  %v16216_v50 = vpop.trf.xlu0 }
 0x6bf   :  { %16816 = vst.msk [vmem:[%s23718_s4 + $0x30] sm:$0x7f] %vm16809_vm3, %v16783_v10  ;;  %16817 = vst.msk [vmem:[%s23718_s4 + $0x38] sm:$0x7f] %vm16809_vm3, %v16784_v35  ;;  %v15687_v31 = vcombine.low %v15679_v4, %v15686_v36  ;;  %v16790_v15 = vmul.f32 %v23534_v7, %v16184_v52  ;;  %v16791_v55 = vmul.f32 %v23534_v7, %v16216_v50 }
 0x6c0   :  { %16818 = vst.msk [vmem:[%s23718_s4 + $0x40] sm:$0x7f] %vm16809_vm3, %v16785_v23  ;;  %16819 = vst.msk [vmem:[%s23718_s4 + $0x48] sm:$0x7f] %vm16809_vm3, %v16786_v43 }
 0x6c1   :  { %16820 = vst.msk [vmem:[%s23718_s4 + $0x50] sm:$0x7f] %vm16809_vm3, %v16787_v20  ;;  %16821 = vst.msk [vmem:[%s23718_s4 + $0x58] sm:$0x7f] %vm16809_vm3, %v16788_v12 }
 0x6c2   :  { %16822 = vst.msk [vmem:[%s23718_s4 + $0x60] sm:$0x7f] %vm16809_vm3, %v16789_v17  ;;  %16745 = vxpose.xlu1.b32.end [2/2] (short) (narrow) %v15687_v31, 8  ;;  %16823 = vst.msk [vmem:[%s23718_s4 + $0x68] sm:$0x7f] %vm16809_vm3, %v16790_v15 }
 0x6c3   :  { %16824 = vst.msk [vmem:[%s23718_s4 + $0x70] sm:$0x7f] %vm16809_vm3, %v16791_v55 }
 0x6ce   :  { %v16248_v5 = vpop.trf.xlu1 }
 0x6cf   :  { %v16792_v34 = vmul.f32 %v23534_v7, %v16248_v5 }
 0x6d1   :  { %16825 = vst.msk [vmem:[%s23718_s4 + $0x78] sm:$0x7f] %vm16809_vm3, %v16792_v34 }
 0x6d8   :  { %v16280_v1 = vpop.trf.xlu0 }
 0x6d9   :  { %v16793_v38 = vmul.f32 %v23534_v7, %v16280_v1 }
 0x6db   :  { %16826 = vst.msk [vmem:[%s23718_s4 + $0x80] sm:$0x7f] %vm16809_vm3, %v16793_v38 }
 0x6e6   :  { %v16312_v40 = vpop.trf.xlu1 }
 0x6e7   :  { %v16794_v61 = vmul.f32 %v23534_v7, %v16312_v40 }
 0x6e9   :  { %16827 = vst.msk [vmem:[%s23718_s4 + $0x88] sm:$0x7f] %vm16809_vm3, %v16794_v61 }
 0x6ee   :  { %v16344_v33 = vpop.trf.xlu0 }
 0x6ef   :  { %v16795_v32 = vmul.f32 %v23534_v7, %v16344_v33 }
 0x6f1   :  { %16828 = vst.msk [vmem:[%s23718_s4 + $0x90] sm:$0x7f] %vm16809_vm3, %v16795_v32 }
 0x6fc   :  { %v16376_v8 = vpop.trf.xlu1 }
 0x6fd   :  { %v16796_v6 = vmul.f32 %v23534_v7, %v16376_v8 }
 0x6ff   :  { %16829 = vst.msk [vmem:[%s23718_s4 + $0x98] sm:$0x7f] %vm16809_vm3, %v16796_v6 }
 0x709   :  { %v16408_v28 = vpop.trf.xlu0 }
 0x70a   :  { %v16797_v58 = vmul.f32 %v23534_v7, %v16408_v28 }
 0x70c   :  { %16830 = vst.msk [vmem:[%s23718_s4 + $0xa0] sm:$0x7f] %vm16809_vm3, %v16797_v58 }
 0x70d   :  { %v16440_v41 = vpop.trf.xlu1 }
 0x70e   :  { %v16798_v51 = vmul.f32 %v23534_v7, %v16440_v41 }
 0x710   :  { %16831 = vst.msk [vmem:[%s23718_s4 + $0xa8] sm:$0x7f] %vm16809_vm3, %v16798_v51 }
 0x712   :  { %v16472_v13 = vpop.trf.xlu0 }
 0x713   :  { %v16799_v56 = vmul.f32 %v23534_v7, %v16472_v13 }
 0x715   :  { %v16504_v62 = vpop.trf.xlu1  ;;  %16832 = vst.msk [vmem:[%s23718_s4 + $0xb0] sm:$0x7f] %vm16809_vm3, %v16799_v56 }
 0x716   :  { %v16800_v53 = vmul.f32 %v23534_v7, %v16504_v62 }
 0x718   :  { %16833 = vst.msk [vmem:[%s23718_s4 + $0xb8] sm:$0x7f] %vm16809_vm3, %v16800_v53 }
 0x71d   :  { %v16536_v29 = vpop.trf.xlu0 }
 0x71e   :  { %v16801_v49 = vmul.f32 %v23534_v7, %v16536_v29 }
 0x720   :  { %v16568_v26 = vpop.trf.xlu1  ;;  %16834 = vst.msk [vmem:[%s23718_s4 + $0xc0] sm:$0x7f] %vm16809_vm3, %v16801_v49 }
 0x721   :  { %v16802_v11 = vmul.f32 %v23534_v7, %v16568_v26 }
 0x723   :  { %16835 = vst.msk [vmem:[%s23718_s4 + $0xc8] sm:$0x7f] %vm16809_vm3, %v16802_v11 }
 0x726   :  { %v16600_v37 = vpop.trf.xlu0 }
 0x727   :  { %v16803_v14 = vmul.f32 %v23534_v7, %v16600_v37 }
 0x729   :  { %v16632_v22 = vpop.trf.xlu1  ;;  %16836 = vst.msk [vmem:[%s23718_s4 + $0xd0] sm:$0x7f] %vm16809_vm3, %v16803_v14 }
 0x72a   :  { %v16804_v54 = vmul.f32 %v23534_v7, %v16632_v22 }
 0x72c   :  { %16837 = vst.msk [vmem:[%s23718_s4 + $0xd8] sm:$0x7f] %vm16809_vm3, %v16804_v54 }
 0x730   :  { %v16664_v44 = vpop.trf.xlu0 }
 0x731   :  { %v16805_v21 = vmul.f32 %v23534_v7, %v16664_v44 }
 0x733   :  { %v16696_v9 = vpop.trf.xlu1  ;;  %16838 = vst.msk [vmem:[%s23718_s4 + $0xe0] sm:$0x7f] %vm16809_vm3, %v16805_v21 }
 0x734   :  { %v16806_v63 = vmul.f32 %v23534_v7, %v16696_v9 }
 0x736   :  { %16839 = vst.msk [vmem:[%s23718_s4 + $0xe8] sm:$0x7f] %vm16809_vm3, %v16806_v63 }
 0x73a   :  { %v16728_v48 = vpop.trf.xlu0 }
 0x73b   :  { %v16807_v0 = vmul.f32 %v23534_v7, %v16728_v48 }
 0x73d   :  { %16840 = vst.msk [vmem:[%s23718_s4 + $0xf0] sm:$0x7f] %vm16809_vm3, %v16807_v0 }
 0x73e   :  { %v16760_v18 = vpop.trf.xlu1 }
 0x73f   :  { %v16808_v27 = vmul.f32 %v23534_v7, %v16760_v18 }
 0x741   :  { %16841 = vst.msk [vmem:[%s23718_s4 + $0xf8] sm:$0x7f] %vm16809_vm3, %v16808_v27 }

</bundles_post_ra>
